<compile_context>
chip_gen: v6e
topology: v6e:2x2x1
jax: 0.10.0
libtpu: 0.0.40
codegen_flags: <defaults>
</compile_context>

<pallas_src>
import math
import jax
import jax.numpy as jnp
from jax.experimental import pallas as pl
from jax.experimental.pallas import tpu as pltpu

# ----------------------- model hyper-parameters (small) -----------------------
B = 8              # batch
N_OBS = 16         # obs_shape (int -> FCEncoder)
HIDDEN = [32, 32]  # hidden_size_list
M = HIDDEN[-1]     # encoder feature size
A = 4              # action_shape
H_INV = 512        # inverse / residual hidden width (fixed by the module)
N_RES = 8          # number of residual blocks (fixed by the module)

# ------------------------- packed-slab row layouts -----------------------------
# Every segment is padded to a multiple of 8 rows so static in-kernel slices
# never straddle an (8, 128) sublane tile boundary.

# Slab A: lane width 512 (inverse_net layer 1 + forward_net_1), bf16, resident
A_INV_W1A = 0          # (M,   512)  rows of inv_w1 for encode_state
A_INV_W1B = 32         # (M,   512)  rows of inv_w1 for encode_next_state
A_INV_B1 = 64          # (1,   512)
A_FWD1_WF = 72         # (M,   512)  feature rows of forward_net_1
A_FWD1_WA = 104        # (A,   512)  action rows of forward_net_1
A_FWD1_B = 112         # (1,   512)
A_ROWS = 120

# Slab B: lane width M (encoder + forward_net_2), bf16, resident
B_ENC_W0 = 0           # (N_OBS, M)
B_ENC_B0 = 16          # (1, M)
B_ENC_W1 = 24          # (HIDDEN[0], M)
B_ENC_B1 = 56          # (1, M)
B_FWD2_WF = 64         # (H_INV, M)
B_FWD2_WA = 576        # (A, M)
B_FWD2_B = 584         # (1, M)
B_ROWS = 592

# Slab C: lane width A (inverse_net layer 2), bf16, resident
C_INV_W2 = 0           # (H_INV, A)
C_INV_B2 = 512         # (1, A)
C_ROWS = 520

# Streamed residual weight slab: int8, shape (N_RES * 1024, 512).
# Per residual block: rows [0,512) = W1F (feature rows of linear1, quantized),
#                     rows [512,1024) = W2 (linear2, quantized).  No padding.
RES_W1F = 0
RES_W2 = 512
RES_ROWS_PER_BLOCK = 1024
BLOCKS_PER_STEP = 4                        # 2 residual pairs per grid step
N_STEPS = N_RES // BLOCKS_PER_STEP         # grid = (2,)
RES_ROWS_PER_STEP = BLOCKS_PER_STEP * RES_ROWS_PER_BLOCK   # 4096

# Streamed residual aux slab: f32, shape (N_RES * 8, 512).
# Per residual block: rows 0-3 = W1A (action rows of linear1, f32),
# row 4 = b1, row 5 = b2, row 6 = per-column scale of W1F, row 7 = scale of W2.
AUX_W1A = 0
AUX_B1 = 4
AUX_B2 = 5
AUX_S1 = 6
AUX_S2 = 7
AUX_ROWS_PER_BLOCK = 8
AUX_ROWS_PER_STEP = BLOCKS_PER_STEP * AUX_ROWS_PER_BLOCK   # 32

BF16 = jnp.bfloat16
F32 = jnp.float32


def _relu(x):
    return jnp.maximum(x, 0.0)


def _leaky_relu(x):
    # nn.LeakyReLU default negative_slope = 0.01
    return jnp.where(x > 0, x, 0.01 * x)


def _dot(x, w):
    return jnp.dot(x, w, preferred_element_type=F32)


def _deq(q_i8):
    # int8 -> bf16: values in [-127, 127] are exactly representable in bf16.
    # The per-column scale is applied to the f32 matmul output instead, so the
    # dequant here is a pure convert (cheap VPU work hidden under the DMA).
    return q_i8.astype(F32).astype(BF16)


# ------------------------------- Pallas kernel --------------------------------
def icm_kernel(
    # inputs
    state_ref, next_state_ref, action_ref,
    slab_a_ref, slab_b_ref, slab_c_ref, res_ref, aux_ref,
    # outputs
    real_feat_ref, pred_feat_ref, pred_logit_ref,
    # scratch
    real_s, logit_s, orig_s,
):
    i = pl.program_id(0)
    last = pl.num_programs(0) - 1
    action = action_ref[...]                      # (B, A) bf16 one-hot (exact)
    action_f32 = action.astype(F32)

    # ---------------- prologue: encoder, inverse_net, forward_net_1 ----------------
    @pl.when(i == 0)
    def _prologue():
        state = state_ref[...].astype(BF16)
        next_state = next_state_ref[...].astype(BF16)

        enc_w0 = slab_b_ref[B_ENC_W0:B_ENC_W0 + N_OBS, :]
        enc_b0 = slab_b_ref[B_ENC_B0:B_ENC_B0 + 1, :].astype(F32)
        enc_w1 = slab_b_ref[B_ENC_W1:B_ENC_W1 + HIDDEN[0], :]
        enc_b1 = slab_b_ref[B_ENC_B1:B_ENC_B1 + 1, :].astype(F32)

        def encode(x_bf16):
            # FCEncoder: ReLU(Linear) -> ReLU(Linear)
            h = _relu(_dot(x_bf16, enc_w0) + enc_b0)
            h = _relu(_dot(h.astype(BF16), enc_w1) + enc_b1)
            return h                              # (B, M) f32

        es = encode(state)
        ens = encode(next_state)
        real_s[...] = ens                         # real_next_state_feature

        es_bf = es.astype(BF16)
        ens_bf = ens.astype(BF16)

        # inverse_net(cat(encode_state, encode_next_state))
        inv_w1a = slab_a_ref[A_INV_W1A:A_INV_W1A + M, :]
        inv_w1b = slab_a_ref[A_INV_W1B:A_INV_W1B + M, :]
        inv_b1 = slab_a_ref[A_INV_B1:A_INV_B1 + 1, :].astype(F32)
        h = _relu(_dot(es_bf, inv_w1a) + _dot(ens_bf, inv_w1b) + inv_b1)
        inv_w2 = slab_c_ref[C_INV_W2:C_INV_W2 + H_INV, :]
        inv_b2 = slab_c_ref[C_INV_B2:C_INV_B2 + 1, :].astype(F32)
        logit_s[...] = _dot(h.astype(BF16), inv_w2) + inv_b2

        # forward_net_1(cat(encode_state, action))
        fwd1_wf = slab_a_ref[A_FWD1_WF:A_FWD1_WF + M, :]
        fwd1_wa = slab_a_ref[A_FWD1_WA:A_FWD1_WA + A, :]
        fwd1_b = slab_a_ref[A_FWD1_B:A_FWD1_B + 1, :].astype(F32)
        orig_s[...] = _leaky_relu(
            _dot(es_bf, fwd1_wf) + _dot(action, fwd1_wa) + fwd1_b
        )

    # -------- residual blocks 4i .. 4i+3 (two pairs), int8 streamed + f32 aux --------
    orig = orig_s[...]                            # (B, 512) f32 carry
    for j in range(2):                            # two residual pairs per grid step
        a0 = (2 * j) * AUX_ROWS_PER_BLOCK         # aux rows, even block of the pair
        a1 = (2 * j + 1) * AUX_ROWS_PER_BLOCK     # aux rows, odd block of the pair
        r0 = (2 * j) * RES_ROWS_PER_BLOCK         # int8 weight rows, even block
        r1 = (2 * j + 1) * RES_ROWS_PER_BLOCK     # int8 weight rows, odd block

        # Action-dependent terms + biases + scales: small resident/aux f32 data,
        # off the serial 512x512 dependency chain.
        act0 = jnp.dot(action_f32, aux_ref[a0 + AUX_W1A:a0 + AUX_W1A + A, :],
                       preferred_element_type=F32) + aux_ref[a0 + AUX_B1:a0 + AUX_B1 + 1, :]
        act1 = jnp.dot(action_f32, aux_ref[a1 + AUX_W1A:a1 + AUX_W1A + A, :],
                       preferred_element_type=F32) + aux_ref[a1 + AUX_B1:a1 + AUX_B1 + 1, :]
        b2_0 = aux_ref[a0 + AUX_B2:a0 + AUX_B2 + 1, :]
        b2_1 = aux_ref[a1 + AUX_B2:a1 + AUX_B2 + 1, :]
        s1_0 = aux_ref[a0 + AUX_S1:a0 + AUX_S1 + 1, :]
        s2_0 = aux_ref[a0 + AUX_S2:a0 + AUX_S2 + 1, :]
        s1_1 = aux_ref[a1 + AUX_S1:a1 + AUX_S1 + 1, :]
        s2_1 = aux_ref[a1 + AUX_S2:a1 + AUX_S2 + 1, :]

        # residual[2*(2i+j)](cat(orig, action)) -- dequant inline right before use
        h1 = _leaky_relu(
            _dot(orig.astype(BF16),
                 _deq(res_ref[r0 + RES_W1F:r0 + RES_W1F + H_INV, :])) * s1_0 + act0)
        pred = _dot(h1.astype(BF16),
                    _deq(res_ref[r0 + RES_W2:r0 + RES_W2 + H_INV, :])) * s2_0 + b2_0
        # residual[2*(2i+j)+1](cat(pred, action)) + orig
        h2 = _leaky_relu(
            _dot(pred.astype(BF16),
                 _deq(res_ref[r1 + RES_W1F:r1 + RES_W1F + H_INV, :])) * s1_1 + act1)
        orig = _dot(h2.astype(BF16),
                    _deq(res_ref[r1 + RES_W2:r1 + RES_W2 + H_INV, :])) * s2_1 + b2_1 + orig
    orig_s[...] = orig

    # ----------------------- epilogue: forward_net_2 + outputs -----------------------
    @pl.when(i == last)
    def _epilogue():
        fwd2_wf = slab_b_ref[B_FWD2_WF:B_FWD2_WF + H_INV, :]
        fwd2_wa = slab_b_ref[B_FWD2_WA:B_FWD2_WA + A, :]
        fwd2_b = slab_b_ref[B_FWD2_B:B_FWD2_B + 1, :].astype(F32)
        pred_feat_ref[...] = (
            _dot(orig_s[...].astype(BF16), fwd2_wf)
            + _dot(action, fwd2_wa)
            + fwd2_b
        )
        real_feat_ref[...] = real_s[...]
        pred_logit_ref[...] = logit_s[...]


# ------------------------------ parameter setup -------------------------------
def _linear_params(key, fan_in, fan_out):
    """PyTorch-style default init (uniform +-1/sqrt(fan_in)); W stored (in, out)."""
    kw, kb = jax.random.split(key)
    bound = 1.0 / math.sqrt(fan_in)
    w = jax.random.uniform(kw, (fan_in, fan_out), F32, -bound, bound)
    b = jax.random.uniform(kb, (1, fan_out), F32, -bound, bound)
    return w, b


def init_params(key):
    """Raw per-layer weights, (in, out) layout, cat order = (features, action)."""
    keys = jax.random.split(key, 32)
    k = iter(keys)

    enc_w0, enc_b0 = _linear_params(next(k), N_OBS, HIDDEN[0])
    enc_w1, enc_b1 = _linear_params(next(k), HIDDEN[0], HIDDEN[1])

    inv_w1, inv_b1 = _linear_params(next(k), 2 * M, H_INV)       # cat(es, ens)
    inv_w2, inv_b2 = _linear_params(next(k), H_INV, A)

    fwd1_w, fwd1_b = _linear_params(next(k), M + A, H_INV)       # cat(feat, action)

    res = []
    for _ in range(N_RES):
        w1, b1 = _linear_params(next(k), H_INV + A, H_INV)       # cat(feat, action)
        w2, b2 = _linear_params(next(k), H_INV, H_INV)
        res.append((w1, b1, w2, b2))

    fwd2_w, fwd2_b = _linear_params(next(k), H_INV + A, M)       # cat(feat, action)

    return dict(
        enc_w0=enc_w0, enc_b0=enc_b0, enc_w1=enc_w1, enc_b1=enc_b1,
        inv_w1=inv_w1, inv_b1=inv_b1, inv_w2=inv_w2, inv_b2=inv_b2,
        fwd1_w=fwd1_w, fwd1_b=fwd1_b, res=res, fwd2_w=fwd2_w, fwd2_b=fwd2_b,
    )


def _seg(x, seg_rows):
    """Pad a (r, c) block to seg_rows rows (multiple of 8) with zeros."""
    r = x.shape[0]
    return jnp.pad(x, ((0, seg_rows - r), (0, 0)))


def _quant_cols(w):
    """Symmetric per-output-column int8 quantization of an (in, out) matrix."""
    amax = jnp.max(jnp.abs(w), axis=0, keepdims=True)          # (1, out)
    scale = jnp.maximum(amax, 1e-8) / 127.0
    q = jnp.clip(jnp.round(w / scale), -127.0, 127.0).astype(jnp.int8)
    return q, scale.astype(F32)


def pack_params(p):
    """Pack raw params into slabs matching the kernel row layout.

    Returns (slab_a bf16, slab_b bf16, slab_c bf16, res_slab int8, aux_slab f32).
    """
    slab_a = jnp.concatenate([
        p["inv_w1"][:M],            # A_INV_W1A
        p["inv_w1"][M:],            # A_INV_W1B
        _seg(p["inv_b1"], 8),       # A_INV_B1
        p["fwd1_w"][:M],            # A_FWD1_WF
        _seg(p["fwd1_w"][M:], 8),   # A_FWD1_WA
        _seg(p["fwd1_b"], 8),       # A_FWD1_B
    ], axis=0).astype(BF16)
    assert slab_a.shape == (A_ROWS, H_INV)

    slab_b = jnp.concatenate([
        p["enc_w0"],                # B_ENC_W0
        _seg(p["enc_b0"], 8),       # B_ENC_B0
        p["enc_w1"],                # B_ENC_W1
        _seg(p["enc_b1"], 8),       # B_ENC_B1
        p["fwd2_w"][:H_INV],        # B_FWD2_WF
        _seg(p["fwd2_w"][H_INV:], 8),  # B_FWD2_WA
        _seg(p["fwd2_b"], 8),       # B_FWD2_B
    ], axis=0).astype(BF16)
    assert slab_b.shape == (B_ROWS, M)

    slab_c = jnp.concatenate([
        p["inv_w2"],                # C_INV_W2
        _seg(p["inv_b2"], 8),       # C_INV_B2
    ], axis=0).astype(BF16)
    assert slab_c.shape == (C_ROWS, A)

    res_rows, aux_rows = [], []
    for (w1, b1, w2, b2) in p["res"]:
        q1, s1 = _quant_cols(w1[:H_INV])            # feature rows of linear1
        q2, s2 = _quant_cols(w2)                    # linear2
        res_rows += [q1, q2]
        aux_rows.append(jnp.concatenate(
            [w1[H_INV:], b1, b2, s1, s2], axis=0))  # (8, 512) f32
    res_slab = jnp.concatenate(res_rows, axis=0)                    # int8
    aux_slab = jnp.concatenate(aux_rows, axis=0).astype(F32)        # f32
    assert res_slab.shape == (N_RES * RES_ROWS_PER_BLOCK, H_INV)
    assert res_slab.dtype == jnp.int8
    assert aux_slab.shape == (N_RES * AUX_ROWS_PER_BLOCK, H_INV)

    return slab_a, slab_b, slab_c, res_slab, aux_slab


# --------------------------------- wrapper ------------------------------------
def icm_forward(state, next_state, action_long, packed):
    slab_a, slab_b, slab_c, res_slab, aux_slab = packed
    batch = state.shape[0]
    # one-hot is cheap glue done in JAX; bf16 values are exact (0/1)
    action = jax.nn.one_hot(action_long, A, dtype=BF16)

    # TODO(synk): in a full RL step, start the res_slab HBM->VMEM DMA in an
    # earlier pallas_call (cross-call future, P10) to hide the weight fetch
    # behind the policy/value nets; not applicable in this standalone script.
    grid_spec = pltpu.PrefetchScalarGridSpec(
        num_scalar_prefetch=0,
        grid=(N_STEPS,),
        in_specs=[
            pl.BlockSpec((batch, N_OBS), lambda i: (0, 0)),         # state (resident)
            pl.BlockSpec((batch, N_OBS), lambda i: (0, 0)),         # next_state
            pl.BlockSpec((batch, A), lambda i: (0, 0)),             # action one-hot
            pl.BlockSpec((A_ROWS, H_INV), lambda i: (0, 0)),        # slab A
            pl.BlockSpec((B_ROWS, M), lambda i: (0, 0)),            # slab B
            pl.BlockSpec((C_ROWS, A), lambda i: (0, 0)),            # slab C
            pl.BlockSpec((RES_ROWS_PER_STEP, H_INV), lambda i: (i, 0)),  # int8 stream
            pl.BlockSpec((AUX_ROWS_PER_STEP, H_INV), lambda i: (i, 0)),  # f32 aux stream
        ],
        out_specs=(
            pl.BlockSpec((batch, M), lambda i: (0, 0)),             # real_next_state_feature
            pl.BlockSpec((batch, M), lambda i: (0, 0)),             # pred_next_state_feature
            pl.BlockSpec((batch, A), lambda i: (0, 0)),             # pred_action_logit
        ),
        scratch_shapes=[
            pltpu.VMEM((batch, M), F32),        # real_s
            pltpu.VMEM((batch, A), F32),        # logit_s
            pltpu.VMEM((batch, H_INV), F32),    # orig_s (residual carry)
        ],
    )

    out_shape = (
        jax.ShapeDtypeStruct((batch, M), F32),
        jax.ShapeDtypeStruct((batch, M), F32),
        jax.ShapeDtypeStruct((batch, A), F32),
    )

    return pl.pallas_call(
        icm_kernel,
        out_shape=out_shape,
        grid_spec=grid_spec,
        compiler_params=pltpu.CompilerParams(
            dimension_semantics=("arbitrary",),   # residual chain is serial
        ),
    )(state, next_state, action, slab_a, slab_b, slab_c, res_slab, aux_slab)


# --------------------------- pure-JAX f32 reference ----------------------------
def ref_forward(state, next_state, action_long, p):
    action = jax.nn.one_hot(action_long, A, dtype=F32)

    def encode(x):
        h = jax.nn.relu(x @ p["enc_w0"] + p["enc_b0"])
        return jax.nn.relu(h @ p["enc_w1"] + p["enc_b1"])

    es, ens = encode(state), encode(next_state)
    h = jax.nn.relu(jnp.concatenate([es, ens], 1) @ p["inv_w1"] + p["inv_b1"])
    logit = h @ p["inv_w2"] + p["inv_b2"]

    orig = jax.nn.leaky_relu(
        jnp.concatenate([es, action], 1) @ p["fwd1_w"] + p["fwd1_b"], 0.01)
    for k in range(4):
        w1, b1, w2, b2 = p["res"][2 * k]
        pred = jax.nn.leaky_relu(
            jnp.concatenate([orig, action], 1) @ w1 + b1, 0.01) @ w2 + b2
        w1, b1, w2, b2 = p["res"][2 * k + 1]
        orig = jax.nn.leaky_relu(
            jnp.concatenate([pred, action], 1) @ w1 + b1, 0.01) @ w2 + b2 + orig
    pred_feat = jnp.concatenate([orig, action], 1) @ p["fwd2_w"] + p["fwd2_b"]
    return ens, pred_feat, logit


# ----------------------------------- main --------------------------------------
if __name__ == "__main__":
    key = jax.random.PRNGKey(0)
    k_state, k_next, k_act, k_params = jax.random.split(key, 4)

    state = jax.random.normal(k_state, (B, N_OBS), F32)
    next_state = jax.random.normal(k_next, (B, N_OBS), F32)
    action_long = jax.random.randint(k_act, (B,), 0, A, jnp.int32)

    params = init_params(k_params)
    packed = pack_params(params)   # pack + quantize once; reuse across RL steps

    fwd = jax.jit(icm_forward)
    real_feat, pred_feat, pred_logit = fwd(state, next_state, action_long, packed)
    jax.block_until_ready((real_feat, pred_feat, pred_logit))

    assert real_feat.shape == (B, M)
    assert pred_feat.shape == (B, M)
    assert pred_logit.shape == (B, A)
    assert bool(jnp.all(jnp.isfinite(real_feat)))
    assert bool(jnp.all(jnp.isfinite(pred_feat)))
    assert bool(jnp.all(jnp.isfinite(pred_logit)))

    # Loose parity check vs. a pure-f32 reference (bf16 weights + int8 residual
    # weights are the intended approximation; tolerances are generous).
    ref_real, ref_pred, ref_logit = ref_forward(state, next_state, action_long, params)
    assert float(jnp.max(jnp.abs(real_feat - ref_real))) < 0.1
    assert float(jnp.max(jnp.abs(pred_logit - ref_logit))) < 0.1
    assert float(jnp.max(jnp.abs(pred_feat - ref_pred))) < 0.15

    print("KERNEL_OK")
</pallas_src>

<mosaic_0001>
module attributes {stable_mosaic.version = 11 : i64} {
  func.func @icm_kernel(%arg0: i32, %arg1: memref<8x16xf32, #tpu.memory_space<vmem>>, %arg2: memref<8x16xf32, #tpu.memory_space<vmem>>, %arg3: memref<8x4xbf16, #tpu.memory_space<vmem>>, %arg4: memref<120x512xbf16, #tpu.memory_space<vmem>>, %arg5: memref<592x32xbf16, #tpu.memory_space<vmem>>, %arg6: memref<520x4xbf16, #tpu.memory_space<vmem>>, %arg7: memref<4096x512xi8, #tpu.memory_space<vmem>>, %arg8: memref<32x512xf32, #tpu.memory_space<vmem>>, %arg9: memref<8x32xf32, #tpu.memory_space<vmem>>, %arg10: memref<8x32xf32, #tpu.memory_space<vmem>>, %arg11: memref<8x4xf32, #tpu.memory_space<vmem>>, %arg12: memref<8x32xf32, #tpu.memory_space<vmem>>, %arg13: memref<8x4xf32, #tpu.memory_space<vmem>>, %arg14: memref<8x512xf32, #tpu.memory_space<vmem>>) attributes {dimension_semantics = [#tpu.dimension_semantics<arbitrary>], iteration_bounds = array<i64: 2>, scalar_prefetch = 0 : i64, scratch_operands = 3 : i64, tpu.core_type = #tpu.core_type<tc>, window_params = [{pipeline_mode = #tpu.pipeline_mode<synchronous>, transform_indices = @transform_0, window_bounds = array<i64: 8, 16>}, {pipeline_mode = #tpu.pipeline_mode<synchronous>, transform_indices = @transform_1, window_bounds = array<i64: 8, 16>}, {pipeline_mode = #tpu.pipeline_mode<synchronous>, transform_indices = @transform_2, window_bounds = array<i64: 8, 4>}, {pipeline_mode = #tpu.pipeline_mode<synchronous>, transform_indices = @transform_3, window_bounds = array<i64: 120, 512>}, {pipeline_mode = #tpu.pipeline_mode<synchronous>, transform_indices = @transform_4, window_bounds = array<i64: 592, 32>}, {pipeline_mode = #tpu.pipeline_mode<synchronous>, transform_indices = @transform_5, window_bounds = array<i64: 520, 4>}, {transform_indices = @transform_6, window_bounds = array<i64: 4096, 512>}, {transform_indices = @transform_7, window_bounds = array<i64: 32, 512>}, {pipeline_mode = #tpu.pipeline_mode<synchronous>, transform_indices = @transform_8, window_bounds = array<i64: 8, 32>}, {pipeline_mode = #tpu.pipeline_mode<synchronous>, transform_indices = @transform_9, window_bounds = array<i64: 8, 32>}, {pipeline_mode = #tpu.pipeline_mode<synchronous>, transform_indices = @transform_10, window_bounds = array<i64: 8, 4>}]} {
    %c0 = arith.constant 0 : index
    %c0_0 = arith.constant 0 : index
    %0 = vector.load %arg3[%c0, %c0_0] : memref<8x4xbf16, #tpu.memory_space<vmem>>, vector<8x4xbf16>
    %1 = arith.extf %0 : vector<8x4xbf16> to vector<8x4xf32>
    %c0_i32 = arith.constant 0 : i32
    %2 = arith.cmpi eq, %arg0, %c0_i32 : i32
    %3 = arith.extui %2 : i1 to i32
    %c0_i32_1 = arith.constant 0 : i32
    %4 = arith.cmpi ne, %3, %c0_i32_1 : i32
    scf.if %4 {
      %c0_56 = arith.constant 0 : index
      %c0_57 = arith.constant 0 : index
      %132 = vector.load %arg1[%c0_56, %c0_57] : memref<8x16xf32, #tpu.memory_space<vmem>>, vector<8x16xf32>
      %133 = arith.truncf %132 : vector<8x16xf32> to vector<8x16xbf16>
      %c0_58 = arith.constant 0 : index
      %c0_59 = arith.constant 0 : index
      %134 = vector.load %arg2[%c0_58, %c0_59] : memref<8x16xf32, #tpu.memory_space<vmem>>, vector<8x16xf32>
      %135 = arith.truncf %134 : vector<8x16xf32> to vector<8x16xbf16>
      %c0_60 = arith.constant 0 : index
      %c0_61 = arith.constant 0 : index
      %136 = vector.load %arg5[%c0_60, %c0_61] : memref<592x32xbf16, #tpu.memory_space<vmem>>, vector<16x32xbf16>
      %c16_62 = arith.constant 16 : index
      %c0_63 = arith.constant 0 : index
      %137 = vector.load %arg5[%c16_62, %c0_63] : memref<592x32xbf16, #tpu.memory_space<vmem>>, vector<1x32xbf16>
      %138 = arith.extf %137 : vector<1x32xbf16> to vector<1x32xf32>
      %c24_64 = arith.constant 24 : index
      %c0_65 = arith.constant 0 : index
      %139 = vector.load %arg5[%c24_64, %c0_65] : memref<592x32xbf16, #tpu.memory_space<vmem>>, vector<32x32xbf16>
      %c56 = arith.constant 56 : index
      %c0_66 = arith.constant 0 : index
      %140 = vector.load %arg5[%c56, %c0_66] : memref<592x32xbf16, #tpu.memory_space<vmem>>, vector<1x32xbf16>
      %141 = arith.extf %140 : vector<1x32xbf16> to vector<1x32xf32>
      %cst_67 = arith.constant dense<0.000000e+00> : vector<8x32xf32>
      %142 = tpu.matmul %133, %136, %cst_67 {dimension_numbers = #tpu.dot_dimension_numbers<[1], [0], [0], [1], [0, 0, 1, 1], [], []>} : vector<8x16xbf16>, vector<16x32xbf16>, vector<8x32xf32> -> vector<8x32xf32>
      %143 = vector.broadcast %138 : vector<1x32xf32> to vector<8x32xf32>
      %144 = arith.addf %142, %143 : vector<8x32xf32>
      %cst_68 = arith.constant 0.000000e+00 : f32
      %145 = vector.broadcast %cst_68 : f32 to vector<8x32xf32>
      %146 = arith.maximumf %144, %145 : vector<8x32xf32>
      %147 = arith.truncf %146 : vector<8x32xf32> to vector<8x32xbf16>
      %cst_69 = arith.constant dense<0.000000e+00> : vector<8x32xf32>
      %148 = tpu.matmul %147, %139, %cst_69 {dimension_numbers = #tpu.dot_dimension_numbers<[1], [0], [0], [1], [0, 0, 1, 1], [], []>} : vector<8x32xbf16>, vector<32x32xbf16>, vector<8x32xf32> -> vector<8x32xf32>
      %149 = vector.broadcast %141 : vector<1x32xf32> to vector<8x32xf32>
      %150 = arith.addf %148, %149 : vector<8x32xf32>
      %cst_70 = arith.constant 0.000000e+00 : f32
      %151 = vector.broadcast %cst_70 : f32 to vector<8x32xf32>
      %152 = arith.maximumf %150, %151 : vector<8x32xf32>
      %cst_71 = arith.constant dense<0.000000e+00> : vector<8x32xf32>
      %153 = tpu.matmul %135, %136, %cst_71 {dimension_numbers = #tpu.dot_dimension_numbers<[1], [0], [0], [1], [0, 0, 1, 1], [], []>} : vector<8x16xbf16>, vector<16x32xbf16>, vector<8x32xf32> -> vector<8x32xf32>
      %154 = vector.broadcast %138 : vector<1x32xf32> to vector<8x32xf32>
      %155 = arith.addf %153, %154 : vector<8x32xf32>
      %cst_72 = arith.constant 0.000000e+00 : f32
      %156 = vector.broadcast %cst_72 : f32 to vector<8x32xf32>
      %157 = arith.maximumf %155, %156 : vector<8x32xf32>
      %158 = arith.truncf %157 : vector<8x32xf32> to vector<8x32xbf16>
      %cst_73 = arith.constant dense<0.000000e+00> : vector<8x32xf32>
      %159 = tpu.matmul %158, %139, %cst_73 {dimension_numbers = #tpu.dot_dimension_numbers<[1], [0], [0], [1], [0, 0, 1, 1], [], []>} : vector<8x32xbf16>, vector<32x32xbf16>, vector<8x32xf32> -> vector<8x32xf32>
      %160 = vector.broadcast %141 : vector<1x32xf32> to vector<8x32xf32>
      %161 = arith.addf %159, %160 : vector<8x32xf32>
      %cst_74 = arith.constant 0.000000e+00 : f32
      %162 = vector.broadcast %cst_74 : f32 to vector<8x32xf32>
      %163 = arith.maximumf %161, %162 : vector<8x32xf32>
      %c0_75 = arith.constant 0 : index
      %c0_76 = arith.constant 0 : index
      %164 = vector.load %arg12[%c0_75, %c0_76] : memref<8x32xf32, #tpu.memory_space<vmem>>, vector<8x32xf32>
      tpu.vector_store %arg12[%c0_75, %c0_76], %163 {strides = array<i32>} : memref<8x32xf32, #tpu.memory_space<vmem>>, vector<8x32xf32>,
      %165 = arith.truncf %152 : vector<8x32xf32> to vector<8x32xbf16>
      %166 = arith.truncf %163 : vector<8x32xf32> to vector<8x32xbf16>
      %c0_77 = arith.constant 0 : index
      %c0_78 = arith.constant 0 : index
      %167 = vector.load %arg4[%c0_77, %c0_78] : memref<120x512xbf16, #tpu.memory_space<vmem>>, vector<32x512xbf16>
      %c32 = arith.constant 32 : index
      %c0_79 = arith.constant 0 : index
      %168 = vector.load %arg4[%c32, %c0_79] : memref<120x512xbf16, #tpu.memory_space<vmem>>, vector<32x512xbf16>
      %c64 = arith.constant 64 : index
      %c0_80 = arith.constant 0 : index
      %169 = vector.load %arg4[%c64, %c0_80] : memref<120x512xbf16, #tpu.memory_space<vmem>>, vector<1x512xbf16>
      %170 = arith.extf %169 : vector<1x512xbf16> to vector<1x512xf32>
      %cst_81 = arith.constant dense<0.000000e+00> : vector<8x512xf32>
      %171 = tpu.matmul %165, %167, %cst_81 {dimension_numbers = #tpu.dot_dimension_numbers<[1], [0], [0], [1], [0, 0, 1, 1], [], []>} : vector<8x32xbf16>, vector<32x512xbf16>, vector<8x512xf32> -> vector<8x512xf32>
      %cst_82 = arith.constant dense<0.000000e+00> : vector<8x512xf32>
      %172 = tpu.matmul %166, %168, %cst_82 {dimension_numbers = #tpu.dot_dimension_numbers<[1], [0], [0], [1], [0, 0, 1, 1], [], []>} : vector<8x32xbf16>, vector<32x512xbf16>, vector<8x512xf32> -> vector<8x512xf32>
      %173 = arith.addf %171, %172 : vector<8x512xf32>
      %174 = vector.broadcast %170 : vector<1x512xf32> to vector<8x512xf32>
      %175 = arith.addf %173, %174 : vector<8x512xf32>
      %cst_83 = arith.constant 0.000000e+00 : f32
      %176 = vector.broadcast %cst_83 : f32 to vector<8x512xf32>
      %177 = arith.maximumf %175, %176 : vector<8x512xf32>
      %c0_84 = arith.constant 0 : index
      %c0_85 = arith.constant 0 : index
      %178 = vector.load %arg6[%c0_84, %c0_85] : memref<520x4xbf16, #tpu.memory_space<vmem>>, vector<512x4xbf16>
      %c512_86 = arith.constant 512 : index
      %c0_87 = arith.constant 0 : index
      %179 = vector.load %arg6[%c512_86, %c0_87] : memref<520x4xbf16, #tpu.memory_space<vmem>>, vector<1x4xbf16>
      %180 = arith.extf %179 : vector<1x4xbf16> to vector<1x4xf32>
      %181 = arith.truncf %177 : vector<8x512xf32> to vector<8x512xbf16>
      %cst_88 = arith.constant dense<0.000000e+00> : vector<8x4xf32>
      %182 = tpu.matmul %181, %178, %cst_88 {dimension_numbers = #tpu.dot_dimension_numbers<[1], [0], [0], [1], [0, 0, 1, 1], [], []>} : vector<8x512xbf16>, vector<512x4xbf16>, vector<8x4xf32> -> vector<8x4xf32>
      %183 = vector.broadcast %180 : vector<1x4xf32> to vector<8x4xf32>
      %184 = arith.addf %182, %183 : vector<8x4xf32>
      %c0_89 = arith.constant 0 : index
      %c0_90 = arith.constant 0 : index
      %185 = vector.load %arg13[%c0_89, %c0_90] : memref<8x4xf32, #tpu.memory_space<vmem>>, vector<8x4xf32>
      tpu.vector_store %arg13[%c0_89, %c0_90], %184 {strides = array<i32>} : memref<8x4xf32, #tpu.memory_space<vmem>>, vector<8x4xf32>,
      %c72 = arith.constant 72 : index
      %c0_91 = arith.constant 0 : index
      %186 = vector.load %arg4[%c72, %c0_91] : memref<120x512xbf16, #tpu.memory_space<vmem>>, vector<32x512xbf16>
      %c104 = arith.constant 104 : index
      %c0_92 = arith.constant 0 : index
      %187 = vector.load %arg4[%c104, %c0_92] : memref<120x512xbf16, #tpu.memory_space<vmem>>, vector<4x512xbf16>
      %c112 = arith.constant 112 : index
      %c0_93 = arith.constant 0 : index
      %188 = vector.load %arg4[%c112, %c0_93] : memref<120x512xbf16, #tpu.memory_space<vmem>>, vector<1x512xbf16>
      %189 = arith.extf %188 : vector<1x512xbf16> to vector<1x512xf32>
      %cst_94 = arith.constant dense<0.000000e+00> : vector<8x512xf32>
      %190 = tpu.matmul %165, %186, %cst_94 {dimension_numbers = #tpu.dot_dimension_numbers<[1], [0], [0], [1], [0, 0, 1, 1], [], []>} : vector<8x32xbf16>, vector<32x512xbf16>, vector<8x512xf32> -> vector<8x512xf32>
      %cst_95 = arith.constant dense<0.000000e+00> : vector<8x512xf32>
      %191 = tpu.matmul %0, %187, %cst_95 {dimension_numbers = #tpu.dot_dimension_numbers<[1], [0], [0], [1], [0, 0, 1, 1], [], []>} : vector<8x4xbf16>, vector<4x512xbf16>, vector<8x512xf32> -> vector<8x512xf32>
      %192 = arith.addf %190, %191 : vector<8x512xf32>
      %193 = vector.broadcast %189 : vector<1x512xf32> to vector<8x512xf32>
      %194 = arith.addf %192, %193 : vector<8x512xf32>
      %cst_96 = arith.constant 0.000000e+00 : f32
      %195 = vector.broadcast %cst_96 : f32 to vector<8x512xf32>
      %196 = arith.cmpf ogt, %194, %195 : vector<8x512xf32>
      %cst_97 = arith.constant 0.00999999977 : f32
      %197 = vector.broadcast %cst_97 : f32 to vector<8x512xf32>
      %198 = arith.mulf %197, %194 : vector<8x512xf32>
      %199 = arith.select %196, %194, %198 : vector<8x512xi1>, vector<8x512xf32>
      %c0_98 = arith.constant 0 : index
      %c0_99 = arith.constant 0 : index
      %200 = vector.load %arg14[%c0_98, %c0_99] : memref<8x512xf32, #tpu.memory_space<vmem>>, vector<8x512xf32>
      tpu.vector_store %arg14[%c0_98, %c0_99], %199 {strides = array<i32>} : memref<8x512xf32, #tpu.memory_space<vmem>>, vector<8x512xf32>,
    } else {
    }
    %c0_2 = arith.constant 0 : index
    %c0_3 = arith.constant 0 : index
    %5 = vector.load %arg14[%c0_2, %c0_3] : memref<8x512xf32, #tpu.memory_space<vmem>>, vector<8x512xf32>
    %c0_4 = arith.constant 0 : index
    %c0_5 = arith.constant 0 : index
    %6 = vector.load %arg8[%c0_4, %c0_5] : memref<32x512xf32, #tpu.memory_space<vmem>>, vector<4x512xf32>
    %cst = arith.constant dense<0.000000e+00> : vector<8x512xf32>
    %7 = tpu.matmul %1, %6, %cst {dimension_numbers = #tpu.dot_dimension_numbers<[1], [0], [0], [1], [0, 0, 1, 1], [], []>} : vector<8x4xf32>, vector<4x512xf32>, vector<8x512xf32> -> vector<8x512xf32>
    %c4 = arith.constant 4 : index
    %c0_6 = arith.constant 0 : index
    %8 = vector.load %arg8[%c4, %c0_6] : memref<32x512xf32, #tpu.memory_space<vmem>>, vector<1x512xf32>
    %9 = vector.broadcast %8 : vector<1x512xf32> to vector<8x512xf32>
    %10 = arith.addf %7, %9 : vector<8x512xf32>
    %c8 = arith.constant 8 : index
    %c0_7 = arith.constant 0 : index
    %11 = vector.load %arg8[%c8, %c0_7] : memref<32x512xf32, #tpu.memory_space<vmem>>, vector<4x512xf32>
    %cst_8 = arith.constant dense<0.000000e+00> : vector<8x512xf32>
    %12 = tpu.matmul %1, %11, %cst_8 {dimension_numbers = #tpu.dot_dimension_numbers<[1], [0], [0], [1], [0, 0, 1, 1], [], []>} : vector<8x4xf32>, vector<4x512xf32>, vector<8x512xf32> -> vector<8x512xf32>
    %c12 = arith.constant 12 : index
    %c0_9 = arith.constant 0 : index
    %13 = vector.load %arg8[%c12, %c0_9] : memref<32x512xf32, #tpu.memory_space<vmem>>, vector<1x512xf32>
    %14 = vector.broadcast %13 : vector<1x512xf32> to vector<8x512xf32>
    %15 = arith.addf %12, %14 : vector<8x512xf32>
    %c5 = arith.constant 5 : index
    %c0_10 = arith.constant 0 : index
    %16 = vector.load %arg8[%c5, %c0_10] : memref<32x512xf32, #tpu.memory_space<vmem>>, vector<1x512xf32>
    %c13 = arith.constant 13 : index
    %c0_11 = arith.constant 0 : index
    %17 = vector.load %arg8[%c13, %c0_11] : memref<32x512xf32, #tpu.memory_space<vmem>>, vector<1x512xf32>
    %c6 = arith.constant 6 : index
    %c0_12 = arith.constant 0 : index
    %18 = vector.load %arg8[%c6, %c0_12] : memref<32x512xf32, #tpu.memory_space<vmem>>, vector<1x512xf32>
    %c7 = arith.constant 7 : index
    %c0_13 = arith.constant 0 : index
    %19 = vector.load %arg8[%c7, %c0_13] : memref<32x512xf32, #tpu.memory_space<vmem>>, vector<1x512xf32>
    %c14 = arith.constant 14 : index
    %c0_14 = arith.constant 0 : index
    %20 = vector.load %arg8[%c14, %c0_14] : memref<32x512xf32, #tpu.memory_space<vmem>>, vector<1x512xf32>
    %c15 = arith.constant 15 : index
    %c0_15 = arith.constant 0 : index
    %21 = vector.load %arg8[%c15, %c0_15] : memref<32x512xf32, #tpu.memory_space<vmem>>, vector<1x512xf32>
    %22 = arith.truncf %5 : vector<8x512xf32> to vector<8x512xbf16>
    %c0_16 = arith.constant 0 : index
    %c0_17 = arith.constant 0 : index
    %23 = vector.load %arg7[%c0_16, %c0_17] : memref<4096x512xi8, #tpu.memory_space<vmem>>, vector<512x512xi8>
    %24 = arith.sitofp %23 : vector<512x512xi8> to vector<512x512xf32>
    %25 = arith.truncf %24 : vector<512x512xf32> to vector<512x512xbf16>
    %cst_18 = arith.constant dense<0.000000e+00> : vector<8x512xf32>
    %26 = tpu.matmul %22, %25, %cst_18 {dimension_numbers = #tpu.dot_dimension_numbers<[1], [0], [0], [1], [0, 0, 1, 1], [], []>} : vector<8x512xbf16>, vector<512x512xbf16>, vector<8x512xf32> -> vector<8x512xf32>
    %27 = vector.broadcast %18 : vector<1x512xf32> to vector<8x512xf32>
    %28 = arith.mulf %26, %27 : vector<8x512xf32>
    %29 = arith.addf %28, %10 : vector<8x512xf32>
    %cst_19 = arith.constant 0.000000e+00 : f32
    %30 = vector.broadcast %cst_19 : f32 to vector<8x512xf32>
    %31 = arith.cmpf ogt, %29, %30 : vector<8x512xf32>
    %cst_20 = arith.constant 0.00999999977 : f32
    %32 = vector.broadcast %cst_20 : f32 to vector<8x512xf32>
    %33 = arith.mulf %32, %29 : vector<8x512xf32>
    %34 = arith.select %31, %29, %33 : vector<8x512xi1>, vector<8x512xf32>
    %35 = arith.truncf %34 : vector<8x512xf32> to vector<8x512xbf16>
    %c512 = arith.constant 512 : index
    %c0_21 = arith.constant 0 : index
    %36 = vector.load %arg7[%c512, %c0_21] : memref<4096x512xi8, #tpu.memory_space<vmem>>, vector<512x512xi8>
    %37 = arith.sitofp %36 : vector<512x512xi8> to vector<512x512xf32>
    %38 = arith.truncf %37 : vector<512x512xf32> to vector<512x512xbf16>
    %cst_22 = arith.constant dense<0.000000e+00> : vector<8x512xf32>
    %39 = tpu.matmul %35, %38, %cst_22 {dimension_numbers = #tpu.dot_dimension_numbers<[1], [0], [0], [1], [0, 0, 1, 1], [], []>} : vector<8x512xbf16>, vector<512x512xbf16>, vector<8x512xf32> -> vector<8x512xf32>
    %40 = vector.broadcast %19 : vector<1x512xf32> to vector<8x512xf32>
    %41 = arith.mulf %39, %40 : vector<8x512xf32>
    %42 = vector.broadcast %16 : vector<1x512xf32> to vector<8x512xf32>
    %43 = arith.addf %41, %42 : vector<8x512xf32>
    %44 = arith.truncf %43 : vector<8x512xf32> to vector<8x512xbf16>
    %c1024 = arith.constant 1024 : index
    %c0_23 = arith.constant 0 : index
    %45 = vector.load %arg7[%c1024, %c0_23] : memref<4096x512xi8, #tpu.memory_space<vmem>>, vector<512x512xi8>
    %46 = arith.sitofp %45 : vector<512x512xi8> to vector<512x512xf32>
    %47 = arith.truncf %46 : vector<512x512xf32> to vector<512x512xbf16>
    %cst_24 = arith.constant dense<0.000000e+00> : vector<8x512xf32>
    %48 = tpu.matmul %44, %47, %cst_24 {dimension_numbers = #tpu.dot_dimension_numbers<[1], [0], [0], [1], [0, 0, 1, 1], [], []>} : vector<8x512xbf16>, vector<512x512xbf16>, vector<8x512xf32> -> vector<8x512xf32>
    %49 = vector.broadcast %20 : vector<1x512xf32> to vector<8x512xf32>
    %50 = arith.mulf %48, %49 : vector<8x512xf32>
    %51 = arith.addf %50, %15 : vector<8x512xf32>
    %cst_25 = arith.constant 0.000000e+00 : f32
    %52 = vector.broadcast %cst_25 : f32 to vector<8x512xf32>
    %53 = arith.cmpf ogt, %51, %52 : vector<8x512xf32>
    %cst_26 = arith.constant 0.00999999977 : f32
    %54 = vector.broadcast %cst_26 : f32 to vector<8x512xf32>
    %55 = arith.mulf %54, %51 : vector<8x512xf32>
    %56 = arith.select %53, %51, %55 : vector<8x512xi1>, vector<8x512xf32>
    %57 = arith.truncf %56 : vector<8x512xf32> to vector<8x512xbf16>
    %c1536 = arith.constant 1536 : index
    %c0_27 = arith.constant 0 : index
    %58 = vector.load %arg7[%c1536, %c0_27] : memref<4096x512xi8, #tpu.memory_space<vmem>>, vector<512x512xi8>
    %59 = arith.sitofp %58 : vector<512x512xi8> to vector<512x512xf32>
    %60 = arith.truncf %59 : vector<512x512xf32> to vector<512x512xbf16>
    %cst_28 = arith.constant dense<0.000000e+00> : vector<8x512xf32>
    %61 = tpu.matmul %57, %60, %cst_28 {dimension_numbers = #tpu.dot_dimension_numbers<[1], [0], [0], [1], [0, 0, 1, 1], [], []>} : vector<8x512xbf16>, vector<512x512xbf16>, vector<8x512xf32> -> vector<8x512xf32>
    %62 = vector.broadcast %21 : vector<1x512xf32> to vector<8x512xf32>
    %63 = arith.mulf %61, %62 : vector<8x512xf32>
    %64 = vector.broadcast %17 : vector<1x512xf32> to vector<8x512xf32>
    %65 = arith.addf %63, %64 : vector<8x512xf32>
    %66 = arith.addf %65, %5 : vector<8x512xf32>
    %c16 = arith.constant 16 : index
    %c0_29 = arith.constant 0 : index
    %67 = vector.load %arg8[%c16, %c0_29] : memref<32x512xf32, #tpu.memory_space<vmem>>, vector<4x512xf32>
    %cst_30 = arith.constant dense<0.000000e+00> : vector<8x512xf32>
    %68 = tpu.matmul %1, %67, %cst_30 {dimension_numbers = #tpu.dot_dimension_numbers<[1], [0], [0], [1], [0, 0, 1, 1], [], []>} : vector<8x4xf32>, vector<4x512xf32>, vector<8x512xf32> -> vector<8x512xf32>
    %c20 = arith.constant 20 : index
    %c0_31 = arith.constant 0 : index
    %69 = vector.load %arg8[%c20, %c0_31] : memref<32x512xf32, #tpu.memory_space<vmem>>, vector<1x512xf32>
    %70 = vector.broadcast %69 : vector<1x512xf32> to vector<8x512xf32>
    %71 = arith.addf %68, %70 : vector<8x512xf32>
    %c24 = arith.constant 24 : index
    %c0_32 = arith.constant 0 : index
    %72 = vector.load %arg8[%c24, %c0_32] : memref<32x512xf32, #tpu.memory_space<vmem>>, vector<4x512xf32>
    %cst_33 = arith.constant dense<0.000000e+00> : vector<8x512xf32>
    %73 = tpu.matmul %1, %72, %cst_33 {dimension_numbers = #tpu.dot_dimension_numbers<[1], [0], [0], [1], [0, 0, 1, 1], [], []>} : vector<8x4xf32>, vector<4x512xf32>, vector<8x512xf32> -> vector<8x512xf32>
    %c28 = arith.constant 28 : index
    %c0_34 = arith.constant 0 : index
    %74 = vector.load %arg8[%c28, %c0_34] : memref<32x512xf32, #tpu.memory_space<vmem>>, vector<1x512xf32>
    %75 = vector.broadcast %74 : vector<1x512xf32> to vector<8x512xf32>
    %76 = arith.addf %73, %75 : vector<8x512xf32>
    %c21 = arith.constant 21 : index
    %c0_35 = arith.constant 0 : index
    %77 = vector.load %arg8[%c21, %c0_35] : memref<32x512xf32, #tpu.memory_space<vmem>>, vector<1x512xf32>
    %c29 = arith.constant 29 : index
    %c0_36 = arith.constant 0 : index
    %78 = vector.load %arg8[%c29, %c0_36] : memref<32x512xf32, #tpu.memory_space<vmem>>, vector<1x512xf32>
    %c22 = arith.constant 22 : index
    %c0_37 = arith.constant 0 : index
    %79 = vector.load %arg8[%c22, %c0_37] : memref<32x512xf32, #tpu.memory_space<vmem>>, vector<1x512xf32>
    %c23 = arith.constant 23 : index
    %c0_38 = arith.constant 0 : index
    %80 = vector.load %arg8[%c23, %c0_38] : memref<32x512xf32, #tpu.memory_space<vmem>>, vector<1x512xf32>
    %c30 = arith.constant 30 : index
    %c0_39 = arith.constant 0 : index
    %81 = vector.load %arg8[%c30, %c0_39] : memref<32x512xf32, #tpu.memory_space<vmem>>, vector<1x512xf32>
    %c31 = arith.constant 31 : index
    %c0_40 = arith.constant 0 : index
    %82 = vector.load %arg8[%c31, %c0_40] : memref<32x512xf32, #tpu.memory_space<vmem>>, vector<1x512xf32>
    %83 = arith.truncf %66 : vector<8x512xf32> to vector<8x512xbf16>
    %c2048 = arith.constant 2048 : index
    %c0_41 = arith.constant 0 : index
    %84 = vector.load %arg7[%c2048, %c0_41] : memref<4096x512xi8, #tpu.memory_space<vmem>>, vector<512x512xi8>
    %85 = arith.sitofp %84 : vector<512x512xi8> to vector<512x512xf32>
    %86 = arith.truncf %85 : vector<512x512xf32> to vector<512x512xbf16>
    %cst_42 = arith.constant dense<0.000000e+00> : vector<8x512xf32>
    %87 = tpu.matmul %83, %86, %cst_42 {dimension_numbers = #tpu.dot_dimension_numbers<[1], [0], [0], [1], [0, 0, 1, 1], [], []>} : vector<8x512xbf16>, vector<512x512xbf16>, vector<8x512xf32> -> vector<8x512xf32>
    %88 = vector.broadcast %79 : vector<1x512xf32> to vector<8x512xf32>
    %89 = arith.mulf %87, %88 : vector<8x512xf32>
    %90 = arith.addf %89, %71 : vector<8x512xf32>
    %cst_43 = arith.constant 0.000000e+00 : f32
    %91 = vector.broadcast %cst_43 : f32 to vector<8x512xf32>
    %92 = arith.cmpf ogt, %90, %91 : vector<8x512xf32>
    %cst_44 = arith.constant 0.00999999977 : f32
    %93 = vector.broadcast %cst_44 : f32 to vector<8x512xf32>
    %94 = arith.mulf %93, %90 : vector<8x512xf32>
    %95 = arith.select %92, %90, %94 : vector<8x512xi1>, vector<8x512xf32>
    %96 = arith.truncf %95 : vector<8x512xf32> to vector<8x512xbf16>
    %c2560 = arith.constant 2560 : index
    %c0_45 = arith.constant 0 : index
    %97 = vector.load %arg7[%c2560, %c0_45] : memref<4096x512xi8, #tpu.memory_space<vmem>>, vector<512x512xi8>
    %98 = arith.sitofp %97 : vector<512x512xi8> to vector<512x512xf32>
    %99 = arith.truncf %98 : vector<512x512xf32> to vector<512x512xbf16>
    %cst_46 = arith.constant dense<0.000000e+00> : vector<8x512xf32>
    %100 = tpu.matmul %96, %99, %cst_46 {dimension_numbers = #tpu.dot_dimension_numbers<[1], [0], [0], [1], [0, 0, 1, 1], [], []>} : vector<8x512xbf16>, vector<512x512xbf16>, vector<8x512xf32> -> vector<8x512xf32>
    %101 = vector.broadcast %80 : vector<1x512xf32> to vector<8x512xf32>
    %102 = arith.mulf %100, %101 : vector<8x512xf32>
    %103 = vector.broadcast %77 : vector<1x512xf32> to vector<8x512xf32>
    %104 = arith.addf %102, %103 : vector<8x512xf32>
    %105 = arith.truncf %104 : vector<8x512xf32> to vector<8x512xbf16>
    %c3072 = arith.constant 3072 : index
    %c0_47 = arith.constant 0 : index
    %106 = vector.load %arg7[%c3072, %c0_47] : memref<4096x512xi8, #tpu.memory_space<vmem>>, vector<512x512xi8>
    %107 = arith.sitofp %106 : vector<512x512xi8> to vector<512x512xf32>
    %108 = arith.truncf %107 : vector<512x512xf32> to vector<512x512xbf16>
    %cst_48 = arith.constant dense<0.000000e+00> : vector<8x512xf32>
    %109 = tpu.matmul %105, %108, %cst_48 {dimension_numbers = #tpu.dot_dimension_numbers<[1], [0], [0], [1], [0, 0, 1, 1], [], []>} : vector<8x512xbf16>, vector<512x512xbf16>, vector<8x512xf32> -> vector<8x512xf32>
    %110 = vector.broadcast %81 : vector<1x512xf32> to vector<8x512xf32>
    %111 = arith.mulf %109, %110 : vector<8x512xf32>
    %112 = arith.addf %111, %76 : vector<8x512xf32>
    %cst_49 = arith.constant 0.000000e+00 : f32
    %113 = vector.broadcast %cst_49 : f32 to vector<8x512xf32>
    %114 = arith.cmpf ogt, %112, %113 : vector<8x512xf32>
    %cst_50 = arith.constant 0.00999999977 : f32
    %115 = vector.broadcast %cst_50 : f32 to vector<8x512xf32>
    %116 = arith.mulf %115, %112 : vector<8x512xf32>
    %117 = arith.select %114, %112, %116 : vector<8x512xi1>, vector<8x512xf32>
    %118 = arith.truncf %117 : vector<8x512xf32> to vector<8x512xbf16>
    %c3584 = arith.constant 3584 : index
    %c0_51 = arith.constant 0 : index
    %119 = vector.load %arg7[%c3584, %c0_51] : memref<4096x512xi8, #tpu.memory_space<vmem>>, vector<512x512xi8>
    %120 = arith.sitofp %119 : vector<512x512xi8> to vector<512x512xf32>
    %121 = arith.truncf %120 : vector<512x512xf32> to vector<512x512xbf16>
    %cst_52 = arith.constant dense<0.000000e+00> : vector<8x512xf32>
    %122 = tpu.matmul %118, %121, %cst_52 {dimension_numbers = #tpu.dot_dimension_numbers<[1], [0], [0], [1], [0, 0, 1, 1], [], []>} : vector<8x512xbf16>, vector<512x512xbf16>, vector<8x512xf32> -> vector<8x512xf32>
    %123 = vector.broadcast %82 : vector<1x512xf32> to vector<8x512xf32>
    %124 = arith.mulf %122, %123 : vector<8x512xf32>
    %125 = vector.broadcast %78 : vector<1x512xf32> to vector<8x512xf32>
    %126 = arith.addf %124, %125 : vector<8x512xf32>
    %127 = arith.addf %126, %66 : vector<8x512xf32>
    %c0_53 = arith.constant 0 : index
    %c0_54 = arith.constant 0 : index
    %128 = vector.load %arg14[%c0_53, %c0_54] : memref<8x512xf32, #tpu.memory_space<vmem>>, vector<8x512xf32>
    tpu.vector_store %arg14[%c0_53, %c0_54], %127 {strides = array<i32>} : memref<8x512xf32, #tpu.memory_space<vmem>>, vector<8x512xf32>,
    %c1_i32 = arith.constant 1 : i32
    %129 = arith.cmpi eq, %arg0, %c1_i32 : i32
    %130 = arith.extui %129 : i1 to i32
    %c0_i32_55 = arith.constant 0 : i32
    %131 = arith.cmpi ne, %130, %c0_i32_55 : i32
    scf.if %131 {
      %c64 = arith.constant 64 : index
      %c0_56 = arith.constant 0 : index
      %132 = vector.load %arg5[%c64, %c0_56] : memref<592x32xbf16, #tpu.memory_space<vmem>>, vector<512x32xbf16>
      %c576 = arith.constant 576 : index
      %c0_57 = arith.constant 0 : index
      %133 = vector.load %arg5[%c576, %c0_57] : memref<592x32xbf16, #tpu.memory_space<vmem>>, vector<4x32xbf16>
      %c584 = arith.constant 584 : index
      %c0_58 = arith.constant 0 : index
      %134 = vector.load %arg5[%c584, %c0_58] : memref<592x32xbf16, #tpu.memory_space<vmem>>, vector<1x32xbf16>
      %135 = arith.extf %134 : vector<1x32xbf16> to vector<1x32xf32>
      %c0_59 = arith.constant 0 : index
      %c0_60 = arith.constant 0 : index
      %136 = vector.load %arg14[%c0_59, %c0_60] : memref<8x512xf32, #tpu.memory_space<vmem>>, vector<8x512xf32>
      %137 = arith.truncf %136 : vector<8x512xf32> to vector<8x512xbf16>
      %cst_61 = arith.constant dense<0.000000e+00> : vector<8x32xf32>
      %138 = tpu.matmul %137, %132, %cst_61 {dimension_numbers = #tpu.dot_dimension_numbers<[1], [0], [0], [1], [0, 0, 1, 1], [], []>} : vector<8x512xbf16>, vector<512x32xbf16>, vector<8x32xf32> -> vector<8x32xf32>
      %cst_62 = arith.constant dense<0.000000e+00> : vector<8x32xf32>
      %139 = tpu.matmul %0, %133, %cst_62 {dimension_numbers = #tpu.dot_dimension_numbers<[1], [0], [0], [1], [0, 0, 1, 1], [], []>} : vector<8x4xbf16>, vector<4x32xbf16>, vector<8x32xf32> -> vector<8x32xf32>
      %140 = arith.addf %138, %139 : vector<8x32xf32>
      %141 = vector.broadcast %135 : vector<1x32xf32> to vector<8x32xf32>
      %142 = arith.addf %140, %141 : vector<8x32xf32>
      %c0_63 = arith.constant 0 : index
      %c0_64 = arith.constant 0 : index
      %143 = vector.load %arg10[%c0_63, %c0_64] : memref<8x32xf32, #tpu.memory_space<vmem>>, vector<8x32xf32>
      tpu.vector_store %arg10[%c0_63, %c0_64], %142 {strides = array<i32>} : memref<8x32xf32, #tpu.memory_space<vmem>>, vector<8x32xf32>,
      %c0_65 = arith.constant 0 : index
      %c0_66 = arith.constant 0 : index
      %144 = vector.load %arg12[%c0_65, %c0_66] : memref<8x32xf32, #tpu.memory_space<vmem>>, vector<8x32xf32>
      %c0_67 = arith.constant 0 : index
      %c0_68 = arith.constant 0 : index
      %145 = vector.load %arg9[%c0_67, %c0_68] : memref<8x32xf32, #tpu.memory_space<vmem>>, vector<8x32xf32>
      tpu.vector_store %arg9[%c0_67, %c0_68], %144 {strides = array<i32>} : memref<8x32xf32, #tpu.memory_space<vmem>>, vector<8x32xf32>,
      %c0_69 = arith.constant 0 : index
      %c0_70 = arith.constant 0 : index
      %146 = vector.load %arg13[%c0_69, %c0_70] : memref<8x4xf32, #tpu.memory_space<vmem>>, vector<8x4xf32>
      %c0_71 = arith.constant 0 : index
      %c0_72 = arith.constant 0 : index
      %147 = vector.load %arg11[%c0_71, %c0_72] : memref<8x4xf32, #tpu.memory_space<vmem>>, vector<8x4xf32>
      tpu.vector_store %arg11[%c0_71, %c0_72], %146 {strides = array<i32>} : memref<8x4xf32, #tpu.memory_space<vmem>>, vector<8x4xf32>,
    } else {
    }
    return
  }
  func.func @transform_0(%arg0: i32) -> (i32, i32) {
    %c0_i32 = arith.constant 0 : i32
    %c0_i32_0 = arith.constant 0 : i32
    %c0_i32_1 = arith.constant 0 : i32
    return %c0_i32, %c0_i32_0 : i32, i32
  }
  func.func @transform_1(%arg0: i32) -> (i32, i32) {
    %c0_i32 = arith.constant 0 : i32
    %c0_i32_0 = arith.constant 0 : i32
    %c0_i32_1 = arith.constant 0 : i32
    return %c0_i32, %c0_i32_0 : i32, i32
  }
  func.func @transform_2(%arg0: i32) -> (i32, i32) {
    %c0_i32 = arith.constant 0 : i32
    %c0_i32_0 = arith.constant 0 : i32
    %c0_i32_1 = arith.constant 0 : i32
    return %c0_i32, %c0_i32_0 : i32, i32
  }
  func.func @transform_3(%arg0: i32) -> (i32, i32) {
    %c0_i32 = arith.constant 0 : i32
    %c0_i32_0 = arith.constant 0 : i32
    %c0_i32_1 = arith.constant 0 : i32
    return %c0_i32, %c0_i32_0 : i32, i32
  }
  func.func @transform_4(%arg0: i32) -> (i32, i32) {
    %c0_i32 = arith.constant 0 : i32
    %c0_i32_0 = arith.constant 0 : i32
    %c0_i32_1 = arith.constant 0 : i32
    return %c0_i32, %c0_i32_0 : i32, i32
  }
  func.func @transform_5(%arg0: i32) -> (i32, i32) {
    %c0_i32 = arith.constant 0 : i32
    %c0_i32_0 = arith.constant 0 : i32
    %c0_i32_1 = arith.constant 0 : i32
    return %c0_i32, %c0_i32_0 : i32, i32
  }
  func.func @transform_6(%arg0: i32) -> (i32, i32) {
    %c0_i32 = arith.constant 0 : i32
    %c0_i32_0 = arith.constant 0 : i32
    return %arg0, %c0_i32 : i32, i32
  }
  func.func @transform_7(%arg0: i32) -> (i32, i32) {
    %c0_i32 = arith.constant 0 : i32
    %c0_i32_0 = arith.constant 0 : i32
    return %arg0, %c0_i32 : i32, i32
  }
  func.func @transform_8(%arg0: i32) -> (i32, i32) {
    %c0_i32 = arith.constant 0 : i32
    %c0_i32_0 = arith.constant 0 : i32
    %c0_i32_1 = arith.constant 0 : i32
    return %c0_i32, %c0_i32_0 : i32, i32
  }
  func.func @transform_9(%arg0: i32) -> (i32, i32) {
    %c0_i32 = arith.constant 0 : i32
    %c0_i32_0 = arith.constant 0 : i32
    %c0_i32_1 = arith.constant 0 : i32
    return %c0_i32, %c0_i32_0 : i32, i32
  }
  func.func @transform_10(%arg0: i32) -> (i32, i32) {
    %c0_i32 = arith.constant 0 : i32
    %c0_i32_0 = arith.constant 0 : i32
    %c0_i32_1 = arith.constant 0 : i32
    return %c0_i32, %c0_i32_0 : i32, i32
  }
}

</mosaic_0001>

<bundles_post_ra>
// kernel: icm_forward.1
= control target key start
LH: loop header
LB: loop body
LE: loop exit
PB: predicated region body
PF: predicated region fallthrough
CT: control target
= control target key end

     0   :  { %s8460_s0 = inlined_call_operand.hbm [shape: f32[8,16], index: 0, kind: input, shape index: {}]   ;;  %s8461_s1 = inlined_call_operand.hbm [shape: f32[8,16], index: 1, kind: input, shape index: {}]   ;;  %s8462_s2 = inlined_call_operand.vmem [shape: bf16[8,4], index: 2, kind: input, shape index: {}]   ;;  %s8463_s3 = inlined_call_operand.hbm [shape: bf16[120,512], index: 3, kind: input, shape index: {}]   ;;  %s8464_s4 = inlined_call_operand.vmem [shape: bf16[592,32], index: 4, kind: input, shape index: {}]   ;;  %s8465_s5 = inlined_call_operand.vmem [shape: bf16[520,4], index: 5, kind: input, shape index: {}]   ;;  %s8466_s6 = inlined_call_operand.hbm [shape: s8[8192,512], index: 6, kind: input, shape index: {}]   ;;  %s8467_s7 = inlined_call_operand.hbm [shape: f32[64,512], index: 7, kind: input, shape index: {}]   ;;  %s8468_s8 = inlined_call_operand.hbm [shape: f32[8,32], index: 8, kind: output, shape index: {0}]   ;;  %s8469_s9 = inlined_call_operand.hbm [shape: f32[8,32], index: 9, kind: output, shape index: {1}]   ;;  %s8470_s10 = inlined_call_operand.vmem [shape: f32[8,4], index: 10, kind: output, shape index: {2}]  }
   0x1   :  { %8478 = sst [smem:[#allocation22_spill]] %s8461_s1 }
   0x2   :  { %8479 = sst [smem:[#allocation23_spill]] %s8466_s6 }
   0x3   :  { %16 = vsyncpa [#allocation6], 0 }
   0x4   :  { %17 = vsyncpa [#allocation9], 0 }
   0x5   :  { %18 = vsyncpa [#allocation12], 0 }
   0x6   :  { %20 = vsyncpa [#allocation12 + $0x1], 0 }
   0x7   :  { %21 = vsyncpa [#allocation7], 0 }
   0x8   :  { %22 = vsyncpa [#allocation16], 0  ;;  %s6991_s13 = smov 0   ;;  %s6993_s14 = smov 0  }
   0x9   :  { %s6995_s15 = smov 0   ;;  %s6997_s16 = smov 0  }
   0xa LB: > { %s7010_s17 = sadd.s32 4294967295, %s6917_s16   ;;  %p174_p0 = scmp.ne.s32.totalorder %s6909_s14, %s6905_s13  ;;  %s6917_s16 = sphi %s6997_s16, %s8502_s16   ;;  %s6913_s15 = sphi %s6995_s15, %s8501_s15   ;;  %s6909_s14 = sphi %s6993_s14, %s8500_s14   ;;  %s6905_s13 = sphi %s6991_s13, %s8499_s13  }
   0xb   : > { %p8472_p1 = scmp.eq.s32.totalorder %s7010_s17, 0  ;;  %p6158_p2 = scmp.ge.s32.totalorder %s6917_s16, 1 }
   0xc   : > { %p274_p3 = scmp.lt.s32.totalorder %s6917_s16, 3  ;;  %s6919_s20 = smov [#allocation8]  }
   0xd   : > { %p7019_p5 = por %p8472_p1, %p174_p0  ;;  %s298_s21 = sshll.u32 %s6919_s20, 4  ;;  %s299_s21 = int_to_ptr.vmem [resolvable:$true] %s298_s21 }
   0xe   : > { %p7023_p6 = pnand %p6158_p2, %p274_p3  ;;  %s7030_s22 = sadd.s32 1, %s6917_s16  }
   0xf   : > { %s8480_s18 = scalar_select %p7019_p5, 1, 0 }
  0x10   : > { %s8481_s19 = scalar_select %p7023_p6, 1, 0 }
  0x11   : > { %p6497_p7 = pneg %p7023_p6  ;;  %s158_s24 = ssub.s32 %s6917_s16, %s7030_s22 }
  0x12   : > { %p7040_p9 = scmp.eq.s32.totalorder %s158_s24, 0  ;;  %s161_s26 = sadd.s32 1, %s6913_s15 }
  0x13   : > { %p7034_p8 = pnand %p6497_p7, %p8472_p1  ;;  %p168_p10 = scmp.ne.s32.totalorder %s6913_s15, %s6909_s14 }
  0x14   : > { %s6696_s27 = scalar_lea.vmem %s299_s21, 128  ;;  %p6704_p2 = scmp.lt.s32.totalorder %s299_s21, %s299_s21 }
  0x15   : > { %p8473_p11 = pneg %p7034_p8  ;;  %p6697_p12 = scmp.ne.s32.totalorder %s299_s21, %s6696_s27 }
  0x16   : > { %p6705_p3 = scmp.lt.s32.totalorder %s6696_s27, %s6696_s27 }
  0x17   : > { %p6699_p13 = pnand %p6697_p12, %p8473_p11 }
  0x18   : > { %p6706_p7 = por %p6705_p3, %p6704_p2 }
  0x19   : > { %p6700_p0 = pneg %p6699_p13 }
  0x1b   : > { %p6707_p4 = pnand %p6706_p7, %p6700_p0 }
  0x1d   : > { %6710 = shalt.err (!%p6707_p4)
}
  0x1e   : > { %s8484_s1 = sld [smem:[#allocation22_spill]]  ;;  %p169_p4 = scmp.eq.s32.totalorder %s6917_s16, 0 }
  0x1f   : > { %s7060_s30 = scalar_select %p7040_p9, %s6913_s15, %s161_s26  }
  0x20   : > { %p6517_p12 = scmp.lt.s32.totalorder %s6917_s16, 2  ;;  %s331_s11 = sand.u32 1, %s6917_s16  }
  0x21   : > { %s8471_s12 = sand.u32 1, %s6913_s15   ;;  %p170_p13 = por %p169_p4, %p168_p10 }
  0x22   : > { %s6163_s13 = sshll.u32 %s8471_s12, 12  ;;  %s6336_s20 = sshll.u32 %s6917_s16, 16 }
  0x23   : > { %s8485_s6 = sld [smem:[#allocation23_spill]]  ;;  %p7077_p9 = pnand %p6517_p12, %p170_p13 }
  0x24   : > { %6503 = dma.hbm_to_vmem [thread:$0]  (!%p7034_p8), %s8484_s1, 128, %s299_s21, [#allocation9]  }
  0x25   : > { %s335_s21 = scalar_lea.vmem [#allocation11], %s6163_s13  ;;  %s7083_s29 = scalar_lea.sflag [#allocation12], %s331_s11 }
  0x26   : > { %s343_s25 = sshll.u32 %s335_s21, 4  ;;  %p6713_p0 = pneg %p7077_p9  ;;  %s7081_s25 = int_to_ptr.vmem [resolvable:$true] %s343_s25 }
  0x29   : > { %s7075_s28 = scalar_lea.hbm %s8485_s6, %s6336_s20  ;;  %s6716_s24 = scalar_lea.hbm %s8485_s6, 131072 }
  0x2a   : > { %s6711_s12 = scalar_lea.hbm %s7075_s28, 65536  ;;  %p6717_p7 = scmp.lt.s32.totalorder %s7075_s28, %s8485_s6 }
  0x2b   : > { %p6712_p10 = scmp.ne.s32.totalorder %s7075_s28, %s6711_s12  ;;  %p6718_p4 = scmp.lt.s32.totalorder %s6716_s24, %s6711_s12 }
  0x2d   : > { %p6714_p2 = pnand %p6713_p0, %p6712_p10  ;;  %p6719_p12 = por %p6718_p4, %p6717_p7 }
  0x2f   : > { %p6715_p3 = pneg %p6714_p2 }
  0x31   : > { %p6720_p13 = pnand %p6719_p12, %p6715_p3 }
  0x33   : > { %6723 = shalt.err (!%p6720_p13)
}
  0x34   : > { %s6724_s11 = scalar_lea.vmem %s7081_s25, 65536  ;;  %s6920_s13 = smov [#allocation11]  }
  0x35   : > { %p6725_p1 = scmp.ne.s32.totalorder %s7081_s25, %s6724_s11  ;;  %s6729_s20 = sshll.u32 %s6920_s13, 4  ;;  %s6730_s20 = int_to_ptr.vmem [resolvable:$false] %s6729_s20 }
  0x36   : > { %s6731_s1 = scalar_lea.vmem %s6730_s20, 131072  ;;  %p6732_p11 = scmp.lt.s32.totalorder %s7081_s25, %s6730_s20 }
  0x37   : > { %p6727_p10 = pnand %p6725_p1, %p6713_p0  ;;  %p6733_p5 = scmp.lt.s32.totalorder %s6731_s1, %s6724_s11 }
  0x39   : > { %p6728_p2 = pneg %p6727_p10  ;;  %p6734_p6 = por %p6733_p5, %p6732_p11 }
  0x3b   : > { %p6735_p7 = pnand %p6734_p6, %p6728_p2 }
  0x3d   : > { %6738 = shalt.err (!%p6735_p7)
}
  0x3e   : > { %s8476_s12 = smov 512   ;;  %s8477_s24 = smov 32  }
  0x3f   : > { %6510 = dma.hbm_to_vmem [thread:$0]  (!%p7077_p9), %s7075_s28, 65536, %s7081_s25, %s7083_s29, %s8476_s12, %s8476_s12, %s8477_s24  }
  0x40   : > { %s8487_s27 = sand.u32 1, %s6913_s15   ;;  %s6923_s13 = smov [#allocation5]  }
  0x41   : > { %s6167_s21 = sshll.u32 %s8487_s27, 7  ;;  %s287_s1 = sshll.u32 %s6923_s13, 4  ;;  %s288_s1 = int_to_ptr.vmem [resolvable:$true] %s287_s1 }
  0x42   : > { %s357_s11 = scalar_lea.vmem [#allocation13], %s6167_s21  ;;  %s6750_s6 = scalar_lea.vmem %s288_s1, 128 }
  0x43   : > { %s7115_s20 = sshll.u32 %s357_s11, 4  ;;  %p6751_p1 = scmp.ne.s32.totalorder %s288_s1, %s6750_s6  ;;  %s366_s20 = int_to_ptr.vmem [resolvable:$true] %s7115_s20 }
  0x44   : > { %p8488_p5 = pneg %p7034_p8  ;;  %p6758_p3 = scmp.lt.s32.totalorder %s288_s1, %s288_s1 }
  0x45   : > { %p6759_p4 = scmp.lt.s32.totalorder %s6750_s6, %s6750_s6 }
  0x46   : > { %p6753_p6 = pnand %p6751_p1, %p8488_p5 }
  0x47   : > { %p6760_p12 = por %p6759_p4, %p6758_p3 }
  0x48   : > { %p6754_p11 = pneg %p6753_p6 }
  0x4a   : > { %p6761_p13 = pnand %p6760_p12, %p6754_p11 }
  0x4c   : > { %6764 = shalt.err (!%p6761_p13)
}
  0x4d   : > { %6500 = dma.hbm_to_vmem [thread:$0]  (!%p7034_p8), %s8460_s0, 128, %s288_s1, [#allocation6]  }
  0x4e   : > { %s6924_s27 = smov [#allocation10]   ;;  %s6338_s13 = sshll.u32 %s6917_s16, 11 }
  0x4f   : > { %s311_s21 = sshll.u32 %s6924_s27, 4  ;;  %p8489_p2 = pmov %p8488_p5  ;;  %s312_s21 = int_to_ptr.vmem [resolvable:$true] %s311_s21 }
  0x50   : > { %s6776_s11 = scalar_lea.vmem %s312_s21, 3840  ;;  %p6784_p5 = scmp.lt.s32.totalorder %s312_s21, %s312_s21 }
  0x51   : > { %p6777_p10 = scmp.ne.s32.totalorder %s312_s21, %s6776_s11  ;;  %p6785_p6 = scmp.lt.s32.totalorder %s6776_s11, %s6776_s11 }
  0x53   : > { %p6779_p7 = pnand %p6777_p10, %p8489_p2  ;;  %p6786_p11 = por %p6785_p6, %p6784_p5 }
  0x55   : > { %p6780_p1 = pneg %p6779_p7 }
  0x57   : > { %p6787_p3 = pnand %p6786_p11, %p6780_p1 }
  0x59   : > { %6790 = shalt.err (!%p6787_p3)
}
  0x5a   : > { %s6925_s6 = smov 256   ;;  %s6926_s1 = smov 16  }
  0x5b   : > { %6506 = dma.hbm_to_vmem [thread:$0]  (!%p7034_p8), %s8463_s3, 3840, %s312_s21, [#allocation9], %s6925_s6, %s6925_s6, %s6926_s1  }
  0x5c   : > { %s7137_s12 = scalar_lea.hbm %s8467_s7, %s6338_s13  ;;  %s6796_s28 = scalar_lea.hbm %s8467_s7, 4096 }
  0x5d   : > { %s6791_s11 = scalar_lea.hbm %s7137_s12, 2048  ;;  %p6797_p8 = scmp.lt.s32.totalorder %s7137_s12, %s8467_s7 }
  0x5e   : > { %p6792_p4 = scmp.ne.s32.totalorder %s7137_s12, %s6791_s11  ;;  %p6798_p10 = scmp.lt.s32.totalorder %s6796_s28, %s6791_s11 }
  0x60   : > { %p6794_p12 = pnand %p6792_p4, %p6713_p0  ;;  %p6799_p2 = por %p6798_p10, %p6797_p8 }
  0x62   : > { %p6795_p13 = pneg %p6794_p12 }
  0x64   : > { %p6800_p7 = pnand %p6799_p2, %p6795_p13 }
  0x66   : > { %6803 = shalt.err (!%p6800_p7)
}
  0x67   : > { %s6804_s13 = scalar_lea.vmem %s366_s20, 2048  ;;  %s6927_s1 = smov [#allocation13]  }
  0x68   : > { %p6805_p1 = scmp.ne.s32.totalorder %s366_s20, %s6804_s13  ;;  %s6809_s25 = sshll.u32 %s6927_s1, 4  ;;  %s6810_s25 = int_to_ptr.vmem [resolvable:$false] %s6809_s25 }
  0x69   : > { %s6811_s24 = scalar_lea.vmem %s6810_s25, 4096  ;;  %p6812_p11 = scmp.lt.s32.totalorder %s366_s20, %s6810_s25 }
  0x6a   : > { %p6807_p5 = pnand %p6805_p1, %p6713_p0  ;;  %p6813_p3 = scmp.lt.s32.totalorder %s6811_s24, %s6804_s13 }
  0x6c   : > { %p6808_p6 = pneg %p6807_p5  ;;  %p6814_p4 = por %p6813_p3, %p6812_p11 }
  0x6e   : > { %p6815_p12 = pnand %p6814_p4, %p6808_p6 }
  0x70   : > { %6818 = shalt.err (!%p6815_p12)
}
  0x71   : > { %s8490_s16 = smov 32   ;;  %s8491_s27 = smov 512  }
  0x72   : > { %6513 = dma.hbm_to_vmem [thread:$0]  (!%p7077_p9), %s7137_s12, 2048, %s366_s20, %s7083_s29, %s8491_s27, %s8491_s27, %s8490_s16  }
  0x73   : > { %p8492_p0 = scmp.ne.s32.totalorder %s8481_s19, 0 }
  0x74   : > { %p8493_p13 = scmp.eq.s32.totalorder (!%p8492_p0), %s7010_s17, 0 }
  0x75   : > { %377 = sbr.rel (%p8492_p0) target bundleno = 3481 (0xd99), region = 52 }
  0x7a   : > { %6884 = dma.done.wait (%p8493_p13), [#allocation6], 128   ;;  %p8494_p8 = pmov %p8493_p13 }
  0x7c   : > { %6886 = vsyncadd (%p8494_p8), [#allocation6], 4294967168  ;;  %p8495_p10 = pmov %p8494_p8 }
  0x7d   : > { %p8496_p2 = pmov %p8494_p8 }
  0x7e   : > { %6888 = dma.done.wait (%p8495_p10), [#allocation9], 3968  }
  0x7f   : > { %6890 = vsyncadd (%p8496_p2), [#allocation9], 4294963328  ;;  %s391_s26 = sand.u32 1, %s7010_s17   ;;  %s393_s29 = sand.u32 1, %s6909_s14  }
  0x80   : > { %s6175_s12 = sshll.u32 %s393_s29, 12  ;;  %s392_s19 = scalar_lea.sflag [#allocation12], %s391_s26 }
  0x81   : > { %s7174_s20 = scalar_lea.vmem [#allocation11], %s6175_s12  ;;  %p8497_p9 = scmp.ne.s32.totalorder %s8480_s18, 0 }
  0x83   : > { %6892 = dma.done.wait (%p8497_p9), %s392_s19, 67584  }
  0x84   : > { %6894 = vsyncadd (%p8497_p9), %s392_s19, 4294899712  ;;  %s6176_s11 = sshll.u32 %s393_s29, 7  ;;  %v7183_v0 = vld [vmem:[%s8462_s2] sm:$0xf]  ;;  %p8498_p7 = scmp.ne.s32.totalorder %s7010_s17, 0 }
  0x85   : > { %v7186_v1 = vunpack.c.l.bf16 %v7183_v0  ;;  %s7188_s21 = scalar_lea.vmem [#allocation13], %s6176_s11 }
  0x86   : > { %449 = sbr.rel (%p8498_p7) target bundleno = 983 (0x3d7), region = 76 }
  0x8b   : > { %v6572_v2 = vld [vmem:[%s8464_s4] sm:$0xff]   ;;  %v6928_v3 = vmov 0.0   ;;  %v450_v4 = vld [vmem:[#allocation5] sm:$0xff]  ;;  %vm6929_vm0 = vmmov 0   ;;  %vm474_vm1 = vcmask 130048   ;;  %v452_v6 = vld [vmem:[#allocation8] sm:$0xff]  ;;  %v464_v10 = vlaneseq }
  0x8c   : > { %6439 = vmatprep.subr.bf16.mxu0 %v6928_v3  ;;  %6445 = vmatprep.subr.bf16.mxu1 %v6928_v3  ;;  %v451_v5 = vpack.c.bf16 %v450_v4, %v450_v4  ;;  %v453_v7 = vpack.c.bf16 %v452_v6, %v452_v6  ;;  %v6573_v8 = vld [vmem:[%s8464_s4 + $0x14] sm:$0xff]   ;;  %v6574_v9 = vld [vmem:[%s8464_s4 + $0xc] sm:$0xff]   ;;  %v456_v12 = vld [vmem:[%s8464_s4 + $0x8] sm:$0x1]  ;;  %vm536_vm2 = vcmask 261120   ;;  %v6930_v40 = vmov 0  }
  0x8d   : > { %6440 = vmatpush3.bf16.msra.mxu0 %v6572_v2  ;;  %6441 = vmatprep.mubr.msk.bf16.mxu0 %vm6929_vm0, %v6928_v3  ;;  %v465_v11 = vshrl.u32 %v464_v10, 7  ;;  %v457_v13 = vunpack.c.l.bf16 %v456_v12  ;;  %v6577_v30 = vld [vmem:[#allocation10 + $0x64] ss:$16 sps:$4 sm:$0xff]   ;;  %v6580_v31 = vld [vmem:[#allocation10 + $0x6c] ss:$16 sps:$4 sm:$0xff]   ;;  %vm1346_vm3 = vcmask 1041408  }
  0x8e   : > { %6453 = vmatprep.subr.bf16.mxu0 %v6928_v3  ;;  %6449 = vmatprep.mubr.msk.bf16.mxu1 %vm6929_vm0, %v6928_v3  ;;  %v6575_v32 = vld [vmem:[#allocation10 + $0x60] ss:$16 sps:$4 sm:$0xff]   ;;  %v6578_v33 = vld [vmem:[#allocation10 + $0x68] ss:$16 sps:$4 sm:$0xff]   ;;  %v6583_v34 = vld [vmem:[#allocation10 + $0x44] ss:$16 sps:$4 sm:$0xff]  }
  0x8f   : > { %6446 = vmatpush3.bf16.msra.mxu1 %v6573_v8  ;;  %v7207_v14 = vsub.s32 0, %v465_v11  ;;  %v6586_v35 = vld [vmem:[#allocation10 + $0x4c] ss:$16 sps:$4 sm:$0xff]   ;;  %v6581_v36 = vld [vmem:[#allocation10 + $0x40] ss:$16 sps:$4 sm:$0xff]   ;;  %vm1315_vm4 = vcmask 31744  }
  0x90   : > { %6442 = vmatmul.mubr.msk.bf16.vlgmr.msra.gmra.mxu0 %vm474_vm1, %v451_v5  ;;  %6447 = vmatprep.subr.bf16.mxu1 %v6928_v3  ;;  %v6584_v37 = vld [vmem:[#allocation10 + $0x48] ss:$16 sps:$4 sm:$0xff]   ;;  %v6589_v38 = vld [vmem:[#allocation10 + $0x24] ss:$16 sps:$4 sm:$0xff]   ;;  %v6592_v39 = vld [vmem:[#allocation10 + $0x2c] ss:$16 sps:$4 sm:$0xff]  }
  0x91   : > { %6454 = vmatpush3.bf16.msra.mxu0 %v6572_v2  ;;  %6455 = vmatprep.mubr.msk.bf16.mxu0 %vm6929_vm0, %v6928_v3  ;;  %v467_v15 = vrot.slane %v457_v13, %v7207_v14  ;;  %v462_v41 = vld [vmem:[%s8464_s4 + $0x1c] sm:$0x1]  ;;  %v6587_v53 = vld [vmem:[#allocation10 + $0x20] ss:$16 sps:$4 sm:$0xff]   ;;  %v6590_v54 = vld [vmem:[#allocation10 + $0x28] ss:$16 sps:$4 sm:$0xff]  }
  0x92   : > { %750 = vmatprep.subr.bf16.mxu0 %v6577_v30  ;;  %v463_v44 = vunpack.c.l.bf16 %v462_v41  ;;  %v6595_v57 = vld [vmem:[#allocation10 + $0x4] ss:$16 sps:$4 sm:$0xff]   ;;  %v6598_v58 = vld [vmem:[#allocation10 + $0xc] ss:$16 sps:$4 sm:$0xff]   ;;  %v6593_v60 = vld [vmem:[#allocation10] ss:$16 sps:$4 sm:$0xff]  }
  0x93   : > { %6448 = vmatpush3.bf16.msra.mxu1 %v6574_v9  ;;  %v6596_v61 = vld [vmem:[#allocation10 + $0x8] ss:$16 sps:$4 sm:$0xff]   ;;  %v6603_v6 = vld [vmem:[%s8465_s5 + $0x70] sm:$0xff]  }
  0x94   : > { %6459 = vmatprep.subr.bf16.mxu1 %v6928_v3  ;;  %v523_v47 = vrot.slane %v463_v44, %v7207_v14  ;;  %v6599_v63 = vld [vmem:[%s8465_s5 + $0x78] sm:$0xff]   ;;  %v6607_v10 = vld [vmem:[%s8465_s5 + $0x68] sm:$0xff]  }
  0x95   : > { %v6600_v2 = vld [vmem:[%s8465_s5 + $0xf8] sm:$0xff]   ;;  %v6608_v11 = vld [vmem:[%s8465_s5 + $0xe8] sm:$0xff]  }
  0x96   : > { %v6602_v4 = vld [vmem:[%s8465_s5 + $0xb8] sm:$0xff]   ;;  %v6609_v12 = vld [vmem:[%s8465_s5 + $0x28] sm:$0xff]  }
  0x97   : > { %v6610_v13 = vld [vmem:[%s8465_s5 + $0xa8] sm:$0xff]  }
  0x98   : > { %6456 = vmatmul.mubr.msk.bf16.vlgmr.msra.gmra.mxu0 %vm474_vm1, %v453_v7  ;;  %v6604_v7 = vld [vmem:[%s8465_s5 + $0xf0] sm:$0xff]   ;;  %v6626_v30 = vld [vmem:[%s8465_s5 + $0x88] sm:$0xff]  }
  0x99   : > { %751 = vmatpush1.bf16.msra.mxu0 %v6575_v32  ;;  %770 = vmatprep.mubr.bf16.mxu0 %v6930_v40  ;;  %v6628_v32 = vld [vmem:[%s8465_s5 + $0xc0] sm:$0xff]  }
  0x9a   : > { %752 = vmatprep.subr.bf16.mxu0 %v6583_v34  ;;  %v6630_v34 = vld [vmem:[%s8465_s5 + $0x80] sm:$0xff]  }
  0x9d   : > { %753 = vmatpush1.bf16.msra.mxu0 %v6581_v36  ;;  %v1326_v36 = vld [vmem:[#allocation10 + $0xd8] sm:$0x33] }
  0x9e   : > { %875 = vmatprep.subr.bf16.mxu0 %v6589_v38  ;;  %v6240_v38 = vcombine.high %v1326_v36, %v1326_v36  ;;  %v6239_v41 = vcombine.low %v1326_v36, %v1326_v36 }
 0x150   : > { %v512_v16 = vpop.f32.mrf.mxu0 }
 0x151   : > { %v513_v17 = vadd.f32 %v512_v16, %v467_v15  ;;  %v6612_v16 = vld [vmem:[%s8465_s5 + $0xe0] sm:$0xff]  }
 0x152   : > { %v6443_v18 = vpop.f32.mrf.mxu0 }
 0x153   : > { %v518_v19 = vmax.f32 %v513_v17, 0.0  ;;  %v6613_v17 = vld [vmem:[%s8465_s5 + $0x20] sm:$0xff]  }
 0x154   : > { %v515_v20 = vpop.f32.mrf.mxu0  ;;  %v6614_v18 = vld [vmem:[%s8465_s5 + $0xa0] sm:$0xff]  }
 0x155   : > { %v519_v21 = vpack.c.bf16 %v518_v19, %v518_v19  ;;  %v6615_v19 = vld [vmem:[%s8465_s5 + $0x58] sm:$0xff]  }
 0x156   : > { %v6444_v22 = vpop.f32.mrf.mxu0  ;;  %v6616_v20 = vld [vmem:[%s8465_s5 + $0xd8] sm:$0xff]  }
 0x157   : > { %6450 = vmatmul.mubr.msk.bf16.vlgmr.msra.gmra.mxu1 %vm536_vm2, %v519_v21  ;;  %v6617_v21 = vld [vmem:[%s8465_s5 + $0x18] sm:$0xff]  }
 0x158   : > { %v618_v23 = vpop.f32.mrf.mxu0  ;;  %6460 = vmatpush3.bf16.msra.mxu1 %v6573_v8  ;;  %6463 = vmatprep.mubr.msk.bf16.mxu1 %vm6929_vm0, %v6928_v3  ;;  %v6605_v8 = vld [vmem:[%s8465_s5 + $0x30] sm:$0xff]   ;;  %v6618_v22 = vld [vmem:[%s8465_s5 + $0x98] sm:$0xff]  }
 0x159   : > { %v619_v24 = vadd.f32 %v618_v23, %v467_v15  ;;  %6461 = vmatprep.subr.bf16.mxu1 %v6928_v3  ;;  %v6601_v3 = vld [vmem:[%s8465_s5 + $0x38] sm:$0xff]   ;;  %v6611_v15 = vld [vmem:[%s8465_s5 + $0x60] sm:$0xff]   ;;  %v6619_v23 = vld [vmem:[%s8465_s5 + $0x50] sm:$0xff]  }
 0x15a   : > { %v6457_v25 = vpop.f32.mrf.mxu0 }
 0x15b   : > { %v624_v26 = vmax.f32 %v619_v24, 0.0  ;;  %v6620_v24 = vld [vmem:[%s8465_s5 + $0xd0] sm:$0xff]  }
 0x15c   : > { %v621_v27 = vpop.f32.mrf.mxu0  ;;  %6462 = vmatpush3.bf16.msra.mxu1 %v6574_v9  ;;  %v6606_v9 = vld [vmem:[%s8465_s5 + $0xb0] sm:$0xff]  }
 0x15d   : > { %v625_v28 = vpack.c.bf16 %v624_v26, %v624_v26  ;;  %791 = vmatprep.subr.bf16.mxu1 %v6580_v31  ;;  %v6621_v25 = vld [vmem:[%s8465_s5 + $0x10] sm:$0xff]   ;;  %v6623_v27 = vld [vmem:[%s8465_s5 + $0x48] sm:$0xff]   ;;  %v6627_v31 = vld [vmem:[%s8465_s5 + $0x40] sm:$0xff]  }
 0x15e   : > { %v6458_v29 = vpop.f32.mrf.mxu0  ;;  %v6622_v26 = vld [vmem:[%s8465_s5 + $0x90] sm:$0xff]  }
 0x15f   : > { %6464 = vmatmul.mubr.msk.bf16.vlgmr.msra.gmra.mxu1 %vm536_vm2, %v625_v28  ;;  %v6624_v28 = vld [vmem:[%s8465_s5 + $0xc8] sm:$0xff]  }
 0x160   : > { %792 = vmatpush1.bf16.msra.mxu1 %v6578_v33  ;;  %811 = vmatprep.mubr.bf16.mxu1 %v6930_v40  ;;  %v6625_v29 = vld [vmem:[%s8465_s5 + $0x8] sm:$0xff]   ;;  %v6629_v33 = vld [vmem:[%s8465_s5] sm:$0xff]  }
 0x161   : > { %793 = vmatprep.subr.bf16.mxu1 %v6586_v35  ;;  %v1325_v35 = vld [vmem:[#allocation10 + $0xd0] sm:$0x33] }
 0x164   : > { %794 = vmatpush1.bf16.msra.mxu1 %v6584_v37  ;;  %v6238_v37 = vcombine.high %v1325_v35, %v1325_v35 }
 0x165   : > { %916 = vmatprep.subr.bf16.mxu1 %v6592_v39  ;;  %v6237_v39 = vcombine.low %v1325_v35, %v1325_v35 }
 0x217   : > { %v574_v42 = vpop.f32.mrf.mxu1 }
 0x218   : > { %v575_v55 = vadd.f32 %v574_v42, %v523_v47  ;;  %v1348_v42 = vsel %vm1346_vm3, %v6237_v39, 0 }
 0x219   : > { %v6451_v43 = vpop.f32.mrf.mxu1 }
 0x21a   : > { %v580_v62 = vmax.f32 %v575_v55, 0.0  ;;  %v1354_v43 = vsel %vm1346_vm3, %v6239_v41, 0 }
 0x21b   : > { %v577_v45 = vpop.f32.mrf.mxu1 }
 0x21c   : > { %v7236_v5 = vpack.c.bf16 %v580_v62, %v580_v62 }
 0x21d   : > { %v6452_v46 = vpop.f32.mrf.mxu1 }
 0x21e   : > { %v689_v46 = vld [vmem:[#allocation10 + $0x80] sm:$0x11] }
 0x21f   : > { %v663_v48 = vpop.f32.mrf.mxu1 }
 0x220   : > { %v664_v49 = vadd.f32 %v663_v48, %v523_v47  ;;  %v690_v47 = vld [vmem:[#allocation10 + $0x88] sm:$0x11] }
 0x221   : > { %v6465_v50 = vpop.f32.mrf.mxu1  ;;  %v694_v55 = vunpack.c.h.bf16 %v690_v47 }
 0x222   : > { %v669_v51 = vmax.f32 %v664_v49, 0.0  ;;  %v691_v50 = vunpack.c.l.bf16 %v689_v46 }
 0x223   : > { %v666_v52 = vpop.f32.mrf.mxu1 }
 0x224   : > { %670 = vst.msk [vmem:[#allocation2] sm:$0xff] %vm536_vm2, %v669_v51  ;;  %v672_v56 = vpack.c.bf16 %v669_v51, %v669_v51  ;;  %v693_v51 = vunpack.c.l.bf16 %v690_v47 }
 0x225   : > { %v6466_v59 = vpop.f32.mrf.mxu1 }
 0x226   : > { %6193 = vmatmul.mubr.msk.bf16.vlgmr.msra.gmra.mxu0 %vm536_vm2, %v672_v56  ;;  %6194 = vmatmul.mubr.msk.bf16.vlgmr.msra.gmra.mxu1 %vm536_vm2, %v672_v56  ;;  %v956_v59 = vrot.slane %v693_v51, %v7207_v14  ;;  %v1328_v51 = vld [vmem:[#allocation10 + $0xe8] sm:$0x11] }
 0x227   : > { %876 = vmatpush1.bf16.msra.mxu0 %v6587_v53  ;;  %917 = vmatpush1.bf16.msra.mxu1 %v6590_v54  ;;  %v692_v54 = vunpack.c.h.bf16 %v689_v46 }
 0x228   : > { %877 = vmatprep.subr.bf16.mxu0 %v6595_v57  ;;  %918 = vmatprep.subr.bf16.mxu1 %v6598_v58  ;;  %v948_v58 = vrot.slane %v691_v50, %v7207_v14  ;;  %v1327_v50 = vld [vmem:[#allocation10 + $0xe0] sm:$0x11] }
 0x229   : > { %895 = vmatprep.mubr.bf16.mxu0 %v6930_v40  ;;  %936 = vmatprep.mubr.bf16.mxu1 %v6930_v40 }
 0x22b   : > { %878 = vmatpush1.bf16.msra.mxu0 %v6593_v60  ;;  %919 = vmatpush1.bf16.msra.mxu1 %v6596_v61 }
 0x22c   : > { %6349 = vmatprep.subr.bf16.mxu0 %v6599_v63  ;;  %6371 = vmatprep.subr.bf16.mxu1 %v6600_v2  ;;  %v952_v2 = vrot.slane %v692_v54, %v7207_v14  ;;  %v1329_v54 = vunpack.c.l.bf16 %v1327_v50 }
 0x22e   : > { %6203 = vmatmul.mubr.msk.bf16.vlgmr.msra.gmra.mxu0 %vm536_vm2, %v7236_v5  ;;  %6204 = vmatmul.mubr.msk.bf16.vlgmr.msra.gmra.mxu1 %vm536_vm2, %v7236_v5 }
 0x22f   : > { %6350 = vmatpush3.bf16.msra.mxu0 %v6601_v3  ;;  %6372 = vmatpush3.bf16.msra.mxu1 %v6602_v4  ;;  %v960_v3 = vrot.slane %v694_v55, %v7207_v14  ;;  %v1331_v55 = vunpack.c.l.bf16 %v1328_v51 }
 0x230   : > { %6351 = vmatprep.subr.bf16.mxu0 %v6603_v6  ;;  %6373 = vmatprep.subr.bf16.mxu1 %v6604_v7 }
 0x233   : > { %6352 = vmatpush3.bf16.msra.mxu0 %v6605_v8  ;;  %6374 = vmatpush3.bf16.msra.mxu1 %v6606_v9 }
 0x234   : > { %6353 = vmatprep.subr.bf16.mxu0 %v6607_v10  ;;  %6375 = vmatprep.subr.bf16.mxu1 %v6608_v11 }
 0x237   : > { %6354 = vmatpush3.bf16.msra.mxu0 %v6609_v12  ;;  %6376 = vmatpush3.bf16.msra.mxu1 %v6610_v13 }
 0x238   : > { %6355 = vmatprep.subr.bf16.mxu0 %v6611_v15  ;;  %6377 = vmatprep.subr.bf16.mxu1 %v6612_v16 }
 0x23b   : > { %6356 = vmatpush3.bf16.msra.mxu0 %v6613_v17  ;;  %6378 = vmatpush3.bf16.msra.mxu1 %v6614_v18 }
 0x23c   : > { %6357 = vmatprep.subr.bf16.mxu0 %v6615_v19  ;;  %6379 = vmatprep.subr.bf16.mxu1 %v6616_v20 }
 0x23f   : > { %6358 = vmatpush3.bf16.msra.mxu0 %v6617_v21  ;;  %6380 = vmatpush3.bf16.msra.mxu1 %v6618_v22 }
 0x240   : > { %6359 = vmatprep.subr.bf16.mxu0 %v6619_v23  ;;  %6381 = vmatprep.subr.bf16.mxu1 %v6620_v24 }
 0x243   : > { %6360 = vmatpush3.bf16.msra.mxu0 %v6621_v25  ;;  %6382 = vmatpush3.bf16.msra.mxu1 %v6622_v26  ;;  %v6637_v26 = vld [vmem:[#allocation10 + $0xb4] ss:$16 sps:$4 sm:$0xff]  }
 0x244   : > { %6361 = vmatprep.subr.bf16.mxu0 %v6623_v27  ;;  %6383 = vmatprep.subr.bf16.mxu1 %v6624_v28  ;;  %v6640_v27 = vld [vmem:[#allocation10 + $0xbc] ss:$16 sps:$4 sm:$0xff]   ;;  %v6635_v28 = vld [vmem:[#allocation10 + $0xb0] ss:$16 sps:$4 sm:$0xff]  }
 0x247   : > { %6362 = vmatpush3.bf16.msra.mxu0 %v6625_v29  ;;  %6384 = vmatpush3.bf16.msra.mxu1 %v6626_v30  ;;  %v6638_v29 = vld [vmem:[#allocation10 + $0xb8] ss:$16 sps:$4 sm:$0xff]   ;;  %v6643_v30 = vld [vmem:[#allocation10 + $0x94] ss:$16 sps:$4 sm:$0xff]  }
 0x248   : > { %6363 = vmatprep.subr.bf16.mxu0 %v6627_v31  ;;  %6385 = vmatprep.subr.bf16.mxu1 %v6628_v32  ;;  %v6646_v31 = vld [vmem:[#allocation10 + $0x9c] ss:$16 sps:$4 sm:$0xff]   ;;  %v6641_v32 = vld [vmem:[#allocation10 + $0x90] ss:$16 sps:$4 sm:$0xff]  }
 0x24b   : > { %6364 = vmatpush3.bf16.msra.mxu0 %v6629_v33  ;;  %6386 = vmatpush3.bf16.msra.mxu1 %v6630_v34  ;;  %v6644_v33 = vld [vmem:[#allocation10 + $0x98] ss:$16 sps:$4 sm:$0xff]   ;;  %v1033_v34 = vld [vmem:[%s8465_s5 + $0x100] sm:$0x1] }
 0x24c   : > { %6241 = vmatprep.subr.msk.bf16.mxu0 %vm1346_vm3, %v6238_v37  ;;  %6243 = vmatprep.subr.msk.bf16.mxu1 %vm1346_vm3, %v6240_v38  ;;  %v1034_v35 = vunpack.c.l.bf16 %v1033_v34 }
 0x24e   : > { %v1042_v38 = vrot.slane %v1034_v35, %v7207_v14 }
 0x2e6   : > { %v772_v44 = vpop.f32.mrf.mxu0  ;;  %v813_v45 = vpop.f32.mrf.mxu1 }
 0x2e8   : > { %v774_v48 = vpop.f32.mrf.mxu0  ;;  %v815_v49 = vpop.f32.mrf.mxu1 }
 0x2ea   : > { %v776_v52 = vpop.f32.mrf.mxu0  ;;  %v817_v53 = vpop.f32.mrf.mxu1 }
 0x2ec   : > { %v777_v56 = vpop.f32.mrf.mxu0  ;;  %v818_v57 = vpop.f32.mrf.mxu1 }
 0x2ee   : > { %v897_v60 = vpop.f32.mrf.mxu0  ;;  %v938_v61 = vpop.f32.mrf.mxu1 }
 0x2ef   : > { %v898_v62 = vadd.f32 %v897_v60, %v772_v44  ;;  %v939_v63 = vadd.f32 %v938_v61, %v813_v45  ;;  %v1330_v60 = vunpack.c.h.bf16 %v1327_v50  ;;  %v1332_v61 = vunpack.c.h.bf16 %v1328_v51 }
 0x2f0   : > { %v899_v4 = vpop.f32.mrf.mxu0  ;;  %v940_v6 = vpop.f32.mrf.mxu1 }
 0x2f1   : > { %v961_v7 = vadd.f32 %v948_v58, %v898_v62  ;;  %v963_v8 = vadd.f32 %v956_v59, %v939_v63  ;;  %v900_v9 = vadd.f32 %v899_v4, %v774_v48  ;;  %v941_v10 = vadd.f32 %v940_v6, %v815_v49 }
 0x2f2   : > { %v901_v11 = vpop.f32.mrf.mxu0  ;;  %v942_v12 = vpop.f32.mrf.mxu1  ;;  %v1566_v62 = vrot.slane %v1329_v54, %v7207_v14  ;;  %v1574_v63 = vrot.slane %v1331_v55, %v7207_v14 }
 0x2f3   : > { %v962_v13 = vadd.f32 %v952_v2, %v900_v9  ;;  %v964_v15 = vadd.f32 %v960_v3, %v941_v10  ;;  %v965_v16 = vmax.f32 %v961_v7, 0.0  ;;  %v967_v17 = vmax.f32 %v963_v8, 0.0 }
 0x2f4   : > { %v902_v18 = vpop.f32.mrf.mxu0  ;;  %v943_v19 = vpop.f32.mrf.mxu1  ;;  %v1570_v8 = vrot.slane %v1330_v60, %v7207_v14  ;;  %v1578_v10 = vrot.slane %v1332_v61, %v7207_v14 }
 0x2f5   : > { %v966_v20 = vmax.f32 %v962_v13, 0.0  ;;  %v968_v21 = vmax.f32 %v964_v15, 0.0  ;;  %v1035_v24 = vpack.c.bf16 %v965_v16, %v965_v16  ;;  %v1037_v25 = vpack.c.bf16 %v967_v17, %v967_v17 }
 0x2f7   : > { %v1036_v22 = vpack.c.bf16 %v966_v20, %v966_v20  ;;  %v1038_v23 = vpack.c.bf16 %v968_v21, %v968_v21 }
 0x2f9   : > { %1267 = vmatprep.mubr.bf16.mxu0 %v1036_v22  ;;  %1307 = vmatprep.mubr.bf16.mxu1 %v1038_v23 }
 0x2fa   : > { %1268 = vmatmul.mubr.bf16.vlgmr.msra.gmra.mxu0 %v1035_v24  ;;  %1308 = vmatmul.mubr.bf16.vlgmr.msra.gmra.mxu1 %v1037_v25 }
 0x2fb   : > { %1374 = vmatpush1.bf16.msra.mxu0 %v1348_v42  ;;  %1415 = vmatpush1.bf16.msra.mxu1 %v1354_v43 }
 0x2fc   : > { %1391 = vmatprep.mubr.bf16.mxu0 %v6930_v40  ;;  %1432 = vmatprep.mubr.bf16.mxu1 %v6930_v40 }
 0x2fd   : > { %1493 = vmatprep.subr.bf16.mxu0 %v6637_v26  ;;  %1534 = vmatprep.subr.bf16.mxu1 %v6640_v27 }
 0x302   : > { %6242 = vmatmul.mubr.msk.bf16.vlgmr.msra.gmra.mxu0 %vm1315_vm4, %v7183_v0  ;;  %6244 = vmatmul.mubr.msk.bf16.vlgmr.msra.gmra.mxu1 %vm1315_vm4, %v7183_v0 }
 0x303   : > { %1494 = vmatpush1.bf16.msra.mxu0 %v6635_v28  ;;  %1535 = vmatpush1.bf16.msra.mxu1 %v6638_v29 }
 0x304   : > { %1495 = vmatprep.subr.bf16.mxu0 %v6643_v30  ;;  %1536 = vmatprep.subr.bf16.mxu1 %v6646_v31 }
 0x305   : > { %1513 = vmatprep.mubr.bf16.mxu0 %v6930_v40  ;;  %1554 = vmatprep.mubr.bf16.mxu1 %v6930_v40 }
 0x307   : > { %1496 = vmatpush1.bf16.msra.mxu0 %v6641_v32  ;;  %1537 = vmatpush1.bf16.msra.mxu1 %v6644_v33 }
 0x30a   : > { %6253 = vmatmul.mubr.msk.bf16.vlgmr.msra.gmra.mxu0 %vm536_vm2, %v7236_v5  ;;  %6254 = vmatmul.mubr.msk.bf16.vlgmr.msra.gmra.mxu1 %vm536_vm2, %v7236_v5 }
 0x3ba   : > { %v6365_v36 = vpop.f32.mrf.mxu0  ;;  %v6387_v37 = vpop.f32.mrf.mxu1 }
 0x3bc   : > { %v6366_v39 = vpop.f32.mrf.mxu0  ;;  %v6388_v41 = vpop.f32.mrf.mxu1 }
 0x3bd   : > { %v6367_v40 = vadd.f32 %v6366_v39, %v6365_v36  ;;  %v6389_v45 = vadd.f32 %v6388_v41, %v6387_v37 }
 0x3be   : > { %v6368_v42 = vpop.f32.mrf.mxu0  ;;  %v6390_v43 = vpop.f32.mrf.mxu1 }
 0x3bf   : > { %v1270_v44 = vadd.f32 %v6367_v40, %v1042_v38 }
 0x3c0   : > { %v6369_v46 = vpop.f32.mrf.mxu0  ;;  %v6391_v47 = vpop.f32.mrf.mxu1 }
 0x3c1   : > { %v1310_v48 = vadd.f32 %v6389_v45, %v1270_v44 }
 0x3c2   : > { %v1393_v5 = vpop.f32.mrf.mxu0  ;;  %v1434_v49 = vpop.f32.mrf.mxu1 }
 0x3c3   : > { %1316 = vst.msk [vmem:[#allocation3] sm:$0xff] %vm1315_vm4, %v1310_v48 }
 0x3c4   : > { %v1395_v52 = vpop.f32.mrf.mxu0  ;;  %v1436_v53 = vpop.f32.mrf.mxu1 }
 0x3c6   : > { %v1397_v56 = vpop.f32.mrf.mxu0  ;;  %v1438_v57 = vpop.f32.mrf.mxu1 }
 0x3c8   : > { %v1398_v58 = vpop.f32.mrf.mxu0  ;;  %v1439_v59 = vpop.f32.mrf.mxu1 }
 0x3ca   : > { %v1515_v2 = vpop.f32.mrf.mxu0  ;;  %v1556_v3 = vpop.f32.mrf.mxu1 }
 0x3cb   : > { %v1516_v4 = vadd.f32 %v1515_v2, %v1393_v5  ;;  %v1557_v6 = vadd.f32 %v1556_v3, %v1434_v49 }
 0x3cc   : > { %v1517_v7 = vpop.f32.mrf.mxu0  ;;  %v1558_v9 = vpop.f32.mrf.mxu1 }
 0x3cd   : > { %v1579_v11 = vadd.f32 %v1566_v62, %v1516_v4  ;;  %v1581_v12 = vadd.f32 %v1574_v63, %v1557_v6  ;;  %v1518_v13 = vadd.f32 %v1517_v7, %v1395_v52  ;;  %v1559_v15 = vadd.f32 %v1558_v9, %v1436_v53 }
 0x3ce   : > { %v1519_v16 = vpop.f32.mrf.mxu0  ;;  %v1560_v17 = vpop.f32.mrf.mxu1 }
 0x3cf   : > { %vm1583_vm5 = vcmp.gt.f32.partialorder %v1579_v11, 0.0  ;;  %v1587_v18 = vmul.f32 0.01, %v1579_v11  ;;  %vm1585_vm6 = vcmp.gt.f32.partialorder %v1581_v12, 0.0  ;;  %v1589_v19 = vmul.f32 0.01, %v1581_v12 }
 0x3d0   : > { %v1580_v20 = vadd.f32 %v1570_v8, %v1518_v13  ;;  %v1582_v21 = vadd.f32 %v1578_v10, %v1559_v15  ;;  %v1520_v22 = vpop.f32.mrf.mxu0  ;;  %v1561_v23 = vpop.f32.mrf.mxu1 }
 0x3d1   : > { %v1591_v24 = vsel %vm1583_vm5, %v1579_v11, %v1587_v18  ;;  %v1593_v25 = vsel %vm1585_vm6, %v1581_v12, %v1589_v19 }
 0x3d2   : > { %1595 = vst [vmem:[#allocation4 + $0x10] sm:$0xff] %v1591_v24  ;;  %1597 = vst [vmem:[#allocation4 + $0x18] sm:$0xff] %v1593_v25  ;;  %vm1584_vm7 = vcmp.gt.f32.partialorder %v1580_v20, 0.0  ;;  %v1588_v14 = vmul.f32 0.01, %v1580_v20  ;;  %vm1586_vm8 = vcmp.gt.f32.partialorder %v1582_v21, 0.0 }
 0x3d3   : > { %v1590_v26 = vmul.f32 0.01, %v1582_v21 }
 0x3d4   : > { %v1592_v27 = vsel %vm1584_vm7, %v1580_v20, %v1588_v14 }
 0x3d5   : > { %v1594_v28 = vsel %vm1586_vm8, %v1582_v21, %v1590_v26  ;;  %1596 = vst [vmem:[#allocation4] sm:$0xff] %v1592_v27 }
 0x3d6   : > { %1598 = vst [vmem:[#allocation4 + $0x8] sm:$0xff] %v1594_v28 }
 0x3d7 PF: > { %v1604_v29 = vld [vmem:[%s7188_s21 + $0x8] sm:$0xf]  ;;  %vm1634_vm9 = vcmask 1043456   ;;  %v1606_v30 = vld [vmem:[%s7188_s21 + $0x18] sm:$0xf]  ;;  %vm1630_vm10 = vcmask 31744  }
 0x3d8   : > { %6256 = vmatprep.subr.msk.mxu0 %vm1634_vm9, %v1604_v29  ;;  %6259 = vmatprep.subr.msk.mxu1 %vm1634_vm9, %v1606_v30  ;;  %v1603_v31 = vld [vmem:[%s7188_s21] sm:$0xf]  ;;  %v1605_v32 = vld [vmem:[%s7188_s21 + $0x10] sm:$0xf]  ;;  %v1999_v33 = vld [vmem:[%s7174_s20 + $0x68] sm:$0xff]  ;;  %v6931_v34 = vmov 0.0  }
 0x3d9   : > { %6257 = vmatpush1.msk.msra.mxu0 %vm1634_vm9, %v1603_v31  ;;  %1711 = vmatprep.mubr.f32.mxu0 %v6931_v34  ;;  %v1790_v35 = vld [vmem:[%s7188_s21 + $0x28] sm:$0xf]  ;;  %v1792_v36 = vld [vmem:[%s7188_s21 + $0x38] sm:$0xf]  ;;  %v1789_v37 = vld [vmem:[%s7188_s21 + $0x20] sm:$0xf]  ;;  %v2079_v40 = vunpack.c.h.s8.bf16 %v1999_v33  ;;  %v2075_v46 = vunpack.c.l.s8.bf16 %v1999_v33 }
 0x3da   : > { %6260 = vmatpush1.msk.msra.mxu1 %vm1634_vm9, %v1605_v32  ;;  %1782 = vmatprep.mubr.f32.mxu1 %v6931_v34  ;;  %v1791_v38 = vld [vmem:[%s7188_s21 + $0x30] sm:$0xf]  ;;  %v2031_v39 = vld [vmem:[%s7174_s20 + $0x168] sm:$0xff]  ;;  %v1998_v41 = vld [vmem:[%s7174_s20 + $0x60] sm:$0xff]  ;;  %p6295_p1 = scmp.ne.s32.totalorder %s7010_s17, 1 }
 0x3db   : > { %6258 = vmatmul.mubr.msk.f32.vlgmr.msra.gmra.mxu0 %vm1630_vm10, %v7186_v1  ;;  %6261 = vmatmul.mubr.msk.f32.vlgmr.msra.gmra.mxu1 %vm1630_vm10, %v7186_v1  ;;  %v2143_v42 = vunpack.c.h.s8.bf16 %v2031_v39  ;;  %v2030_v43 = vld [vmem:[%s7174_s20 + $0x160] sm:$0xff]  ;;  %v2078_v44 = vunpack.c.h.s8.bf16 %v1998_v41  ;;  %v2139_v47 = vunpack.c.l.s8.bf16 %v2031_v39  ;;  %v1995_v48 = vld [vmem:[%s7174_s20 + $0x48] sm:$0xff]  ;;  %v2074_v49 = vunpack.c.l.s8.bf16 %v1998_v41 }
 0x3dc   : > { %6263 = vmatprep.subr.msk.mxu0 %vm1634_vm9, %v1790_v35  ;;  %6266 = vmatprep.subr.msk.mxu1 %vm1634_vm9, %v1792_v36  ;;  %v2142_v45 = vunpack.c.h.s8.bf16 %v2030_v43  ;;  %v2027_v5 = vld [vmem:[%s7174_s20 + $0x148] sm:$0xff]  ;;  %v2138_v50 = vunpack.c.l.s8.bf16 %v2030_v43  ;;  %v2071_v51 = vunpack.c.h.s8.bf16 %v1995_v48  ;;  %v1994_v53 = vld [vmem:[%s7174_s20 + $0x40] sm:$0xff]  ;;  %v2067_v57 = vunpack.c.l.s8.bf16 %v1995_v48 }
 0x3dd   : > { %6264 = vmatpush1.msk.msra.mxu0 %vm1634_vm9, %v1789_v37  ;;  %6267 = vmatpush1.msk.msra.mxu1 %vm1634_vm9, %v1791_v38  ;;  %v2135_v52 = vunpack.c.h.s8.bf16 %v2027_v5  ;;  %v2026_v54 = vld [vmem:[%s7174_s20 + $0x140] sm:$0xff]  ;;  %v2070_v55 = vunpack.c.h.s8.bf16 %v1994_v53  ;;  %v2131_v58 = vunpack.c.l.s8.bf16 %v2027_v5  ;;  %v1991_v59 = vld [vmem:[%s7174_s20 + $0x28] sm:$0xff]  ;;  %v2066_v63 = vunpack.c.l.s8.bf16 %v1994_v53 }
 0x3de   : > { %1892 = vmatprep.mubr.f32.mxu0 %v6931_v34  ;;  %1963 = vmatprep.mubr.f32.mxu1 %v6931_v34  ;;  %v2134_v56 = vunpack.c.h.s8.bf16 %v2026_v54  ;;  %v2023_v60 = vld [vmem:[%s7174_s20 + $0x128] sm:$0xff]  ;;  %v1600_v61 = vld [vmem:[#allocation4] sm:$0xff]  ;;  %v2130_v2 = vunpack.c.l.s8.bf16 %v2026_v54  ;;  %v2063_v3 = vunpack.c.h.s8.bf16 %v1991_v59  ;;  %v2059_v12 = vunpack.c.l.s8.bf16 %v1991_v59 }
 0x3df   : > { %2178 = vmatprep.subr.bf16.mxu0 %v2079_v40  ;;  %2219 = vmatprep.subr.bf16.mxu1 %v2143_v42  ;;  %v1602_v62 = vld [vmem:[#allocation4 + $0x8] sm:$0xff]  ;;  %v2127_v4 = vunpack.c.h.s8.bf16 %v2023_v60  ;;  %v1990_v6 = vld [vmem:[%s7174_s20 + $0x20] sm:$0xff]  ;;  %v7391_v8 = vpack.c.bf16 %v1600_v61, %v1600_v61  ;;  %v2123_v13 = vunpack.c.l.s8.bf16 %v2023_v60 }
 0x3e0   : > { %6265 = vmatmul.mubr.msk.f32.vlgmr.msra.gmra.mxu0 %vm1630_vm10, %v7186_v1  ;;  %6268 = vmatmul.mubr.msk.f32.vlgmr.msra.gmra.mxu1 %vm1630_vm10, %v7186_v1  ;;  %v2022_v7 = vld [vmem:[%s7174_s20 + $0x120] sm:$0xff]  ;;  %v7393_v9 = vpack.c.bf16 %v1602_v62, %v1602_v62  ;;  %v2062_v10 = vunpack.c.h.s8.bf16 %v1990_v6  ;;  %v1987_v15 = vld [vmem:[%s7174_s20 + $0x8] sm:$0xff]  ;;  %v2058_v17 = vunpack.c.l.s8.bf16 %v1990_v6 }
 0x3e1   : > { %2179 = vmatpush1.bf16.msra.mxu0 %v2078_v44  ;;  %2220 = vmatpush1.bf16.msra.mxu1 %v2142_v45  ;;  %v2126_v11 = vunpack.c.h.s8.bf16 %v2022_v7  ;;  %v2019_v16 = vld [vmem:[%s7174_s20 + $0x108] sm:$0xff]  ;;  %v2122_v18 = vunpack.c.l.s8.bf16 %v2022_v7  ;;  %v2055_v19 = vunpack.c.h.s8.bf16 %v1987_v15  ;;  %v1986_v21 = vld [vmem:[%s7174_s20] sm:$0xff]  ;;  %v2051_v25 = vunpack.c.l.s8.bf16 %v1987_v15 }
 0x3e2   : > { %2180 = vmatprep.subr.bf16.mxu0 %v2075_v46  ;;  %2221 = vmatprep.subr.bf16.mxu1 %v2139_v47  ;;  %v2119_v20 = vunpack.c.h.s8.bf16 %v2019_v16  ;;  %v2018_v22 = vld [vmem:[%s7174_s20 + $0x100] sm:$0xff]  ;;  %v2054_v23 = vunpack.c.h.s8.bf16 %v1986_v21  ;;  %v2115_v14 = vunpack.c.l.s8.bf16 %v2019_v16  ;;  %v2015_v26 = vld [vmem:[%s7174_s20 + $0xe8] sm:$0xff]  ;;  %v2050_v28 = vunpack.c.l.s8.bf16 %v1986_v21  ;;  %v2001_v16 = vld [vmem:[%s7174_s20 + $0x78] sm:$0xff] }
 0x3e3   : > { %2210 = vmatprep.mubr.bf16.mxu0 %v7391_v8  ;;  %2251 = vmatprep.mubr.bf16.mxu1 %v7393_v9  ;;  %v2118_v24 = vunpack.c.h.s8.bf16 %v2018_v22  ;;  %v2047_v27 = vld [vmem:[%s7174_s20 + $0x1e8] sm:$0xff]  ;;  %v2114_v29 = vunpack.c.l.s8.bf16 %v2018_v22  ;;  %v2111_v30 = vunpack.c.h.s8.bf16 %v2015_v26  ;;  %v2014_v32 = vld [vmem:[%s7174_s20 + $0xe0] sm:$0xff]  ;;  %v2107_v37 = vunpack.c.l.s8.bf16 %v2015_v26  ;;  %v1601_v21 = vld [vmem:[#allocation4 + $0x18] sm:$0xff] }
 0x3e4   : > { %v2175_v31 = vunpack.c.h.s8.bf16 %v2047_v27  ;;  %v2046_v33 = vld [vmem:[%s7174_s20 + $0x1e0] sm:$0xff]  ;;  %v2110_v35 = vunpack.c.h.s8.bf16 %v2014_v32  ;;  %v2171_v38 = vunpack.c.l.s8.bf16 %v2047_v27  ;;  %v2011_v39 = vld [vmem:[%s7174_s20 + $0xc8] sm:$0xff]  ;;  %v2106_v40 = vunpack.c.l.s8.bf16 %v2014_v32  ;;  %v2029_v32 = vld [vmem:[%s7174_s20 + $0x158] sm:$0xff] }
 0x3e5   : > { %2181 = vmatpush1.bf16.msra.mxu0 %v2074_v49  ;;  %2222 = vmatpush1.bf16.msra.mxu1 %v2138_v50  ;;  %v2174_v36 = vunpack.c.h.s8.bf16 %v2046_v33  ;;  %v2043_v41 = vld [vmem:[%s7174_s20 + $0x1c8] sm:$0xff]  ;;  %v2170_v42 = vunpack.c.l.s8.bf16 %v2046_v33  ;;  %v2103_v43 = vunpack.c.h.s8.bf16 %v2011_v39  ;;  %v2010_v45 = vld [vmem:[%s7174_s20 + $0xc0] sm:$0xff]  ;;  %v2099_v5 = vunpack.c.l.s8.bf16 %v2011_v39  ;;  %v2028_v39 = vld [vmem:[%s7174_s20 + $0x150] sm:$0xff] }
 0x3e6   : > { %2182 = vmatprep.subr.bf16.mxu0 %v2071_v51  ;;  %2223 = vmatprep.subr.bf16.mxu1 %v2135_v52  ;;  %v2167_v44 = vunpack.c.h.s8.bf16 %v2043_v41  ;;  %v2042_v46 = vld [vmem:[%s7174_s20 + $0x1c0] sm:$0xff]  ;;  %v2102_v47 = vunpack.c.h.s8.bf16 %v2010_v45  ;;  %v2163_v49 = vunpack.c.l.s8.bf16 %v2043_v41  ;;  %v2007_v50 = vld [vmem:[%s7174_s20 + $0xa8] sm:$0xff]  ;;  %v2098_v52 = vunpack.c.l.s8.bf16 %v2010_v45  ;;  %v2025_v45 = vld [vmem:[%s7174_s20 + $0x138] sm:$0xff] }
 0x3e7   : > { %v2166_v48 = vunpack.c.h.s8.bf16 %v2042_v46  ;;  %v2039_v51 = vld [vmem:[%s7174_s20 + $0x1a8] sm:$0xff]  ;;  %v2162_v53 = vunpack.c.l.s8.bf16 %v2042_v46  ;;  %v2095_v54 = vunpack.c.h.s8.bf16 %v2007_v50  ;;  %v2091_v60 = vunpack.c.l.s8.bf16 %v2007_v50  ;;  %v2002_v7 = vld [vmem:[%s7174_s20 + $0x80] sm:$0xff] }
 0x3e8   : > { %v2155_v61 = vunpack.c.l.s8.bf16 %v2039_v51  ;;  %v2003_v62 = vld [vmem:[%s7174_s20 + $0x88] sm:$0xff]  ;;  %v2081_v22 = vunpack.c.h.s8.bf16 %v2001_v16  ;;  %v7423_v26 = vpack.c.bf16 %v1601_v21, %v1601_v21 }
 0x3e9   : > { %2183 = vmatpush1.bf16.msra.mxu0 %v2070_v55  ;;  %2224 = vmatpush1.bf16.msra.mxu1 %v2134_v56  ;;  %v2159_v55 = vunpack.c.h.s8.bf16 %v2039_v51  ;;  %v2006_v56 = vld [vmem:[%s7174_s20 + $0xa0] sm:$0xff] }
 0x3ea   : > { %2184 = vmatprep.subr.bf16.mxu0 %v2067_v57  ;;  %2225 = vmatprep.subr.bf16.mxu1 %v2131_v58  ;;  %v2038_v57 = vld [vmem:[%s7174_s20 + $0x1a0] sm:$0xff]  ;;  %v2094_v58 = vunpack.c.h.s8.bf16 %v2006_v56 }
 0x3eb   : > { %v2158_v59 = vunpack.c.h.s8.bf16 %v2038_v57 }
 0x3ed   : > { %2185 = vmatpush1.bf16.msra.mxu0 %v2066_v63  ;;  %2226 = vmatpush1.bf16.msra.mxu1 %v2130_v2  ;;  %v2035_v63 = vld [vmem:[%s7174_s20 + $0x188] sm:$0xff]  ;;  %v2090_v2 = vunpack.c.l.s8.bf16 %v2006_v56 }
 0x3ee   : > { %2186 = vmatprep.subr.bf16.mxu0 %v2063_v3  ;;  %2227 = vmatprep.subr.bf16.mxu1 %v2127_v4  ;;  %v2154_v3 = vunpack.c.l.s8.bf16 %v2038_v57  ;;  %v2087_v4 = vunpack.c.h.s8.bf16 %v2003_v62  ;;  %v2151_v6 = vunpack.c.h.s8.bf16 %v2035_v63  ;;  %v2147_v15 = vunpack.c.l.s8.bf16 %v2035_v63 }
 0x3f1   : > { %2187 = vmatpush1.bf16.msra.mxu0 %v2062_v10  ;;  %2228 = vmatpush1.bf16.msra.mxu1 %v2126_v11  ;;  %v2034_v10 = vld [vmem:[%s7174_s20 + $0x180] sm:$0xff]  ;;  %v2086_v11 = vunpack.c.h.s8.bf16 %v2002_v7 }
 0x3f2   : > { %2188 = vmatprep.subr.bf16.mxu0 %v2059_v12  ;;  %2229 = vmatprep.subr.bf16.mxu1 %v2123_v13  ;;  %v2150_v12 = vunpack.c.h.s8.bf16 %v2034_v10  ;;  %v2083_v13 = vunpack.c.l.s8.bf16 %v2003_v62 }
 0x3f5   : > { %2189 = vmatpush1.bf16.msra.mxu0 %v2058_v17  ;;  %2230 = vmatpush1.bf16.msra.mxu1 %v2122_v18  ;;  %v2033_v17 = vld [vmem:[%s7174_s20 + $0x178] sm:$0xff]  ;;  %v2082_v18 = vunpack.c.l.s8.bf16 %v2002_v7 }
 0x3f6   : > { %2190 = vmatprep.subr.bf16.mxu0 %v2055_v19  ;;  %2231 = vmatprep.subr.bf16.mxu1 %v2119_v20  ;;  %v2146_v19 = vunpack.c.l.s8.bf16 %v2034_v10  ;;  %v1599_v20 = vld [vmem:[#allocation4 + $0x10] sm:$0xff] }
 0x3f9   : > { %2191 = vmatpush1.bf16.msra.mxu0 %v2054_v23  ;;  %2232 = vmatpush1.bf16.msra.mxu1 %v2118_v24  ;;  %v2145_v23 = vunpack.c.h.s8.bf16 %v2033_v17  ;;  %v2000_v24 = vld [vmem:[%s7174_s20 + $0x70] sm:$0xff] }
 0x3fa   : > { %2192 = vmatprep.subr.bf16.mxu0 %v2051_v25  ;;  %2233 = vmatprep.subr.bf16.mxu1 %v2115_v14  ;;  %v2032_v25 = vld [vmem:[%s7174_s20 + $0x170] sm:$0xff]  ;;  %v7421_v14 = vpack.c.bf16 %v1599_v20, %v1599_v20  ;;  %v2080_v27 = vunpack.c.h.s8.bf16 %v2000_v24  ;;  %v2076_v33 = vunpack.c.l.s8.bf16 %v2000_v24  ;;  %v2045_v20 = vld [vmem:[%s7174_s20 + $0x1d8] sm:$0xff] }
 0x3fb   : > { %v2169_v24 = vunpack.c.h.s8.bf16 %v2045_v20 }
 0x3fd   : > { %2193 = vmatpush1.bf16.msra.mxu0 %v2050_v28  ;;  %2234 = vmatpush1.bf16.msra.mxu1 %v2114_v29  ;;  %v2144_v28 = vunpack.c.h.s8.bf16 %v2032_v25  ;;  %v2077_v29 = vunpack.c.l.s8.bf16 %v2001_v16 }
 0x3fe   : > { %2194 = vmatprep.subr.bf16.mxu0 %v2111_v30  ;;  %2235 = vmatprep.subr.bf16.mxu1 %v2175_v31  ;;  %v2141_v30 = vunpack.c.l.s8.bf16 %v2033_v17  ;;  %v1997_v31 = vld [vmem:[%s7174_s20 + $0x58] sm:$0xff] }
 0x401   : > { %2195 = vmatpush2.bf16.msra.mxu0 %v2110_v35  ;;  %2236 = vmatpush2.bf16.msra.mxu1 %v2174_v36  ;;  %v2140_v35 = vunpack.c.l.s8.bf16 %v2032_v25  ;;  %v2073_v36 = vunpack.c.h.s8.bf16 %v1997_v31  ;;  %v2012_v25 = vld [vmem:[%s7174_s20 + $0xd0] sm:$0xff] }
 0x402   : > { %2196 = vmatprep.subr.bf16.mxu0 %v2107_v37  ;;  %2237 = vmatprep.subr.bf16.mxu1 %v2171_v38  ;;  %v2137_v37 = vunpack.c.h.s8.bf16 %v2029_v32  ;;  %v1996_v38 = vld [vmem:[%s7174_s20 + $0x50] sm:$0xff] }
 0x403   : > { %v2072_v41 = vunpack.c.h.s8.bf16 %v1996_v38  ;;  %v2068_v46 = vunpack.c.l.s8.bf16 %v1996_v38 }
 0x405   : > { %2197 = vmatpush2.bf16.msra.mxu0 %v2106_v40  ;;  %2238 = vmatpush2.bf16.msra.mxu1 %v2170_v42  ;;  %v2136_v40 = vunpack.c.h.s8.bf16 %v2028_v39  ;;  %v2069_v42 = vunpack.c.l.s8.bf16 %v1997_v31  ;;  %v2165_v31 = vunpack.c.l.s8.bf16 %v2045_v20 }
 0x406   : > { %2198 = vmatprep.subr.bf16.mxu0 %v2103_v43  ;;  %2239 = vmatprep.subr.bf16.mxu1 %v2167_v44  ;;  %v2133_v43 = vunpack.c.l.s8.bf16 %v2029_v32  ;;  %v1993_v44 = vld [vmem:[%s7174_s20 + $0x38] sm:$0xff] }
 0x407   : > { %v2061_v51 = vunpack.c.l.s8.bf16 %v1993_v44  ;;  %v2009_v32 = vld [vmem:[%s7174_s20 + $0xb8] sm:$0xff] }
 0x409   : > { %2199 = vmatpush2.bf16.msra.mxu0 %v2102_v47  ;;  %2240 = vmatpush2.bf16.msra.mxu1 %v2166_v48  ;;  %v2132_v47 = vunpack.c.l.s8.bf16 %v2028_v39  ;;  %v1992_v48 = vld [vmem:[%s7174_s20 + $0x30] sm:$0xff] }
 0x40a   : > { %2200 = vmatprep.subr.bf16.mxu0 %v2099_v5  ;;  %2241 = vmatprep.subr.bf16.mxu1 %v2163_v49  ;;  %v2024_v5 = vld [vmem:[%s7174_s20 + $0x130] sm:$0xff]  ;;  %v2064_v49 = vunpack.c.h.s8.bf16 %v1992_v48 }
 0x40b   : > { %v2128_v50 = vunpack.c.h.s8.bf16 %v2024_v5  ;;  %v2124_v56 = vunpack.c.l.s8.bf16 %v2024_v5  ;;  %v2008_v39 = vld [vmem:[%s7174_s20 + $0xb0] sm:$0xff] }
 0x40c   : > { %v2004_v5 = vld [vmem:[%s7174_s20 + $0x90] sm:$0xff] }
 0x40d   : > { %2201 = vmatpush2.bf16.msra.mxu0 %v2098_v52  ;;  %2242 = vmatpush2.bf16.msra.mxu1 %v2162_v53  ;;  %v2125_v52 = vunpack.c.l.s8.bf16 %v2025_v45  ;;  %v1989_v53 = vld [vmem:[%s7174_s20 + $0x18] sm:$0xff] }
 0x40e   : > { %2202 = vmatprep.subr.bf16.mxu0 %v2095_v54  ;;  %2243 = vmatprep.subr.bf16.mxu1 %v2159_v55  ;;  %v2021_v54 = vld [vmem:[%s7174_s20 + $0x118] sm:$0xff]  ;;  %v2060_v55 = vunpack.c.l.s8.bf16 %v1992_v48  ;;  %v2057_v57 = vunpack.c.h.s8.bf16 %v1989_v53  ;;  %v2053_v63 = vunpack.c.l.s8.bf16 %v1989_v53 }
 0x411   : > { %2203 = vmatpush2.bf16.msra.mxu0 %v2094_v58  ;;  %2244 = vmatpush2.bf16.msra.mxu1 %v2158_v59  ;;  %v2121_v58 = vunpack.c.h.s8.bf16 %v2021_v54  ;;  %v1988_v59 = vld [vmem:[%s7174_s20 + $0x10] sm:$0xff] }
 0x412   : > { %2204 = vmatprep.subr.bf16.mxu0 %v2091_v60  ;;  %2245 = vmatprep.subr.bf16.mxu1 %v2155_v61  ;;  %v2020_v60 = vld [vmem:[%s7174_s20 + $0x110] sm:$0xff]  ;;  %v2056_v61 = vunpack.c.h.s8.bf16 %v1988_v59 }
 0x413   : > { %v2120_v62 = vunpack.c.h.s8.bf16 %v2020_v60  ;;  %v2116_v7 = vunpack.c.l.s8.bf16 %v2020_v60 }
 0x415   : > { %2205 = vmatpush2.bf16.msra.mxu0 %v2090_v2  ;;  %2246 = vmatpush2.bf16.msra.mxu1 %v2154_v3  ;;  %v2117_v2 = vunpack.c.l.s8.bf16 %v2021_v54  ;;  %v2017_v3 = vld [vmem:[%s7174_s20 + $0xf8] sm:$0xff]  ;;  %v2400_v54 = vld [vmem:[%s7174_s20 + $0x268] sm:$0xff] }
 0x416   : > { %2206 = vmatprep.subr.bf16.mxu0 %v2087_v4  ;;  %2247 = vmatprep.subr.bf16.mxu1 %v2151_v6  ;;  %v2049_v4 = vld [vmem:[%s7174_s20 + $0x1f8] sm:$0xff]  ;;  %v2052_v6 = vunpack.c.l.s8.bf16 %v1988_v59  ;;  %v2113_v10 = vunpack.c.h.s8.bf16 %v2017_v3  ;;  %v2109_v17 = vunpack.c.l.s8.bf16 %v2017_v3  ;;  %v2476_v60 = vunpack.c.l.s8.bf16 %v2400_v54 }
 0x419   : > { %2207 = vmatpush2.bf16.msra.mxu0 %v2086_v11  ;;  %2248 = vmatpush2.bf16.msra.mxu1 %v2150_v12  ;;  %v2177_v11 = vunpack.c.h.s8.bf16 %v2049_v4  ;;  %v2016_v12 = vld [vmem:[%s7174_s20 + $0xf0] sm:$0xff] }
 0x41a   : > { %2208 = vmatprep.subr.bf16.mxu0 %v2083_v13  ;;  %2249 = vmatprep.subr.bf16.mxu1 %v2147_v15  ;;  %v2048_v13 = vld [vmem:[%s7174_s20 + $0x1f0] sm:$0xff]  ;;  %v2112_v15 = vunpack.c.h.s8.bf16 %v2016_v12  ;;  %v2108_v21 = vunpack.c.l.s8.bf16 %v2016_v12  ;;  %v2431_v12 = vld [vmem:[%s7174_s20 + $0x360] sm:$0xff] }
 0x41b   : > { %v2176_v16 = vunpack.c.h.s8.bf16 %v2048_v13  ;;  %v2539_v20 = vunpack.c.l.s8.bf16 %v2431_v12 }
 0x41d   : > { %2209 = vmatpush2.bf16.msra.mxu0 %v2082_v18  ;;  %2250 = vmatpush2.bf16.msra.mxu1 %v2146_v19  ;;  %v2173_v18 = vunpack.c.l.s8.bf16 %v2049_v4  ;;  %v2013_v19 = vld [vmem:[%s7174_s20 + $0xd8] sm:$0xff] }
 0x41e   : > { %2260 = vmatprep.subr.bf16.mxu0 %v2081_v22  ;;  %2301 = vmatprep.subr.bf16.mxu1 %v2145_v23  ;;  %v2172_v22 = vunpack.c.l.s8.bf16 %v2048_v13  ;;  %v2105_v23 = vunpack.c.h.s8.bf16 %v2013_v19 }
 0x420   : > { %2211 = vmatmul.mubr.bf16.vlgmr.msra.gmra.mxu0 %v7421_v14  ;;  %2252 = vmatmul.mubr.bf16.vlgmr.msra.gmra.mxu1 %v7423_v26 }
 0x421   : > { %2261 = vmatpush1.bf16.msra.mxu0 %v2080_v27  ;;  %2302 = vmatpush1.bf16.msra.mxu1 %v2144_v28  ;;  %v2044_v27 = vld [vmem:[%s7174_s20 + $0x1d0] sm:$0xff]  ;;  %v2104_v28 = vunpack.c.h.s8.bf16 %v2012_v25 }
 0x422   : > { %2262 = vmatprep.subr.bf16.mxu0 %v2077_v29  ;;  %2303 = vmatprep.subr.bf16.mxu1 %v2141_v30  ;;  %v2168_v29 = vunpack.c.h.s8.bf16 %v2044_v27  ;;  %v2101_v30 = vunpack.c.l.s8.bf16 %v2013_v19 }
 0x423   : > { %2292 = vmatprep.mubr.bf16.mxu0 %v7391_v8  ;;  %2333 = vmatprep.mubr.bf16.mxu1 %v7393_v9  ;;  %v2065_v8 = vunpack.c.h.s8.bf16 %v1993_v44  ;;  %v2129_v9 = vunpack.c.h.s8.bf16 %v2025_v45  ;;  %v2005_v45 = vld [vmem:[%s7174_s20 + $0x98] sm:$0xff] }
 0x425   : > { %2263 = vmatpush1.bf16.msra.mxu0 %v2076_v33  ;;  %2304 = vmatpush1.bf16.msra.mxu1 %v2140_v35  ;;  %v2041_v33 = vld [vmem:[%s7174_s20 + $0x1b8] sm:$0xff]  ;;  %v2100_v35 = vunpack.c.l.s8.bf16 %v2012_v25 }
 0x426   : > { %2264 = vmatprep.subr.bf16.mxu0 %v2073_v36  ;;  %2305 = vmatprep.subr.bf16.mxu1 %v2137_v37  ;;  %v2164_v36 = vunpack.c.l.s8.bf16 %v2044_v27  ;;  %v2097_v37 = vunpack.c.h.s8.bf16 %v2009_v32  ;;  %v2161_v38 = vunpack.c.h.s8.bf16 %v2041_v33  ;;  %v2157_v44 = vunpack.c.l.s8.bf16 %v2041_v33  ;;  %v2427_v27 = vld [vmem:[%s7174_s20 + $0x340] sm:$0xff] }
 0x427   : > { %v2531_v33 = vunpack.c.l.s8.bf16 %v2427_v27 }
 0x429   : > { %2265 = vmatpush1.bf16.msra.mxu0 %v2072_v41  ;;  %2306 = vmatpush1.bf16.msra.mxu1 %v2136_v40  ;;  %v2040_v41 = vld [vmem:[%s7174_s20 + $0x1b0] sm:$0xff]  ;;  %v2096_v40 = vunpack.c.h.s8.bf16 %v2008_v39 }
 0x42a   : > { %2266 = vmatprep.subr.bf16.mxu0 %v2069_v42  ;;  %2307 = vmatprep.subr.bf16.mxu1 %v2133_v43  ;;  %v2160_v42 = vunpack.c.h.s8.bf16 %v2040_v41  ;;  %v2093_v43 = vunpack.c.l.s8.bf16 %v2009_v32 }
 0x42d   : > { %2267 = vmatpush1.bf16.msra.mxu0 %v2068_v46  ;;  %2308 = vmatpush1.bf16.msra.mxu1 %v2132_v47  ;;  %v2037_v46 = vld [vmem:[%s7174_s20 + $0x198] sm:$0xff]  ;;  %v2092_v47 = vunpack.c.l.s8.bf16 %v2008_v39 }
 0x42e   : > { %2268 = vmatprep.subr.bf16.mxu0 %v2065_v8  ;;  %2309 = vmatprep.subr.bf16.mxu1 %v2129_v9  ;;  %v2156_v8 = vunpack.c.l.s8.bf16 %v2040_v41  ;;  %v2089_v9 = vunpack.c.h.s8.bf16 %v2005_v45  ;;  %v2153_v48 = vunpack.c.h.s8.bf16 %v2037_v46  ;;  %v2149_v53 = vunpack.c.l.s8.bf16 %v2037_v46  ;;  %v2423_v41 = vld [vmem:[%s7174_s20 + $0x320] sm:$0xff] }
 0x42f   : > { %v2523_v46 = vunpack.c.l.s8.bf16 %v2423_v41 }
 0x431   : > { %2269 = vmatpush1.bf16.msra.mxu0 %v2064_v49  ;;  %2310 = vmatpush1.bf16.msra.mxu1 %v2128_v50  ;;  %v2036_v49 = vld [vmem:[%s7174_s20 + $0x190] sm:$0xff]  ;;  %v2088_v50 = vunpack.c.h.s8.bf16 %v2004_v5 }
 0x432   : > { %2270 = vmatprep.subr.bf16.mxu0 %v2061_v51  ;;  %2311 = vmatprep.subr.bf16.mxu1 %v2125_v52  ;;  %v2152_v51 = vunpack.c.h.s8.bf16 %v2036_v49  ;;  %v2085_v52 = vunpack.c.l.s8.bf16 %v2005_v45 }
 0x435   : > { %2271 = vmatpush1.bf16.msra.mxu0 %v2060_v55  ;;  %2312 = vmatpush1.bf16.msra.mxu1 %v2124_v56  ;;  %v2084_v55 = vunpack.c.l.s8.bf16 %v2004_v5  ;;  %v2148_v56 = vunpack.c.l.s8.bf16 %v2036_v49  ;;  %v2419_v49 = vld [vmem:[%s7174_s20 + $0x300] sm:$0xff] }
 0x436   : > { %2272 = vmatprep.subr.bf16.mxu0 %v2057_v57  ;;  %2313 = vmatprep.subr.bf16.mxu1 %v2121_v58  ;;  %v2480_v57 = vunpack.c.h.s8.bf16 %v2400_v54  ;;  %v2399_v58 = vld [vmem:[%s7174_s20 + $0x260] sm:$0xff] }
 0x437   : > { %v2479_v59 = vunpack.c.h.s8.bf16 %v2399_v58 }
 0x439   : > { %2273 = vmatpush1.bf16.msra.mxu0 %v2056_v61  ;;  %2314 = vmatpush1.bf16.msra.mxu1 %v2120_v62  ;;  %v2396_v61 = vld [vmem:[%s7174_s20 + $0x248] sm:$0xff]  ;;  %v2475_v62 = vunpack.c.l.s8.bf16 %v2399_v58  ;;  %v1610_v58 = vlaneseq }
 0x43a   : > { %2274 = vmatprep.subr.bf16.mxu0 %v2053_v63  ;;  %2315 = vmatprep.subr.bf16.mxu1 %v2117_v2  ;;  %v2472_v63 = vunpack.c.h.s8.bf16 %v2396_v61  ;;  %v2395_v2 = vld [vmem:[%s7174_s20 + $0x240] sm:$0xff]  ;;  %v2468_v4 = vunpack.c.l.s8.bf16 %v2396_v61 }
 0x43b   : > { %v2471_v3 = vunpack.c.h.s8.bf16 %v2395_v2 }
 0x43d   : > { %2275 = vmatpush1.bf16.msra.mxu0 %v2052_v6  ;;  %2316 = vmatpush1.bf16.msra.mxu1 %v2116_v7  ;;  %v2392_v6 = vld [vmem:[%s7174_s20 + $0x228] sm:$0xff]  ;;  %v2467_v7 = vunpack.c.l.s8.bf16 %v2395_v2 }
 0x43e   : > { %2276 = vmatprep.subr.bf16.mxu0 %v2113_v10  ;;  %2317 = vmatprep.subr.bf16.mxu1 %v2177_v11  ;;  %v2391_v10 = vld [vmem:[%s7174_s20 + $0x220] sm:$0xff]  ;;  %v2432_v11 = vld [vmem:[%s7174_s20 + $0x368] sm:$0xff] }
 0x43f   : > { %v2463_v13 = vunpack.c.h.s8.bf16 %v2391_v10  ;;  %v2459_v19 = vunpack.c.l.s8.bf16 %v2391_v10 }
 0x441   : > { %2277 = vmatpush2.bf16.msra.mxu0 %v2112_v15  ;;  %2318 = vmatpush2.bf16.msra.mxu1 %v2176_v16  ;;  %v2543_v15 = vunpack.c.h.s8.bf16 %v2431_v12  ;;  %v2460_v16 = vunpack.c.l.s8.bf16 %v2392_v6  ;;  %v2444_v12 = vld [vmem:[%s7174_s20 + $0x3c8] sm:$0xff] }
 0x442   : > { %2278 = vmatprep.subr.bf16.mxu0 %v2109_v17  ;;  %2319 = vmatprep.subr.bf16.mxu1 %v2173_v18  ;;  %v2388_v17 = vld [vmem:[%s7174_s20 + $0x208] sm:$0xff]  ;;  %v2540_v18 = vunpack.c.l.s8.bf16 %v2432_v11 }
 0x445   : > { %2279 = vmatpush2.bf16.msra.mxu0 %v2108_v21  ;;  %2320 = vmatpush2.bf16.msra.mxu1 %v2172_v22  ;;  %v2456_v21 = vunpack.c.h.s8.bf16 %v2388_v17  ;;  %v2387_v22 = vld [vmem:[%s7174_s20 + $0x200] sm:$0xff] }
 0x446   : > { %2280 = vmatprep.subr.bf16.mxu0 %v2105_v23  ;;  %2321 = vmatprep.subr.bf16.mxu1 %v2169_v24  ;;  %v2428_v23 = vld [vmem:[%s7174_s20 + $0x348] sm:$0xff]  ;;  %v2455_v24 = vunpack.c.h.s8.bf16 %v2387_v22  ;;  %v2451_v32 = vunpack.c.l.s8.bf16 %v2387_v22 }
 0x447   : > { %v2536_v25 = vunpack.c.h.s8.bf16 %v2428_v23 }
 0x449   : > { %2281 = vmatpush2.bf16.msra.mxu0 %v2104_v28  ;;  %2322 = vmatpush2.bf16.msra.mxu1 %v2168_v29  ;;  %v2452_v28 = vunpack.c.l.s8.bf16 %v2388_v17  ;;  %v2535_v29 = vunpack.c.h.s8.bf16 %v2427_v27  ;;  %v2443_v17 = vld [vmem:[%s7174_s20 + $0x3c0] sm:$0xff] }
 0x44a   : > { %2282 = vmatprep.subr.bf16.mxu0 %v2101_v30  ;;  %2323 = vmatprep.subr.bf16.mxu1 %v2165_v31  ;;  %v2416_v30 = vld [vmem:[%s7174_s20 + $0x2e8] sm:$0xff]  ;;  %v2532_v31 = vunpack.c.l.s8.bf16 %v2428_v23  ;;  %v2564_v23 = vunpack.c.l.s8.bf16 %v2444_v12 }
 0x44d   : > { %2283 = vmatpush2.bf16.msra.mxu0 %v2100_v35  ;;  %2324 = vmatpush2.bf16.msra.mxu1 %v2164_v36  ;;  %v2512_v35 = vunpack.c.h.s8.bf16 %v2416_v30  ;;  %v2415_v36 = vld [vmem:[%s7174_s20 + $0x2e0] sm:$0xff] }
 0x44e   : > { %2284 = vmatprep.subr.bf16.mxu0 %v2097_v37  ;;  %2325 = vmatprep.subr.bf16.mxu1 %v2161_v38  ;;  %v2424_v37 = vld [vmem:[%s7174_s20 + $0x328] sm:$0xff]  ;;  %v2511_v38 = vunpack.c.h.s8.bf16 %v2415_v36  ;;  %v2507_v45 = vunpack.c.l.s8.bf16 %v2415_v36 }
 0x44f   : > { %v2528_v39 = vunpack.c.h.s8.bf16 %v2424_v37 }
 0x451   : > { %2285 = vmatpush2.bf16.msra.mxu0 %v2096_v40  ;;  %2326 = vmatpush2.bf16.msra.mxu1 %v2160_v42  ;;  %v2508_v40 = vunpack.c.l.s8.bf16 %v2416_v30  ;;  %v2527_v42 = vunpack.c.h.s8.bf16 %v2423_v41 }
 0x452   : > { %2286 = vmatprep.subr.bf16.mxu0 %v2093_v43  ;;  %2327 = vmatprep.subr.bf16.mxu1 %v2157_v44  ;;  %v2412_v43 = vld [vmem:[%s7174_s20 + $0x2c8] sm:$0xff]  ;;  %v2524_v44 = vunpack.c.l.s8.bf16 %v2424_v37  ;;  %v2439_v37 = vld [vmem:[%s7174_s20 + $0x3a0] sm:$0xff] }
 0x455   : > { %2287 = vmatpush2.bf16.msra.mxu0 %v2092_v47  ;;  %2328 = vmatpush2.bf16.msra.mxu1 %v2156_v8  ;;  %v2504_v47 = vunpack.c.h.s8.bf16 %v2412_v43  ;;  %v2411_v8 = vld [vmem:[%s7174_s20 + $0x2c0] sm:$0xff] }
 0x456   : > { %2288 = vmatprep.subr.bf16.mxu0 %v2089_v9  ;;  %2329 = vmatprep.subr.bf16.mxu1 %v2153_v48  ;;  %v2420_v9 = vld [vmem:[%s7174_s20 + $0x308] sm:$0xff]  ;;  %v2503_v48 = vunpack.c.h.s8.bf16 %v2411_v8  ;;  %v2499_v54 = vunpack.c.l.s8.bf16 %v2411_v8 }
 0x457   : > { %v2520_v5 = vunpack.c.h.s8.bf16 %v2420_v9 }
 0x459   : > { %2289 = vmatpush2.bf16.msra.mxu0 %v2088_v50  ;;  %2330 = vmatpush2.bf16.msra.mxu1 %v2152_v51  ;;  %v2500_v50 = vunpack.c.l.s8.bf16 %v2412_v43  ;;  %v2519_v51 = vunpack.c.h.s8.bf16 %v2419_v49 }
 0x45a   : > { %2290 = vmatprep.subr.bf16.mxu0 %v2085_v52  ;;  %2331 = vmatprep.subr.bf16.mxu1 %v2149_v53  ;;  %v2408_v52 = vld [vmem:[%s7174_s20 + $0x2a8] sm:$0xff]  ;;  %v2516_v53 = vunpack.c.l.s8.bf16 %v2420_v9  ;;  %v2435_v9 = vld [vmem:[%s7174_s20 + $0x380] sm:$0xff] }
 0x45d   : > { %2291 = vmatpush2.bf16.msra.mxu0 %v2084_v55  ;;  %2332 = vmatpush2.bf16.msra.mxu1 %v2148_v56  ;;  %v2515_v55 = vunpack.c.l.s8.bf16 %v2419_v49  ;;  %v2496_v56 = vunpack.c.h.s8.bf16 %v2408_v52  ;;  %v2547_v49 = vunpack.c.l.s8.bf16 %v2435_v9 }
 0x45e   : > { %2579 = vmatprep.subr.bf16.mxu0 %v2480_v57  ;;  %v2407_v57 = vld [vmem:[%s7174_s20 + $0x2a0] sm:$0xff] }
 0x460   : > { %2293 = vmatmul.mubr.bf16.vlgmr.msra.gmra.mxu0 %v7421_v14  ;;  %2334 = vmatmul.mubr.bf16.vlgmr.msra.gmra.mxu1 %v7423_v26  ;;  %v2464_v14 = vunpack.c.h.s8.bf16 %v2392_v6  ;;  %v2544_v26 = vunpack.c.h.s8.bf16 %v2432_v11  ;;  %v2403_v11 = vld [vmem:[%s7174_s20 + $0x280] sm:$0xff] }
 0x461   : > { %2580 = vmatpush1.bf16.msra.mxu0 %v2479_v59  ;;  %v2448_v59 = vld [vmem:[%s7174_s20 + $0x3e8] sm:$0xff] }
 0x462   : > { %2581 = vmatprep.subr.bf16.mxu0 %v2476_v60  ;;  %2620 = vmatprep.subr.bf16.mxu1 %v2544_v26  ;;  %v2495_v60 = vunpack.c.h.s8.bf16 %v2407_v57  ;;  %v2576_v61 = vunpack.c.h.s8.bf16 %v2448_v59  ;;  %v2572_v6 = vunpack.c.l.s8.bf16 %v2448_v59 }
 0x463   : > { %2621 = vmatpush1.bf16.msra.mxu1 %v2543_v15  ;;  %v2487_v15 = vunpack.c.h.s8.bf16 %v2403_v11 }
 0x464   : > { %2622 = vmatprep.subr.bf16.mxu1 %v2540_v18 }
 0x465   : > { %2582 = vmatpush1.bf16.msra.mxu0 %v2475_v62  ;;  %v2447_v62 = vld [vmem:[%s7174_s20 + $0x3e0] sm:$0xff] }
 0x466   : > { %2583 = vmatprep.subr.bf16.mxu0 %v2472_v63  ;;  %v2492_v63 = vunpack.c.l.s8.bf16 %v2408_v52  ;;  %v2575_v2 = vunpack.c.h.s8.bf16 %v2447_v62 }
 0x467   : > { %2623 = vmatpush1.bf16.msra.mxu1 %v2539_v20  ;;  %v2567_v20 = vunpack.c.h.s8.bf16 %v2443_v17 }
 0x468   : > { %2624 = vmatprep.subr.bf16.mxu1 %v2536_v25  ;;  %v2563_v25 = vunpack.c.l.s8.bf16 %v2443_v17 }
 0x469   : > { %2584 = vmatpush1.bf16.msra.mxu0 %v2471_v3  ;;  %v2404_v3 = vld [vmem:[%s7174_s20 + $0x288] sm:$0xff] }
 0x46a   : > { %2585 = vmatprep.subr.bf16.mxu0 %v2468_v4  ;;  %v7484_v4 = vshrl.u32 %v1610_v58, 7  ;;  %v2488_v10 = vunpack.c.h.s8.bf16 %v2404_v3 }
 0x46b   : > { %2625 = vmatpush1.bf16.msra.mxu1 %v2535_v29 }
 0x46c   : > { %2626 = vmatprep.subr.bf16.mxu1 %v2532_v31  ;;  %v7488_v26 = vsub.s32 2, %v7484_v4  ;;  %v7496_v18 = vsub.s32 3, %v7484_v4 }
 0x46d   : > { %2586 = vmatpush1.bf16.msra.mxu0 %v2467_v7  ;;  %v2491_v7 = vunpack.c.l.s8.bf16 %v2407_v57  ;;  %v7534_v57 = vsub.s32 1, %v7484_v4 }
 0x46e   : > { %2587 = vmatprep.subr.bf16.mxu0 %v2464_v14  ;;  %v2571_v14 = vunpack.c.l.s8.bf16 %v2447_v62 }
 0x46f   : > { %2627 = vmatpush1.bf16.msra.mxu1 %v2531_v33 }
 0x470   : > { %2628 = vmatprep.subr.bf16.mxu1 %v2528_v39  ;;  %v2559_v39 = vunpack.c.h.s8.bf16 %v2439_v37 }
 0x471   : > { %2588 = vmatpush1.bf16.msra.mxu0 %v2463_v13  ;;  %v7492_v13 = vld [vmem:[%s7188_s21 + $0x4] ss:$8 sm:$0xf] }
 0x472   : > { %2589 = vmatprep.subr.bf16.mxu0 %v2460_v16  ;;  %v2568_v16 = vunpack.c.h.s8.bf16 %v2444_v12  ;;  %v1621_v22 = vrot.slane %v7492_v13, %v7488_v26  ;;  %v1625_v27 = vrot.slane %v7492_v13, %v7496_v18 }
 0x473   : > { %2629 = vmatpush1.bf16.msra.mxu1 %v2527_v42 }
 0x474   : > { %2630 = vmatprep.subr.bf16.mxu1 %v2524_v44 }
 0x475   : > { %2590 = vmatpush1.bf16.msra.mxu0 %v2459_v19  ;;  %v2484_v19 = vunpack.c.l.s8.bf16 %v2404_v3 }
 0x476   : > { %2591 = vmatprep.subr.bf16.mxu0 %v2456_v21  ;;  %v7499_v21 = vld [vmem:[%s7174_s20 + $0x278] sm:$0xff] }
 0x477   : > { %2631 = vmatpush1.bf16.msra.mxu1 %v2523_v46  ;;  %v2482_v29 = vunpack.c.h.s8.bf16 %v7499_v21 }
 0x478   : > { %2632 = vmatprep.subr.bf16.mxu1 %v2520_v5 }
 0x479   : > { %2592 = vmatpush1.bf16.msra.mxu0 %v2455_v24  ;;  %v2483_v24 = vunpack.c.l.s8.bf16 %v2403_v11 }
 0x47a   : > { %2593 = vmatprep.subr.bf16.mxu0 %v2452_v28  ;;  %v6262_v28 = vld [vmem:[%s7188_s21 + $0x24] ss:$8 sm:$0xf] }
 0x47b   : > { %2633 = vmatpush1.bf16.msra.mxu1 %v2519_v51  ;;  %v1811_v41 = vrot.slane %v6262_v28, %v7496_v18 }
 0x47c   : > { %2634 = vmatprep.subr.bf16.mxu1 %v2516_v53 }
 0x47d   : > { %2594 = vmatpush1.bf16.msra.mxu0 %v2451_v32  ;;  %v2440_v32 = vld [vmem:[%s7174_s20 + $0x3a8] sm:$0xff] }
 0x47e   : > { %2595 = vmatprep.subr.bf16.mxu0 %v2512_v35  ;;  %v1807_v35 = vrot.slane %v6262_v28, %v7488_v26  ;;  %v2560_v36 = vunpack.c.h.s8.bf16 %v2440_v32  ;;  %v2556_v43 = vunpack.c.l.s8.bf16 %v2440_v32  ;;  %v2478_v32 = vunpack.c.l.s8.bf16 %v7499_v21 }
 0x47f   : > { %2635 = vmatpush1.bf16.msra.mxu1 %v2515_v55  ;;  %v7528_v55 = vsub.s32 0, %v7484_v4 }
 0x480   : > { %2636 = vmatprep.subr.bf16.mxu1 %v2576_v61 }
 0x481   : > { %2596 = vmatpush2.bf16.msra.mxu0 %v2511_v38  ;;  %v1613_v59 = vrot.slane %v7492_v13, %v7528_v55 }
 0x482   : > { %2597 = vmatprep.subr.bf16.mxu0 %v2508_v40 }
 0x483   : > { %2637 = vmatpush2.bf16.msra.mxu1 %v2575_v2 }
 0x484   : > { %2638 = vmatprep.subr.bf16.mxu1 %v2572_v6 }
 0x485   : > { %2598 = vmatpush2.bf16.msra.mxu0 %v2507_v45  ;;  %v2555_v45 = vunpack.c.l.s8.bf16 %v2439_v37  ;;  %v2397_v37 = vld [vmem:[%s7174_s20 + $0x250] sm:$0xff] }
 0x486   : > { %2599 = vmatprep.subr.bf16.mxu0 %v2504_v47  ;;  %v2436_v47 = vld [vmem:[%s7174_s20 + $0x388] sm:$0xff]  ;;  %v2469_v21 = vunpack.c.l.s8.bf16 %v2397_v37 }
 0x487   : > { %2639 = vmatpush2.bf16.msra.mxu1 %v2571_v14  ;;  %v2552_v8 = vunpack.c.h.s8.bf16 %v2436_v47  ;;  %v2548_v5 = vunpack.c.l.s8.bf16 %v2436_v47 }
 0x488   : > { %2640 = vmatprep.subr.bf16.mxu1 %v2568_v16 }
 0x489   : > { %2600 = vmatpush2.bf16.msra.mxu0 %v2503_v48  ;;  %v2551_v48 = vunpack.c.h.s8.bf16 %v2435_v9 }
 0x48a   : > { %2601 = vmatprep.subr.bf16.mxu0 %v2500_v50  ;;  %v7522_v50 = vld [vmem:[%s7174_s20 + $0x378] sm:$0xff] }
 0x48b   : > { %2641 = vmatpush2.bf16.msra.mxu1 %v2567_v20  ;;  %v2546_v51 = vunpack.c.h.s8.bf16 %v7522_v50 }
 0x48c   : > { %2642 = vmatprep.subr.bf16.mxu1 %v2564_v23 }
 0x48d   : > { %2602 = vmatpush2.bf16.msra.mxu0 %v2499_v54 }
 0x48e   : > { %2603 = vmatprep.subr.bf16.mxu0 %v2496_v56  ;;  %v7531_v56 = vld [vmem:[%s7188_s21 + $0x6] ss:$8 sm:$0xf] }
 0x48f   : > { %2643 = vmatpush2.bf16.msra.mxu1 %v2563_v25  ;;  %v2350_v3 = vrot.slane %v7531_v56, %v7534_v57 }
 0x490   : > { %2644 = vmatprep.subr.bf16.mxu1 %v2560_v36 }
 0x491   : > { %2604 = vmatpush2.bf16.msra.mxu0 %v2495_v60  ;;  %v2346_v60 = vrot.slane %v7531_v56, %v7528_v55 }
 0x492   : > { %2605 = vmatprep.subr.bf16.mxu0 %v2492_v63  ;;  %v1617_v63 = vrot.slane %v7492_v13, %v7534_v57 }
 0x493   : > { %2645 = vmatpush2.bf16.msra.mxu1 %v2559_v39  ;;  %v2473_v39 = vunpack.c.h.s8.bf16 %v2397_v37 }
 0x494   : > { %2646 = vmatprep.subr.bf16.mxu1 %v2556_v43 }
 0x495   : > { %2606 = vmatpush2.bf16.msra.mxu0 %v2491_v7 }
 0x496   : > { %2607 = vmatprep.subr.bf16.mxu0 %v2488_v10 }
 0x497   : > { %2647 = vmatpush2.bf16.msra.mxu1 %v2555_v45 }
 0x498   : > { %2648 = vmatprep.subr.bf16.mxu1 %v2552_v8  ;;  %v2390_v8 = vld [vmem:[%s7174_s20 + $0x218] sm:$0xff] }
 0x499   : > { %2608 = vmatpush2.bf16.msra.mxu0 %v2487_v15 }
 0x49a   : > { %2609 = vmatprep.subr.bf16.mxu0 %v2484_v19 }
 0x49b   : > { %v1784_v30 = vpop.f32.mrf.mxu1  ;;  %2649 = vmatpush2.bf16.msra.mxu1 %v2551_v48  ;;  %v1713_v52 = vpop.f32.mrf.mxu0  ;;  %v2458_v48 = vunpack.c.h.s8.bf16 %v2390_v8 }
 0x49c   : > { %v7507_v31 = vadd.f32 %v1784_v30, %v1621_v22  ;;  %2650 = vmatprep.subr.bf16.mxu1 %v2548_v5  ;;  %v1714_v7 = vadd.f32 %v1713_v52, %v1613_v59  ;;  %v2389_v5 = vld [vmem:[%s7174_s20 + $0x210] sm:$0xff]  ;;  %v2418_v52 = vld [vmem:[%s7174_s20 + $0x2f8] sm:$0xff] }
 0x49d   : > { %v1786_v33 = vpop.f32.mrf.mxu1  ;;  %2610 = vmatpush2.bf16.msra.mxu0 %v2483_v24  ;;  %v1715_v53 = vpop.f32.mrf.mxu0  ;;  %v2401_v24 = vld [vmem:[%s7174_s20 + $0x270] sm:$0xff]  ;;  %v2514_v59 = vunpack.c.h.s8.bf16 %v2418_v52 }
 0x49e   : > { %v7512_v38 = vadd.f32 %v1786_v33, %v1625_v27  ;;  %2661 = vmatprep.subr.bf16.mxu0 %v2482_v29  ;;  %v1716_v15 = vadd.f32 %v1715_v53, %v1617_v63  ;;  %v2481_v29 = vunpack.c.h.s8.bf16 %v2401_v24  ;;  %v2398_v33 = vld [vmem:[%s7174_s20 + $0x258] sm:$0xff]  ;;  %v2453_v53 = vunpack.c.l.s8.bf16 %v2389_v5 }
 0x49f   : > { %2651 = vmatpush2.bf16.msra.mxu1 %v2547_v49  ;;  %v2474_v36 = vunpack.c.h.s8.bf16 %v2398_v33  ;;  %v2457_v49 = vunpack.c.h.s8.bf16 %v2389_v5  ;;  %v2414_v63 = vld [vmem:[%s7174_s20 + $0x2d8] sm:$0xff] }
 0x4a0   : > { %v1965_v40 = vpop.f32.mrf.mxu1  ;;  %2702 = vmatprep.subr.bf16.mxu1 %v2546_v51  ;;  %v7525_v54 = vpop.f32.mrf.mxu0  ;;  %v2454_v51 = vunpack.c.l.s8.bf16 %v2390_v8  ;;  %v2433_v8 = vld [vmem:[%s7174_s20 + $0x370] sm:$0xff] }
 0x4a1   : > { %v7515_v42 = vadd.f32 %v1965_v40, %v1807_v35  ;;  %v2477_v35 = vunpack.c.l.s8.bf16 %v2401_v24  ;;  %v2394_v40 = vld [vmem:[%s7174_s20 + $0x238] sm:$0xff]  ;;  %v2358_v24 = vrot.slane %v7531_v56, %v7496_v18  ;;  %v2545_v5 = vunpack.c.h.s8.bf16 %v2433_v8 }
 0x4a2   : > { %v1967_v44 = vpop.f32.mrf.mxu1  ;;  %v7536_v58 = vpop.f32.mrf.mxu0  ;;  %v2466_v43 = vunpack.c.h.s8.bf16 %v2394_v40  ;;  %v2462_v47 = vunpack.c.l.s8.bf16 %v2394_v40 }
 0x4a3   : > { %v7517_v46 = vadd.f32 %v1967_v44, %v1811_v41  ;;  %v2470_v41 = vunpack.c.l.s8.bf16 %v2398_v33  ;;  %v2393_v44 = vld [vmem:[%s7174_s20 + $0x230] sm:$0xff] }
 0x4a4   : > { %v2465_v45 = vunpack.c.h.s8.bf16 %v2393_v44  ;;  %v2461_v9 = vunpack.c.l.s8.bf16 %v2393_v44 }
 0x4e0   : > { %v2212_v61 = vpop.f32.mrf.mxu0  ;;  %v2253_v62 = vpop.f32.mrf.mxu1 }
 0x4e1   : > { %v2254_v2 = vadd.f32 %v2253_v62, %v2212_v61  ;;  %v2510_v62 = vunpack.c.l.s8.bf16 %v2418_v52  ;;  %v2541_v52 = vunpack.c.l.s8.bf16 %v2433_v8  ;;  %v2446_v8 = vld [vmem:[%s7174_s20 + $0x3d8] sm:$0xff] }
 0x4e2   : > { %v2214_v6 = vpop.f32.mrf.mxu0  ;;  %v2255_v4 = vpop.f32.mrf.mxu1 }
 0x4e3   : > { %v2363_v14 = vmul.f32 %v2346_v60, %v2254_v2  ;;  %v2256_v10 = vadd.f32 %v2255_v4, %v2214_v6  ;;  %v2417_v60 = vld [vmem:[%s7174_s20 + $0x2f0] sm:$0xff] }
 0x4e4   : > { %v2216_v11 = vpop.f32.mrf.mxu0  ;;  %v2257_v12 = vpop.f32.mrf.mxu1  ;;  %v2513_v61 = vunpack.c.h.s8.bf16 %v2417_v60  ;;  %v2509_v2 = vunpack.c.l.s8.bf16 %v2417_v60  ;;  %v2413_v6 = vld [vmem:[%s7174_s20 + $0x2d0] sm:$0xff] }
 0x4e5   : > { %v2367_v16 = vadd.f32 %v2363_v14, %v1714_v7  ;;  %v2364_v17 = vmul.f32 %v2350_v3, %v2256_v10  ;;  %v2506_v3 = vunpack.c.h.s8.bf16 %v2414_v63  ;;  %v2505_v4 = vunpack.c.h.s8.bf16 %v2413_v6  ;;  %v2410_v14 = vld [vmem:[%s7174_s20 + $0x2b8] sm:$0xff]  ;;  %v2409_v12 = vld [vmem:[%s7174_s20 + $0x2b0] sm:$0xff] }
 0x4e6   : > { %v2217_v19 = vpop.f32.mrf.mxu0  ;;  %v2258_v20 = vpop.f32.mrf.mxu1  ;;  %v2502_v7 = vunpack.c.l.s8.bf16 %v2414_v63  ;;  %v2501_v10 = vunpack.c.l.s8.bf16 %v2413_v6  ;;  %v2498_v11 = vunpack.c.h.s8.bf16 %v2410_v14  ;;  %v2426_v63 = vld [vmem:[%s7174_s20 + $0x338] sm:$0xff]  ;;  %v2806_v6 = vld [vmem:[%s7174_s20 + $0x448] sm:$0xff] }
 0x4e7   : > { %vm2371_vm11 = vcmp.gt.f32.partialorder %v2367_v16, 0.0  ;;  %v2375_v13 = vmul.f32 0.01, %v2367_v16  ;;  %v2368_v22 = vadd.f32 %v2364_v17, %v1716_v15  ;;  %v2497_v15 = vunpack.c.h.s8.bf16 %v2409_v12  ;;  %v2406_v17 = vld [vmem:[%s7174_s20 + $0x298] sm:$0xff] }
 0x4e8   : > { %v2354_v19 = vrot.slane %v7531_v56, %v7488_v26  ;;  %v2486_v40 = vunpack.c.l.s8.bf16 %v2406_v17 }
 0x4e9   : > { %vm2372_vm12 = vcmp.gt.f32.partialorder %v2368_v22, 0.0  ;;  %v2376_v23 = vmul.f32 0.01, %v2368_v22  ;;  %v2379_v25 = vsel %vm2371_vm11, %v2367_v16, %v2375_v13  ;;  %v2494_v16 = vunpack.c.l.s8.bf16 %v2410_v14  ;;  %v2425_v14 = vld [vmem:[%s7174_s20 + $0x330] sm:$0xff] }
 0x4ea   : > { %v7547_v30 = vpack.c.bf16 %v2379_v25, %v2379_v25  ;;  %v2490_v25 = vunpack.c.h.s8.bf16 %v2406_v17 }
 0x4eb   : > { %v2380_v27 = vsel %vm2372_vm12, %v2368_v22, %v2376_v23  ;;  %v2493_v22 = vunpack.c.l.s8.bf16 %v2409_v12  ;;  %v2805_v12 = vld [vmem:[%s7174_s20 + $0x440] sm:$0xff] }
 0x4ec   : > { %v2384_v28 = vpack.c.bf16 %v2380_v27, %v2380_v27  ;;  %v2405_v27 = vld [vmem:[%s7174_s20 + $0x290] sm:$0xff]  ;;  %v2881_v17 = vunpack.c.h.s8.bf16 %v2805_v12 }
 0x4ed   : > { %v2489_v37 = vunpack.c.h.s8.bf16 %v2405_v27 }
 0x4ee   : > { %2611 = vmatprep.mubr.bf16.mxu0 %v2384_v28 }
 0x4ef   : > { %2612 = vmatmul.mubr.bf16.vlgmr.msra.gmra.mxu0 %v7547_v30 }
 0x4f0   : > { %2662 = vmatpush1.bf16.msra.mxu0 %v2481_v29  ;;  %2693 = vmatprep.mubr.bf16.mxu0 %v2384_v28 }
 0x4f1   : > { %2663 = vmatprep.subr.bf16.mxu0 %v2478_v32 }
 0x4f4   : > { %2664 = vmatpush1.bf16.msra.mxu0 %v2477_v35 }
 0x4f5   : > { %2665 = vmatprep.subr.bf16.mxu0 %v2474_v36 }
 0x4f8   : > { %2666 = vmatpush1.bf16.msra.mxu0 %v2473_v39 }
 0x4f9   : > { %2667 = vmatprep.subr.bf16.mxu0 %v2470_v41 }
 0x4fc   : > { %2668 = vmatpush1.bf16.msra.mxu0 %v2469_v21 }
 0x4fd   : > { %2669 = vmatprep.subr.bf16.mxu0 %v2466_v43 }
 0x500   : > { %2670 = vmatpush1.bf16.msra.mxu0 %v2465_v45  ;;  %v2485_v45 = vunpack.c.l.s8.bf16 %v2405_v27 }
 0x501   : > { %2671 = vmatprep.subr.bf16.mxu0 %v2462_v47 }
 0x504   : > { %2672 = vmatpush1.bf16.msra.mxu0 %v2461_v9 }
 0x505   : > { %2673 = vmatprep.subr.bf16.mxu0 %v2458_v48 }
 0x508   : > { %2674 = vmatpush1.bf16.msra.mxu0 %v2457_v49 }
 0x509   : > { %2675 = vmatprep.subr.bf16.mxu0 %v2454_v51  ;;  %v2542_v51 = vunpack.c.l.s8.bf16 %v7522_v50 }
 0x50c   : > { %2676 = vmatpush1.bf16.msra.mxu0 %v2453_v53 }
 0x50d   : > { %2677 = vmatprep.subr.bf16.mxu0 %v2514_v59  ;;  %v2429_v59 = vld [vmem:[%s7174_s20 + $0x350] sm:$0xff] }
 0x50e   : > { %v2537_v60 = vunpack.c.h.s8.bf16 %v2429_v59 }
 0x510   : > { %2678 = vmatpush2.bf16.msra.mxu0 %v2513_v61  ;;  %v2810_v61 = vld [vmem:[%s7174_s20 + $0x468] sm:$0xff] }
 0x511   : > { %2679 = vmatprep.subr.bf16.mxu0 %v2510_v62  ;;  %v2809_v62 = vld [vmem:[%s7174_s20 + $0x460] sm:$0xff] }
 0x514   : > { %2680 = vmatpush2.bf16.msra.mxu0 %v2509_v2  ;;  %v2890_v2 = vunpack.c.h.s8.bf16 %v2810_v61 }
 0x515   : > { %2681 = vmatprep.subr.bf16.mxu0 %v2506_v3  ;;  %v2886_v3 = vunpack.c.l.s8.bf16 %v2810_v61  ;;  %v2442_v61 = vld [vmem:[%s7174_s20 + $0x3b8] sm:$0xff] }
 0x518   : > { %2682 = vmatpush2.bf16.msra.mxu0 %v2505_v4  ;;  %v2533_v4 = vunpack.c.l.s8.bf16 %v2429_v59 }
 0x519   : > { %2683 = vmatprep.subr.bf16.mxu0 %v2502_v7  ;;  %v2530_v7 = vunpack.c.h.s8.bf16 %v2426_v63 }
 0x51c   : > { %2684 = vmatpush2.bf16.msra.mxu0 %v2501_v10  ;;  %v2885_v10 = vunpack.c.l.s8.bf16 %v2809_v62 }
 0x51d   : > { %2685 = vmatprep.subr.bf16.mxu0 %v2498_v11  ;;  %v2882_v11 = vunpack.c.h.s8.bf16 %v2806_v6 }
 0x520   : > { %2686 = vmatpush2.bf16.msra.mxu0 %v2497_v15  ;;  %v2294_v20 = vpop.f32.mrf.mxu0  ;;  %v2335_v13 = vpop.f32.mrf.mxu1  ;;  %v2529_v15 = vunpack.c.h.s8.bf16 %v2425_v14 }
 0x521   : > { %v2336_v23 = vadd.f32 %v2335_v13, %v2294_v20  ;;  %2687 = vmatprep.subr.bf16.mxu0 %v2494_v16  ;;  %v2526_v16 = vunpack.c.l.s8.bf16 %v2426_v63  ;;  %v2878_v20 = vunpack.c.l.s8.bf16 %v2806_v6  ;;  %v2802_v13 = vld [vmem:[%s7174_s20 + $0x428] sm:$0xff] }
 0x522   : > { %v2296_v28 = vpop.f32.mrf.mxu0  ;;  %v2337_v29 = vpop.f32.mrf.mxu1  ;;  %v2874_v27 = vunpack.c.h.s8.bf16 %v2802_v13  ;;  %v2822_v63 = vld [vmem:[%s7174_s20 + $0x4c8] sm:$0xff] }
 0x523   : > { %v2365_v32 = vmul.f32 %v2354_v19, %v2336_v23  ;;  %v2338_v33 = vadd.f32 %v2337_v29, %v2296_v28  ;;  %v2422_v19 = vld [vmem:[%s7174_s20 + $0x318] sm:$0xff]  ;;  %v2801_v28 = vld [vmem:[%s7174_s20 + $0x420] sm:$0xff] }
 0x524   : > { %2688 = vmatpush2.bf16.msra.mxu0 %v2493_v22  ;;  %v2298_v35 = vpop.f32.mrf.mxu0  ;;  %v2339_v36 = vpop.f32.mrf.mxu1  ;;  %v2525_v22 = vunpack.c.l.s8.bf16 %v2425_v14  ;;  %v2522_v23 = vunpack.c.h.s8.bf16 %v2422_v19 }
 0x525   : > { %v2369_v39 = vadd.f32 %v2365_v32, %v7507_v31  ;;  %v2366_v41 = vmul.f32 %v2358_v24, %v2338_v33  ;;  %2689 = vmatprep.subr.bf16.mxu0 %v2490_v25  ;;  %v2421_v24 = vld [vmem:[%s7174_s20 + $0x310] sm:$0xff]  ;;  %v2877_v25 = vunpack.c.l.s8.bf16 %v2805_v12  ;;  %v2518_v32 = vunpack.c.l.s8.bf16 %v2422_v19  ;;  %v2450_v35 = vld [vmem:[%s7174_s20 + $0x3f8] sm:$0xff] }
 0x526   : > { %v2299_v21 = vpop.f32.mrf.mxu0  ;;  %v2340_v43 = vpop.f32.mrf.mxu1  ;;  %v2521_v29 = vunpack.c.h.s8.bf16 %v2421_v24  ;;  %v2873_v33 = vunpack.c.h.s8.bf16 %v2801_v28  ;;  %v2870_v36 = vunpack.c.l.s8.bf16 %v2802_v13  ;;  %v2438_v12 = vld [vmem:[%s7174_s20 + $0x398] sm:$0xff] }
 0x527   : > { %vm2373_vm13 = vcmp.gt.f32.partialorder %v2369_v39, 0.0  ;;  %v2377_v56 = vmul.f32 0.01, %v2369_v39  ;;  %v2370_v44 = vadd.f32 %v2366_v41, %v7512_v38  ;;  %v2430_v38 = vld [vmem:[%s7174_s20 + $0x358] sm:$0xff]  ;;  %v2578_v41 = vunpack.c.h.s8.bf16 %v2450_v35 }
 0x528   : > { %2690 = vmatpush2.bf16.msra.mxu0 %v2489_v37  ;;  %v2538_v53 = vunpack.c.h.s8.bf16 %v2430_v38  ;;  %v2534_v50 = vunpack.c.l.s8.bf16 %v2430_v38  ;;  %v2798_v37 = vld [vmem:[%s7174_s20 + $0x408] sm:$0xff]  ;;  %v2869_v21 = vunpack.c.l.s8.bf16 %v2801_v28  ;;  %v2554_v19 = vunpack.c.h.s8.bf16 %v2438_v12 }
 0x529   : > { %2691 = vmatprep.subr.bf16.mxu0 %v2486_v40  ;;  %vm2374_vm14 = vcmp.gt.f32.partialorder %v2370_v44, 0.0  ;;  %v2378_v47 = vmul.f32 0.01, %v2370_v44  ;;  %v2381_v9 = vsel %vm2373_vm13, %v2369_v39, %v2377_v56  ;;  %v2517_v39 = vunpack.c.l.s8.bf16 %v2421_v24  ;;  %v2449_v40 = vld [vmem:[%s7174_s20 + $0x3f0] sm:$0xff]  ;;  %v2797_v56 = vld [vmem:[%s7174_s20 + $0x400] sm:$0xff] }
 0x52a   : > { %v7572_v49 = vpack.c.bf16 %v2381_v9, %v2381_v9  ;;  %v2866_v43 = vunpack.c.h.s8.bf16 %v2798_v37  ;;  %v2862_v9 = vunpack.c.l.s8.bf16 %v2798_v37  ;;  %v2861_v38 = vunpack.c.l.s8.bf16 %v2797_v56 }
 0x52b   : > { %v2382_v48 = vsel %vm2374_vm14, %v2370_v44, %v2378_v47  ;;  %v2577_v44 = vunpack.c.h.s8.bf16 %v2449_v40  ;;  %v2865_v47 = vunpack.c.h.s8.bf16 %v2797_v56  ;;  %v7611_v56 = vld [vmem:[%s7174_s20 + $0x478] sm:$0xff] }
 0x52c   : > { %2692 = vmatpush2.bf16.msra.mxu0 %v2485_v45  ;;  %v2386_v31 = vpack.c.bf16 %v2382_v48, %v2382_v48  ;;  %v2574_v45 = vunpack.c.l.s8.bf16 %v2450_v35  ;;  %v2826_v48 = vld [vmem:[%s7174_s20 + $0x4e8] sm:$0xff] }
 0x52d   : > { %2989 = vmatprep.subr.bf16.mxu0 %v2890_v2 }
 0x52e   : > { %2652 = vmatprep.mubr.bf16.mxu1 %v2386_v31 }
 0x52f   : > { %2694 = vmatmul.mubr.bf16.vlgmr.msra.gmra.mxu0 %v7547_v30  ;;  %2653 = vmatmul.mubr.bf16.vlgmr.msra.gmra.mxu1 %v7572_v49  ;;  %v2889_v30 = vunpack.c.h.s8.bf16 %v2809_v62  ;;  %v2918_v62 = vunpack.c.l.s8.bf16 %v2826_v48 }
 0x530   : > { %2703 = vmatpush1.bf16.msra.mxu1 %v2545_v5  ;;  %2734 = vmatprep.mubr.bf16.mxu1 %v2386_v31  ;;  %v2573_v31 = vunpack.c.l.s8.bf16 %v2449_v40  ;;  %v2570_v5 = vunpack.c.h.s8.bf16 %v2446_v8  ;;  %v2842_v40 = vld [vmem:[%s7174_s20 + $0x568] sm:$0xff] }
 0x531   : > { %2704 = vmatprep.subr.bf16.mxu1 %v2542_v51  ;;  %2990 = vmatpush1.bf16.msra.mxu0 %v2889_v30  ;;  %v2445_v51 = vld [vmem:[%s7174_s20 + $0x3d0] sm:$0xff]  ;;  %v2562_v30 = vunpack.c.h.s8.bf16 %v2442_v61 }
 0x532   : > { %2991 = vmatprep.subr.bf16.mxu0 %v2886_v3  ;;  %v2569_v59 = vunpack.c.h.s8.bf16 %v2445_v51  ;;  %v2565_v2 = vunpack.c.l.s8.bf16 %v2445_v51  ;;  %v2441_v3 = vld [vmem:[%s7174_s20 + $0x3b0] sm:$0xff] }
 0x533   : > { %v2561_v14 = vunpack.c.h.s8.bf16 %v2441_v3 }
 0x534   : > { %2705 = vmatpush1.bf16.msra.mxu1 %v2541_v52  ;;  %v2922_v52 = vunpack.c.h.s8.bf16 %v2826_v48  ;;  %v2837_v48 = vld [vmem:[%s7174_s20 + $0x540] sm:$0xff] }
 0x535   : > { %2706 = vmatprep.subr.bf16.mxu1 %v2538_v53  ;;  %2992 = vmatpush1.bf16.msra.mxu0 %v2885_v10  ;;  %v2825_v53 = vld [vmem:[%s7174_s20 + $0x4e0] sm:$0xff]  ;;  %v2558_v10 = vunpack.c.l.s8.bf16 %v2442_v61  ;;  %v2941_v51 = vunpack.c.l.s8.bf16 %v2837_v48  ;;  %v2830_v61 = vld [vmem:[%s7174_s20 + $0x508] sm:$0xff] }
 0x536   : > { %2993 = vmatprep.subr.bf16.mxu0 %v2882_v11  ;;  %v2917_v6 = vunpack.c.l.s8.bf16 %v2825_v53 }
 0x538   : > { %2707 = vmatpush1.bf16.msra.mxu1 %v2537_v60  ;;  %v2566_v60 = vunpack.c.l.s8.bf16 %v2446_v8  ;;  %v2838_v8 = vld [vmem:[%s7174_s20 + $0x548] sm:$0xff] }
 0x539   : > { %2708 = vmatprep.subr.bf16.mxu1 %v2534_v50  ;;  %2994 = vmatpush1.bf16.msra.mxu0 %v2881_v17  ;;  %v2921_v50 = vunpack.c.h.s8.bf16 %v2825_v53  ;;  %v2557_v17 = vunpack.c.l.s8.bf16 %v2441_v3  ;;  %v2833_v53 = vld [vmem:[%s7174_s20 + $0x520] sm:$0xff] }
 0x53a   : > { %2995 = vmatprep.subr.bf16.mxu0 %v2878_v20  ;;  %v2437_v20 = vld [vmem:[%s7174_s20 + $0x390] sm:$0xff] }
 0x53b   : > { %v2553_v24 = vunpack.c.h.s8.bf16 %v2437_v20  ;;  %v2549_v28 = vunpack.c.l.s8.bf16 %v2437_v20 }
 0x53c   : > { %2709 = vmatpush1.bf16.msra.mxu1 %v2533_v4  ;;  %v2914_v4 = vunpack.c.h.s8.bf16 %v2822_v63 }
 0x53d   : > { %2710 = vmatprep.subr.bf16.mxu1 %v2530_v7  ;;  %2996 = vmatpush1.bf16.msra.mxu0 %v2877_v25  ;;  %v2821_v7 = vld [vmem:[%s7174_s20 + $0x4c0] sm:$0xff]  ;;  %v2550_v25 = vunpack.c.l.s8.bf16 %v2438_v12  ;;  %v2854_v12 = vld [vmem:[%s7174_s20 + $0x5c8] sm:$0xff] }
 0x53e   : > { %2997 = vmatprep.subr.bf16.mxu0 %v2874_v27  ;;  %v2913_v11 = vunpack.c.h.s8.bf16 %v2821_v7  ;;  %v2909_v13 = vunpack.c.l.s8.bf16 %v2821_v7  ;;  %v2857_v7 = vld [vmem:[%s7174_s20 + $0x5e0] sm:$0xff] }
 0x540   : > { %2711 = vmatpush1.bf16.msra.mxu1 %v2529_v15  ;;  %v2910_v15 = vunpack.c.l.s8.bf16 %v2822_v63  ;;  %v2829_v63 = vld [vmem:[%s7174_s20 + $0x500] sm:$0xff] }
 0x541   : > { %2712 = vmatprep.subr.bf16.mxu1 %v2526_v16  ;;  %2998 = vmatpush1.bf16.msra.mxu0 %v2873_v33  ;;  %v2818_v16 = vld [vmem:[%s7174_s20 + $0x4a8] sm:$0xff]  ;;  %v2925_v3 = vunpack.c.l.s8.bf16 %v2829_v63 }
 0x542   : > { %2999 = vmatprep.subr.bf16.mxu0 %v2870_v36  ;;  %v2814_v33 = vld [vmem:[%s7174_s20 + $0x488] sm:$0xff]  ;;  %v2813_v36 = vld [vmem:[%s7174_s20 + $0x480] sm:$0xff] }
 0x543   : > { %v2898_v35 = vunpack.c.h.s8.bf16 %v2814_v33  ;;  %v2897_v37 = vunpack.c.h.s8.bf16 %v2813_v36 }
 0x544   : > { %2713 = vmatpush1.bf16.msra.mxu1 %v2525_v22  ;;  %v2906_v22 = vunpack.c.h.s8.bf16 %v2818_v16 }
 0x545   : > { %2714 = vmatprep.subr.bf16.mxu1 %v2522_v23  ;;  %3000 = vmatpush1.bf16.msra.mxu0 %v2869_v21  ;;  %v2817_v23 = vld [vmem:[%s7174_s20 + $0x4a0] sm:$0xff]  ;;  %v2954_v21 = vunpack.c.h.s8.bf16 %v2842_v40 }
 0x546   : > { %3001 = vmatprep.subr.bf16.mxu0 %v2866_v43  ;;  %v2905_v27 = vunpack.c.h.s8.bf16 %v2817_v23  ;;  %v2841_v43 = vld [vmem:[%s7174_s20 + $0x560] sm:$0xff] }
 0x548   : > { %2715 = vmatpush1.bf16.msra.mxu1 %v2521_v29  ;;  %v2902_v29 = vunpack.c.l.s8.bf16 %v2818_v16  ;;  %v2853_v16 = vld [vmem:[%s7174_s20 + $0x5c0] sm:$0xff] }
 0x549   : > { %2716 = vmatprep.subr.bf16.mxu1 %v2518_v32  ;;  %3002 = vmatpush1.bf16.msra.mxu0 %v2865_v47  ;;  %v2901_v32 = vunpack.c.l.s8.bf16 %v2817_v23  ;;  %v2949_v47 = vunpack.c.l.s8.bf16 %v2841_v43  ;;  %v2973_v20 = vunpack.c.l.s8.bf16 %v2853_v16  ;;  %v2849_v23 = vld [vmem:[%s7174_s20 + $0x5a0] sm:$0xff] }
 0x54a   : > { %3003 = vmatprep.subr.bf16.mxu0 %v2862_v9  ;;  %v2946_v9 = vunpack.c.h.s8.bf16 %v2838_v8 }
 0x54c   : > { %2717 = vmatpush1.bf16.msra.mxu1 %v2517_v39  ;;  %v2894_v39 = vunpack.c.l.s8.bf16 %v2814_v33  ;;  %v2845_v33 = vld [vmem:[%s7174_s20 + $0x580] sm:$0xff] }
 0x54d   : > { %2718 = vmatprep.subr.bf16.mxu1 %v2578_v41  ;;  %3004 = vmatpush1.bf16.msra.mxu0 %v2861_v38  ;;  %v2893_v41 = vunpack.c.l.s8.bf16 %v2813_v36  ;;  %v2834_v38 = vld [vmem:[%s7174_s20 + $0x528] sm:$0xff]  ;;  %v2961_v36 = vunpack.c.h.s8.bf16 %v2845_v33 }
 0x54e   : > { %3005 = vmatprep.subr.bf16.mxu0 %v2922_v52  ;;  %v2938_v52 = vunpack.c.h.s8.bf16 %v2834_v38 }
 0x550   : > { %2719 = vmatpush2.bf16.msra.mxu1 %v2577_v44  ;;  %v2892_v44 = vunpack.c.h.s8.bf16 %v7611_v56 }
 0x551   : > { %2720 = vmatprep.subr.bf16.mxu1 %v2574_v45  ;;  %3006 = vmatpush2.bf16.msra.mxu0 %v2921_v50  ;;  %v2950_v45 = vunpack.c.l.s8.bf16 %v2842_v40  ;;  %v2933_v50 = vunpack.c.l.s8.bf16 %v2833_v53  ;;  %v2957_v40 = vunpack.c.l.s8.bf16 %v2845_v33 }
 0x552   : > { %3007 = vmatprep.subr.bf16.mxu0 %v2918_v62  ;;  %v2930_v62 = vunpack.c.h.s8.bf16 %v2830_v61 }
 0x554   : > { %2721 = vmatpush2.bf16.msra.mxu1 %v2573_v31  ;;  %v2945_v31 = vunpack.c.h.s8.bf16 %v2837_v48 }
 0x555   : > { %2722 = vmatprep.subr.bf16.mxu1 %v2570_v5  ;;  %3008 = vmatpush2.bf16.msra.mxu0 %v2917_v6  ;;  %v2942_v5 = vunpack.c.l.s8.bf16 %v2838_v8  ;;  %v2858_v6 = vld [vmem:[%s7174_s20 + $0x5e8] sm:$0xff] }
 0x556   : > { %3009 = vmatprep.subr.bf16.mxu0 %v2914_v4  ;;  %v2986_v4 = vunpack.c.h.s8.bf16 %v2858_v6 }
 0x558   : > { %2723 = vmatpush2.bf16.msra.mxu1 %v2569_v59  ;;  %v2937_v59 = vunpack.c.h.s8.bf16 %v2833_v53 }
 0x559   : > { %2724 = vmatprep.subr.bf16.mxu1 %v2566_v60  ;;  %3010 = vmatpush2.bf16.msra.mxu0 %v2913_v11  ;;  %v2934_v60 = vunpack.c.l.s8.bf16 %v2834_v38  ;;  %v2981_v11 = vunpack.c.l.s8.bf16 %v2857_v7 }
 0x55a   : > { %3011 = vmatprep.subr.bf16.mxu0 %v2910_v15  ;;  %v2978_v15 = vunpack.c.h.s8.bf16 %v2854_v12 }
 0x55c   : > { %2725 = vmatpush2.bf16.msra.mxu1 %v2565_v2  ;;  %v2929_v2 = vunpack.c.h.s8.bf16 %v2829_v63 }
 0x55d   : > { %2726 = vmatprep.subr.bf16.mxu1 %v2562_v30  ;;  %3012 = vmatpush2.bf16.msra.mxu0 %v2909_v13  ;;  %v2926_v30 = vunpack.c.l.s8.bf16 %v2830_v61  ;;  %v2850_v13 = vld [vmem:[%s7174_s20 + $0x5a8] sm:$0xff] }
 0x55e   : > { %3013 = vmatprep.subr.bf16.mxu0 %v2906_v22  ;;  %v2970_v22 = vunpack.c.h.s8.bf16 %v2850_v13 }
 0x560   : > { %2727 = vmatpush2.bf16.msra.mxu1 %v2561_v14  ;;  %v2985_v14 = vunpack.c.h.s8.bf16 %v2857_v7  ;;  %v2888_v7 = vunpack.c.l.s8.bf16 %v7611_v56 }
 0x561   : > { %2728 = vmatprep.subr.bf16.mxu1 %v2558_v10  ;;  %3014 = vmatpush2.bf16.msra.mxu0 %v2905_v27  ;;  %v2982_v10 = vunpack.c.l.s8.bf16 %v2858_v6  ;;  %v2965_v27 = vunpack.c.l.s8.bf16 %v2849_v23 }
 0x562   : > { %3015 = vmatprep.subr.bf16.mxu0 %v2902_v29  ;;  %v2846_v29 = vld [vmem:[%s7174_s20 + $0x588] sm:$0xff] }
 0x564   : > { %2729 = vmatpush2.bf16.msra.mxu1 %v2557_v17  ;;  %v2977_v17 = vunpack.c.h.s8.bf16 %v2853_v16 }
 0x565   : > { %2730 = vmatprep.subr.bf16.mxu1 %v2554_v19  ;;  %3016 = vmatpush2.bf16.msra.mxu0 %v2901_v32  ;;  %v2974_v19 = vunpack.c.l.s8.bf16 %v2854_v12  ;;  %v2962_v32 = vunpack.c.h.s8.bf16 %v2846_v29  ;;  %v2807_v12 = vld [vmem:[%s7174_s20 + $0x450] sm:$0xff] }
 0x566   : > { %3017 = vmatprep.subr.bf16.mxu0 %v2898_v35  ;;  %v2879_v56 = vunpack.c.l.s8.bf16 %v2807_v12 }
 0x568   : > { %2731 = vmatpush2.bf16.msra.mxu1 %v2553_v24  ;;  %v2969_v24 = vunpack.c.h.s8.bf16 %v2849_v23  ;;  %v2800_v23 = vld [vmem:[%s7174_s20 + $0x418] sm:$0xff] }
 0x569   : > { %2732 = vmatprep.subr.bf16.mxu1 %v2550_v25  ;;  %3018 = vmatpush2.bf16.msra.mxu0 %v2897_v37  ;;  %v2966_v25 = vunpack.c.l.s8.bf16 %v2850_v13 }
 0x56a   : > { %3019 = vmatprep.subr.bf16.mxu0 %v2894_v39  ;;  %v2958_v39 = vunpack.c.l.s8.bf16 %v2846_v29  ;;  %v2864_v29 = vunpack.c.l.s8.bf16 %v2800_v23 }
 0x56c   : > { %2733 = vmatpush2.bf16.msra.mxu1 %v2549_v28 }
 0x56d   : > { %3020 = vmatpush2.bf16.msra.mxu0 %v2893_v41  ;;  %3030 = vmatprep.subr.bf16.mxu1 %v2954_v21  ;;  %v7629_v21 = vld [vmem:[%s7174_s20 + $0x578] sm:$0xff] }
 0x56e   : > { %3071 = vmatprep.subr.bf16.mxu0 %v2892_v44  ;;  %v7636_v44 = vld [vmem:[%s7188_s21 + $0x5] ss:$8 sm:$0xf] }
 0x56f   : > { %2735 = vmatmul.mubr.bf16.vlgmr.msra.gmra.mxu1 %v7572_v49  ;;  %v2953_v49 = vunpack.c.h.s8.bf16 %v2841_v43  ;;  %v2956_v43 = vunpack.c.h.s8.bf16 %v7629_v21  ;;  %v2776_v53 = vrot.slane %v7636_v44, %v7534_v57 }
 0x571   : > { %3031 = vmatpush1.bf16.msra.mxu1 %v2953_v49  ;;  %v7633_v49 = vld [vmem:[%s7188_s21 + $0x7] ss:$8 sm:$0xf] }
 0x572   : > { %3032 = vmatprep.subr.bf16.mxu1 %v2950_v45  ;;  %v2747_v45 = vrot.slane %v7633_v49, %v7528_v55  ;;  %v2751_v48 = vrot.slane %v7633_v49, %v7534_v57 }
 0x575   : > { %3033 = vmatpush1.bf16.msra.mxu1 %v2949_v47 }
 0x576   : > { %3034 = vmatprep.subr.bf16.mxu1 %v2946_v9 }
 0x579   : > { %3035 = vmatpush1.bf16.msra.mxu1 %v2945_v31  ;;  %v2772_v31 = vrot.slane %v7636_v44, %v7528_v55 }
 0x57a   : > { %3036 = vmatprep.subr.bf16.mxu1 %v2942_v5 }
 0x57d   : > { %3037 = vmatpush1.bf16.msra.mxu1 %v2941_v51 }
 0x57e   : > { %3038 = vmatprep.subr.bf16.mxu1 %v2938_v52 }
 0x581   : > { %3039 = vmatpush1.bf16.msra.mxu1 %v2937_v59 }
 0x582   : > { %3040 = vmatprep.subr.bf16.mxu1 %v2934_v60 }
 0x585   : > { %3041 = vmatpush1.bf16.msra.mxu1 %v2933_v50 }
 0x586   : > { %3042 = vmatprep.subr.bf16.mxu1 %v2930_v62 }
 0x589   : > { %3043 = vmatpush1.bf16.msra.mxu1 %v2929_v2  ;;  %v2811_v2 = vld [vmem:[%s7174_s20 + $0x470] sm:$0xff] }
 0x58a   : > { %3044 = vmatprep.subr.bf16.mxu1 %v2926_v30  ;;  %v2891_v6 = vunpack.c.h.s8.bf16 %v2811_v2 }
 0x58d   : > { %3045 = vmatpush1.bf16.msra.mxu1 %v2925_v3 }
 0x58e   : > { %3046 = vmatprep.subr.bf16.mxu1 %v2986_v4 }
 0x591   : > { %3047 = vmatpush2.bf16.msra.mxu1 %v2985_v14  ;;  %v2808_v14 = vld [vmem:[%s7174_s20 + $0x458] sm:$0xff] }
 0x592   : > { %3048 = vmatprep.subr.bf16.mxu1 %v2982_v10  ;;  %v2887_v10 = vunpack.c.l.s8.bf16 %v2811_v2  ;;  %v2880_v16 = vunpack.c.l.s8.bf16 %v2808_v14 }
 0x595   : > { %3049 = vmatpush2.bf16.msra.mxu1 %v2981_v11  ;;  %v2884_v11 = vunpack.c.h.s8.bf16 %v2808_v14 }
 0x596   : > { %3050 = vmatprep.subr.bf16.mxu1 %v2978_v15  ;;  %v2883_v15 = vunpack.c.h.s8.bf16 %v2807_v12  ;;  %v2784_v12 = vrot.slane %v7636_v44, %v7496_v18 }
 0x599   : > { %3051 = vmatpush2.bf16.msra.mxu1 %v2977_v17  ;;  %v2804_v17 = vld [vmem:[%s7174_s20 + $0x438] sm:$0xff] }
 0x59a   : > { %3052 = vmatprep.subr.bf16.mxu1 %v2974_v19  ;;  %v2876_v19 = vunpack.c.h.s8.bf16 %v2804_v17 }
 0x59d   : > { %3053 = vmatpush2.bf16.msra.mxu1 %v2973_v20  ;;  %v2803_v20 = vld [vmem:[%s7174_s20 + $0x430] sm:$0xff] }
 0x59e   : > { %3054 = vmatprep.subr.bf16.mxu1 %v2970_v22  ;;  %v2875_v13 = vunpack.c.h.s8.bf16 %v2803_v20  ;;  %v2872_v22 = vunpack.c.l.s8.bf16 %v2804_v17 }
 0x5a1   : > { %3055 = vmatpush2.bf16.msra.mxu1 %v2969_v24  ;;  %v2871_v24 = vunpack.c.l.s8.bf16 %v2803_v20 }
 0x5a2   : > { %3056 = vmatprep.subr.bf16.mxu1 %v2966_v25  ;;  %v2868_v25 = vunpack.c.h.s8.bf16 %v2800_v23 }
 0x5a5   : > { %3057 = vmatpush2.bf16.msra.mxu1 %v2965_v27  ;;  %v2799_v27 = vld [vmem:[%s7174_s20 + $0x410] sm:$0xff] }
 0x5a6   : > { %3058 = vmatprep.subr.bf16.mxu1 %v2962_v32  ;;  %v2828_v32 = vld [vmem:[%s7174_s20 + $0x4f8] sm:$0xff]  ;;  %v2863_v33 = vunpack.c.l.s8.bf16 %v2799_v27 }
 0x5a9   : > { %3059 = vmatpush2.bf16.msra.mxu1 %v2961_v36  ;;  %v2827_v36 = vld [vmem:[%s7174_s20 + $0x4f0] sm:$0xff] }
 0x5aa   : > { %3060 = vmatprep.subr.bf16.mxu1 %v2958_v39  ;;  %v2920_v39 = vunpack.c.l.s8.bf16 %v2828_v32 }
 0x5ad   : > { %3061 = vmatpush2.bf16.msra.mxu1 %v2957_v40  ;;  %v2919_v40 = vunpack.c.l.s8.bf16 %v2827_v36 }
 0x5ae   : > { %3112 = vmatprep.subr.bf16.mxu1 %v2956_v43 }
 0x5af   : > { %v2613_v28 = vpop.f32.mrf.mxu0 }
 0x5b1   : > { %v2615_v35 = vpop.f32.mrf.mxu0 }
 0x5b3   : > { %v2617_v37 = vpop.f32.mrf.mxu0 }
 0x5b4   : > { %v2923_v37 = vunpack.c.h.s8.bf16 %v2827_v36 }
 0x5b5   : > { %v2618_v41 = vpop.f32.mrf.mxu0 }
 0x5b6   : > { %v2824_v41 = vld [vmem:[%s7174_s20 + $0x4d8] sm:$0xff] }
 0x5b7   : > { %v2916_v43 = vunpack.c.h.s8.bf16 %v2824_v41 }
 0x5ef   : > { %v7640_v47 = vpop.f32.mrf.mxu0  ;;  %v2654_v8 = vpop.f32.mrf.mxu1 }
 0x5f0   : > { %v2655_v9 = vadd.f32 %v2654_v8, %v2613_v28  ;;  %v2867_v28 = vunpack.c.h.s8.bf16 %v2799_v27 }
 0x5f1   : > { %v7646_v5 = vpop.f32.mrf.mxu0  ;;  %v2656_v51 = vpop.f32.mrf.mxu1 }
 0x5f2   : > { %v2764_v38 = vmul.f32 %v2747_v45, %v2655_v9  ;;  %v2657_v52 = vadd.f32 %v2656_v51, %v2615_v35  ;;  %v2924_v35 = vunpack.c.h.s8.bf16 %v2828_v32  ;;  %v2823_v45 = vld [vmem:[%s7174_s20 + $0x4d0] sm:$0xff]  ;;  %v2912_v9 = vunpack.c.l.s8.bf16 %v2824_v41  ;;  %v2836_v32 = vld [vmem:[%s7174_s20 + $0x538] sm:$0xff] }
 0x5f3   : > { %v2699_v59 = vpop.f32.mrf.mxu0  ;;  %v2658_v60 = vpop.f32.mrf.mxu1  ;;  %v2915_v8 = vunpack.c.h.s8.bf16 %v2823_v45  ;;  %v2835_v41 = vld [vmem:[%s7174_s20 + $0x530] sm:$0xff] }
 0x5f4   : > { %v2765_v50 = vmul.f32 %v2751_v48, %v2657_v52  ;;  %v2789_v61 = vadd.f32 %v2772_v31, %v2764_v38  ;;  %v2820_v48 = vld [vmem:[%s7174_s20 + $0x4b8] sm:$0xff]  ;;  %v2911_v31 = vunpack.c.l.s8.bf16 %v2823_v45  ;;  %v2819_v38 = vld [vmem:[%s7174_s20 + $0x4b0] sm:$0xff]  ;;  %v3206_v45 = vld [vmem:[%s7174_s20 + $0x640] sm:$0xff] }
 0x5f5   : > { %v2700_v62 = vpop.f32.mrf.mxu0  ;;  %v2659_v63 = vpop.f32.mrf.mxu1  ;;  %v2908_v51 = vunpack.c.h.s8.bf16 %v2820_v48  ;;  %v2907_v52 = vunpack.c.h.s8.bf16 %v2819_v38  ;;  %v2816_v59 = vld [vmem:[%s7174_s20 + $0x498] sm:$0xff]  ;;  %v2903_v60 = vunpack.c.l.s8.bf16 %v2819_v38  ;;  %v3203_v38 = vld [vmem:[%s7174_s20 + $0x628] sm:$0xff] }
 0x5f6   : > { %v2790_v30 = vadd.f32 %v2776_v53, %v2765_v50  ;;  %v7651_v4 = vpack.c.bf16 %v2789_v61, %v2789_v61  ;;  %v2904_v53 = vunpack.c.l.s8.bf16 %v2820_v48  ;;  %v2900_v50 = vunpack.c.h.s8.bf16 %v2816_v59  ;;  %v2815_v61 = vld [vmem:[%s7174_s20 + $0x490] sm:$0xff] }
 0x5f7   : > { %v2755_v62 = vrot.slane %v7633_v49, %v7488_v26  ;;  %v2896_v14 = vunpack.c.l.s8.bf16 %v2816_v59  ;;  %v3282_v48 = vunpack.c.h.s8.bf16 %v3206_v45  ;;  %v2831_v59 = vld [vmem:[%s7174_s20 + $0x510] sm:$0xff] }
 0x5f8   : > { %v2794_v3 = vpack.c.bf16 %v2790_v30, %v2790_v30  ;;  %v2759_v30 = vrot.slane %v7633_v49, %v7496_v18 }
 0x5fa   : > { %3021 = vmatprep.mubr.bf16.mxu0 %v2794_v3 }
 0x5fb   : > { %3022 = vmatmul.mubr.bf16.vlgmr.msra.gmra.mxu0 %v7651_v4 }
 0x5fc   : > { %3072 = vmatpush1.bf16.msra.mxu0 %v2891_v6  ;;  %3103 = vmatprep.mubr.bf16.mxu0 %v2794_v3  ;;  %v2899_v3 = vunpack.c.h.s8.bf16 %v2815_v61  ;;  %v2780_v6 = vrot.slane %v7636_v44, %v7488_v26  ;;  %v2840_v44 = vld [vmem:[%s7174_s20 + $0x558] sm:$0xff] }
 0x5fd   : > { %3073 = vmatprep.subr.bf16.mxu0 %v2888_v7 }
 0x600   : > { %3074 = vmatpush1.bf16.msra.mxu0 %v2887_v10 }
 0x601   : > { %3075 = vmatprep.subr.bf16.mxu0 %v2884_v11 }
 0x604   : > { %3076 = vmatpush1.bf16.msra.mxu0 %v2883_v15 }
 0x605   : > { %3077 = vmatprep.subr.bf16.mxu0 %v2880_v16  ;;  %v2895_v16 = vunpack.c.l.s8.bf16 %v2815_v61  ;;  %v3202_v61 = vld [vmem:[%s7174_s20 + $0x620] sm:$0xff] }
 0x608   : > { %3078 = vmatpush1.bf16.msra.mxu0 %v2879_v56  ;;  %v2843_v56 = vld [vmem:[%s7174_s20 + $0x570] sm:$0xff] }
 0x609   : > { %3079 = vmatprep.subr.bf16.mxu0 %v2876_v19  ;;  %v2951_v23 = vunpack.c.l.s8.bf16 %v2843_v56 }
 0x60c   : > { %3080 = vmatpush1.bf16.msra.mxu0 %v2875_v13  ;;  %v2955_v13 = vunpack.c.h.s8.bf16 %v2843_v56 }
 0x60d   : > { %3081 = vmatprep.subr.bf16.mxu0 %v2872_v22 }
 0x610   : > { %3082 = vmatpush1.bf16.msra.mxu0 %v2871_v24  ;;  %v2948_v24 = vunpack.c.h.s8.bf16 %v2840_v44 }
 0x611   : > { %3083 = vmatprep.subr.bf16.mxu0 %v2868_v25  ;;  %v2839_v25 = vld [vmem:[%s7174_s20 + $0x550] sm:$0xff] }
 0x612   : > { %v2947_v27 = vunpack.c.h.s8.bf16 %v2839_v25 }
 0x614   : > { %3084 = vmatpush1.bf16.msra.mxu0 %v2867_v28  ;;  %v3211_v28 = vld [vmem:[%s7174_s20 + $0x668] sm:$0xff] }
 0x615   : > { %3085 = vmatprep.subr.bf16.mxu0 %v2864_v29  ;;  %v3210_v29 = vld [vmem:[%s7174_s20 + $0x660] sm:$0xff]  ;;  %v3287_v36 = vunpack.c.l.s8.bf16 %v3211_v28 }
 0x618   : > { %3086 = vmatpush1.bf16.msra.mxu0 %v2863_v33  ;;  %v3291_v33 = vunpack.c.h.s8.bf16 %v3211_v28  ;;  %v2852_v28 = vld [vmem:[%s7174_s20 + $0x5b8] sm:$0xff] }
 0x619   : > { %3087 = vmatprep.subr.bf16.mxu0 %v2924_v35  ;;  %v3290_v35 = vunpack.c.h.s8.bf16 %v3210_v29 }
 0x61c   : > { %3088 = vmatpush2.bf16.msra.mxu0 %v2923_v37  ;;  %v2943_v37 = vunpack.c.l.s8.bf16 %v2839_v25 }
 0x61d   : > { %3089 = vmatprep.subr.bf16.mxu0 %v2920_v39  ;;  %v2940_v39 = vunpack.c.h.s8.bf16 %v2836_v32 }
 0x620   : > { %3090 = vmatpush2.bf16.msra.mxu0 %v2919_v40  ;;  %v3286_v40 = vunpack.c.l.s8.bf16 %v3210_v29 }
 0x621   : > { %3091 = vmatprep.subr.bf16.mxu0 %v2916_v43 }
 0x624   : > { %3092 = vmatpush2.bf16.msra.mxu0 %v2915_v8  ;;  %v2939_v8 = vunpack.c.h.s8.bf16 %v2835_v41 }
 0x625   : > { %3093 = vmatprep.subr.bf16.mxu0 %v2912_v9  ;;  %v2936_v9 = vunpack.c.l.s8.bf16 %v2836_v32  ;;  %v3223_v32 = vld [vmem:[%s7174_s20 + $0x6c8] sm:$0xff] }
 0x628   : > { %3094 = vmatpush2.bf16.msra.mxu0 %v2911_v31  ;;  %v2832_v31 = vld [vmem:[%s7174_s20 + $0x518] sm:$0xff] }
 0x629   : > { %3095 = vmatprep.subr.bf16.mxu0 %v2908_v51 }
 0x62c   : > { %3096 = vmatpush2.bf16.msra.mxu0 %v2907_v52  ;;  %v2935_v52 = vunpack.c.l.s8.bf16 %v2835_v41 }
 0x62d   : > { %3097 = vmatprep.subr.bf16.mxu0 %v2904_v53  ;;  %v2932_v53 = vunpack.c.h.s8.bf16 %v2832_v31 }
 0x62f   : > { %v2736_v63 = vpop.f32.mrf.mxu1 }
 0x630   : > { %v2737_v2 = vadd.f32 %v2736_v63, %v7640_v47  ;;  %3098 = vmatpush2.bf16.msra.mxu0 %v2903_v60  ;;  %v3278_v60 = vunpack.c.l.s8.bf16 %v3206_v45  ;;  %v2928_v63 = vunpack.c.l.s8.bf16 %v2832_v31  ;;  %v2848_v45 = vld [vmem:[%s7174_s20 + $0x598] sm:$0xff] }
 0x631   : > { %v2738_v7 = vpop.f32.mrf.mxu1  ;;  %3099 = vmatprep.subr.bf16.mxu0 %v2900_v50  ;;  %v3275_v50 = vunpack.c.h.s8.bf16 %v3203_v38  ;;  %v2964_v31 = vunpack.c.h.s8.bf16 %v2848_v45 }
 0x632   : > { %v2766_v10 = vmul.f32 %v2755_v62, %v2737_v2  ;;  %v2739_v11 = vadd.f32 %v2738_v7, %v7646_v5  ;;  %v2952_v5 = vunpack.c.l.s8.bf16 %v7629_v21  ;;  %v2944_v21 = vunpack.c.l.s8.bf16 %v2840_v44 }
 0x633   : > { %v2740_v47 = vpop.f32.mrf.mxu1  ;;  %v2931_v62 = vunpack.c.h.s8.bf16 %v2831_v59  ;;  %v3274_v2 = vunpack.c.h.s8.bf16 %v3202_v61  ;;  %v2927_v7 = vunpack.c.l.s8.bf16 %v2831_v59 }
 0x634   : > { %v2767_v15 = vmul.f32 %v2759_v30, %v2739_v11  ;;  %3100 = vmatpush2.bf16.msra.mxu0 %v2899_v3  ;;  %v2791_v49 = vadd.f32 %v2780_v6, %v2766_v10  ;;  %v2860_v30 = vld [vmem:[%s7174_s20 + $0x5f8] sm:$0xff]  ;;  %v3271_v3 = vunpack.c.l.s8.bf16 %v3203_v38  ;;  %v3199_v6 = vld [vmem:[%s7174_s20 + $0x608] sm:$0xff]  ;;  %v2859_v10 = vld [vmem:[%s7174_s20 + $0x5f0] sm:$0xff]  ;;  %v3270_v11 = vunpack.c.l.s8.bf16 %v3202_v61 }
 0x635   : > { %v2741_v17 = vpop.f32.mrf.mxu1  ;;  %3101 = vmatprep.subr.bf16.mxu0 %v2896_v14  ;;  %v2988_v14 = vunpack.c.h.s8.bf16 %v2860_v30  ;;  %v3198_v47 = vld [vmem:[%s7174_s20 + $0x600] sm:$0xff]  ;;  %v3263_v56 = vunpack.c.l.s8.bf16 %v3199_v6 }
 0x636   : > { %v2792_v19 = vadd.f32 %v2784_v12, %v2767_v15  ;;  %v7680_v22 = vpack.c.bf16 %v2791_v49, %v2791_v49  ;;  %v3267_v12 = vunpack.c.h.s8.bf16 %v3199_v6  ;;  %v2987_v15 = vunpack.c.h.s8.bf16 %v2859_v10  ;;  %v2856_v17 = vld [vmem:[%s7174_s20 + $0x5d8] sm:$0xff] }
 0x637   : > { %v3266_v49 = vunpack.c.h.s8.bf16 %v3198_v47  ;;  %v3262_v44 = vunpack.c.l.s8.bf16 %v3198_v47 }
 0x638   : > { %3102 = vmatpush2.bf16.msra.mxu0 %v2895_v16  ;;  %v2796_v20 = vpack.c.bf16 %v2792_v19, %v2792_v19  ;;  %v2984_v16 = vunpack.c.l.s8.bf16 %v2860_v30  ;;  %v3227_v19 = vld [vmem:[%s7174_s20 + $0x6e8] sm:$0xff] }
 0x639   : > { %3390 = vmatprep.subr.bf16.mxu0 %v3291_v33  ;;  %v3319_v29 = vunpack.c.l.s8.bf16 %v3227_v19 }
 0x63a   : > { %3062 = vmatprep.mubr.bf16.mxu1 %v2796_v20 }
 0x63b   : > { %3063 = vmatmul.mubr.bf16.vlgmr.msra.gmra.mxu1 %v7680_v22  ;;  %3104 = vmatmul.mubr.bf16.vlgmr.msra.gmra.mxu0 %v7651_v4  ;;  %v3207_v4 = vld [vmem:[%s7174_s20 + $0x648] sm:$0xff] }
 0x63c   : > { %3113 = vmatpush1.bf16.msra.mxu1 %v2955_v13  ;;  %3144 = vmatprep.mubr.bf16.mxu1 %v2796_v20  ;;  %v3283_v43 = vunpack.c.h.s8.bf16 %v3207_v4  ;;  %v3279_v51 = vunpack.c.l.s8.bf16 %v3207_v4  ;;  %v2983_v20 = vunpack.c.l.s8.bf16 %v2859_v10  ;;  %v2980_v13 = vunpack.c.h.s8.bf16 %v2856_v17 }
 0x63d   : > { %3114 = vmatprep.subr.bf16.mxu1 %v2952_v5  ;;  %3391 = vmatpush1.bf16.msra.mxu0 %v3290_v35  ;;  %v2855_v5 = vld [vmem:[%s7174_s20 + $0x5d0] sm:$0xff]  ;;  %v2972_v35 = vunpack.c.h.s8.bf16 %v2852_v28 }
 0x63e   : > { %3392 = vmatprep.subr.bf16.mxu0 %v3287_v36  ;;  %v2979_v25 = vunpack.c.h.s8.bf16 %v2855_v5  ;;  %v2975_v33 = vunpack.c.l.s8.bf16 %v2855_v5  ;;  %v2851_v36 = vld [vmem:[%s7174_s20 + $0x5b0] sm:$0xff] }
 0x63f   : > { %v2971_v41 = vunpack.c.h.s8.bf16 %v2851_v36 }
 0x640   : > { %3115 = vmatpush1.bf16.msra.mxu1 %v2951_v23  ;;  %v3323_v23 = vunpack.c.h.s8.bf16 %v3227_v19  ;;  %v3238_v19 = vld [vmem:[%s7174_s20 + $0x740] sm:$0xff] }
 0x641   : > { %3116 = vmatprep.subr.bf16.mxu1 %v2948_v24  ;;  %3393 = vmatpush1.bf16.msra.mxu0 %v3286_v40  ;;  %v3226_v24 = vld [vmem:[%s7174_s20 + $0x6e0] sm:$0xff]  ;;  %v2968_v40 = vunpack.c.l.s8.bf16 %v2852_v28  ;;  %v3342_v5 = vunpack.c.l.s8.bf16 %v3238_v19  ;;  %v3231_v28 = vld [vmem:[%s7174_s20 + $0x708] sm:$0xff] }
 0x642   : > { %3394 = vmatprep.subr.bf16.mxu0 %v3283_v43  ;;  %v3318_v4 = vunpack.c.l.s8.bf16 %v3226_v24 }
 0x644   : > { %3117 = vmatpush1.bf16.msra.mxu1 %v2947_v27  ;;  %v2976_v27 = vunpack.c.l.s8.bf16 %v2856_v17  ;;  %v3239_v17 = vld [vmem:[%s7174_s20 + $0x748] sm:$0xff] }
 0x645   : > { %3118 = vmatprep.subr.bf16.mxu1 %v2944_v21  ;;  %3395 = vmatpush1.bf16.msra.mxu0 %v3282_v48  ;;  %v3322_v21 = vunpack.c.h.s8.bf16 %v3226_v24  ;;  %v2967_v48 = vunpack.c.l.s8.bf16 %v2851_v36  ;;  %v3234_v24 = vld [vmem:[%s7174_s20 + $0x720] sm:$0xff] }
 0x646   : > { %3396 = vmatprep.subr.bf16.mxu0 %v3279_v51  ;;  %v2847_v51 = vld [vmem:[%s7174_s20 + $0x590] sm:$0xff] }
 0x647   : > { %v2963_v59 = vunpack.c.h.s8.bf16 %v2847_v51  ;;  %v2959_v61 = vunpack.c.l.s8.bf16 %v2847_v51 }
 0x648   : > { %3119 = vmatpush1.bf16.msra.mxu1 %v2943_v37  ;;  %v3315_v37 = vunpack.c.h.s8.bf16 %v3223_v32 }
 0x649   : > { %3120 = vmatprep.subr.bf16.mxu1 %v2940_v39  ;;  %3397 = vmatpush1.bf16.msra.mxu0 %v3278_v60  ;;  %v3222_v39 = vld [vmem:[%s7174_s20 + $0x6c0] sm:$0xff]  ;;  %v2960_v60 = vunpack.c.l.s8.bf16 %v2848_v45  ;;  %v3255_v45 = vld [vmem:[%s7174_s20 + $0x7c8] sm:$0xff] }
 0x64a   : > { %3398 = vmatprep.subr.bf16.mxu0 %v3275_v50  ;;  %v3314_v43 = vunpack.c.h.s8.bf16 %v3222_v39  ;;  %v3310_v38 = vunpack.c.l.s8.bf16 %v3222_v39  ;;  %v3258_v39 = vld [vmem:[%s7174_s20 + $0x7e0] sm:$0xff] }
 0x64c   : > { %3121 = vmatpush1.bf16.msra.mxu1 %v2939_v8  ;;  %v3311_v8 = vunpack.c.l.s8.bf16 %v3223_v32  ;;  %v3230_v32 = vld [vmem:[%s7174_s20 + $0x700] sm:$0xff] }
 0x64d   : > { %3122 = vmatprep.subr.bf16.mxu1 %v2936_v9  ;;  %3399 = vmatpush1.bf16.msra.mxu0 %v3274_v2  ;;  %v3219_v9 = vld [vmem:[%s7174_s20 + $0x6a8] sm:$0xff]  ;;  %v3326_v36 = vunpack.c.l.s8.bf16 %v3230_v32 }
 0x64e   : > { %3400 = vmatprep.subr.bf16.mxu0 %v3271_v3  ;;  %v3215_v2 = vld [vmem:[%s7174_s20 + $0x688] sm:$0xff]  ;;  %v3214_v3 = vld [vmem:[%s7174_s20 + $0x680] sm:$0xff] }
 0x64f   : > { %v3299_v30 = vunpack.c.h.s8.bf16 %v3215_v2  ;;  %v3298_v6 = vunpack.c.h.s8.bf16 %v3214_v3  ;;  %v3294_v10 = vunpack.c.l.s8.bf16 %v3214_v3  ;;  %v3246_v3 = vld [vmem:[%s7174_s20 + $0x780] sm:$0xff] }
 0x650   : > { %3123 = vmatpush1.bf16.msra.mxu1 %v2935_v52  ;;  %v3307_v52 = vunpack.c.h.s8.bf16 %v3219_v9 }
 0x651   : > { %3124 = vmatprep.subr.bf16.mxu1 %v2932_v53  ;;  %3401 = vmatpush1.bf16.msra.mxu0 %v3270_v11  ;;  %v3218_v53 = vld [vmem:[%s7174_s20 + $0x6a0] sm:$0xff] }
 0x652   : > { %3402 = vmatprep.subr.bf16.mxu0 %v3267_v12  ;;  %v3306_v50 = vunpack.c.h.s8.bf16 %v3218_v53  ;;  %v7719_v12 = vld [vmem:[%s7174_s20 + $0x678] sm:$0xff] }
 0x654   : > { %3125 = vmatpush1.bf16.msra.mxu1 %v2931_v62  ;;  %v3303_v62 = vunpack.c.l.s8.bf16 %v3219_v9  ;;  %v3254_v9 = vld [vmem:[%s7174_s20 + $0x7c0] sm:$0xff] }
 0x655   : > { %3126 = vmatprep.subr.bf16.mxu1 %v2928_v63  ;;  %3403 = vmatpush1.bf16.msra.mxu0 %v3266_v49  ;;  %v3302_v63 = vunpack.c.l.s8.bf16 %v3218_v53  ;;  %v3374_v51 = vunpack.c.l.s8.bf16 %v3254_v9  ;;  %v3250_v53 = vld [vmem:[%s7174_s20 + $0x7a0] sm:$0xff] }
 0x656   : > { %3404 = vmatprep.subr.bf16.mxu0 %v3263_v56  ;;  %v3347_v56 = vunpack.c.h.s8.bf16 %v3239_v17 }
 0x658   : > { %3127 = vmatpush1.bf16.msra.mxu1 %v2927_v7  ;;  %v3295_v7 = vunpack.c.l.s8.bf16 %v3215_v2 }
 0x659   : > { %3128 = vmatprep.subr.bf16.mxu1 %v2988_v14  ;;  %3405 = vmatpush1.bf16.msra.mxu0 %v3262_v44  ;;  %v3243_v14 = vld [vmem:[%s7174_s20 + $0x768] sm:$0xff] }
 0x65a   : > { %3406 = vmatprep.subr.bf16.mxu0 %v3323_v23  ;;  %v3355_v11 = vunpack.c.h.s8.bf16 %v3243_v14  ;;  %v3235_v44 = vld [vmem:[%s7174_s20 + $0x728] sm:$0xff] }
 0x65b   : > { %v3339_v23 = vunpack.c.h.s8.bf16 %v3235_v44 }
 0x65c   : > { %3129 = vmatpush2.bf16.msra.mxu1 %v2987_v15  ;;  %v3293_v15 = vunpack.c.h.s8.bf16 %v7719_v12 }
 0x65d   : > { %3130 = vmatprep.subr.bf16.mxu1 %v2984_v16  ;;  %3407 = vmatpush2.bf16.msra.mxu0 %v3322_v21  ;;  %v3351_v16 = vunpack.c.l.s8.bf16 %v3243_v14  ;;  %v3334_v21 = vunpack.c.l.s8.bf16 %v3234_v24 }
 0x65e   : > { %3408 = vmatprep.subr.bf16.mxu0 %v3319_v29  ;;  %v3331_v29 = vunpack.c.h.s8.bf16 %v3231_v28 }
 0x660   : > { %3131 = vmatpush2.bf16.msra.mxu1 %v2983_v20  ;;  %v3346_v20 = vunpack.c.h.s8.bf16 %v3238_v19 }
 0x661   : > { %3132 = vmatprep.subr.bf16.mxu1 %v2980_v13  ;;  %3409 = vmatpush2.bf16.msra.mxu0 %v3318_v4  ;;  %v3343_v13 = vunpack.c.l.s8.bf16 %v3239_v17  ;;  %v3259_v4 = vld [vmem:[%s7174_s20 + $0x7e8] sm:$0xff] }
 0x662   : > { %3410 = vmatprep.subr.bf16.mxu0 %v3315_v37  ;;  %v3387_v37 = vunpack.c.h.s8.bf16 %v3259_v4 }
 0x664   : > { %3133 = vmatpush2.bf16.msra.mxu1 %v2979_v25  ;;  %v3338_v25 = vunpack.c.h.s8.bf16 %v3234_v24 }
 0x665   : > { %3134 = vmatprep.subr.bf16.mxu1 %v2976_v27  ;;  %3411 = vmatpush2.bf16.msra.mxu0 %v3314_v43  ;;  %v3335_v27 = vunpack.c.l.s8.bf16 %v3235_v44  ;;  %v3382_v43 = vunpack.c.l.s8.bf16 %v3258_v39 }
 0x666   : > { %3412 = vmatprep.subr.bf16.mxu0 %v3311_v8  ;;  %v3379_v8 = vunpack.c.h.s8.bf16 %v3255_v45 }
 0x668   : > { %3135 = vmatpush2.bf16.msra.mxu1 %v2975_v33  ;;  %v3330_v33 = vunpack.c.h.s8.bf16 %v3230_v32 }
 0x669   : > { %3136 = vmatprep.subr.bf16.mxu1 %v2972_v35  ;;  %3413 = vmatpush2.bf16.msra.mxu0 %v3310_v38  ;;  %v3327_v35 = vunpack.c.l.s8.bf16 %v3231_v28  ;;  %v3251_v38 = vld [vmem:[%s7174_s20 + $0x7a8] sm:$0xff] }
 0x66a   : > { %3414 = vmatprep.subr.bf16.mxu0 %v3307_v52  ;;  %v3371_v52 = vunpack.c.h.s8.bf16 %v3251_v38 }
 0x66c   : > { %3137 = vmatpush2.bf16.msra.mxu1 %v2971_v41  ;;  %v3386_v41 = vunpack.c.h.s8.bf16 %v3258_v39  ;;  %v3212_v39 = vld [vmem:[%s7174_s20 + $0x670] sm:$0xff] }
 0x66d   : > { %3138 = vmatprep.subr.bf16.mxu1 %v2968_v40  ;;  %3415 = vmatpush2.bf16.msra.mxu0 %v3306_v50  ;;  %v3383_v40 = vunpack.c.l.s8.bf16 %v3259_v4  ;;  %v3367_v50 = vunpack.c.l.s8.bf16 %v3251_v38 }
 0x66e   : > { %3416 = vmatprep.subr.bf16.mxu0 %v3303_v62 }
 0x670   : > { %3139 = vmatpush2.bf16.msra.mxu1 %v2967_v48  ;;  %v3378_v48 = vunpack.c.h.s8.bf16 %v3254_v9  ;;  %v3288_v9 = vunpack.c.l.s8.bf16 %v3212_v39 }
 0x671   : > { %3140 = vmatprep.subr.bf16.mxu1 %v2964_v31  ;;  %3417 = vmatpush2.bf16.msra.mxu0 %v3302_v63  ;;  %v3375_v31 = vunpack.c.l.s8.bf16 %v3255_v45  ;;  %v3247_v63 = vld [vmem:[%s7174_s20 + $0x788] sm:$0xff] }
 0x672   : > { %3418 = vmatprep.subr.bf16.mxu0 %v3299_v30  ;;  %v3363_v30 = vunpack.c.h.s8.bf16 %v3247_v63  ;;  %v3359_v14 = vunpack.c.l.s8.bf16 %v3247_v63 }
 0x674   : > { %3141 = vmatpush2.bf16.msra.mxu1 %v2963_v59  ;;  %v3370_v59 = vunpack.c.h.s8.bf16 %v3250_v53 }
 0x675   : > { %3142 = vmatprep.subr.bf16.mxu1 %v2960_v60  ;;  %3419 = vmatpush2.bf16.msra.mxu0 %v3298_v6  ;;  %v3362_v6 = vunpack.c.h.s8.bf16 %v3246_v3 }
 0x676   : > { %3420 = vmatprep.subr.bf16.mxu0 %v3295_v7 }
 0x678   : > { %3143 = vmatpush2.bf16.msra.mxu1 %v2959_v61  ;;  %v3366_v61 = vunpack.c.l.s8.bf16 %v3250_v53 }
 0x679   : > { %3431 = vmatprep.subr.bf16.mxu1 %v3355_v11  ;;  %3421 = vmatpush2.bf16.msra.mxu0 %v3294_v10  ;;  %v3358_v10 = vunpack.c.l.s8.bf16 %v3246_v3  ;;  %v7737_v11 = vld [vmem:[%s7174_s20 + $0x778] sm:$0xff] }
 0x67a   : > { %3472 = vmatprep.subr.bf16.mxu0 %v3293_v15  ;;  %v6647_v15 = vld [vmem:[%s7188_s21 + $0x24] ss:$8 sm:$0xf] }
 0x67b   : > { %3145 = vmatmul.mubr.bf16.vlgmr.msra.gmra.mxu1 %v7680_v22  ;;  %v3242_v22 = vld [vmem:[%s7174_s20 + $0x760] sm:$0xff]  ;;  %v1803_v19 = vrot.slane %v6647_v15, %v7534_v57 }
 0x67c   : > { %v3354_v47 = vunpack.c.h.s8.bf16 %v3242_v22  ;;  %v3350_v49 = vunpack.c.l.s8.bf16 %v3242_v22  ;;  %v3357_v22 = vunpack.c.h.s8.bf16 %v7737_v11 }
 0x67d   : > { %v1897_v28 = vadd.f32 %v7536_v58, %v1803_v19  ;;  %v3289_v58 = vunpack.c.l.s8.bf16 %v7719_v12  ;;  %v3224_v19 = vld [vmem:[%s7174_s20 + $0x6d0] sm:$0xff] }
 0x67e   : > { %3432 = vmatpush1.bf16.msra.mxu1 %v3354_v47  ;;  %v7741_v47 = vld [vmem:[%s7188_s21 + $0x26] ss:$8 sm:$0xf] }
 0x67f   : > { %3433 = vmatprep.subr.bf16.mxu1 %v3351_v16  ;;  %v1799_v16 = vrot.slane %v6647_v15, %v7528_v55 }
 0x682   : > { %3434 = vmatpush1.bf16.msra.mxu1 %v3350_v49  ;;  %v3157_v49 = vrot.slane %v7741_v47, %v7528_v55 }
 0x683   : > { %3435 = vmatprep.subr.bf16.mxu1 %v3347_v56 }
 0x686   : > { %3436 = vmatpush1.bf16.msra.mxu1 %v3346_v20 }
 0x687   : > { %3437 = vmatprep.subr.bf16.mxu1 %v3343_v13  ;;  %v3161_v13 = vrot.slane %v7741_v47, %v7534_v57 }
 0x68a   : > { %3438 = vmatpush1.bf16.msra.mxu1 %v3342_v5 }
 0x68b   : > { %3439 = vmatprep.subr.bf16.mxu1 %v3339_v23  ;;  %v1895_v23 = vadd.f32 %v7525_v54, %v1799_v16  ;;  %v3225_v16 = vld [vmem:[%s7174_s20 + $0x6d8] sm:$0xff] }
 0x68e   : > { %3440 = vmatpush1.bf16.msra.mxu1 %v3338_v25 }
 0x68f   : > { %3441 = vmatprep.subr.bf16.mxu1 %v3335_v27 }
 0x692   : > { %3442 = vmatpush1.bf16.msra.mxu1 %v3334_v21 }
 0x693   : > { %3443 = vmatprep.subr.bf16.mxu1 %v3331_v29 }
 0x696   : > { %3444 = vmatpush1.bf16.msra.mxu1 %v3330_v33 }
 0x697   : > { %3445 = vmatprep.subr.bf16.mxu1 %v3327_v35 }
 0x69a   : > { %3446 = vmatpush1.bf16.msra.mxu1 %v3326_v36 }
 0x69b   : > { %3447 = vmatprep.subr.bf16.mxu1 %v3387_v37 }
 0x69e   : > { %3448 = vmatpush2.bf16.msra.mxu1 %v3386_v41 }
 0x69f   : > { %3449 = vmatprep.subr.bf16.mxu1 %v3383_v40 }
 0x6a2   : > { %3450 = vmatpush2.bf16.msra.mxu1 %v3382_v43  ;;  %v3292_v43 = vunpack.c.h.s8.bf16 %v3212_v39 }
 0x6a3   : > { %3451 = vmatprep.subr.bf16.mxu1 %v3379_v8  ;;  %v3209_v8 = vld [vmem:[%s7174_s20 + $0x658] sm:$0xff] }
 0x6a4   : > { %v3281_v38 = vunpack.c.l.s8.bf16 %v3209_v8 }
 0x6a6   : > { %3452 = vmatpush2.bf16.msra.mxu1 %v3378_v48  ;;  %v3285_v48 = vunpack.c.h.s8.bf16 %v3209_v8 }
 0x6a7   : > { %3453 = vmatprep.subr.bf16.mxu1 %v3375_v31  ;;  %v3208_v31 = vld [vmem:[%s7174_s20 + $0x650] sm:$0xff] }
 0x6a8   : > { %v3280_v12 = vunpack.c.l.s8.bf16 %v3208_v31 }
 0x6aa   : > { %3454 = vmatpush2.bf16.msra.mxu1 %v3374_v51  ;;  %v3284_v51 = vunpack.c.h.s8.bf16 %v3208_v31 }
 0x6ab   : > { %3455 = vmatprep.subr.bf16.mxu1 %v3371_v52  ;;  %v3205_v52 = vld [vmem:[%s7174_s20 + $0x638] sm:$0xff] }
 0x6ac   : > { %v3277_v53 = vunpack.c.h.s8.bf16 %v3205_v52 }
 0x6ae   : > { %3456 = vmatpush2.bf16.msra.mxu1 %v3370_v59  ;;  %v3204_v59 = vld [vmem:[%s7174_s20 + $0x630] sm:$0xff] }
 0x6af   : > { %3457 = vmatprep.subr.bf16.mxu1 %v3367_v50  ;;  %v3273_v50 = vunpack.c.l.s8.bf16 %v3205_v52 }
 0x6b2   : > { %3458 = vmatpush2.bf16.msra.mxu1 %v3366_v61  ;;  %v3201_v61 = vld [vmem:[%s7174_s20 + $0x618] sm:$0xff] }
 0x6b3   : > { %3459 = vmatprep.subr.bf16.mxu1 %v3363_v30  ;;  %v3269_v63 = vunpack.c.h.s8.bf16 %v3201_v61  ;;  %v3265_v3 = vunpack.c.l.s8.bf16 %v3201_v61  ;;  %v3240_v61 = vld [vmem:[%s7174_s20 + $0x750] sm:$0xff] }
 0x6b6   : > { %3460 = vmatpush2.bf16.msra.mxu1 %v3362_v6  ;;  %v3229_v6 = vld [vmem:[%s7174_s20 + $0x6f8] sm:$0xff] }
 0x6b7   : > { %3461 = vmatprep.subr.bf16.mxu1 %v3359_v14  ;;  %v3325_v14 = vunpack.c.h.s8.bf16 %v3229_v6  ;;  %v3321_v15 = vunpack.c.l.s8.bf16 %v3229_v6  ;;  %v3998_v6 = vld [vmem:[%s7174_s20 + $0x860] sm:$0xff] }
 0x6ba   : > { %3462 = vmatpush2.bf16.msra.mxu1 %v3358_v10  ;;  %v3228_v10 = vld [vmem:[%s7174_s20 + $0x6f0] sm:$0xff] }
 0x6bb   : > { %v3023_v60 = vpop.f32.mrf.mxu0  ;;  %3513 = vmatprep.subr.bf16.mxu1 %v3357_v22  ;;  %v3324_v22 = vunpack.c.h.s8.bf16 %v3228_v10 }
 0x6bd   : > { %v3025_v62 = vpop.f32.mrf.mxu0 }
 0x6bf   : > { %v3027_v2 = vpop.f32.mrf.mxu0 }
 0x6c0   : > { %v3200_v2 = vld [vmem:[%s7174_s20 + $0x610] sm:$0xff] }
 0x6c1   : > { %v3028_v7 = vpop.f32.mrf.mxu0  ;;  %v3268_v30 = vunpack.c.h.s8.bf16 %v3200_v2 }
 0x6c2   : > { %v3264_v7 = vunpack.c.l.s8.bf16 %v3200_v2  ;;  %v3609_v2 = vld [vmem:[%s7188_s21 + $0x48] sm:$0xf] }
 0x6fb   : > { %v3064_v17 = vpop.f32.mrf.mxu1  ;;  %v7747_v56 = vpop.f32.mrf.mxu0 }
 0x6fc   : > { %v3065_v20 = vadd.f32 %v3064_v17, %v3023_v60  ;;  %v3276_v60 = vunpack.c.h.s8.bf16 %v3204_v59  ;;  %v3317_v17 = vunpack.c.h.s8.bf16 %v3225_v16 }
 0x6fd   : > { %v3066_v5 = vpop.f32.mrf.mxu1  ;;  %v7752_v44 = vpop.f32.mrf.mxu0 }
 0x6fe   : > { %v3174_v24 = vmul.f32 %v3157_v49, %v3065_v20  ;;  %v3067_v25 = vadd.f32 %v3066_v5, %v3025_v62  ;;  %v3272_v62 = vunpack.c.l.s8.bf16 %v3204_v59  ;;  %v3320_v49 = vunpack.c.l.s8.bf16 %v3228_v10  ;;  %v3221_v5 = vld [vmem:[%s7174_s20 + $0x6b8] sm:$0xff] }
 0x6ff   : > { %v3068_v27 = vpop.f32.mrf.mxu1  ;;  %v3109_v21 = vpop.f32.mrf.mxu0  ;;  %v3316_v20 = vunpack.c.h.s8.bf16 %v3224_v19  ;;  %v3353_v59 = vunpack.c.l.s8.bf16 %v7737_v11  ;;  %v3348_v11 = vunpack.c.h.s8.bf16 %v3240_v61  ;;  %v3344_v10 = vunpack.c.l.s8.bf16 %v3240_v61  ;;  %v3253_v61 = vld [vmem:[%s7174_s20 + $0x7b8] sm:$0xff] }
 0x700   : > { %v3178_v29 = vadd.f32 %v3174_v24, %v1895_v23  ;;  %v3175_v32 = vmul.f32 %v3161_v13, %v3067_v25  ;;  %v3313_v13 = vunpack.c.l.s8.bf16 %v3225_v16  ;;  %v3312_v23 = vunpack.c.l.s8.bf16 %v3224_v19  ;;  %v3220_v25 = vld [vmem:[%s7174_s20 + $0x6b0] sm:$0xff] }
 0x701   : > { %v3069_v33 = vpop.f32.mrf.mxu1  ;;  %v3110_v35 = vpop.f32.mrf.mxu0  ;;  %v3309_v24 = vunpack.c.h.s8.bf16 %v3221_v5  ;;  %v3308_v27 = vunpack.c.h.s8.bf16 %v3220_v25  ;;  %v3305_v21 = vunpack.c.l.s8.bf16 %v3221_v5  ;;  %v4078_v16 = vunpack.c.h.s8.bf16 %v3998_v6  ;;  %v3233_v5 = vld [vmem:[%s7174_s20 + $0x718] sm:$0xff] }
 0x702   : > { %vm3182_vm15 = vcmp.gt.f32.partialorder %v3178_v29, 0.0  ;;  %v3186_v36 = vmul.f32 0.01, %v3178_v29  ;;  %v3179_v4 = vadd.f32 %v3175_v32, %v1897_v28  ;;  %v3217_v28 = vld [vmem:[%s7174_s20 + $0x698] sm:$0xff]  ;;  %v3304_v33 = vunpack.c.l.s8.bf16 %v3220_v25 }
 0x704   : > { %vm3183_vm0 = vcmp.gt.f32.partialorder %v3179_v4, 0.0  ;;  %v3187_v37 = vmul.f32 0.01, %v3179_v4  ;;  %v3190_v41 = vsel %vm3182_vm15, %v3178_v29, %v3186_v36  ;;  %v3165_v29 = vrot.slane %v7741_v47, %v7488_v26 }
 0x705   : > { %v7757_v45 = vpack.c.bf16 %v3190_v41, %v3190_v41  ;;  %v3169_v36 = vrot.slane %v7741_v47, %v7496_v18 }
 0x706   : > { %v3191_v54 = vsel %vm3183_vm0, %v3179_v4, %v3187_v37  ;;  %v3301_v4 = vunpack.c.h.s8.bf16 %v3217_v28  ;;  %v3216_v37 = vld [vmem:[%s7174_s20 + $0x690] sm:$0xff] }
 0x707   : > { %v3195_v40 = vpack.c.bf16 %v3191_v54, %v3191_v54  ;;  %v3296_v31 = vunpack.c.l.s8.bf16 %v3216_v37 }
 0x709   : > { %3422 = vmatprep.mubr.bf16.mxu0 %v3195_v40 }
 0x70a   : > { %3423 = vmatmul.mubr.bf16.vlgmr.msra.gmra.mxu0 %v7757_v45 }
 0x70b   : > { %3473 = vmatpush1.bf16.msra.mxu0 %v3292_v43  ;;  %3504 = vmatprep.mubr.bf16.mxu0 %v3195_v40  ;;  %v3300_v43 = vunpack.c.h.s8.bf16 %v3216_v37 }
 0x70c   : > { %3474 = vmatprep.subr.bf16.mxu0 %v3289_v58 }
 0x70f   : > { %3475 = vmatpush1.bf16.msra.mxu0 %v3288_v9  ;;  %v3297_v9 = vunpack.c.l.s8.bf16 %v3217_v28 }
 0x710   : > { %3476 = vmatprep.subr.bf16.mxu0 %v3285_v48 }
 0x713   : > { %3477 = vmatpush1.bf16.msra.mxu0 %v3284_v51  ;;  %v3244_v51 = vld [vmem:[%s7174_s20 + $0x770] sm:$0xff] }
 0x714   : > { %3478 = vmatprep.subr.bf16.mxu0 %v3281_v38 }
 0x717   : > { %3479 = vmatpush1.bf16.msra.mxu0 %v3280_v12  ;;  %v3356_v12 = vunpack.c.h.s8.bf16 %v3244_v51 }
 0x718   : > { %3480 = vmatprep.subr.bf16.mxu0 %v3277_v53 }
 0x71b   : > { %3481 = vmatpush1.bf16.msra.mxu0 %v3276_v60  ;;  %v3352_v60 = vunpack.c.l.s8.bf16 %v3244_v51 }
 0x71c   : > { %3482 = vmatprep.subr.bf16.mxu0 %v3273_v50 }
 0x71f   : > { %3483 = vmatpush1.bf16.msra.mxu0 %v3272_v62 }
 0x720   : > { %3484 = vmatprep.subr.bf16.mxu0 %v3269_v63  ;;  %v3237_v63 = vld [vmem:[%s7174_s20 + $0x738] sm:$0xff] }
 0x723   : > { %3485 = vmatpush1.bf16.msra.mxu0 %v3268_v30  ;;  %v3790_v30 = vld [vmem:[%s7188_s21 + $0x68] sm:$0xf] }
 0x724   : > { %3486 = vmatprep.subr.bf16.mxu0 %v3265_v3  ;;  %v3999_v3 = vld [vmem:[%s7174_s20 + $0x868] sm:$0xff] }
 0x727   : > { %3487 = vmatpush1.bf16.msra.mxu0 %v3264_v7  ;;  %v3789_v7 = vld [vmem:[%s7188_s21 + $0x60] sm:$0xf] }
 0x728   : > { %3488 = vmatprep.subr.bf16.mxu0 %v3325_v14  ;;  %v4079_v14 = vunpack.c.h.s8.bf16 %v3999_v3 }
 0x72b   : > { %3489 = vmatpush2.bf16.msra.mxu0 %v3324_v22  ;;  %v3341_v22 = vunpack.c.h.s8.bf16 %v3237_v63 }
 0x72c   : > { %3490 = vmatprep.subr.bf16.mxu0 %v3321_v15  ;;  %v3236_v15 = vld [vmem:[%s7174_s20 + $0x730] sm:$0xff] }
 0x72d   : > { %v3340_v19 = vunpack.c.h.s8.bf16 %v3236_v15  ;;  %v3336_v25 = vunpack.c.l.s8.bf16 %v3236_v15 }
 0x72f   : > { %3491 = vmatpush2.bf16.msra.mxu0 %v3320_v49  ;;  %v4075_v49 = vunpack.c.l.s8.bf16 %v3999_v3 }
 0x730   : > { %3492 = vmatprep.subr.bf16.mxu0 %v3317_v17  ;;  %v3995_v17 = vld [vmem:[%s7174_s20 + $0x848] sm:$0xff] }
 0x733   : > { %3493 = vmatpush2.bf16.msra.mxu0 %v3316_v20  ;;  %v3337_v20 = vunpack.c.l.s8.bf16 %v3237_v63 }
 0x734   : > { %3494 = vmatprep.subr.bf16.mxu0 %v3313_v13  ;;  %v4074_v13 = vunpack.c.l.s8.bf16 %v3998_v6  ;;  %v4011_v6 = vld [vmem:[%s7174_s20 + $0x8c8] sm:$0xff] }
 0x735   : > { %v4103_v15 = vunpack.c.h.s8.bf16 %v4011_v6 }
 0x737   : > { %3495 = vmatpush2.bf16.msra.mxu0 %v3312_v23  ;;  %v4071_v23 = vunpack.c.h.s8.bf16 %v3995_v17 }
 0x738   : > { %3496 = vmatprep.subr.bf16.mxu0 %v3309_v24  ;;  %v3994_v24 = vld [vmem:[%s7174_s20 + $0x840] sm:$0xff] }
 0x739   : > { %v4070_v28 = vunpack.c.h.s8.bf16 %v3994_v24 }
 0x73b   : > { %v3146_v32 = vpop.f32.mrf.mxu1  ;;  %3497 = vmatpush2.bf16.msra.mxu0 %v3308_v27  ;;  %v3333_v27 = vunpack.c.h.s8.bf16 %v3233_v5 }
 0x73c   : > { %v3147_v35 = vadd.f32 %v3146_v32, %v7747_v56  ;;  %3498 = vmatprep.subr.bf16.mxu0 %v3305_v21  ;;  %v3232_v21 = vld [vmem:[%s7174_s20 + $0x710] sm:$0xff]  ;;  %v3991_v32 = vld [vmem:[%s7174_s20 + $0x828] sm:$0xff] }
 0x73d   : > { %v3148_v39 = vpop.f32.mrf.mxu1  ;;  %v4063_v37 = vunpack.c.h.s8.bf16 %v3991_v32 }
 0x73e   : > { %v3176_v41 = vmul.f32 %v3165_v29, %v3147_v35  ;;  %v3149_v54 = vadd.f32 %v3148_v39, %v7752_v44  ;;  %v4067_v29 = vunpack.c.l.s8.bf16 %v3995_v17  ;;  %v3329_v35 = vunpack.c.l.s8.bf16 %v3233_v5  ;;  %v3990_v39 = vld [vmem:[%s7174_s20 + $0x820] sm:$0xff]  ;;  %v4007_v5 = vld [vmem:[%s7174_s20 + $0x8a8] sm:$0xff] }
 0x73f   : > { %v3150_v40 = vpop.f32.mrf.mxu1  ;;  %3499 = vmatpush2.bf16.msra.mxu0 %v3304_v33  ;;  %v3332_v33 = vunpack.c.h.s8.bf16 %v3232_v21 }
 0x740   : > { %v3180_v58 = vadd.f32 %v3176_v41, %v7515_v42  ;;  %v3177_v8 = vmul.f32 %v3169_v36, %v3149_v54  ;;  %3500 = vmatprep.subr.bf16.mxu0 %v3301_v4  ;;  %v4066_v36 = vunpack.c.l.s8.bf16 %v3994_v24  ;;  %v3261_v4 = vld [vmem:[%s7174_s20 + $0x7f8] sm:$0xff]  ;;  %v3328_v41 = vunpack.c.l.s8.bf16 %v3232_v21  ;;  %v3260_v40 = vld [vmem:[%s7174_s20 + $0x7f0] sm:$0xff]  ;;  %v4006_v21 = vld [vmem:[%s7174_s20 + $0x8a0] sm:$0xff] }
 0x741   : > { %v3151_v56 = vpop.f32.mrf.mxu1  ;;  %v3389_v54 = vunpack.c.h.s8.bf16 %v3261_v4  ;;  %v3384_v51 = vunpack.c.l.s8.bf16 %v3260_v40 }
 0x742   : > { %vm3184_vm1 = vcmp.gt.f32.partialorder %v3180_v58, 0.0  ;;  %v3188_v48 = vmul.f32 0.01, %v3180_v58  ;;  %v3181_v47 = vadd.f32 %v3177_v8, %v7517_v46  ;;  %v3241_v46 = vld [vmem:[%s7174_s20 + $0x758] sm:$0xff]  ;;  %v3987_v8 = vld [vmem:[%s7174_s20 + $0x808] sm:$0xff]  ;;  %v3385_v56 = vunpack.c.l.s8.bf16 %v3261_v4  ;;  %v4002_v4 = vld [vmem:[%s7174_s20 + $0x880] sm:$0xff] }
 0x743   : > { %3501 = vmatpush2.bf16.msra.mxu0 %v3300_v43  ;;  %v3349_v50 = vunpack.c.h.s8.bf16 %v3241_v46  ;;  %v3345_v62 = vunpack.c.l.s8.bf16 %v3241_v46  ;;  %v4062_v43 = vunpack.c.h.s8.bf16 %v3990_v39 }
 0x744   : > { %3502 = vmatprep.subr.bf16.mxu0 %v3297_v9  ;;  %vm3185_vm2 = vcmp.gt.f32.partialorder %v3181_v47, 0.0  ;;  %v3189_v44 = vmul.f32 0.01, %v3181_v47  ;;  %v3192_v38 = vsel %vm3184_vm1, %v3180_v58, %v3188_v48  ;;  %v4059_v58 = vunpack.c.l.s8.bf16 %v3991_v32 }
 0x745   : > { %v7784_v53 = vpack.c.bf16 %v3192_v38, %v3192_v38  ;;  %v3388_v9 = vunpack.c.h.s8.bf16 %v3260_v40  ;;  %v4058_v48 = vunpack.c.l.s8.bf16 %v3990_v39  ;;  %v4091_v32 = vunpack.c.l.s8.bf16 %v4007_v5  ;;  %v3791_v40 = vld [vmem:[%s7188_s21 + $0x70] sm:$0xf] }
 0x746   : > { %v3193_v52 = vsel %vm3185_vm2, %v3181_v47, %v3189_v44  ;;  %v3257_v47 = vld [vmem:[%s7174_s20 + $0x7d8] sm:$0xff]  ;;  %v3986_v44 = vld [vmem:[%s7174_s20 + $0x800] sm:$0xff]  ;;  %v4086_v39 = vunpack.c.h.s8.bf16 %v4002_v4 }
 0x747   : > { %3503 = vmatpush2.bf16.msra.mxu0 %v3296_v31  ;;  %v3197_v42 = vpack.c.bf16 %v3193_v52, %v3193_v52  ;;  %v4055_v31 = vunpack.c.h.s8.bf16 %v3987_v8  ;;  %v3381_v38 = vunpack.c.h.s8.bf16 %v3257_v47  ;;  %v3256_v52 = vld [vmem:[%s7174_s20 + $0x7d0] sm:$0xff] }
 0x748   : > { %6276 = vmatprep.subr.msk.mxu0 %vm1634_vm9, %v3609_v2  ;;  %v3380_v46 = vunpack.c.h.s8.bf16 %v3256_v52  ;;  %v3376_v63 = vunpack.c.l.s8.bf16 %v3256_v52  ;;  %v3373_v2 = vunpack.c.h.s8.bf16 %v3253_v61 }
 0x749   : > { %3463 = vmatprep.mubr.bf16.mxu1 %v3197_v42 }
 0x74a   : > { %3464 = vmatmul.mubr.bf16.vlgmr.msra.gmra.mxu1 %v7784_v53  ;;  %3505 = vmatmul.mubr.bf16.vlgmr.msra.gmra.mxu0 %v7757_v45  ;;  %v3608_v45 = vld [vmem:[%s7188_s21 + $0x40] sm:$0xf] }
 0x74b   : > { %3514 = vmatpush1.bf16.msra.mxu1 %v3356_v12  ;;  %3545 = vmatprep.mubr.bf16.mxu1 %v3197_v42  ;;  %v4054_v42 = vunpack.c.h.s8.bf16 %v3986_v44  ;;  %v4051_v12 = vunpack.c.l.s8.bf16 %v3987_v8 }
 0x74c   : > { %3515 = vmatprep.subr.bf16.mxu1 %v3353_v59  ;;  %3711 = vmatprep.mubr.f32.mxu0 %v6931_v34  ;;  %v4015_v59 = vld [vmem:[%s7174_s20 + $0x8e8] sm:$0xff] }
 0x74d   : > { %6277 = vmatpush1.msk.msra.mxu0 %vm1634_vm9, %v3608_v45  ;;  %v3252_v45 = vld [vmem:[%s7174_s20 + $0x7b0] sm:$0xff]  ;;  %v4107_v3 = vunpack.c.l.s8.bf16 %v4015_v59 }
 0x74e   : > { %6283 = vmatprep.subr.msk.mxu0 %vm1634_vm9, %v3790_v30 }
 0x74f   : > { %3516 = vmatpush1.bf16.msra.mxu1 %v3352_v60  ;;  %v3377_v60 = vunpack.c.l.s8.bf16 %v3257_v47 }
 0x750   : > { %3517 = vmatprep.subr.bf16.mxu1 %v3349_v50  ;;  %v4050_v50 = vunpack.c.l.s8.bf16 %v3986_v44 }
 0x752   : > { %6278 = vmatmul.mubr.msk.f32.vlgmr.msra.gmra.mxu0 %vm1630_vm10, %v7186_v1 }
 0x753   : > { %3518 = vmatpush1.bf16.msra.mxu1 %v3348_v11  ;;  %6284 = vmatpush1.msk.msra.mxu0 %vm1634_vm9, %v3789_v7  ;;  %v4111_v11 = vunpack.c.h.s8.bf16 %v4015_v59  ;;  %v3372_v7 = vunpack.c.h.s8.bf16 %v3252_v45 }
 0x754   : > { %3519 = vmatprep.subr.bf16.mxu1 %v3345_v62  ;;  %3892 = vmatprep.mubr.f32.mxu0 %v6931_v34  ;;  %v4014_v62 = vld [vmem:[%s7174_s20 + $0x8e0] sm:$0xff] }
 0x755   : > { %4178 = vmatprep.subr.bf16.mxu0 %v4079_v14  ;;  %v4110_v30 = vunpack.c.h.s8.bf16 %v4014_v62  ;;  %v3369_v14 = vunpack.c.l.s8.bf16 %v3253_v61 }
 0x756   : > { %6285 = vmatmul.mubr.msk.f32.vlgmr.msra.gmra.mxu0 %vm1630_vm10, %v7186_v1 }
 0x757   : > { %3520 = vmatpush1.bf16.msra.mxu1 %v3344_v10  ;;  %4179 = vmatpush1.bf16.msra.mxu0 %v4078_v16  ;;  %v4106_v10 = vunpack.c.l.s8.bf16 %v4014_v62  ;;  %v4010_v16 = vld [vmem:[%s7174_s20 + $0x8c0] sm:$0xff] }
 0x758   : > { %3521 = vmatprep.subr.bf16.mxu1 %v3341_v22  ;;  %4180 = vmatprep.subr.bf16.mxu0 %v4075_v49  ;;  %v3249_v22 = vld [vmem:[%s7174_s20 + $0x798] sm:$0xff]  ;;  %v3368_v49 = vunpack.c.l.s8.bf16 %v3252_v45 }
 0x759   : > { %v3365_v17 = vunpack.c.h.s8.bf16 %v3249_v22  ;;  %v3361_v24 = vunpack.c.l.s8.bf16 %v3249_v22 }
 0x75b   : > { %3522 = vmatpush1.bf16.msra.mxu1 %v3340_v19  ;;  %4181 = vmatpush1.bf16.msra.mxu0 %v4074_v13  ;;  %v3248_v19 = vld [vmem:[%s7174_s20 + $0x790] sm:$0xff]  ;;  %v4099_v13 = vunpack.c.l.s8.bf16 %v4011_v6 }
 0x75c   : > { %3523 = vmatprep.subr.bf16.mxu1 %v3337_v20  ;;  %4182 = vmatprep.subr.bf16.mxu0 %v4071_v23  ;;  %v4102_v20 = vunpack.c.h.s8.bf16 %v4010_v16  ;;  %v3364_v23 = vunpack.c.h.s8.bf16 %v3248_v19 }
 0x75f   : > { %3524 = vmatpush1.bf16.msra.mxu1 %v3336_v25  ;;  %4183 = vmatpush1.bf16.msra.mxu0 %v4070_v28  ;;  %v4098_v25 = vunpack.c.l.s8.bf16 %v4010_v16  ;;  %v3360_v28 = vunpack.c.l.s8.bf16 %v3248_v19 }
 0x760   : > { %3525 = vmatprep.subr.bf16.mxu1 %v3333_v27  ;;  %4184 = vmatprep.subr.bf16.mxu0 %v4067_v29  ;;  %v4095_v27 = vunpack.c.h.s8.bf16 %v4007_v5  ;;  %v4094_v29 = vunpack.c.h.s8.bf16 %v4006_v21 }
 0x763   : > { %3526 = vmatpush1.bf16.msra.mxu1 %v3332_v33  ;;  %4185 = vmatpush1.bf16.msra.mxu0 %v4066_v36  ;;  %v4090_v33 = vunpack.c.l.s8.bf16 %v4006_v21 }
 0x764   : > { %3527 = vmatprep.subr.bf16.mxu1 %v3329_v35  ;;  %4186 = vmatprep.subr.bf16.mxu0 %v4063_v37  ;;  %v4003_v35 = vld [vmem:[%s7174_s20 + $0x888] sm:$0xff]  ;;  %v3611_v37 = vld [vmem:[%s7188_s21 + $0x58] sm:$0xf] }
 0x765   : > { %v4087_v36 = vunpack.c.h.s8.bf16 %v4003_v35 }
 0x767   : > { %3528 = vmatpush1.bf16.msra.mxu1 %v3328_v41  ;;  %4187 = vmatpush1.bf16.msra.mxu0 %v4062_v43  ;;  %v3610_v41 = vld [vmem:[%s7188_s21 + $0x50] sm:$0xf]  ;;  %v4082_v43 = vunpack.c.l.s8.bf16 %v4002_v4 }
 0x768   : > { %3529 = vmatprep.subr.bf16.mxu1 %v3389_v54  ;;  %4188 = vmatprep.subr.bf16.mxu0 %v4059_v58  ;;  %v4083_v54 = vunpack.c.l.s8.bf16 %v4003_v35  ;;  %v4031_v58 = vld [vmem:[%s7174_s20 + $0x968] sm:$0xff] }
 0x769   : > { %v4143_v8 = vunpack.c.h.s8.bf16 %v4031_v58 }
 0x76b   : > { %3530 = vmatpush2.bf16.msra.mxu1 %v3388_v9  ;;  %4189 = vmatpush1.bf16.msra.mxu0 %v4058_v48  ;;  %v4030_v9 = vld [vmem:[%s7174_s20 + $0x960] sm:$0xff] }
 0x76c   : > { %3531 = vmatprep.subr.bf16.mxu1 %v3385_v56  ;;  %4190 = vmatprep.subr.bf16.mxu0 %v4055_v31  ;;  %v7849_v56 = vld [vmem:[%s7174_s20 + $0x878] sm:$0xff]  ;;  %v4142_v48 = vunpack.c.h.s8.bf16 %v4030_v9  ;;  %v4139_v31 = vunpack.c.l.s8.bf16 %v4031_v58  ;;  %v4138_v44 = vunpack.c.l.s8.bf16 %v4030_v9 }
 0x76d   : > { %v4081_v47 = vunpack.c.h.s8.bf16 %v7849_v56 }
 0x76f   : > { %3532 = vmatpush2.bf16.msra.mxu1 %v3384_v51  ;;  %4191 = vmatpush1.bf16.msra.mxu0 %v4054_v42 }
 0x770   : > { %3533 = vmatprep.subr.bf16.mxu1 %v3381_v38  ;;  %4192 = vmatprep.subr.bf16.mxu0 %v4051_v12  ;;  %v4026_v38 = vld [vmem:[%s7174_s20 + $0x940] sm:$0xff]  ;;  %v4023_v12 = vld [vmem:[%s7174_s20 + $0x928] sm:$0xff] }
 0x771   : > { %v4134_v52 = vunpack.c.h.s8.bf16 %v4026_v38  ;;  %v4127_v59 = vunpack.c.h.s8.bf16 %v4023_v12 }
 0x773   : > { %3534 = vmatpush2.bf16.msra.mxu1 %v3380_v46  ;;  %4193 = vmatpush1.bf16.msra.mxu0 %v4050_v50  ;;  %v4022_v46 = vld [vmem:[%s7174_s20 + $0x920] sm:$0xff]  ;;  %v4123_v50 = vunpack.c.l.s8.bf16 %v4023_v12 }
 0x774   : > { %3535 = vmatprep.subr.bf16.mxu1 %v3377_v60  ;;  %4194 = vmatprep.subr.bf16.mxu0 %v4111_v11  ;;  %v4126_v60 = vunpack.c.h.s8.bf16 %v4022_v46  ;;  %v4122_v61 = vunpack.c.l.s8.bf16 %v4022_v46  ;;  %v4019_v11 = vld [vmem:[%s7174_s20 + $0x908] sm:$0xff] }
 0x775   : > { %v4119_v62 = vunpack.c.h.s8.bf16 %v4019_v11  ;;  %v4115_v45 = vunpack.c.l.s8.bf16 %v4019_v11  ;;  %v4000_v11 = vld [vmem:[%s7174_s20 + $0x870] sm:$0xff] }
 0x777   : > { %3536 = vmatpush2.bf16.msra.mxu1 %v3376_v63  ;;  %4195 = vmatpush2.bf16.msra.mxu0 %v4110_v30  ;;  %v4018_v63 = vld [vmem:[%s7174_s20 + $0x900] sm:$0xff] }
 0x778   : > { %3537 = vmatprep.subr.bf16.mxu1 %v3373_v2  ;;  %4196 = vmatprep.subr.bf16.mxu0 %v4107_v3  ;;  %v4118_v2 = vunpack.c.h.s8.bf16 %v4018_v63  ;;  %v4114_v30 = vunpack.c.l.s8.bf16 %v4018_v63  ;;  %v4047_v3 = vld [vmem:[%s7174_s20 + $0x9e8] sm:$0xff] }
 0x779   : > { %v4175_v6 = vunpack.c.h.s8.bf16 %v4047_v3 }
 0x77b   : > { %3538 = vmatpush2.bf16.msra.mxu1 %v3372_v7  ;;  %4197 = vmatpush2.bf16.msra.mxu0 %v4106_v10  ;;  %v4046_v7 = vld [vmem:[%s7174_s20 + $0x9e0] sm:$0xff]  ;;  %v4171_v10 = vunpack.c.l.s8.bf16 %v4047_v3  ;;  %v4077_v3 = vunpack.c.l.s8.bf16 %v7849_v56 }
 0x77c   : > { %3539 = vmatprep.subr.bf16.mxu1 %v3369_v14  ;;  %4198 = vmatprep.subr.bf16.mxu0 %v4103_v15  ;;  %v4174_v14 = vunpack.c.h.s8.bf16 %v4046_v7  ;;  %v4170_v22 = vunpack.c.l.s8.bf16 %v4046_v7  ;;  %v4043_v15 = vld [vmem:[%s7174_s20 + $0x9c8] sm:$0xff]  ;;  %v4076_v7 = vunpack.c.l.s8.bf16 %v4000_v11 }
 0x77d   : > { %v4167_v16 = vunpack.c.h.s8.bf16 %v4043_v15  ;;  %v4163_v19 = vunpack.c.l.s8.bf16 %v4043_v15 }
 0x77f   : > { %3540 = vmatpush2.bf16.msra.mxu1 %v3368_v49  ;;  %4199 = vmatpush2.bf16.msra.mxu0 %v4102_v20  ;;  %v4042_v49 = vld [vmem:[%s7174_s20 + $0x9c0] sm:$0xff] }
 0x780   : > { %3541 = vmatprep.subr.bf16.mxu1 %v3365_v17  ;;  %4200 = vmatprep.subr.bf16.mxu0 %v4099_v13  ;;  %v4166_v17 = vunpack.c.h.s8.bf16 %v4042_v49  ;;  %v4162_v20 = vunpack.c.l.s8.bf16 %v4042_v49  ;;  %v4039_v13 = vld [vmem:[%s7174_s20 + $0x9a8] sm:$0xff] }
 0x781   : > { %v4159_v5 = vunpack.c.h.s8.bf16 %v4039_v13 }
 0x783   : > { %3542 = vmatpush2.bf16.msra.mxu1 %v3364_v23  ;;  %4201 = vmatpush2.bf16.msra.mxu0 %v4098_v25  ;;  %v4038_v23 = vld [vmem:[%s7174_s20 + $0x9a0] sm:$0xff]  ;;  %v4155_v25 = vunpack.c.l.s8.bf16 %v4039_v13  ;;  %v3989_v13 = vld [vmem:[%s7174_s20 + $0x818] sm:$0xff] }
 0x784   : > { %3543 = vmatprep.subr.bf16.mxu1 %v3361_v24  ;;  %4202 = vmatprep.subr.bf16.mxu0 %v4095_v27  ;;  %v4158_v24 = vunpack.c.h.s8.bf16 %v4038_v23  ;;  %v4154_v21 = vunpack.c.l.s8.bf16 %v4038_v23  ;;  %v4057_v23 = vunpack.c.h.s8.bf16 %v3989_v13 }
 0x787   : > { %3544 = vmatpush2.bf16.msra.mxu1 %v3360_v28  ;;  %4203 = vmatpush2.bf16.msra.mxu0 %v4094_v29  ;;  %v4035_v29 = vld [vmem:[%s7174_s20 + $0x988] sm:$0xff] }
 0x788   : > { %4204 = vmatprep.subr.bf16.mxu0 %v4091_v32  ;;  %6279 = vmatprep.subr.msk.mxu1 %vm1634_vm9, %v3611_v37  ;;  %v4151_v32 = vunpack.c.h.s8.bf16 %v4035_v29  ;;  %v4147_v37 = vunpack.c.l.s8.bf16 %v4035_v29 }
 0x78a   : > { %3546 = vmatmul.mubr.bf16.vlgmr.msra.gmra.mxu1 %v7784_v53  ;;  %v3792_v53 = vld [vmem:[%s7188_s21 + $0x78] sm:$0xf] }
 0x78b   : > { %3782 = vmatprep.mubr.f32.mxu1 %v6931_v34  ;;  %4205 = vmatpush2.bf16.msra.mxu0 %v4090_v33  ;;  %v4034_v33 = vld [vmem:[%s7174_s20 + $0x980] sm:$0xff] }
 0x78c   : > { %4206 = vmatprep.subr.bf16.mxu0 %v4087_v36  ;;  %6280 = vmatpush1.msk.msra.mxu1 %vm1634_vm9, %v3610_v41  ;;  %v4150_v36 = vunpack.c.h.s8.bf16 %v4034_v33  ;;  %v7869_v41 = vld [vmem:[%s7174_s20 + $0x978] sm:$0xff] }
 0x78d   : > { %6286 = vmatprep.subr.msk.mxu1 %vm1634_vm9, %v3792_v53  ;;  %v4145_v53 = vunpack.c.h.s8.bf16 %v7869_v41 }
 0x78f   : > { %4207 = vmatpush2.bf16.msra.mxu0 %v4086_v39  ;;  %v4146_v39 = vunpack.c.l.s8.bf16 %v4034_v33 }
 0x790   : > { %4208 = vmatprep.subr.bf16.mxu0 %v4083_v54  ;;  %v7873_v54 = vld [vmem:[%s7188_s21 + $0x27] ss:$8 sm:$0xf] }
 0x792   : > { %6281 = vmatmul.mubr.msk.f32.vlgmr.msra.gmra.mxu1 %vm1630_vm10, %v7186_v1 }
 0x793   : > { %6287 = vmatpush1.msk.msra.mxu1 %vm1634_vm9, %v3791_v40  ;;  %3963 = vmatprep.mubr.f32.mxu1 %v6931_v34  ;;  %v4027_v34 = vld [vmem:[%s7174_s20 + $0x948] sm:$0xff] }
 0x794   : > { %4219 = vmatprep.subr.bf16.mxu1 %v4143_v8  ;;  %4209 = vmatpush2.bf16.msra.mxu0 %v4082_v43  ;;  %v4135_v51 = vunpack.c.h.s8.bf16 %v4027_v34  ;;  %v4131_v42 = vunpack.c.l.s8.bf16 %v4027_v34  ;;  %v7876_v40 = vld [vmem:[%s7188_s21 + $0x25] ss:$8 sm:$0xf]  ;;  %v3558_v43 = vrot.slane %v7873_v54, %v7528_v55 }
 0x795   : > { %4260 = vmatprep.subr.bf16.mxu0 %v4081_v47  ;;  %v3562_v47 = vrot.slane %v7873_v54, %v7534_v57 }
 0x796   : > { %6288 = vmatmul.mubr.msk.f32.vlgmr.msra.gmra.mxu1 %vm1630_vm10, %v7186_v1  ;;  %v4130_v1 = vunpack.c.l.s8.bf16 %v4026_v38  ;;  %v3587_v38 = vrot.slane %v7876_v40, %v7534_v57 }
 0x797   : > { %4220 = vmatpush1.bf16.msra.mxu1 %v4142_v48  ;;  %v3583_v48 = vrot.slane %v7876_v40, %v7528_v55 }
 0x798   : > { %4221 = vmatprep.subr.bf16.mxu1 %v4139_v31 }
 0x79b   : > { %4222 = vmatpush1.bf16.msra.mxu1 %v4138_v44 }
 0x79c   : > { %4223 = vmatprep.subr.bf16.mxu1 %v4135_v51 }
 0x79f   : > { %4224 = vmatpush1.bf16.msra.mxu1 %v4134_v52 }
 0x7a0   : > { %4225 = vmatprep.subr.bf16.mxu1 %v4131_v42 }
 0x7a3   : > { %4226 = vmatpush1.bf16.msra.mxu1 %v4130_v1 }
 0x7a4   : > { %4227 = vmatprep.subr.bf16.mxu1 %v4127_v59 }
 0x7a7   : > { %4228 = vmatpush1.bf16.msra.mxu1 %v4126_v60 }
 0x7a8   : > { %4229 = vmatprep.subr.bf16.mxu1 %v4123_v50  ;;  %v6648_v50 = vld [vmem:[#allocation4 + $0x10] sm:$0xff] }
 0x7ab   : > { %4230 = vmatpush1.bf16.msra.mxu1 %v4122_v61 }
 0x7ac   : > { %4231 = vmatprep.subr.bf16.mxu1 %v4119_v62  ;;  %v6649_v62 = vld [vmem:[#allocation4] sm:$0xff] }
 0x7af   : > { %4232 = vmatpush1.bf16.msra.mxu1 %v4118_v2 }
 0x7b0   : > { %4233 = vmatprep.subr.bf16.mxu1 %v4115_v45  ;;  %v4080_v45 = vunpack.c.h.s8.bf16 %v4000_v11  ;;  %v7925_v11 = vld [vmem:[%s7188_s21 + $0x44] ss:$8 sm:$0xf] }
 0x7b3   : > { %4234 = vmatpush1.bf16.msra.mxu1 %v4114_v30 }
 0x7b4   : > { %4235 = vmatprep.subr.bf16.mxu1 %v4175_v6  ;;  %v3997_v6 = vld [vmem:[%s7174_s20 + $0x858] sm:$0xff] }
 0x7b5   : > { %v4069_v15 = vunpack.c.l.s8.bf16 %v3997_v6 }
 0x7b7   : > { %4236 = vmatpush2.bf16.msra.mxu1 %v4174_v14  ;;  %v4073_v14 = vunpack.c.h.s8.bf16 %v3997_v6 }
 0x7b8   : > { %4237 = vmatprep.subr.bf16.mxu1 %v4171_v10  ;;  %v3996_v10 = vld [vmem:[%s7174_s20 + $0x850] sm:$0xff] }
 0x7b9   : > { %v4068_v56 = vunpack.c.l.s8.bf16 %v3996_v10 }
 0x7bb   : > { %4238 = vmatpush2.bf16.msra.mxu1 %v4170_v22  ;;  %v4072_v22 = vunpack.c.h.s8.bf16 %v3996_v10 }
 0x7bc   : > { %4239 = vmatprep.subr.bf16.mxu1 %v4167_v16  ;;  %v3993_v16 = vld [vmem:[%s7174_s20 + $0x838] sm:$0xff] }
 0x7bd   : > { %v4065_v49 = vunpack.c.h.s8.bf16 %v3993_v16 }
 0x7bf   : > { %4240 = vmatpush2.bf16.msra.mxu1 %v4166_v17  ;;  %v3992_v17 = vld [vmem:[%s7174_s20 + $0x830] sm:$0xff] }
 0x7c0   : > { %4241 = vmatprep.subr.bf16.mxu1 %v4163_v19  ;;  %v4064_v19 = vunpack.c.h.s8.bf16 %v3992_v17 }
 0x7c3   : > { %4242 = vmatpush2.bf16.msra.mxu1 %v4162_v20  ;;  %v4061_v20 = vunpack.c.l.s8.bf16 %v3993_v16 }
 0x7c4   : > { %4243 = vmatprep.subr.bf16.mxu1 %v4159_v5  ;;  %v4060_v5 = vunpack.c.l.s8.bf16 %v3992_v17 }
 0x7c7   : > { %4244 = vmatpush2.bf16.msra.mxu1 %v4158_v24  ;;  %v3988_v24 = vld [vmem:[%s7174_s20 + $0x810] sm:$0xff] }
 0x7c8   : > { %4245 = vmatprep.subr.bf16.mxu1 %v4155_v25  ;;  %v4056_v25 = vunpack.c.h.s8.bf16 %v3988_v24 }
 0x7ca   : > { %v3424_v27 = vpop.f32.mrf.mxu0 }
 0x7cb   : > { %4246 = vmatpush2.bf16.msra.mxu1 %v4154_v21  ;;  %v4017_v21 = vld [vmem:[%s7174_s20 + $0x8f8] sm:$0xff] }
 0x7cc   : > { %v3426_v28 = vpop.f32.mrf.mxu0  ;;  %4247 = vmatprep.subr.bf16.mxu1 %v4151_v32  ;;  %v4113_v29 = vunpack.c.h.s8.bf16 %v4017_v21  ;;  %v4016_v32 = vld [vmem:[%s7174_s20 + $0x8f0] sm:$0xff] }
 0x7cd   : > { %v4112_v33 = vunpack.c.h.s8.bf16 %v4016_v32 }
 0x7ce   : > { %v3428_v35 = vpop.f32.mrf.mxu0 }
 0x7cf   : > { %4248 = vmatpush2.bf16.msra.mxu1 %v4150_v36  ;;  %v4109_v35 = vunpack.c.l.s8.bf16 %v4017_v21  ;;  %v4013_v36 = vld [vmem:[%s7174_s20 + $0x8d8] sm:$0xff] }
 0x7d0   : > { %v3429_v4 = vpop.f32.mrf.mxu0  ;;  %4249 = vmatprep.subr.bf16.mxu1 %v4147_v37  ;;  %v4105_v37 = vunpack.c.h.s8.bf16 %v4013_v36 }
 0x7d1   : > { %v4108_v4 = vunpack.c.l.s8.bf16 %v4016_v32  ;;  %v4029_v32 = vld [vmem:[%s7174_s20 + $0x958] sm:$0xff] }
 0x7d3   : > { %4250 = vmatpush2.bf16.msra.mxu1 %v4146_v39  ;;  %v4012_v39 = vld [vmem:[%s7174_s20 + $0x8d0] sm:$0xff] }
 0x7d4   : > { %4301 = vmatprep.subr.bf16.mxu1 %v4145_v53  ;;  %v4104_v53 = vunpack.c.h.s8.bf16 %v4012_v39 }
 0x80a   : > { %v3465_v58 = vpop.f32.mrf.mxu1  ;;  %v7880_v8 = vpop.f32.mrf.mxu0 }
 0x80b   : > { %v3466_v9 = vadd.f32 %v3465_v58, %v3424_v27  ;;  %v4053_v27 = vunpack.c.l.s8.bf16 %v3989_v13  ;;  %v4009_v58 = vld [vmem:[%s7174_s20 + $0x8b8] sm:$0xff] }
 0x80c   : > { %v3467_v31 = vpop.f32.mrf.mxu1  ;;  %v7886_v44 = vpop.f32.mrf.mxu0 }
 0x80d   : > { %v3575_v34 = vmul.f32 %v3558_v43, %v3466_v9  ;;  %v3468_v51 = vadd.f32 %v3467_v31, %v3426_v28  ;;  %v4052_v28 = vunpack.c.l.s8.bf16 %v3988_v24  ;;  %v4101_v43 = vunpack.c.l.s8.bf16 %v4013_v36 }
 0x80e   : > { %v3469_v52 = vpop.f32.mrf.mxu1  ;;  %v3510_v42 = vpop.f32.mrf.mxu0  ;;  %v4100_v9 = vunpack.c.l.s8.bf16 %v4012_v39  ;;  %v4137_v36 = vunpack.c.h.s8.bf16 %v4029_v32  ;;  %v4400_v39 = vld [vmem:[%s7174_s20 + $0xa68] sm:$0xff] }
 0x80f   : > { %v3600_v1 = vadd.f32 %v3583_v48, %v3575_v34  ;;  %v3576_v12 = vmul.f32 %v3562_v47, %v3468_v51  ;;  %v4097_v48 = vunpack.c.h.s8.bf16 %v4009_v58  ;;  %v4008_v47 = vld [vmem:[%s7174_s20 + $0x8b0] sm:$0xff]  ;;  %v4093_v34 = vunpack.c.l.s8.bf16 %v4009_v58  ;;  %v4005_v51 = vld [vmem:[%s7174_s20 + $0x898] sm:$0xff] }
 0x810   : > { %v3470_v59 = vpop.f32.mrf.mxu1  ;;  %v3511_v46 = vpop.f32.mrf.mxu0  ;;  %v4096_v31 = vunpack.c.h.s8.bf16 %v4008_v47  ;;  %v4092_v52 = vunpack.c.l.s8.bf16 %v4008_v47  ;;  %v4085_v6 = vunpack.c.l.s8.bf16 %v4005_v51  ;;  %v4480_v58 = vunpack.c.h.s8.bf16 %v4400_v39 }
 0x811   : > { %v3601_v60 = vadd.f32 %v3587_v38, %v3576_v12  ;;  %v7890_v61 = vadd.f32 %v6648_v50, %v3600_v1  ;;  %v3566_v38 = vrot.slane %v7873_v54, %v7488_v26  ;;  %v4089_v1 = vunpack.c.h.s8.bf16 %v4005_v51  ;;  %v4004_v12 = vld [vmem:[%s7174_s20 + $0x890] sm:$0xff] }
 0x812   : > { %v3591_v46 = vrot.slane %v7876_v40, %v7488_v26  ;;  %v4084_v16 = vunpack.c.l.s8.bf16 %v4004_v12 }
 0x813   : > { %v7893_v63 = vadd.f32 %v6649_v62, %v3601_v60  ;;  %v7899_v30 = vpack.c.bf16 %v7890_v61, %v7890_v61  ;;  %v3570_v60 = vrot.slane %v7873_v54, %v7496_v18  ;;  %v3626_v54 = vrot.slane %v7925_v11, %v7488_v26 }
 0x815   : > { %v3983_v2 = vpack.c.bf16 %v7893_v63, %v7893_v63 }
 0x817   : > { %4210 = vmatprep.mubr.bf16.mxu0 %v3983_v2 }
 0x818   : > { %4211 = vmatmul.mubr.bf16.vlgmr.msra.gmra.mxu0 %v7899_v30 }
 0x819   : > { %4261 = vmatpush1.bf16.msra.mxu0 %v4080_v45  ;;  %4292 = vmatprep.mubr.bf16.mxu0 %v3983_v2  ;;  %v3595_v45 = vrot.slane %v7876_v40, %v7496_v18  ;;  %v6650_v40 = vld [vmem:[#allocation4 + $0x18] sm:$0xff] }
 0x81a   : > { %4262 = vmatprep.subr.bf16.mxu0 %v4077_v3  ;;  %v4088_v3 = vunpack.c.h.s8.bf16 %v4004_v12 }
 0x81d   : > { %4263 = vmatpush1.bf16.msra.mxu0 %v4076_v7 }
 0x81e   : > { %4264 = vmatprep.subr.bf16.mxu0 %v4073_v14 }
 0x821   : > { %4265 = vmatpush1.bf16.msra.mxu0 %v4072_v22  ;;  %v6282_v22 = vld [vmem:[%s7188_s21 + $0x64] ss:$8 sm:$0xf] }
 0x822   : > { %4266 = vmatprep.subr.bf16.mxu0 %v4069_v15 }
 0x825   : > { %4267 = vmatpush1.bf16.msra.mxu0 %v4068_v56 }
 0x826   : > { %4268 = vmatprep.subr.bf16.mxu0 %v4065_v49  ;;  %v4032_v49 = vld [vmem:[%s7174_s20 + $0x970] sm:$0xff] }
 0x829   : > { %4269 = vmatpush1.bf16.msra.mxu0 %v4064_v19  ;;  %v6651_v19 = vld [vmem:[#allocation4 + $0x8] sm:$0xff] }
 0x82a   : > { %4270 = vmatprep.subr.bf16.mxu0 %v4061_v20 }
 0x82d   : > { %4271 = vmatpush1.bf16.msra.mxu0 %v4060_v5  ;;  %v3807_v5 = vrot.slane %v6282_v22, %v7488_v26  ;;  %v4388_v22 = vld [vmem:[%s7174_s20 + $0xa08] sm:$0xff] }
 0x82e   : > { %4272 = vmatprep.subr.bf16.mxu0 %v4057_v23 }
 0x831   : > { %4273 = vmatpush1.bf16.msra.mxu0 %v4056_v25  ;;  %v4144_v25 = vunpack.c.h.s8.bf16 %v4032_v49 }
 0x832   : > { %4274 = vmatprep.subr.bf16.mxu0 %v4053_v27 }
 0x835   : > { %4275 = vmatpush1.bf16.msra.mxu0 %v4052_v28  ;;  %v4141_v28 = vunpack.c.l.s8.bf16 %v7869_v41 }
 0x836   : > { %4276 = vmatprep.subr.bf16.mxu0 %v4113_v29 }
 0x839   : > { %4277 = vmatpush2.bf16.msra.mxu0 %v4112_v33 }
 0x83a   : > { %4278 = vmatprep.subr.bf16.mxu0 %v4109_v35  ;;  %v4140_v35 = vunpack.c.l.s8.bf16 %v4032_v49  ;;  %v4456_v49 = vunpack.c.h.s8.bf16 %v4388_v22 }
 0x83d   : > { %4279 = vmatpush2.bf16.msra.mxu0 %v4108_v4  ;;  %v4028_v4 = vld [vmem:[%s7174_s20 + $0x950] sm:$0xff] }
 0x83e   : > { %4280 = vmatprep.subr.bf16.mxu0 %v4105_v37  ;;  %v4136_v41 = vunpack.c.h.s8.bf16 %v4028_v4  ;;  %v4133_v37 = vunpack.c.l.s8.bf16 %v4029_v32  ;;  %v4132_v47 = vunpack.c.l.s8.bf16 %v4028_v4 }
 0x841   : > { %4281 = vmatpush2.bf16.msra.mxu0 %v4104_v53  ;;  %v4399_v53 = vld [vmem:[%s7174_s20 + $0xa60] sm:$0xff] }
 0x842   : > { %4282 = vmatprep.subr.bf16.mxu0 %v4101_v43  ;;  %v4025_v43 = vld [vmem:[%s7174_s20 + $0x938] sm:$0xff]  ;;  %v4475_v51 = vunpack.c.l.s8.bf16 %v4399_v53 }
 0x845   : > { %4283 = vmatpush2.bf16.msra.mxu0 %v4100_v9  ;;  %v4479_v9 = vunpack.c.h.s8.bf16 %v4399_v53 }
 0x846   : > { %4284 = vmatprep.subr.bf16.mxu0 %v4097_v48  ;;  %v4476_v48 = vunpack.c.l.s8.bf16 %v4400_v39 }
 0x849   : > { %4285 = vmatpush2.bf16.msra.mxu0 %v4096_v31  ;;  %v4129_v31 = vunpack.c.h.s8.bf16 %v4025_v43 }
 0x84a   : > { %v3547_v42 = vpop.f32.mrf.mxu1  ;;  %4286 = vmatprep.subr.bf16.mxu0 %v4093_v34  ;;  %v4024_v34 = vld [vmem:[%s7174_s20 + $0x930] sm:$0xff] }
 0x84b   : > { %v3548_v59 = vadd.f32 %v3547_v42, %v7880_v8  ;;  %v4128_v42 = vunpack.c.h.s8.bf16 %v4024_v34 }
 0x84c   : > { %v3549_v50 = vpop.f32.mrf.mxu1 }
 0x84d   : > { %v3577_v62 = vmul.f32 %v3566_v38, %v3548_v59  ;;  %v3550_v2 = vadd.f32 %v3549_v50, %v7886_v44  ;;  %4287 = vmatpush2.bf16.msra.mxu0 %v4092_v52  ;;  %v3630_v44 = vrot.slane %v7925_v11, %v7496_v18  ;;  %v4395_v52 = vld [vmem:[%s7174_s20 + $0xa40] sm:$0xff]  ;;  %v4021_v59 = vld [vmem:[%s7174_s20 + $0x918] sm:$0xff]  ;;  %v4124_v50 = vunpack.c.l.s8.bf16 %v4024_v34 }
 0x84e   : > { %v3551_v8 = vpop.f32.mrf.mxu1  ;;  %4288 = vmatprep.subr.bf16.mxu0 %v4089_v1  ;;  %v4125_v1 = vunpack.c.l.s8.bf16 %v4025_v43  ;;  %v4471_v12 = vunpack.c.h.s8.bf16 %v4395_v52  ;;  %v4041_v43 = vld [vmem:[%s7174_s20 + $0x9b8] sm:$0xff] }
 0x84f   : > { %v3602_v7 = vadd.f32 %v3591_v46, %v3577_v62  ;;  %v3578_v14 = vmul.f32 %v3570_v60, %v3550_v2  ;;  %v4392_v60 = vld [vmem:[%s7174_s20 + $0xa28] sm:$0xff]  ;;  %v4121_v62 = vunpack.c.h.s8.bf16 %v4021_v59  ;;  %v4020_v2 = vld [vmem:[%s7174_s20 + $0x910] sm:$0xff]  ;;  %v4391_v8 = vld [vmem:[%s7174_s20 + $0xa20] sm:$0xff] }
 0x850   : > { %v3552_v10 = vpop.f32.mrf.mxu1 }
 0x851   : > { %v3603_v15 = vadd.f32 %v3595_v45, %v3578_v14  ;;  %4289 = vmatpush2.bf16.msra.mxu0 %v4088_v3  ;;  %v7935_v56 = vadd.f32 %v6650_v40, %v3602_v7  ;;  %v4467_v45 = vunpack.c.l.s8.bf16 %v4395_v52  ;;  %v4464_v3 = vunpack.c.h.s8.bf16 %v4392_v60 }
 0x852   : > { %4290 = vmatprep.subr.bf16.mxu0 %v4085_v6  ;;  %v3784_v17 = vpop.f32.mrf.mxu1  ;;  %v4120_v6 = vunpack.c.h.s8.bf16 %v4020_v2  ;;  %v4117_v7 = vunpack.c.l.s8.bf16 %v4021_v59  ;;  %v4463_v14 = vunpack.c.h.s8.bf16 %v4391_v8  ;;  %v4460_v10 = vunpack.c.l.s8.bf16 %v4392_v60  ;;  %v4408_v59 = vld [vmem:[%s7174_s20 + $0xaa8] sm:$0xff] }
 0x853   : > { %v7938_v20 = vadd.f32 %v6651_v19, %v3603_v15  ;;  %v7940_v13 = vadd.f32 %v3784_v17, %v3626_v54  ;;  %v7949_v21 = vpack.c.bf16 %v7935_v56, %v7935_v56  ;;  %v4049_v54 = vld [vmem:[%s7174_s20 + $0x9f8] sm:$0xff]  ;;  %v4116_v15 = vunpack.c.l.s8.bf16 %v4020_v2  ;;  %v4387_v17 = vld [vmem:[%s7174_s20 + $0xa00] sm:$0xff] }
 0x854   : > { %v3786_v23 = vpop.f32.mrf.mxu1  ;;  %v4459_v40 = vunpack.c.l.s8.bf16 %v4391_v8  ;;  %v4157_v52 = vunpack.c.l.s8.bf16 %v4041_v43  ;;  %v4496_v2 = vunpack.c.h.s8.bf16 %v4408_v59 }
 0x855   : > { %4291 = vmatpush2.bf16.msra.mxu0 %v4084_v16  ;;  %v3985_v24 = vpack.c.bf16 %v7938_v20, %v7938_v20  ;;  %v7945_v27 = vadd.f32 %v3786_v23, %v3630_v44  ;;  %v4177_v16 = vunpack.c.h.s8.bf16 %v4049_v54  ;;  %v4048_v44 = vld [vmem:[%s7174_s20 + $0x9f0] sm:$0xff]  ;;  %v4455_v23 = vunpack.c.h.s8.bf16 %v4387_v17 }
 0x856   : > { %v3965_v29 = vpop.f32.mrf.mxu1  ;;  %4579 = vmatprep.subr.bf16.mxu0 %v4480_v58  ;;  %v4176_v19 = vunpack.c.h.s8.bf16 %v4048_v44 }
 0x857   : > { %4251 = vmatprep.mubr.bf16.mxu1 %v3985_v24  ;;  %v7953_v33 = vadd.f32 %v3965_v29, %v3807_v5  ;;  %v4173_v5 = vunpack.c.l.s8.bf16 %v4049_v54  ;;  %v4172_v29 = vunpack.c.l.s8.bf16 %v4048_v44 }
 0x858   : > { %4252 = vmatmul.mubr.bf16.vlgmr.msra.gmra.mxu1 %v7949_v21  ;;  %4293 = vmatmul.mubr.bf16.vlgmr.msra.gmra.mxu0 %v7899_v30  ;;  %v4396_v30 = vld [vmem:[%s7174_s20 + $0xa48] sm:$0xff] }
 0x859   : > { %4302 = vmatpush1.bf16.msra.mxu1 %v4144_v25  ;;  %4333 = vmatprep.mubr.bf16.mxu1 %v3985_v24  ;;  %v4472_v38 = vunpack.c.h.s8.bf16 %v4396_v30  ;;  %v4468_v46 = vunpack.c.l.s8.bf16 %v4396_v30  ;;  %v4045_v24 = vld [vmem:[%s7174_s20 + $0x9d8] sm:$0xff]  ;;  %v4452_v25 = vunpack.c.l.s8.bf16 %v4388_v22  ;;  %v4161_v30 = vunpack.c.h.s8.bf16 %v4041_v43 }
 0x85a   : > { %4303 = vmatprep.subr.bf16.mxu1 %v4141_v28  ;;  %4580 = vmatpush1.bf16.msra.mxu0 %v4479_v9  ;;  %v4416_v28 = vld [vmem:[%s7174_s20 + $0xae8] sm:$0xff]  ;;  %v4169_v32 = vunpack.c.h.s8.bf16 %v4045_v24  ;;  %v4165_v39 = vunpack.c.l.s8.bf16 %v4045_v24 }
 0x85b   : > { %4581 = vmatprep.subr.bf16.mxu0 %v4476_v48  ;;  %v4512_v4 = vunpack.c.h.s8.bf16 %v4416_v28  ;;  %v4508_v58 = vunpack.c.l.s8.bf16 %v4416_v28  ;;  %v4412_v9 = vld [vmem:[%s7174_s20 + $0xac8] sm:$0xff] }
 0x85c   : > { %v4504_v34 = vunpack.c.h.s8.bf16 %v4412_v9  ;;  %v4428_v28 = vld [vmem:[%s7174_s20 + $0xb48] sm:$0xff] }
 0x85d   : > { %4304 = vmatpush1.bf16.msra.mxu1 %v4140_v35  ;;  %v4044_v35 = vld [vmem:[%s7174_s20 + $0x9d0] sm:$0xff] }
 0x85e   : > { %4305 = vmatprep.subr.bf16.mxu1 %v4137_v36  ;;  %4582 = vmatpush1.bf16.msra.mxu0 %v4475_v51  ;;  %v4451_v36 = vunpack.c.l.s8.bf16 %v4387_v17  ;;  %v4164_v48 = vunpack.c.l.s8.bf16 %v4044_v35  ;;  %v4411_v51 = vld [vmem:[%s7174_s20 + $0xac0] sm:$0xff] }
 0x85f   : > { %4583 = vmatprep.subr.bf16.mxu0 %v4472_v38 }
 0x861   : > { %4306 = vmatpush1.bf16.msra.mxu1 %v4136_v41  ;;  %v4415_v41 = vld [vmem:[%s7174_s20 + $0xae0] sm:$0xff] }
 0x862   : > { %4307 = vmatprep.subr.bf16.mxu1 %v4133_v37  ;;  %4584 = vmatpush1.bf16.msra.mxu0 %v4471_v12  ;;  %v4168_v37 = vunpack.c.h.s8.bf16 %v4044_v35  ;;  %v4511_v53 = vunpack.c.h.s8.bf16 %v4415_v41  ;;  %v4500_v12 = vunpack.c.l.s8.bf16 %v4412_v9  ;;  %v4420_v9 = vld [vmem:[%s7174_s20 + $0xb08] sm:$0xff] }
 0x863   : > { %4585 = vmatprep.subr.bf16.mxu0 %v4468_v46 }
 0x865   : > { %4308 = vmatpush1.bf16.msra.mxu1 %v4132_v47  ;;  %v4040_v47 = vld [vmem:[%s7174_s20 + $0x9b0] sm:$0xff] }
 0x866   : > { %4309 = vmatprep.subr.bf16.mxu1 %v4129_v31  ;;  %4586 = vmatpush1.bf16.msra.mxu0 %v4467_v45  ;;  %v4507_v31 = vunpack.c.l.s8.bf16 %v4415_v41  ;;  %v4160_v38 = vunpack.c.h.s8.bf16 %v4040_v47  ;;  %v4156_v46 = vunpack.c.l.s8.bf16 %v4040_v47  ;;  %v4407_v45 = vld [vmem:[%s7174_s20 + $0xaa0] sm:$0xff]  ;;  %v4424_v41 = vld [vmem:[%s7174_s20 + $0xb28] sm:$0xff] }
 0x867   : > { %4587 = vmatprep.subr.bf16.mxu0 %v4464_v3  ;;  %v4491_v54 = vunpack.c.l.s8.bf16 %v4407_v45  ;;  %v4524_v43 = vunpack.c.l.s8.bf16 %v4424_v41 }
 0x869   : > { %4310 = vmatpush1.bf16.msra.mxu1 %v4128_v42  ;;  %v4503_v42 = vunpack.c.h.s8.bf16 %v4411_v51 }
 0x86a   : > { %4311 = vmatprep.subr.bf16.mxu1 %v4125_v1  ;;  %4588 = vmatpush1.bf16.msra.mxu0 %v4463_v14  ;;  %v4037_v1 = vld [vmem:[%s7174_s20 + $0x998] sm:$0xff]  ;;  %v4492_v14 = vunpack.c.l.s8.bf16 %v4408_v59 }
 0x86b   : > { %4589 = vmatprep.subr.bf16.mxu0 %v4460_v10  ;;  %v4153_v60 = vunpack.c.h.s8.bf16 %v4037_v1  ;;  %v4149_v8 = vunpack.c.l.s8.bf16 %v4037_v1  ;;  %v4404_v10 = vld [vmem:[%s7174_s20 + $0xa88] sm:$0xff]  ;;  %v3713_v1 = vpop.f32.mrf.mxu0 }
 0x86c   : > { %v4488_v22 = vunpack.c.h.s8.bf16 %v4404_v10  ;;  %v4484_v44 = vunpack.c.l.s8.bf16 %v4404_v10 }
 0x86d   : > { %4312 = vmatpush1.bf16.msra.mxu1 %v4124_v50  ;;  %v4036_v50 = vld [vmem:[%s7174_s20 + $0x990] sm:$0xff] }
 0x86e   : > { %4313 = vmatprep.subr.bf16.mxu1 %v4121_v62  ;;  %4590 = vmatpush1.bf16.msra.mxu0 %v4459_v40  ;;  %v4499_v62 = vunpack.c.l.s8.bf16 %v4411_v51  ;;  %v4152_v3 = vunpack.c.h.s8.bf16 %v4036_v50  ;;  %v4432_v40 = vld [vmem:[%s7174_s20 + $0xb68] sm:$0xff] }
 0x86f   : > { %4591 = vmatprep.subr.bf16.mxu0 %v4456_v49  ;;  %v4544_v17 = vunpack.c.h.s8.bf16 %v4432_v40  ;;  %v4540_v24 = vunpack.c.l.s8.bf16 %v4432_v40  ;;  %v4448_v51 = vld [vmem:[%s7174_s20 + $0xbe8] sm:$0xff] }
 0x870   : > { %v4436_v40 = vld [vmem:[%s7174_s20 + $0xb88] sm:$0xff] }
 0x871   : > { %4314 = vmatpush1.bf16.msra.mxu1 %v4120_v6  ;;  %v4495_v6 = vunpack.c.h.s8.bf16 %v4407_v45 }
 0x872   : > { %4315 = vmatprep.subr.bf16.mxu1 %v4117_v7  ;;  %4592 = vmatpush1.bf16.msra.mxu0 %v4455_v23  ;;  %v4148_v7 = vunpack.c.l.s8.bf16 %v4036_v50 }
 0x873   : > { %4593 = vmatprep.subr.bf16.mxu0 %v4452_v25 }
 0x875   : > { %4316 = vmatpush1.bf16.msra.mxu1 %v4116_v15  ;;  %v4403_v15 = vld [vmem:[%s7174_s20 + $0xa80] sm:$0xff] }
 0x876   : > { %4317 = vmatprep.subr.bf16.mxu1 %v4177_v16  ;;  %4594 = vmatpush1.bf16.msra.mxu0 %v4451_v36  ;;  %v4487_v16 = vunpack.c.h.s8.bf16 %v4403_v15  ;;  %v4483_v49 = vunpack.c.l.s8.bf16 %v4403_v15  ;;  %v4532_v36 = vunpack.c.l.s8.bf16 %v4428_v28 }
 0x877   : > { %4595 = vmatprep.subr.bf16.mxu0 %v4512_v4 }
 0x879   : > { %4318 = vmatpush2.bf16.msra.mxu1 %v4176_v19  ;;  %v7990_v19 = vld [vmem:[%s7174_s20 + $0xa78] sm:$0xff] }
 0x87a   : > { %4319 = vmatprep.subr.bf16.mxu1 %v4173_v5  ;;  %4596 = vmatpush2.bf16.msra.mxu0 %v4511_v53  ;;  %v4482_v23 = vunpack.c.h.s8.bf16 %v7990_v19 }
 0x87b   : > { %4597 = vmatprep.subr.bf16.mxu0 %v4508_v58 }
 0x87d   : > { %4320 = vmatpush2.bf16.msra.mxu1 %v4172_v29  ;;  %v4536_v29 = vunpack.c.h.s8.bf16 %v4428_v28  ;;  %v8012_v28 = vld [vmem:[%s7174_s20 + $0xb78] sm:$0xff] }
 0x87e   : > { %4321 = vmatprep.subr.bf16.mxu1 %v4169_v32  ;;  %4598 = vmatpush2.bf16.msra.mxu0 %v4507_v31  ;;  %v4427_v32 = vld [vmem:[%s7174_s20 + $0xb40] sm:$0xff]  ;;  %v4516_v31 = vunpack.c.l.s8.bf16 %v4420_v9 }
 0x87f   : > { %4599 = vmatprep.subr.bf16.mxu0 %v4504_v34  ;;  %v4535_v35 = vunpack.c.h.s8.bf16 %v4427_v32  ;;  %v4531_v4 = vunpack.c.l.s8.bf16 %v4427_v32  ;;  %v8016_v32 = vld [vmem:[%s7188_s21 + $0x46] ss:$8 sm:$0xf] }
 0x881   : > { %4322 = vmatpush2.bf16.msra.mxu1 %v4168_v37  ;;  %v4528_v37 = vunpack.c.h.s8.bf16 %v4424_v41 }
 0x882   : > { %4323 = vmatprep.subr.bf16.mxu1 %v4165_v39  ;;  %4600 = vmatpush2.bf16.msra.mxu0 %v4503_v42  ;;  %v4423_v39 = vld [vmem:[%s7174_s20 + $0xb20] sm:$0xff] }
 0x883   : > { %4601 = vmatprep.subr.bf16.mxu0 %v4500_v12  ;;  %v4527_v53 = vunpack.c.h.s8.bf16 %v4423_v39  ;;  %v4523_v58 = vunpack.c.l.s8.bf16 %v4423_v39  ;;  %v4572_v12 = vunpack.c.l.s8.bf16 %v4448_v51  ;;  %v3622_v39 = vrot.slane %v7925_v11, %v7534_v57 }
 0x885   : > { %4324 = vmatpush2.bf16.msra.mxu1 %v4164_v48  ;;  %v4520_v48 = vunpack.c.h.s8.bf16 %v4420_v9 }
 0x886   : > { %4325 = vmatprep.subr.bf16.mxu1 %v4161_v30  ;;  %4602 = vmatpush2.bf16.msra.mxu0 %v4499_v62  ;;  %v4419_v30 = vld [vmem:[%s7174_s20 + $0xb00] sm:$0xff] }
 0x887   : > { %4603 = vmatprep.subr.bf16.mxu0 %v4496_v2  ;;  %v4519_v47 = vunpack.c.h.s8.bf16 %v4419_v30  ;;  %v4515_v34 = vunpack.c.l.s8.bf16 %v4419_v30  ;;  %v4443_v62 = vld [vmem:[%s7174_s20 + $0xbc0] sm:$0xff] }
 0x888   : > { %v4567_v2 = vunpack.c.h.s8.bf16 %v4443_v62 }
 0x889   : > { %4326 = vmatpush2.bf16.msra.mxu1 %v4160_v38  ;;  %v4576_v38 = vunpack.c.h.s8.bf16 %v4448_v51 }
 0x88a   : > { %4327 = vmatprep.subr.bf16.mxu1 %v4157_v52  ;;  %4604 = vmatpush2.bf16.msra.mxu0 %v4495_v6  ;;  %v4447_v52 = vld [vmem:[%s7174_s20 + $0xbe0] sm:$0xff]  ;;  %v4440_v6 = vld [vmem:[%s7174_s20 + $0xba8] sm:$0xff] }
 0x88b   : > { %4605 = vmatprep.subr.bf16.mxu0 %v4492_v14  ;;  %v4575_v42 = vunpack.c.h.s8.bf16 %v4447_v52  ;;  %v4571_v59 = vunpack.c.l.s8.bf16 %v4447_v52  ;;  %v4560_v14 = vunpack.c.h.s8.bf16 %v4440_v6  ;;  %v4556_v15 = vunpack.c.l.s8.bf16 %v4440_v6  ;;  %v4398_v6 = vld [vmem:[%s7174_s20 + $0xa58] sm:$0xff] }
 0x88d   : > { %4328 = vmatpush2.bf16.msra.mxu1 %v4156_v46  ;;  %v4444_v46 = vld [vmem:[%s7174_s20 + $0xbc8] sm:$0xff] }
 0x88e   : > { %4329 = vmatprep.subr.bf16.mxu1 %v4153_v60  ;;  %4606 = vmatpush2.bf16.msra.mxu0 %v4491_v54  ;;  %v3715_v60 = vpop.f32.mrf.mxu0  ;;  %v4568_v50 = vunpack.c.h.s8.bf16 %v4444_v46  ;;  %v4439_v54 = vld [vmem:[%s7174_s20 + $0xba0] sm:$0xff] }
 0x88f   : > { %4607 = vmatprep.subr.bf16.mxu0 %v4488_v22  ;;  %v4559_v10 = vunpack.c.h.s8.bf16 %v4439_v54  ;;  %v3716_v51 = vadd.f32 %v3715_v60, %v3622_v39  ;;  %v4478_v60 = vunpack.c.l.s8.bf16 %v7990_v19  ;;  %v4417_v39 = vld [vmem:[%s7174_s20 + $0xaf0] sm:$0xff] }
 0x890   : > { %v8003_v45 = vpop.f32.mrf.mxu0 }
 0x891   : > { %4330 = vmatpush2.bf16.msra.mxu1 %v4152_v3  ;;  %v4564_v3 = vunpack.c.l.s8.bf16 %v4444_v46 }
 0x892   : > { %4331 = vmatprep.subr.bf16.mxu1 %v4149_v8  ;;  %4608 = vmatpush2.bf16.msra.mxu0 %v4487_v16  ;;  %v4563_v8 = vunpack.c.l.s8.bf16 %v4443_v62  ;;  %v4555_v16 = vunpack.c.l.s8.bf16 %v4439_v54  ;;  %v4474_v54 = vunpack.c.h.s8.bf16 %v4398_v6 }
 0x893   : > { %4609 = vmatprep.subr.bf16.mxu0 %v4484_v44 }
 0x895   : > { %4332 = vmatpush2.bf16.msra.mxu1 %v4148_v7  ;;  %v8006_v7 = vpop.f32.mrf.mxu0 }
 0x896   : > { %4620 = vmatprep.subr.bf16.mxu1 %v4544_v17  ;;  %4610 = vmatpush2.bf16.msra.mxu0 %v4483_v49  ;;  %v4552_v17 = vunpack.c.h.s8.bf16 %v4436_v40 }
 0x897   : > { %4661 = vmatprep.subr.bf16.mxu0 %v4482_v23 }
 0x898   : > { %4334 = vmatmul.mubr.bf16.vlgmr.msra.gmra.mxu1 %v7949_v21  ;;  %v4431_v21 = vld [vmem:[%s7174_s20 + $0xb60] sm:$0xff] }
 0x899   : > { %v4543_v5 = vunpack.c.h.s8.bf16 %v4431_v21  ;;  %v4539_v25 = vunpack.c.l.s8.bf16 %v4431_v21  ;;  %v4435_v21 = vld [vmem:[%s7174_s20 + $0xb80] sm:$0xff] }
 0x89b   : > { %4621 = vmatpush1.bf16.msra.mxu1 %v4543_v5  ;;  %v4551_v5 = vunpack.c.h.s8.bf16 %v4435_v21 }
 0x89c   : > { %4622 = vmatprep.subr.bf16.mxu1 %v4540_v24  ;;  %v4548_v24 = vunpack.c.l.s8.bf16 %v4436_v40  ;;  %v4393_v40 = vld [vmem:[%s7174_s20 + $0xa30] sm:$0xff] }
 0x89f   : > { %4623 = vmatpush1.bf16.msra.mxu1 %v4539_v25  ;;  %v4547_v25 = vunpack.c.l.s8.bf16 %v4435_v21  ;;  %v4390_v21 = vld [vmem:[%s7174_s20 + $0xa18] sm:$0xff] }
 0x8a0   : > { %4624 = vmatprep.subr.bf16.mxu1 %v4536_v29  ;;  %v4546_v29 = vunpack.c.h.s8.bf16 %v8012_v28 }
 0x8a3   : > { %4625 = vmatpush1.bf16.msra.mxu1 %v4535_v35  ;;  %v8018_v35 = vpop.f32.mrf.mxu1 }
 0x8a4   : > { %4626 = vmatprep.subr.bf16.mxu1 %v4532_v36  ;;  %v3618_v36 = vrot.slane %v7925_v11, %v7528_v55 }
 0x8a7   : > { %4627 = vmatpush1.bf16.msra.mxu1 %v4531_v4  ;;  %v4346_v4 = vrot.slane %v8016_v32, %v7528_v55 }
 0x8a8   : > { %4628 = vmatprep.subr.bf16.mxu1 %v4528_v37 }
 0x8ab   : > { %4629 = vmatpush1.bf16.msra.mxu1 %v4527_v53 }
 0x8ac   : > { %4630 = vmatprep.subr.bf16.mxu1 %v4524_v43  ;;  %v4350_v43 = vrot.slane %v8016_v32, %v7534_v57 }
 0x8af   : > { %4631 = vmatpush1.bf16.msra.mxu1 %v4523_v58 }
 0x8b0   : > { %4632 = vmatprep.subr.bf16.mxu1 %v4520_v48  ;;  %v3714_v48 = vadd.f32 %v3713_v1, %v3618_v36  ;;  %v4418_v36 = vld [vmem:[%s7174_s20 + $0xaf8] sm:$0xff] }
 0x8b3   : > { %4633 = vmatpush1.bf16.msra.mxu1 %v4519_v47 }
 0x8b4   : > { %4634 = vmatprep.subr.bf16.mxu1 %v4516_v31 }
 0x8b7   : > { %4635 = vmatpush1.bf16.msra.mxu1 %v4515_v34 }
 0x8b8   : > { %4636 = vmatprep.subr.bf16.mxu1 %v4576_v38 }
 0x8bb   : > { %4637 = vmatpush2.bf16.msra.mxu1 %v4575_v42 }
 0x8bc   : > { %4638 = vmatprep.subr.bf16.mxu1 %v4572_v12 }
 0x8bf   : > { %4639 = vmatpush2.bf16.msra.mxu1 %v4571_v59 }
 0x8c0   : > { %4640 = vmatprep.subr.bf16.mxu1 %v4568_v50  ;;  %v4401_v50 = vld [vmem:[%s7174_s20 + $0xa70] sm:$0xff] }
 0x8c3   : > { %4641 = vmatpush2.bf16.msra.mxu1 %v4567_v2 }
 0x8c4   : > { %4642 = vmatprep.subr.bf16.mxu1 %v4564_v3  ;;  %v4481_v3 = vunpack.c.h.s8.bf16 %v4401_v50 }
 0x8c7   : > { %4643 = vmatpush2.bf16.msra.mxu1 %v4563_v8 }
 0x8c8   : > { %4644 = vmatprep.subr.bf16.mxu1 %v4560_v14  ;;  %v4477_v14 = vunpack.c.l.s8.bf16 %v4401_v50 }
 0x8cb   : > { %4645 = vmatpush2.bf16.msra.mxu1 %v4559_v10  ;;  %v4397_v10 = vld [vmem:[%s7174_s20 + $0xa50] sm:$0xff] }
 0x8cc   : > { %4646 = vmatprep.subr.bf16.mxu1 %v4556_v15  ;;  %v4470_v15 = vunpack.c.l.s8.bf16 %v4398_v6  ;;  %v4469_v19 = vunpack.c.l.s8.bf16 %v4397_v10 }
 0x8cf   : > { %4647 = vmatpush2.bf16.msra.mxu1 %v4555_v16  ;;  %v4394_v16 = vld [vmem:[%s7174_s20 + $0xa38] sm:$0xff] }
 0x8d0   : > { %4648 = vmatprep.subr.bf16.mxu1 %v4552_v17  ;;  %v4462_v17 = vunpack.c.l.s8.bf16 %v4394_v16 }
 0x8d3   : > { %4649 = vmatpush2.bf16.msra.mxu1 %v4551_v5  ;;  %v4461_v5 = vunpack.c.l.s8.bf16 %v4393_v40 }
 0x8d4   : > { %4650 = vmatprep.subr.bf16.mxu1 %v4548_v24  ;;  %v4389_v24 = vld [vmem:[%s7174_s20 + $0xa10] sm:$0xff] }
 0x8d7   : > { %4651 = vmatpush2.bf16.msra.mxu1 %v4547_v25  ;;  %v4457_v25 = vunpack.c.h.s8.bf16 %v4389_v24 }
 0x8d8   : > { %v4212_v22 = vpop.f32.mrf.mxu0  ;;  %4702 = vmatprep.subr.bf16.mxu1 %v4546_v29  ;;  %v4454_v29 = vunpack.c.l.s8.bf16 %v4390_v21 }
 0x8da   : > { %v4214_v44 = vpop.f32.mrf.mxu0 }
 0x8dc   : > { %v4216_v49 = vpop.f32.mrf.mxu0 }
 0x8dd   : > { %v4465_v49 = vunpack.c.h.s8.bf16 %v4393_v40 }
 0x8de   : > { %v4217_v23 = vpop.f32.mrf.mxu0 }
 0x8df   : > { %v4458_v23 = vunpack.c.h.s8.bf16 %v4390_v21 }
 0x918   : > { %v4253_v41 = vpop.f32.mrf.mxu1  ;;  %v8024_v37 = vpop.f32.mrf.mxu0 }
 0x919   : > { %v4254_v53 = vadd.f32 %v4253_v41, %v4212_v22  ;;  %v4473_v22 = vunpack.c.h.s8.bf16 %v4397_v10  ;;  %v4514_v41 = vunpack.c.h.s8.bf16 %v4418_v36 }
 0x91a   : > { %v4255_v58 = vpop.f32.mrf.mxu1  ;;  %v8030_v9 = vpop.f32.mrf.mxu0 }
 0x91b   : > { %v4363_v30 = vmul.f32 %v4346_v4, %v4254_v53  ;;  %v4256_v47 = vadd.f32 %v4255_v58, %v4214_v44  ;;  %v4466_v44 = vunpack.c.h.s8.bf16 %v4394_v16  ;;  %v4453_v4 = vunpack.c.l.s8.bf16 %v4389_v24  ;;  %v4414_v58 = vld [vmem:[%s7174_s20 + $0xad8] sm:$0xff] }
 0x91c   : > { %v4257_v31 = vpop.f32.mrf.mxu1  ;;  %v4298_v34 = vpop.f32.mrf.mxu0  ;;  %v4513_v53 = vunpack.c.h.s8.bf16 %v4417_v39  ;;  %v4542_v24 = vunpack.c.l.s8.bf16 %v8012_v28 }
 0x91d   : > { %v4367_v38 = vadd.f32 %v4363_v30, %v3714_v48  ;;  %v4364_v52 = vmul.f32 %v4350_v43, %v4256_v47  ;;  %v4510_v43 = vunpack.c.l.s8.bf16 %v4418_v36  ;;  %v4509_v48 = vunpack.c.l.s8.bf16 %v4417_v39  ;;  %v4413_v47 = vld [vmem:[%s7174_s20 + $0xad0] sm:$0xff]  ;;  %v4809_v39 = vld [vmem:[%s7174_s20 + $0xc60] sm:$0xff] }
 0x91e   : > { %v4258_v42 = vpop.f32.mrf.mxu1  ;;  %v4299_v12 = vpop.f32.mrf.mxu0  ;;  %v4506_v30 = vunpack.c.h.s8.bf16 %v4414_v58  ;;  %v4505_v31 = vunpack.c.h.s8.bf16 %v4413_v47  ;;  %v4502_v34 = vunpack.c.l.s8.bf16 %v4414_v58  ;;  %v4429_v36 = vld [vmem:[%s7174_s20 + $0xb50] sm:$0xff]  ;;  %v4889_v58 = vunpack.c.h.s8.bf16 %v4809_v39 }
 0x91f   : > { %vm4371_vm3 = vcmp.gt.f32.partialorder %v4367_v38, 0.0  ;;  %v4375_v11 = vmul.f32 0.01, %v4367_v38  ;;  %v4368_v59 = vadd.f32 %v4364_v52, %v3716_v51  ;;  %v4410_v51 = vld [vmem:[%s7174_s20 + $0xab8] sm:$0xff]  ;;  %v4409_v42 = vld [vmem:[%s7174_s20 + $0xab0] sm:$0xff] }
 0x920   : > { %v4498_v52 = vunpack.c.h.s8.bf16 %v4410_v51  ;;  %v4497_v12 = vunpack.c.h.s8.bf16 %v4409_v42 }
 0x921   : > { %vm4372_vm4 = vcmp.gt.f32.partialorder %v4368_v59, 0.0  ;;  %v4376_v46 = vmul.f32 0.01, %v4368_v59  ;;  %v4379_v62 = vsel %vm4371_vm3, %v4367_v38, %v4375_v11  ;;  %v4501_v38 = vunpack.c.l.s8.bf16 %v4413_v47 }
 0x922   : > { %v8033_v8 = vpack.c.bf16 %v4379_v62, %v4379_v62  ;;  %v4494_v11 = vunpack.c.l.s8.bf16 %v4410_v51  ;;  %v4493_v62 = vunpack.c.l.s8.bf16 %v4409_v42 }
 0x923   : > { %v4380_v2 = vsel %vm4372_vm4, %v4368_v59, %v4376_v46  ;;  %v4406_v59 = vld [vmem:[%s7174_s20 + $0xa98] sm:$0xff]  ;;  %v4354_v46 = vrot.slane %v8016_v32, %v7488_v26 }
 0x924   : > { %v4384_v1 = vpack.c.bf16 %v4380_v2, %v4380_v2 }
 0x926   : > { %4611 = vmatprep.mubr.bf16.mxu0 %v4384_v1 }
 0x927   : > { %4612 = vmatmul.mubr.bf16.vlgmr.msra.gmra.mxu0 %v8033_v8 }
 0x928   : > { %4662 = vmatpush1.bf16.msra.mxu0 %v4481_v3  ;;  %4693 = vmatprep.mubr.bf16.mxu0 %v4384_v1  ;;  %v4358_v1 = vrot.slane %v8016_v32, %v7496_v18  ;;  %v4490_v3 = vunpack.c.h.s8.bf16 %v4406_v59 }
 0x929   : > { %4663 = vmatprep.subr.bf16.mxu0 %v4478_v60  ;;  %v4405_v60 = vld [vmem:[%s7174_s20 + $0xa90] sm:$0xff] }
 0x92a   : > { %v4485_v40 = vunpack.c.l.s8.bf16 %v4405_v60 }
 0x92c   : > { %4664 = vmatpush1.bf16.msra.mxu0 %v4477_v14 }
 0x92d   : > { %4665 = vmatprep.subr.bf16.mxu0 %v4474_v54 }
 0x930   : > { %4666 = vmatpush1.bf16.msra.mxu0 %v4473_v22  ;;  %v4489_v22 = vunpack.c.h.s8.bf16 %v4405_v60  ;;  %v4801_v60 = vld [vmem:[%s7174_s20 + $0xc20] sm:$0xff] }
 0x931   : > { %4667 = vmatprep.subr.bf16.mxu0 %v4470_v15 }
 0x934   : > { %4668 = vmatpush1.bf16.msra.mxu0 %v4469_v19  ;;  %v4486_v19 = vunpack.c.l.s8.bf16 %v4406_v59 }
 0x935   : > { %4669 = vmatprep.subr.bf16.mxu0 %v4466_v44 }
 0x938   : > { %4670 = vmatpush1.bf16.msra.mxu0 %v4465_v49  ;;  %v4433_v49 = vld [vmem:[%s7174_s20 + $0xb70] sm:$0xff] }
 0x939   : > { %4671 = vmatprep.subr.bf16.mxu0 %v4462_v17 }
 0x93c   : > { %4672 = vmatpush1.bf16.msra.mxu0 %v4461_v5  ;;  %v4545_v5 = vunpack.c.h.s8.bf16 %v4433_v49 }
 0x93d   : > { %4673 = vmatprep.subr.bf16.mxu0 %v4458_v23 }
 0x940   : > { %4674 = vmatpush1.bf16.msra.mxu0 %v4457_v25  ;;  %v4541_v25 = vunpack.c.l.s8.bf16 %v4433_v49 }
 0x941   : > { %4675 = vmatprep.subr.bf16.mxu0 %v4454_v29 }
 0x944   : > { %4676 = vmatpush1.bf16.msra.mxu0 %v4453_v4  ;;  %v4537_v4 = vunpack.c.h.s8.bf16 %v4429_v36 }
 0x945   : > { %4677 = vmatprep.subr.bf16.mxu0 %v4514_v41  ;;  %v4810_v41 = vld [vmem:[%s7174_s20 + $0xc68] sm:$0xff] }
 0x948   : > { %4678 = vmatpush2.bf16.msra.mxu0 %v4513_v53  ;;  %v4426_v53 = vld [vmem:[%s7174_s20 + $0xb38] sm:$0xff] }
 0x949   : > { %4679 = vmatprep.subr.bf16.mxu0 %v4510_v43  ;;  %v4890_v43 = vunpack.c.h.s8.bf16 %v4810_v41  ;;  %v4530_v47 = vunpack.c.h.s8.bf16 %v4426_v53  ;;  %v4526_v42 = vunpack.c.l.s8.bf16 %v4426_v53  ;;  %v4442_v53 = vld [vmem:[%s7174_s20 + $0xbb8] sm:$0xff] }
 0x94c   : > { %4680 = vmatpush2.bf16.msra.mxu0 %v4509_v48  ;;  %v4886_v48 = vunpack.c.l.s8.bf16 %v4810_v41 }
 0x94d   : > { %4681 = vmatprep.subr.bf16.mxu0 %v4506_v30  ;;  %v4533_v30 = vunpack.c.l.s8.bf16 %v4429_v36 }
 0x950   : > { %4682 = vmatpush2.bf16.msra.mxu0 %v4505_v31  ;;  %v4425_v31 = vld [vmem:[%s7174_s20 + $0xb30] sm:$0xff] }
 0x951   : > { %4683 = vmatprep.subr.bf16.mxu0 %v4502_v34  ;;  %v4885_v34 = vunpack.c.l.s8.bf16 %v4809_v39 }
 0x954   : > { %4684 = vmatpush2.bf16.msra.mxu0 %v4501_v38  ;;  %v4805_v38 = vld [vmem:[%s7174_s20 + $0xc40] sm:$0xff] }
 0x955   : > { %4685 = vmatprep.subr.bf16.mxu0 %v4498_v52  ;;  %v4529_v52 = vunpack.c.h.s8.bf16 %v4425_v31 }
 0x958   : > { %v4335_v50 = vpop.f32.mrf.mxu1  ;;  %4686 = vmatpush2.bf16.msra.mxu0 %v4497_v12  ;;  %v4881_v12 = vunpack.c.h.s8.bf16 %v4805_v38 }
 0x959   : > { %v4336_v2 = vadd.f32 %v4335_v50, %v8024_v37  ;;  %4687 = vmatprep.subr.bf16.mxu0 %v4494_v11  ;;  %v4422_v11 = vld [vmem:[%s7174_s20 + $0xb18] sm:$0xff]  ;;  %v4525_v50 = vunpack.c.l.s8.bf16 %v4425_v31 }
 0x95a   : > { %v4337_v6 = vpop.f32.mrf.mxu1 }
 0x95b   : > { %v4365_v14 = vmul.f32 %v4354_v46, %v4336_v2  ;;  %v4338_v54 = vadd.f32 %v4337_v6, %v8030_v9  ;;  %v4802_v46 = vld [vmem:[%s7174_s20 + $0xc28] sm:$0xff]  ;;  %v4421_v2 = vld [vmem:[%s7174_s20 + $0xb10] sm:$0xff] }
 0x95c   : > { %v4339_v10 = vpop.f32.mrf.mxu1  ;;  %4688 = vmatpush2.bf16.msra.mxu0 %v4493_v62  ;;  %v4522_v62 = vunpack.c.h.s8.bf16 %v4422_v11  ;;  %v4521_v6 = vunpack.c.h.s8.bf16 %v4421_v2 }
 0x95d   : > { %v4369_v15 = vadd.f32 %v4365_v14, %v7940_v13  ;;  %v4366_v16 = vmul.f32 %v4358_v1, %v4338_v54  ;;  %4689 = vmatprep.subr.bf16.mxu0 %v4490_v3  ;;  %v4877_v1 = vunpack.c.l.s8.bf16 %v4805_v38  ;;  %v4874_v3 = vunpack.c.h.s8.bf16 %v4802_v46  ;;  %v4450_v10 = vld [vmem:[%s7174_s20 + $0xbf8] sm:$0xff] }
 0x95e   : > { %v4340_v37 = vpop.f32.mrf.mxu1  ;;  %v4518_v14 = vunpack.c.l.s8.bf16 %v4422_v11  ;;  %v4873_v54 = vunpack.c.h.s8.bf16 %v4801_v60  ;;  %v4574_v49 = vunpack.c.l.s8.bf16 %v4450_v10  ;;  %v4558_v38 = vunpack.c.l.s8.bf16 %v4442_v53  ;;  %v4818_v11 = vld [vmem:[%s7174_s20 + $0xca8] sm:$0xff] }
 0x95f   : > { %vm4373_vm5 = vcmp.gt.f32.partialorder %v4369_v15, 0.0  ;;  %v4377_v44 = vmul.f32 0.01, %v4369_v15  ;;  %v4370_v32 = vadd.f32 %v4366_v16, %v7945_v27  ;;  %v4430_v27 = vld [vmem:[%s7174_s20 + $0xb58] sm:$0xff]  ;;  %v4517_v16 = vunpack.c.l.s8.bf16 %v4421_v2  ;;  %v4449_v37 = vld [vmem:[%s7174_s20 + $0xbf0] sm:$0xff] }
 0x960   : > { %4690 = vmatpush2.bf16.msra.mxu0 %v4489_v22  ;;  %v4538_v29 = vunpack.c.h.s8.bf16 %v4430_v27  ;;  %v4534_v28 = vunpack.c.l.s8.bf16 %v4430_v27  ;;  %v4870_v22 = vunpack.c.l.s8.bf16 %v4802_v46  ;;  %v4906_v2 = vunpack.c.h.s8.bf16 %v4818_v11 }
 0x961   : > { %4691 = vmatprep.subr.bf16.mxu0 %v4486_v19  ;;  %vm4374_vm6 = vcmp.gt.f32.partialorder %v4370_v32, 0.0  ;;  %v4378_v9 = vmul.f32 0.01, %v4370_v32  ;;  %v4381_v17 = vsel %vm4373_vm5, %v4369_v15, %v4377_v44  ;;  %v4798_v15 = vld [vmem:[%s7174_s20 + $0xc08] sm:$0xff]  ;;  %v4578_v19 = vunpack.c.h.s8.bf16 %v4450_v10 }
 0x962   : > { %v8060_v23 = vpack.c.bf16 %v4381_v17, %v4381_v17  ;;  %v4869_v44 = vunpack.c.l.s8.bf16 %v4801_v60 }
 0x963   : > { %v4382_v21 = vsel %vm4374_vm6, %v4370_v32, %v4378_v9  ;;  %v4866_v32 = vunpack.c.h.s8.bf16 %v4798_v15  ;;  %v4577_v9 = vunpack.c.h.s8.bf16 %v4449_v37 }
 0x964   : > { %4692 = vmatpush2.bf16.msra.mxu0 %v4485_v40  ;;  %v4386_v13 = vpack.c.bf16 %v4382_v21, %v4382_v21  ;;  %v4797_v40 = vld [vmem:[%s7174_s20 + $0xc00] sm:$0xff]  ;;  %v4446_v21 = vld [vmem:[%s7174_s20 + $0xbd8] sm:$0xff] }
 0x965   : > { %4989 = vmatprep.subr.bf16.mxu0 %v4890_v43  ;;  %v4865_v17 = vunpack.c.h.s8.bf16 %v4797_v40  ;;  %v4570_v27 = vunpack.c.h.s8.bf16 %v4446_v21  ;;  %v4566_v41 = vunpack.c.l.s8.bf16 %v4446_v21 }
 0x966   : > { %4652 = vmatprep.mubr.bf16.mxu1 %v4386_v13 }
 0x967   : > { %4653 = vmatmul.mubr.bf16.vlgmr.msra.gmra.mxu1 %v8060_v23  ;;  %4694 = vmatmul.mubr.bf16.vlgmr.msra.gmra.mxu0 %v8033_v8  ;;  %v4806_v8 = vld [vmem:[%s7174_s20 + $0xc48] sm:$0xff] }
 0x968   : > { %4703 = vmatpush1.bf16.msra.mxu1 %v4545_v5  ;;  %4734 = vmatprep.mubr.bf16.mxu1 %v4386_v13  ;;  %v4882_v51 = vunpack.c.h.s8.bf16 %v4806_v8  ;;  %v4878_v59 = vunpack.c.l.s8.bf16 %v4806_v8  ;;  %v4862_v13 = vunpack.c.l.s8.bf16 %v4798_v15  ;;  %v4826_v5 = vld [vmem:[%s7174_s20 + $0xce8] sm:$0xff]  ;;  %v4562_v8 = vunpack.c.h.s8.bf16 %v4442_v53 }
 0x969   : > { %4704 = vmatprep.subr.bf16.mxu1 %v4542_v24  ;;  %4990 = vmatpush1.bf16.msra.mxu0 %v4889_v58  ;;  %v4573_v24 = vunpack.c.l.s8.bf16 %v4449_v37  ;;  %v4922_v36 = vunpack.c.h.s8.bf16 %v4826_v5  ;;  %v4918_v43 = vunpack.c.l.s8.bf16 %v4826_v5  ;;  %v4822_v58 = vld [vmem:[%s7174_s20 + $0xcc8] sm:$0xff] }
 0x96a   : > { %4991 = vmatprep.subr.bf16.mxu0 %v4886_v48  ;;  %v4914_v31 = vunpack.c.h.s8.bf16 %v4822_v58  ;;  %v4838_v5 = vld [vmem:[%s7174_s20 + $0xd48] sm:$0xff] }
 0x96c   : > { %4705 = vmatpush1.bf16.msra.mxu1 %v4541_v25  ;;  %v4445_v25 = vld [vmem:[%s7174_s20 + $0xbd0] sm:$0xff] }
 0x96d   : > { %4706 = vmatprep.subr.bf16.mxu1 %v4538_v29  ;;  %4992 = vmatpush1.bf16.msra.mxu0 %v4885_v34  ;;  %v4861_v29 = vunpack.c.l.s8.bf16 %v4797_v40  ;;  %v4565_v48 = vunpack.c.l.s8.bf16 %v4445_v25  ;;  %v4821_v34 = vld [vmem:[%s7174_s20 + $0xcc0] sm:$0xff] }
 0x96e   : > { %4993 = vmatprep.subr.bf16.mxu0 %v4882_v51 }
 0x970   : > { %4707 = vmatpush1.bf16.msra.mxu1 %v4537_v4  ;;  %v4825_v4 = vld [vmem:[%s7174_s20 + $0xce0] sm:$0xff] }
 0x971   : > { %4708 = vmatprep.subr.bf16.mxu1 %v4534_v28  ;;  %4994 = vmatpush1.bf16.msra.mxu0 %v4881_v12  ;;  %v4569_v28 = vunpack.c.h.s8.bf16 %v4445_v25  ;;  %v4921_v39 = vunpack.c.h.s8.bf16 %v4825_v4  ;;  %v4910_v12 = vunpack.c.l.s8.bf16 %v4822_v58  ;;  %v4830_v58 = vld [vmem:[%s7174_s20 + $0xd08] sm:$0xff] }
 0x972   : > { %4995 = vmatprep.subr.bf16.mxu0 %v4878_v59 }
 0x974   : > { %4709 = vmatpush1.bf16.msra.mxu1 %v4533_v30  ;;  %v4441_v30 = vld [vmem:[%s7174_s20 + $0xbb0] sm:$0xff] }
 0x975   : > { %4710 = vmatprep.subr.bf16.mxu1 %v4530_v47  ;;  %4996 = vmatpush1.bf16.msra.mxu0 %v4877_v1  ;;  %v4917_v47 = vunpack.c.l.s8.bf16 %v4825_v4  ;;  %v4561_v51 = vunpack.c.h.s8.bf16 %v4441_v30  ;;  %v4557_v59 = vunpack.c.l.s8.bf16 %v4441_v30  ;;  %v4817_v1 = vld [vmem:[%s7174_s20 + $0xca0] sm:$0xff]  ;;  %v4834_v4 = vld [vmem:[%s7174_s20 + $0xd28] sm:$0xff] }
 0x976   : > { %4997 = vmatprep.subr.bf16.mxu0 %v4874_v3  ;;  %v4901_v10 = vunpack.c.l.s8.bf16 %v4817_v1  ;;  %v4934_v53 = vunpack.c.l.s8.bf16 %v4834_v4 }
 0x978   : > { %4711 = vmatpush1.bf16.msra.mxu1 %v4529_v52  ;;  %v4913_v52 = vunpack.c.h.s8.bf16 %v4821_v34 }
 0x979   : > { %4712 = vmatprep.subr.bf16.mxu1 %v4526_v42  ;;  %4998 = vmatpush1.bf16.msra.mxu0 %v4873_v54  ;;  %v4438_v42 = vld [vmem:[%s7174_s20 + $0xb98] sm:$0xff] }
 0x97a   : > { %4999 = vmatprep.subr.bf16.mxu0 %v4870_v22  ;;  %v4554_v46 = vunpack.c.h.s8.bf16 %v4438_v42  ;;  %v4550_v60 = vunpack.c.l.s8.bf16 %v4438_v42  ;;  %v4814_v22 = vld [vmem:[%s7174_s20 + $0xc88] sm:$0xff] }
 0x97b   : > { %v4898_v15 = vunpack.c.h.s8.bf16 %v4814_v22  ;;  %v4894_v37 = vunpack.c.l.s8.bf16 %v4814_v22  ;;  %v4846_v22 = vld [vmem:[%s7174_s20 + $0xd88] sm:$0xff] }
 0x97c   : > { %4713 = vmatpush1.bf16.msra.mxu1 %v4525_v50  ;;  %v4437_v50 = vld [vmem:[%s7174_s20 + $0xb90] sm:$0xff] }
 0x97d   : > { %4714 = vmatprep.subr.bf16.mxu1 %v4522_v62  ;;  %5000 = vmatpush1.bf16.msra.mxu0 %v4869_v44  ;;  %v4909_v62 = vunpack.c.l.s8.bf16 %v4821_v34  ;;  %v4553_v3 = vunpack.c.h.s8.bf16 %v4437_v50  ;;  %v4549_v54 = vunpack.c.l.s8.bf16 %v4437_v50  ;;  %v4858_v34 = vld [vmem:[%s7174_s20 + $0xde8] sm:$0xff] }
 0x97e   : > { %5001 = vmatprep.subr.bf16.mxu0 %v4866_v32  ;;  %v4842_v32 = vld [vmem:[%s7174_s20 + $0xd68] sm:$0xff]  ;;  %v4982_v42 = vunpack.c.l.s8.bf16 %v4858_v34 }
 0x97f   : > { %v4954_v40 = vunpack.c.h.s8.bf16 %v4842_v32  ;;  %v4950_v21 = vunpack.c.l.s8.bf16 %v4842_v32  ;;  %v4958_v32 = vunpack.c.l.s8.bf16 %v4846_v22 }
 0x980   : > { %4715 = vmatpush1.bf16.msra.mxu1 %v4521_v6  ;;  %v4905_v6 = vunpack.c.h.s8.bf16 %v4817_v1  ;;  %v4850_v1 = vld [vmem:[%s7174_s20 + $0xda8] sm:$0xff] }
 0x981   : > { %4716 = vmatprep.subr.bf16.mxu1 %v4518_v14  ;;  %5002 = vmatpush1.bf16.msra.mxu0 %v4865_v17  ;;  %v4902_v14 = vunpack.c.l.s8.bf16 %v4818_v11  ;;  %v4854_v11 = vld [vmem:[%s7174_s20 + $0xdc8] sm:$0xff] }
 0x982   : > { %5003 = vmatprep.subr.bf16.mxu0 %v4862_v13 }
 0x984   : > { %4717 = vmatpush1.bf16.msra.mxu1 %v4517_v16  ;;  %v4813_v16 = vld [vmem:[%s7174_s20 + $0xc80] sm:$0xff] }
 0x985   : > { %4718 = vmatprep.subr.bf16.mxu1 %v4578_v19  ;;  %5004 = vmatpush1.bf16.msra.mxu0 %v4861_v29  ;;  %v4897_v19 = vunpack.c.h.s8.bf16 %v4813_v16  ;;  %v4893_v44 = vunpack.c.l.s8.bf16 %v4813_v16  ;;  %v4942_v29 = vunpack.c.l.s8.bf16 %v4838_v5  ;;  %v4845_v16 = vld [vmem:[%s7174_s20 + $0xd80] sm:$0xff] }
 0x986   : > { %5005 = vmatprep.subr.bf16.mxu0 %v4922_v36 }
 0x988   : > { %4719 = vmatpush2.bf16.msra.mxu1 %v4577_v9  ;;  %v4841_v9 = vld [vmem:[%s7174_s20 + $0xd60] sm:$0xff] }
 0x989   : > { %4720 = vmatprep.subr.bf16.mxu1 %v4574_v49  ;;  %5006 = vmatpush2.bf16.msra.mxu0 %v4921_v39  ;;  %v8099_v49 = vld [vmem:[%s7174_s20 + $0xc78] sm:$0xff]  ;;  %v4949_v13 = vunpack.c.l.s8.bf16 %v4841_v9 }
 0x98a   : > { %5007 = vmatprep.subr.bf16.mxu0 %v4918_v43  ;;  %v4892_v17 = vunpack.c.h.s8.bf16 %v8099_v49 }
 0x98c   : > { %4721 = vmatpush2.bf16.msra.mxu1 %v4573_v24  ;;  %v4946_v24 = vunpack.c.h.s8.bf16 %v4838_v5 }
 0x98d   : > { %4722 = vmatprep.subr.bf16.mxu1 %v4570_v27  ;;  %5008 = vmatpush2.bf16.msra.mxu0 %v4917_v47  ;;  %v4837_v27 = vld [vmem:[%s7174_s20 + $0xd40] sm:$0xff]  ;;  %v4926_v47 = vunpack.c.l.s8.bf16 %v4830_v58 }
 0x98e   : > { %5009 = vmatprep.subr.bf16.mxu0 %v4914_v31  ;;  %v4945_v25 = vunpack.c.h.s8.bf16 %v4837_v27  ;;  %v4941_v36 = vunpack.c.l.s8.bf16 %v4837_v27 }
 0x990   : > { %4723 = vmatpush2.bf16.msra.mxu1 %v4569_v28  ;;  %v4938_v28 = vunpack.c.h.s8.bf16 %v4834_v4 }
 0x991   : > { %4724 = vmatprep.subr.bf16.mxu1 %v4566_v41  ;;  %5010 = vmatpush2.bf16.msra.mxu0 %v4913_v52  ;;  %v4833_v41 = vld [vmem:[%s7174_s20 + $0xd20] sm:$0xff] }
 0x992   : > { %5011 = vmatprep.subr.bf16.mxu0 %v4910_v12  ;;  %v4937_v39 = vunpack.c.h.s8.bf16 %v4833_v41  ;;  %v4933_v43 = vunpack.c.l.s8.bf16 %v4833_v41 }
 0x994   : > { %4725 = vmatpush2.bf16.msra.mxu1 %v4565_v48  ;;  %v4930_v48 = vunpack.c.h.s8.bf16 %v4830_v58 }
 0x995   : > { %4726 = vmatprep.subr.bf16.mxu1 %v4562_v8  ;;  %5012 = vmatpush2.bf16.msra.mxu0 %v4909_v62  ;;  %v4829_v8 = vld [vmem:[%s7174_s20 + $0xd00] sm:$0xff]  ;;  %v4974_v62 = vunpack.c.l.s8.bf16 %v4854_v11 }
 0x996   : > { %5013 = vmatprep.subr.bf16.mxu0 %v4906_v2  ;;  %v4929_v30 = vunpack.c.h.s8.bf16 %v4829_v8  ;;  %v4925_v31 = vunpack.c.l.s8.bf16 %v4829_v8 }
 0x998   : > { %4727 = vmatpush2.bf16.msra.mxu1 %v4561_v51  ;;  %v4986_v51 = vunpack.c.h.s8.bf16 %v4858_v34 }
 0x999   : > { %4728 = vmatprep.subr.bf16.mxu1 %v4558_v38  ;;  %5014 = vmatpush2.bf16.msra.mxu0 %v4905_v6  ;;  %v4857_v38 = vld [vmem:[%s7174_s20 + $0xde0] sm:$0xff] }
 0x99a   : > { %5015 = vmatprep.subr.bf16.mxu0 %v4902_v14  ;;  %v4985_v52 = vunpack.c.h.s8.bf16 %v4857_v38  ;;  %v4981_v12 = vunpack.c.l.s8.bf16 %v4857_v38  ;;  %v4966_v14 = vunpack.c.l.s8.bf16 %v4850_v1 }
 0x99c   : > { %4729 = vmatpush2.bf16.msra.mxu1 %v4557_v59  ;;  %v4978_v59 = vunpack.c.h.s8.bf16 %v4854_v11 }
 0x99d   : > { %4730 = vmatprep.subr.bf16.mxu1 %v4554_v46  ;;  %5016 = vmatpush2.bf16.msra.mxu0 %v4901_v10  ;;  %v4853_v46 = vld [vmem:[%s7174_s20 + $0xdc0] sm:$0xff] }
 0x99e   : > { %5017 = vmatprep.subr.bf16.mxu0 %v4898_v15  ;;  %v4977_v50 = vunpack.c.h.s8.bf16 %v4853_v46  ;;  %v4973_v2 = vunpack.c.l.s8.bf16 %v4853_v46  ;;  %v4962_v15 = vunpack.c.h.s8.bf16 %v4846_v22  ;;  %v4807_v46 = vld [vmem:[%s7174_s20 + $0xc50] sm:$0xff] }
 0x99f   : > { %v4799_v22 = vld [vmem:[%s7174_s20 + $0xc10] sm:$0xff] }
 0x9a0   : > { %4731 = vmatpush2.bf16.msra.mxu1 %v4553_v3  ;;  %v4970_v3 = vunpack.c.h.s8.bf16 %v4850_v1 }
 0x9a1   : > { %4732 = vmatprep.subr.bf16.mxu1 %v4550_v60  ;;  %5018 = vmatpush2.bf16.msra.mxu0 %v4897_v19  ;;  %v4849_v60 = vld [vmem:[%s7174_s20 + $0xda0] sm:$0xff] }
 0x9a2   : > { %5019 = vmatprep.subr.bf16.mxu0 %v4894_v37  ;;  %v4969_v6 = vunpack.c.h.s8.bf16 %v4849_v60  ;;  %v4961_v37 = vunpack.c.h.s8.bf16 %v4845_v16 }
 0x9a4   : > { %4733 = vmatpush2.bf16.msra.mxu1 %v4549_v54  ;;  %v4965_v54 = vunpack.c.l.s8.bf16 %v4849_v60 }
 0x9a5   : > { %5020 = vmatpush2.bf16.msra.mxu0 %v4893_v44  ;;  %5030 = vmatprep.subr.bf16.mxu1 %v4954_v40 }
 0x9a6   : > { %5071 = vmatprep.subr.bf16.mxu0 %v4892_v17 }
 0x9a7   : > { %4735 = vmatmul.mubr.bf16.vlgmr.msra.gmra.mxu1 %v8060_v23  ;;  %v4953_v23 = vunpack.c.h.s8.bf16 %v4841_v9  ;;  %v4957_v9 = vunpack.c.l.s8.bf16 %v4845_v16 }
 0x9a9   : > { %5031 = vmatpush1.bf16.msra.mxu1 %v4953_v23  ;;  %v8117_v23 = vld [vmem:[%s7174_s20 + $0xd78] sm:$0xff] }
 0x9aa   : > { %5032 = vmatprep.subr.bf16.mxu1 %v4950_v21  ;;  %v4956_v17 = vunpack.c.h.s8.bf16 %v8117_v23  ;;  %v8121_v21 = vld [vmem:[%s7188_s21 + $0x47] ss:$8 sm:$0xf] }
 0x9ab   : > { %v4747_v5 = vrot.slane %v8121_v21, %v7528_v55 }
 0x9ad   : > { %5033 = vmatpush1.bf16.msra.mxu1 %v4949_v13  ;;  %v8124_v13 = vld [vmem:[%s7188_s21 + $0x45] ss:$8 sm:$0xf] }
 0x9ae   : > { %5034 = vmatprep.subr.bf16.mxu1 %v4946_v24 }
 0x9b1   : > { %5035 = vmatpush1.bf16.msra.mxu1 %v4945_v25 }
 0x9b2   : > { %5036 = vmatprep.subr.bf16.mxu1 %v4942_v29  ;;  %v4751_v29 = vrot.slane %v8121_v21, %v7534_v57 }
 0x9b5   : > { %5037 = vmatpush1.bf16.msra.mxu1 %v4941_v36  ;;  %v4772_v36 = vrot.slane %v8124_v13, %v7528_v55 }
 0x9b6   : > { %5038 = vmatprep.subr.bf16.mxu1 %v4938_v28 }
 0x9b9   : > { %5039 = vmatpush1.bf16.msra.mxu1 %v4937_v39 }
 0x9ba   : > { %5040 = vmatprep.subr.bf16.mxu1 %v4934_v53  ;;  %v4776_v53 = vrot.slane %v8124_v13, %v7534_v57 }
 0x9bd   : > { %5041 = vmatpush1.bf16.msra.mxu1 %v4933_v43 }
 0x9be   : > { %5042 = vmatprep.subr.bf16.mxu1 %v4930_v48 }
 0x9c1   : > { %5043 = vmatpush1.bf16.msra.mxu1 %v4929_v30 }
 0x9c2   : > { %5044 = vmatprep.subr.bf16.mxu1 %v4926_v47 }
 0x9c5   : > { %5045 = vmatpush1.bf16.msra.mxu1 %v4925_v31  ;;  %v4811_v31 = vld [vmem:[%s7174_s20 + $0xc70] sm:$0xff] }
 0x9c6   : > { %5046 = vmatprep.subr.bf16.mxu1 %v4986_v51  ;;  %v4891_v38 = vunpack.c.h.s8.bf16 %v4811_v31  ;;  %v4887_v11 = vunpack.c.l.s8.bf16 %v4811_v31  ;;  %v4755_v31 = vrot.slane %v8121_v21, %v7488_v26 }
 0x9c9   : > { %5047 = vmatpush2.bf16.msra.mxu1 %v4985_v52 }
 0x9ca   : > { %5048 = vmatprep.subr.bf16.mxu1 %v4982_v42  ;;  %v4888_v42 = vunpack.c.l.s8.bf16 %v8099_v49  ;;  %v4879_v49 = vunpack.c.l.s8.bf16 %v4807_v46 }
 0x9cd   : > { %5049 = vmatpush2.bf16.msra.mxu1 %v4981_v12  ;;  %v4808_v12 = vld [vmem:[%s7174_s20 + $0xc58] sm:$0xff] }
 0x9ce   : > { %5050 = vmatprep.subr.bf16.mxu1 %v4978_v59  ;;  %v4884_v59 = vunpack.c.h.s8.bf16 %v4808_v12 }
 0x9d1   : > { %5051 = vmatpush2.bf16.msra.mxu1 %v4977_v50  ;;  %v4883_v50 = vunpack.c.h.s8.bf16 %v4807_v46 }
 0x9d2   : > { %5052 = vmatprep.subr.bf16.mxu1 %v4974_v62  ;;  %v4880_v62 = vunpack.c.l.s8.bf16 %v4808_v12  ;;  %v4780_v12 = vrot.slane %v8124_v13, %v7488_v26 }
 0x9d5   : > { %5053 = vmatpush2.bf16.msra.mxu1 %v4973_v2  ;;  %v4804_v2 = vld [vmem:[%s7174_s20 + $0xc38] sm:$0xff] }
 0x9d6   : > { %5054 = vmatprep.subr.bf16.mxu1 %v4970_v3  ;;  %v4876_v1 = vunpack.c.h.s8.bf16 %v4804_v2  ;;  %v4803_v3 = vld [vmem:[%s7174_s20 + $0xc30] sm:$0xff] }
 0x9d7   : > { %v4875_v60 = vunpack.c.h.s8.bf16 %v4803_v3 }
 0x9d9   : > { %5055 = vmatpush2.bf16.msra.mxu1 %v4969_v6  ;;  %v4872_v6 = vunpack.c.l.s8.bf16 %v4804_v2 }
 0x9da   : > { %5056 = vmatprep.subr.bf16.mxu1 %v4966_v14  ;;  %v4800_v14 = vld [vmem:[%s7174_s20 + $0xc18] sm:$0xff] }
 0x9db   : > { %v4864_v16 = vunpack.c.l.s8.bf16 %v4800_v14 }
 0x9dd   : > { %5057 = vmatpush2.bf16.msra.mxu1 %v4965_v54  ;;  %v4871_v54 = vunpack.c.l.s8.bf16 %v4803_v3  ;;  %v4843_v3 = vld [vmem:[%s7174_s20 + $0xd70] sm:$0xff] }
 0x9de   : > { %5058 = vmatprep.subr.bf16.mxu1 %v4962_v15  ;;  %v4867_v15 = vunpack.c.h.s8.bf16 %v4799_v22 }
 0x9e1   : > { %5059 = vmatpush2.bf16.msra.mxu1 %v4961_v37  ;;  %v4863_v37 = vunpack.c.l.s8.bf16 %v4799_v22 }
 0x9e2   : > { %5060 = vmatprep.subr.bf16.mxu1 %v4958_v32  ;;  %v4827_v32 = vld [vmem:[%s7174_s20 + $0xcf0] sm:$0xff] }
 0x9e5   : > { %5061 = vmatpush2.bf16.msra.mxu1 %v4957_v9 }
 0x9e6   : > { %5112 = vmatprep.subr.bf16.mxu1 %v4956_v17  ;;  %v4824_v17 = vld [vmem:[%s7174_s20 + $0xcd8] sm:$0xff] }
 0x9e7   : > { %v4613_v10 = vpop.f32.mrf.mxu0 }
 0x9e9   : > { %v4615_v19 = vpop.f32.mrf.mxu0 }
 0x9eb   : > { %v4617_v44 = vpop.f32.mrf.mxu0 }
 0x9ed   : > { %v4618_v40 = vpop.f32.mrf.mxu0 }
 0x9ee   : > { %v4923_v40 = vunpack.c.h.s8.bf16 %v4827_v32 }
 0xa27   : > { %v4654_v24 = vpop.f32.mrf.mxu1  ;;  %v8128_v27 = vpop.f32.mrf.mxu0 }
 0xa28   : > { %v4655_v25 = vadd.f32 %v4654_v24, %v4613_v10  ;;  %v4868_v10 = vunpack.c.h.s8.bf16 %v4800_v14  ;;  %v4916_v24 = vunpack.c.h.s8.bf16 %v4824_v17  ;;  %v4955_v14 = vunpack.c.h.s8.bf16 %v4843_v3 }
 0xa29   : > { %v4656_v4 = vpop.f32.mrf.mxu1  ;;  %v8134_v28 = vpop.f32.mrf.mxu0 }
 0xa2a   : > { %v4764_v41 = vmul.f32 %v4747_v5, %v4655_v25  ;;  %v4657_v39 = vadd.f32 %v4656_v4, %v4615_v19  ;;  %v4828_v19 = vld [vmem:[%s7174_s20 + $0xcf8] sm:$0xff]  ;;  %v4919_v5 = vunpack.c.l.s8.bf16 %v4827_v32  ;;  %v4823_v25 = vld [vmem:[%s7174_s20 + $0xcd0] sm:$0xff] }
 0xa2b   : > { %v4658_v43 = vpop.f32.mrf.mxu1  ;;  %v4699_v58 = vpop.f32.mrf.mxu0  ;;  %v4924_v44 = vunpack.c.h.s8.bf16 %v4828_v19  ;;  %v4920_v9 = vunpack.c.l.s8.bf16 %v4828_v19  ;;  %v4820_v4 = vld [vmem:[%s7174_s20 + $0xcb8] sm:$0xff]  ;;  %v5211_v19 = vld [vmem:[%s7174_s20 + $0xe68] sm:$0xff] }
 0xa2c   : > { %v4765_v48 = vmul.f32 %v4751_v29, %v4657_v39  ;;  %v4789_v8 = vadd.f32 %v4772_v36, %v4764_v41  ;;  %v4915_v29 = vunpack.c.h.s8.bf16 %v4823_v25  ;;  %v4912_v36 = vunpack.c.l.s8.bf16 %v4824_v17 }
 0xa2d   : > { %v4659_v30 = vpop.f32.mrf.mxu1  ;;  %v4700_v47 = vpop.f32.mrf.mxu0  ;;  %v4911_v41 = vunpack.c.l.s8.bf16 %v4823_v25  ;;  %v4908_v39 = vunpack.c.h.s8.bf16 %v4820_v4  ;;  %v4904_v58 = vunpack.c.l.s8.bf16 %v4820_v4  ;;  %v5291_v32 = vunpack.c.h.s8.bf16 %v5211_v19 }
 0xa2e   : > { %v4790_v34 = vadd.f32 %v4776_v53, %v4765_v48  ;;  %v8139_v52 = vpack.c.bf16 %v4789_v8, %v4789_v8  ;;  %v4819_v53 = vld [vmem:[%s7174_s20 + $0xcb0] sm:$0xff]  ;;  %v4816_v48 = vld [vmem:[%s7174_s20 + $0xc98] sm:$0xff] }
 0xa2f   : > { %v4907_v43 = vunpack.c.h.s8.bf16 %v4819_v53  ;;  %v4903_v8 = vunpack.c.l.s8.bf16 %v4819_v53  ;;  %v4900_v30 = vunpack.c.h.s8.bf16 %v4816_v48  ;;  %v4815_v47 = vld [vmem:[%s7174_s20 + $0xc90] sm:$0xff]  ;;  %v4832_v53 = vld [vmem:[%s7174_s20 + $0xd18] sm:$0xff] }
 0xa30   : > { %v4794_v51 = vpack.c.bf16 %v4790_v34, %v4790_v34 }
 0xa32   : > { %5021 = vmatprep.mubr.bf16.mxu0 %v4794_v51 }
 0xa33   : > { %5022 = vmatmul.mubr.bf16.vlgmr.msra.gmra.mxu0 %v8139_v52 }
 0xa34   : > { %5072 = vmatpush1.bf16.msra.mxu0 %v4891_v38  ;;  %5103 = vmatprep.mubr.bf16.mxu0 %v4794_v51  ;;  %v4759_v38 = vrot.slane %v8121_v21, %v7496_v18 }
 0xa35   : > { %5073 = vmatprep.subr.bf16.mxu0 %v4888_v42  ;;  %v4899_v42 = vunpack.c.h.s8.bf16 %v4815_v47 }
 0xa38   : > { %5074 = vmatpush1.bf16.msra.mxu0 %v4887_v11 }
 0xa39   : > { %5075 = vmatprep.subr.bf16.mxu0 %v4884_v59  ;;  %v4896_v59 = vunpack.c.l.s8.bf16 %v4816_v48 }
 0xa3c   : > { %5076 = vmatpush1.bf16.msra.mxu0 %v4883_v50 }
 0xa3d   : > { %5077 = vmatprep.subr.bf16.mxu0 %v4880_v62  ;;  %v4784_v62 = vrot.slane %v8124_v13, %v7496_v18  ;;  %v4840_v13 = vld [vmem:[%s7174_s20 + $0xd58] sm:$0xff] }
 0xa3e   : > { %v4948_v22 = vunpack.c.h.s8.bf16 %v4840_v13 }
 0xa40   : > { %5078 = vmatpush1.bf16.msra.mxu0 %v4879_v49  ;;  %v4895_v49 = vunpack.c.l.s8.bf16 %v4815_v47 }
 0xa41   : > { %5079 = vmatprep.subr.bf16.mxu0 %v4876_v1 }
 0xa44   : > { %5080 = vmatpush1.bf16.msra.mxu0 %v4875_v60 }
 0xa45   : > { %5081 = vmatprep.subr.bf16.mxu0 %v4872_v6 }
 0xa48   : > { %5082 = vmatpush1.bf16.msra.mxu0 %v4871_v54 }
 0xa49   : > { %5083 = vmatprep.subr.bf16.mxu0 %v4868_v10  ;;  %v4951_v10 = vunpack.c.l.s8.bf16 %v4843_v3 }
 0xa4c   : > { %5084 = vmatpush1.bf16.msra.mxu0 %v4867_v15  ;;  %v4839_v15 = vld [vmem:[%s7174_s20 + $0xd50] sm:$0xff] }
 0xa4d   : > { %5085 = vmatprep.subr.bf16.mxu0 %v4864_v16  ;;  %v4947_v16 = vunpack.c.h.s8.bf16 %v4839_v15  ;;  %v4943_v17 = vunpack.c.l.s8.bf16 %v4839_v15 }
 0xa50   : > { %5086 = vmatpush1.bf16.msra.mxu0 %v4863_v37  ;;  %v5210_v37 = vld [vmem:[%s7174_s20 + $0xe60] sm:$0xff] }
 0xa51   : > { %5087 = vmatprep.subr.bf16.mxu0 %v4924_v44  ;;  %v4836_v44 = vld [vmem:[%s7174_s20 + $0xd38] sm:$0xff]  ;;  %v5286_v25 = vunpack.c.l.s8.bf16 %v5210_v37 }
 0xa54   : > { %5088 = vmatpush2.bf16.msra.mxu0 %v4923_v40  ;;  %v5290_v40 = vunpack.c.h.s8.bf16 %v5210_v37 }
 0xa55   : > { %5089 = vmatprep.subr.bf16.mxu0 %v4920_v9  ;;  %v5287_v9 = vunpack.c.l.s8.bf16 %v5211_v19 }
 0xa58   : > { %5090 = vmatpush2.bf16.msra.mxu0 %v4919_v5  ;;  %v4940_v5 = vunpack.c.h.s8.bf16 %v4836_v44 }
 0xa59   : > { %5091 = vmatprep.subr.bf16.mxu0 %v4916_v24  ;;  %v4835_v24 = vld [vmem:[%s7174_s20 + $0xd30] sm:$0xff] }
 0xa5a   : > { %v4939_v4 = vunpack.c.h.s8.bf16 %v4835_v24  ;;  %v4935_v48 = vunpack.c.l.s8.bf16 %v4835_v24 }
 0xa5c   : > { %5092 = vmatpush2.bf16.msra.mxu0 %v4915_v29 }
 0xa5d   : > { %5093 = vmatprep.subr.bf16.mxu0 %v4912_v36  ;;  %v5206_v36 = vld [vmem:[%s7174_s20 + $0xe40] sm:$0xff] }
 0xa5e   : > { %v5278_v47 = vunpack.c.l.s8.bf16 %v5206_v36 }
 0xa60   : > { %5094 = vmatpush2.bf16.msra.mxu0 %v4911_v41  ;;  %v4936_v41 = vunpack.c.l.s8.bf16 %v4836_v44  ;;  %v4852_v44 = vld [vmem:[%s7174_s20 + $0xdb8] sm:$0xff] }
 0xa61   : > { %5095 = vmatprep.subr.bf16.mxu0 %v4908_v39  ;;  %v5282_v39 = vunpack.c.h.s8.bf16 %v5206_v36  ;;  %v4968_v36 = vunpack.c.l.s8.bf16 %v4852_v44 }
 0xa64   : > { %5096 = vmatpush2.bf16.msra.mxu0 %v4907_v43 }
 0xa65   : > { %5097 = vmatprep.subr.bf16.mxu0 %v4904_v58  ;;  %v5203_v58 = vld [vmem:[%s7174_s20 + $0xe28] sm:$0xff] }
 0xa67   : > { %v4736_v34 = vpop.f32.mrf.mxu1 }
 0xa68   : > { %v4737_v51 = vadd.f32 %v4736_v34, %v8128_v27  ;;  %5098 = vmatpush2.bf16.msra.mxu0 %v4903_v8  ;;  %v4932_v8 = vunpack.c.h.s8.bf16 %v4832_v53  ;;  %v5202_v34 = vld [vmem:[%s7174_s20 + $0xe20] sm:$0xff] }
 0xa69   : > { %v4738_v11 = vpop.f32.mrf.mxu1  ;;  %5099 = vmatprep.subr.bf16.mxu0 %v4900_v30  ;;  %v4831_v30 = vld [vmem:[%s7174_s20 + $0xd10] sm:$0xff] }
 0xa6a   : > { %v4766_v46 = vmul.f32 %v4755_v31, %v4737_v51  ;;  %v4739_v50 = vadd.f32 %v4738_v11, %v8134_v28  ;;  %v4952_v28 = vunpack.c.l.s8.bf16 %v8117_v23  ;;  %v4944_v23 = vunpack.c.l.s8.bf16 %v4840_v13 }
 0xa6b   : > { %v4740_v27 = vpop.f32.mrf.mxu1  ;;  %v5275_v31 = vunpack.c.h.s8.bf16 %v5203_v58  ;;  %v4931_v51 = vunpack.c.h.s8.bf16 %v4831_v30  ;;  %v5271_v11 = vunpack.c.l.s8.bf16 %v5203_v58 }
 0xa6c   : > { %v4767_v2 = vmul.f32 %v4759_v38, %v4739_v50  ;;  %5100 = vmatpush2.bf16.msra.mxu0 %v4899_v42  ;;  %v4791_v21 = vadd.f32 %v4780_v12, %v4766_v46  ;;  %v4928_v38 = vunpack.c.l.s8.bf16 %v4832_v53  ;;  %v5274_v42 = vunpack.c.h.s8.bf16 %v5202_v34  ;;  %v4860_v12 = vld [vmem:[%s7174_s20 + $0xdf8] sm:$0xff]  ;;  %v5219_v53 = vld [vmem:[%s7174_s20 + $0xea8] sm:$0xff] }
 0xa6d   : > { %v4741_v1 = vpop.f32.mrf.mxu1  ;;  %5101 = vmatprep.subr.bf16.mxu0 %v4896_v59  ;;  %v5199_v59 = vld [vmem:[%s7174_s20 + $0xe08] sm:$0xff]  ;;  %v4927_v46 = vunpack.c.l.s8.bf16 %v4831_v30  ;;  %v4988_v50 = vunpack.c.h.s8.bf16 %v4860_v12  ;;  %v5270_v27 = vunpack.c.l.s8.bf16 %v5202_v34  ;;  %v5307_v30 = vunpack.c.h.s8.bf16 %v5219_v53 }
 0xa6e   : > { %v4792_v60 = vadd.f32 %v4784_v62, %v4767_v2  ;;  %v8168_v54 = vpack.c.bf16 %v4791_v21, %v4791_v21  ;;  %v4859_v62 = vld [vmem:[%s7174_s20 + $0xdf0] sm:$0xff]  ;;  %v5267_v2 = vunpack.c.h.s8.bf16 %v5199_v59  ;;  %v4984_v1 = vunpack.c.l.s8.bf16 %v4860_v12 }
 0xa6f   : > { %v4987_v21 = vunpack.c.h.s8.bf16 %v4859_v62 }
 0xa70   : > { %5102 = vmatpush2.bf16.msra.mxu0 %v4895_v49  ;;  %v4796_v6 = vpack.c.bf16 %v4792_v60, %v4792_v60  ;;  %v5198_v49 = vld [vmem:[%s7174_s20 + $0xe00] sm:$0xff]  ;;  %v4856_v60 = vld [vmem:[%s7174_s20 + $0xdd8] sm:$0xff] }
 0xa71   : > { %5390 = vmatprep.subr.bf16.mxu0 %v5291_v32  ;;  %v5266_v3 = vunpack.c.h.s8.bf16 %v5198_v49  ;;  %v4980_v13 = vunpack.c.h.s8.bf16 %v4856_v60  ;;  %v4976_v19 = vunpack.c.l.s8.bf16 %v4856_v60 }
 0xa72   : > { %5062 = vmatprep.mubr.bf16.mxu1 %v4796_v6 }
 0xa73   : > { %5063 = vmatmul.mubr.bf16.vlgmr.msra.gmra.mxu1 %v8168_v54  ;;  %5104 = vmatmul.mubr.bf16.vlgmr.msra.gmra.mxu0 %v8139_v52  ;;  %v5207_v52 = vld [vmem:[%s7174_s20 + $0xe48] sm:$0xff] }
 0xa74   : > { %5113 = vmatpush1.bf16.msra.mxu1 %v4955_v14  ;;  %5144 = vmatprep.mubr.bf16.mxu1 %v4796_v6  ;;  %v5283_v29 = vunpack.c.h.s8.bf16 %v5207_v52  ;;  %v5279_v43 = vunpack.c.l.s8.bf16 %v5207_v52  ;;  %v5263_v6 = vunpack.c.l.s8.bf16 %v5199_v59  ;;  %v5227_v14 = vld [vmem:[%s7174_s20 + $0xee8] sm:$0xff]  ;;  %v4972_v52 = vunpack.c.h.s8.bf16 %v4852_v44 }
 0xa75   : > { %5114 = vmatprep.subr.bf16.mxu1 %v4952_v28  ;;  %5391 = vmatpush1.bf16.msra.mxu0 %v5290_v40  ;;  %v4983_v28 = vunpack.c.l.s8.bf16 %v4859_v62  ;;  %v5323_v15 = vunpack.c.h.s8.bf16 %v5227_v14  ;;  %v5319_v32 = vunpack.c.l.s8.bf16 %v5227_v14  ;;  %v5223_v40 = vld [vmem:[%s7174_s20 + $0xec8] sm:$0xff] }
 0xa76   : > { %5392 = vmatprep.subr.bf16.mxu0 %v5287_v9  ;;  %v5315_v24 = vunpack.c.h.s8.bf16 %v5223_v40  ;;  %v5239_v14 = vld [vmem:[%s7174_s20 + $0xf48] sm:$0xff] }
 0xa78   : > { %5115 = vmatpush1.bf16.msra.mxu1 %v4951_v10  ;;  %v4855_v10 = vld [vmem:[%s7174_s20 + $0xdd0] sm:$0xff] }
 0xa79   : > { %5116 = vmatprep.subr.bf16.mxu1 %v4948_v22  ;;  %5393 = vmatpush1.bf16.msra.mxu0 %v5286_v25  ;;  %v5262_v22 = vunpack.c.l.s8.bf16 %v5198_v49  ;;  %v4975_v9 = vunpack.c.l.s8.bf16 %v4855_v10  ;;  %v5222_v25 = vld [vmem:[%s7174_s20 + $0xec0] sm:$0xff] }
 0xa7a   : > { %5394 = vmatprep.subr.bf16.mxu0 %v5283_v29 }
 0xa7c   : > { %5117 = vmatpush1.bf16.msra.mxu1 %v4947_v16  ;;  %v5226_v16 = vld [vmem:[%s7174_s20 + $0xee0] sm:$0xff] }
 0xa7d   : > { %5118 = vmatprep.subr.bf16.mxu1 %v4944_v23  ;;  %5395 = vmatpush1.bf16.msra.mxu0 %v5282_v39  ;;  %v4979_v23 = vunpack.c.h.s8.bf16 %v4855_v10  ;;  %v5322_v37 = vunpack.c.h.s8.bf16 %v5226_v16  ;;  %v5311_v39 = vunpack.c.l.s8.bf16 %v5223_v40  ;;  %v5231_v40 = vld [vmem:[%s7174_s20 + $0xf08] sm:$0xff] }
 0xa7e   : > { %5396 = vmatprep.subr.bf16.mxu0 %v5279_v43 }
 0xa80   : > { %5119 = vmatpush1.bf16.msra.mxu1 %v4943_v17  ;;  %v4851_v17 = vld [vmem:[%s7174_s20 + $0xdb0] sm:$0xff] }
 0xa81   : > { %5120 = vmatprep.subr.bf16.mxu1 %v4940_v5  ;;  %5397 = vmatpush1.bf16.msra.mxu0 %v5278_v47  ;;  %v5318_v5 = vunpack.c.l.s8.bf16 %v5226_v16  ;;  %v4971_v29 = vunpack.c.h.s8.bf16 %v4851_v17  ;;  %v4967_v43 = vunpack.c.l.s8.bf16 %v4851_v17  ;;  %v5218_v47 = vld [vmem:[%s7174_s20 + $0xea0] sm:$0xff]  ;;  %v5235_v16 = vld [vmem:[%s7174_s20 + $0xf28] sm:$0xff] }
 0xa82   : > { %5398 = vmatprep.subr.bf16.mxu0 %v5275_v31  ;;  %v5302_v12 = vunpack.c.l.s8.bf16 %v5218_v47  ;;  %v5335_v44 = vunpack.c.l.s8.bf16 %v5235_v16 }
 0xa84   : > { %5121 = vmatpush1.bf16.msra.mxu1 %v4939_v4  ;;  %v5314_v4 = vunpack.c.h.s8.bf16 %v5222_v25 }
 0xa85   : > { %5122 = vmatprep.subr.bf16.mxu1 %v4936_v41  ;;  %5399 = vmatpush1.bf16.msra.mxu0 %v5274_v42  ;;  %v4848_v41 = vld [vmem:[%s7174_s20 + $0xd98] sm:$0xff]  ;;  %v5303_v42 = vunpack.c.l.s8.bf16 %v5219_v53  ;;  %v5255_v53 = vld [vmem:[%s7174_s20 + $0xfc8] sm:$0xff] }
 0xa86   : > { %5400 = vmatprep.subr.bf16.mxu0 %v5271_v11  ;;  %v4964_v58 = vunpack.c.h.s8.bf16 %v4848_v41  ;;  %v4960_v34 = vunpack.c.l.s8.bf16 %v4848_v41  ;;  %v5215_v11 = vld [vmem:[%s7174_s20 + $0xe88] sm:$0xff] }
 0xa87   : > { %v5299_v59 = vunpack.c.h.s8.bf16 %v5215_v11  ;;  %v5295_v62 = vunpack.c.l.s8.bf16 %v5215_v11 }
 0xa88   : > { %5123 = vmatpush1.bf16.msra.mxu1 %v4935_v48  ;;  %v4847_v48 = vld [vmem:[%s7174_s20 + $0xd90] sm:$0xff] }
 0xa89   : > { %5124 = vmatprep.subr.bf16.mxu1 %v4932_v8  ;;  %5401 = vmatpush1.bf16.msra.mxu0 %v5270_v27  ;;  %v5310_v8 = vunpack.c.l.s8.bf16 %v5222_v25  ;;  %v4963_v31 = vunpack.c.h.s8.bf16 %v4847_v48  ;;  %v5243_v27 = vld [vmem:[%s7174_s20 + $0xf68] sm:$0xff] }
 0xa8a   : > { %5402 = vmatprep.subr.bf16.mxu0 %v5267_v2  ;;  %v5355_v49 = vunpack.c.h.s8.bf16 %v5243_v27  ;;  %v5351_v60 = vunpack.c.l.s8.bf16 %v5243_v27  ;;  %v5259_v25 = vld [vmem:[%s7174_s20 + $0xfe8] sm:$0xff] }
 0xa8b   : > { %v5383_v41 = vunpack.c.l.s8.bf16 %v5259_v25 }
 0xa8c   : > { %5125 = vmatpush1.bf16.msra.mxu1 %v4931_v51  ;;  %v5306_v51 = vunpack.c.h.s8.bf16 %v5218_v47  ;;  %v5251_v47 = vld [vmem:[%s7174_s20 + $0xfa8] sm:$0xff] }
 0xa8d   : > { %5126 = vmatprep.subr.bf16.mxu1 %v4928_v38  ;;  %5403 = vmatpush1.bf16.msra.mxu0 %v5266_v3  ;;  %v4959_v38 = vunpack.c.l.s8.bf16 %v4847_v48 }
 0xa8e   : > { %5404 = vmatprep.subr.bf16.mxu0 %v5263_v6 }
 0xa90   : > { %5127 = vmatpush1.bf16.msra.mxu1 %v4927_v46  ;;  %v5214_v46 = vld [vmem:[%s7174_s20 + $0xe80] sm:$0xff] }
 0xa91   : > { %5128 = vmatprep.subr.bf16.mxu1 %v4988_v50  ;;  %5405 = vmatpush1.bf16.msra.mxu0 %v5262_v22  ;;  %v5298_v50 = vunpack.c.h.s8.bf16 %v5214_v46  ;;  %v5294_v2 = vunpack.c.l.s8.bf16 %v5214_v46  ;;  %v5343_v22 = vunpack.c.l.s8.bf16 %v5239_v14 }
 0xa92   : > { %5406 = vmatprep.subr.bf16.mxu0 %v5323_v15 }
 0xa94   : > { %5129 = vmatpush2.bf16.msra.mxu1 %v4987_v21  ;;  %v8207_v21 = vld [vmem:[%s7174_s20 + $0xe78] sm:$0xff] }
 0xa95   : > { %5130 = vmatprep.subr.bf16.mxu1 %v4984_v1  ;;  %5407 = vmatpush2.bf16.msra.mxu0 %v5322_v37  ;;  %v5293_v3 = vunpack.c.h.s8.bf16 %v8207_v21 }
 0xa96   : > { %5408 = vmatprep.subr.bf16.mxu0 %v5319_v32 }
 0xa98   : > { %5131 = vmatpush2.bf16.msra.mxu1 %v4983_v28  ;;  %v5347_v28 = vunpack.c.h.s8.bf16 %v5239_v14 }
 0xa99   : > { %5132 = vmatprep.subr.bf16.mxu1 %v4980_v13  ;;  %5409 = vmatpush2.bf16.msra.mxu0 %v5318_v5  ;;  %v5238_v13 = vld [vmem:[%s7174_s20 + $0xf40] sm:$0xff]  ;;  %v5327_v5 = vunpack.c.l.s8.bf16 %v5231_v40 }
 0xa9a   : > { %5410 = vmatprep.subr.bf16.mxu0 %v5315_v24  ;;  %v5346_v10 = vunpack.c.h.s8.bf16 %v5238_v13  ;;  %v5342_v15 = vunpack.c.l.s8.bf16 %v5238_v13 }
 0xa9c   : > { %5133 = vmatpush2.bf16.msra.mxu1 %v4979_v23  ;;  %v5339_v23 = vunpack.c.h.s8.bf16 %v5235_v16 }
 0xa9d   : > { %5134 = vmatprep.subr.bf16.mxu1 %v4976_v19  ;;  %5411 = vmatpush2.bf16.msra.mxu0 %v5314_v4  ;;  %v5234_v19 = vld [vmem:[%s7174_s20 + $0xf20] sm:$0xff] }
 0xa9e   : > { %5412 = vmatprep.subr.bf16.mxu0 %v5311_v39  ;;  %v5338_v37 = vunpack.c.h.s8.bf16 %v5234_v19  ;;  %v5334_v32 = vunpack.c.l.s8.bf16 %v5234_v19 }
 0xaa0   : > { %5135 = vmatpush2.bf16.msra.mxu1 %v4975_v9  ;;  %v5331_v9 = vunpack.c.h.s8.bf16 %v5231_v40 }
 0xaa1   : > { %5136 = vmatprep.subr.bf16.mxu1 %v4972_v52  ;;  %5413 = vmatpush2.bf16.msra.mxu0 %v5310_v8  ;;  %v5230_v52 = vld [vmem:[%s7174_s20 + $0xf00] sm:$0xff]  ;;  %v5375_v8 = vunpack.c.l.s8.bf16 %v5255_v53 }
 0xaa2   : > { %5414 = vmatprep.subr.bf16.mxu0 %v5307_v30  ;;  %v5330_v17 = vunpack.c.h.s8.bf16 %v5230_v52  ;;  %v5326_v24 = vunpack.c.l.s8.bf16 %v5230_v52 }
 0xaa4   : > { %5137 = vmatpush2.bf16.msra.mxu1 %v4971_v29  ;;  %v5387_v29 = vunpack.c.h.s8.bf16 %v5259_v25 }
 0xaa5   : > { %5138 = vmatprep.subr.bf16.mxu1 %v4968_v36  ;;  %5415 = vmatpush2.bf16.msra.mxu0 %v5306_v51  ;;  %v5258_v36 = vld [vmem:[%s7174_s20 + $0xfe0] sm:$0xff] }
 0xaa6   : > { %5416 = vmatprep.subr.bf16.mxu0 %v5303_v42  ;;  %v5386_v4 = vunpack.c.h.s8.bf16 %v5258_v36  ;;  %v5382_v39 = vunpack.c.l.s8.bf16 %v5258_v36  ;;  %v5367_v42 = vunpack.c.l.s8.bf16 %v5251_v47 }
 0xaa8   : > { %5139 = vmatpush2.bf16.msra.mxu1 %v4967_v43  ;;  %v5379_v43 = vunpack.c.h.s8.bf16 %v5255_v53 }
 0xaa9   : > { %5140 = vmatprep.subr.bf16.mxu1 %v4964_v58  ;;  %5417 = vmatpush2.bf16.msra.mxu0 %v5302_v12  ;;  %v5254_v58 = vld [vmem:[%s7174_s20 + $0xfc0] sm:$0xff] }
 0xaaa   : > { %5418 = vmatprep.subr.bf16.mxu0 %v5299_v59  ;;  %v5378_v48 = vunpack.c.h.s8.bf16 %v5254_v58  ;;  %v5374_v30 = vunpack.c.l.s8.bf16 %v5254_v58  ;;  %v5247_v59 = vld [vmem:[%s7174_s20 + $0xf88] sm:$0xff] }
 0xaac   : > { %5141 = vmatpush2.bf16.msra.mxu1 %v4963_v31  ;;  %v5371_v31 = vunpack.c.h.s8.bf16 %v5251_v47  ;;  %v5208_v47 = vld [vmem:[%s7174_s20 + $0xe50] sm:$0xff] }
 0xaad   : > { %5142 = vmatprep.subr.bf16.mxu1 %v4960_v34  ;;  %5419 = vmatpush2.bf16.msra.mxu0 %v5298_v50  ;;  %v5250_v34 = vld [vmem:[%s7174_s20 + $0xfa0] sm:$0xff]  ;;  %v5363_v50 = vunpack.c.h.s8.bf16 %v5247_v59 }
 0xaae   : > { %5420 = vmatprep.subr.bf16.mxu0 %v5295_v62  ;;  %v5370_v51 = vunpack.c.h.s8.bf16 %v5250_v34  ;;  %v5366_v12 = vunpack.c.l.s8.bf16 %v5250_v34  ;;  %v5246_v62 = vld [vmem:[%s7174_s20 + $0xf80] sm:$0xff] }
 0xaaf   : > { %v5362_v27 = vunpack.c.h.s8.bf16 %v5246_v62 }
 0xab0   : > { %5143 = vmatpush2.bf16.msra.mxu1 %v4959_v38 }
 0xab1   : > { %5431 = vmatprep.subr.bf16.mxu1 %v5355_v49  ;;  %5421 = vmatpush2.bf16.msra.mxu0 %v5294_v2  ;;  %v5359_v49 = vunpack.c.l.s8.bf16 %v5247_v59  ;;  %v5201_v59 = vld [vmem:[%s7174_s20 + $0xe18] sm:$0xff] }
 0xab2   : > { %5472 = vmatprep.subr.bf16.mxu0 %v5293_v3 }
 0xab3   : > { %5145 = vmatmul.mubr.bf16.vlgmr.msra.gmra.mxu1 %v8168_v54  ;;  %v5242_v54 = vld [vmem:[%s7174_s20 + $0xf60] sm:$0xff] }
 0xab4   : > { %v5354_v1 = vunpack.c.h.s8.bf16 %v5242_v54  ;;  %v5350_v6 = vunpack.c.l.s8.bf16 %v5242_v54  ;;  %v5358_v54 = vunpack.c.l.s8.bf16 %v5246_v62  ;;  %v5200_v62 = vld [vmem:[%s7174_s20 + $0xe10] sm:$0xff] }
 0xab6   : > { %5432 = vmatpush1.bf16.msra.mxu1 %v5354_v1  ;;  %v8225_v1 = vld [vmem:[%s7174_s20 + $0xf78] sm:$0xff] }
 0xab7   : > { %5433 = vmatprep.subr.bf16.mxu1 %v5351_v60  ;;  %v5357_v3 = vunpack.c.h.s8.bf16 %v8225_v1  ;;  %v8229_v60 = vld [vmem:[%s7188_s21 + $0x66] ss:$8 sm:$0xf] }
 0xab8   : > { %v5161_v16 = vrot.slane %v8229_v60, %v7534_v57 }
 0xaba   : > { %5434 = vmatpush1.bf16.msra.mxu1 %v5350_v6  ;;  %v8232_v6 = vld [vmem:[%s7188_s21 + $0x64] ss:$8 sm:$0xf] }
 0xabb   : > { %5435 = vmatprep.subr.bf16.mxu1 %v5347_v28  ;;  %v3799_v14 = vrot.slane %v8232_v6, %v7528_v55  ;;  %v5157_v28 = vrot.slane %v8229_v60, %v7528_v55 }
 0xabe   : > { %5436 = vmatpush1.bf16.msra.mxu1 %v5346_v10 }
 0xabf   : > { %5437 = vmatprep.subr.bf16.mxu1 %v5343_v22  ;;  %v3803_v22 = vrot.slane %v8232_v6, %v7534_v57 }
 0xac1   : > { %v3897_v52 = vadd.f32 %v8006_v7, %v3803_v22  ;;  %v5289_v7 = vunpack.c.l.s8.bf16 %v8207_v21  ;;  %v5280_v21 = vunpack.c.l.s8.bf16 %v5208_v47  ;;  %v5225_v22 = vld [vmem:[%s7174_s20 + $0xed8] sm:$0xff] }
 0xac2   : > { %5438 = vmatpush1.bf16.msra.mxu1 %v5342_v15 }
 0xac3   : > { %5439 = vmatprep.subr.bf16.mxu1 %v5339_v23 }
 0xac6   : > { %5440 = vmatpush1.bf16.msra.mxu1 %v5338_v37  ;;  %v3895_v37 = vadd.f32 %v8003_v45, %v3799_v14  ;;  %v5228_v14 = vld [vmem:[%s7174_s20 + $0xef0] sm:$0xff] }
 0xac7   : > { %5441 = vmatprep.subr.bf16.mxu1 %v5335_v44 }
 0xaca   : > { %5442 = vmatpush1.bf16.msra.mxu1 %v5334_v32 }
 0xacb   : > { %5443 = vmatprep.subr.bf16.mxu1 %v5331_v9 }
 0xace   : > { %5444 = vmatpush1.bf16.msra.mxu1 %v5330_v17 }
 0xacf   : > { %5445 = vmatprep.subr.bf16.mxu1 %v5327_v5 }
 0xad2   : > { %5446 = vmatpush1.bf16.msra.mxu1 %v5326_v24 }
 0xad3   : > { %5447 = vmatprep.subr.bf16.mxu1 %v5387_v29 }
 0xad6   : > { %5448 = vmatpush2.bf16.msra.mxu1 %v5386_v4 }
 0xad7   : > { %5449 = vmatprep.subr.bf16.mxu1 %v5383_v41  ;;  %v5212_v41 = vld [vmem:[%s7174_s20 + $0xe70] sm:$0xff] }
 0xada   : > { %5450 = vmatpush2.bf16.msra.mxu1 %v5382_v39 }
 0xadb   : > { %5451 = vmatprep.subr.bf16.mxu1 %v5379_v43  ;;  %v5292_v43 = vunpack.c.h.s8.bf16 %v5212_v41 }
 0xade   : > { %5452 = vmatpush2.bf16.msra.mxu1 %v5378_v48  ;;  %v5209_v48 = vld [vmem:[%s7174_s20 + $0xe58] sm:$0xff] }
 0xadf   : > { %5453 = vmatprep.subr.bf16.mxu1 %v5375_v8  ;;  %v5288_v8 = vunpack.c.l.s8.bf16 %v5212_v41  ;;  %v5281_v34 = vunpack.c.l.s8.bf16 %v5209_v48 }
 0xae2   : > { %5454 = vmatpush2.bf16.msra.mxu1 %v5374_v30  ;;  %v5285_v30 = vunpack.c.h.s8.bf16 %v5209_v48 }
 0xae3   : > { %5455 = vmatprep.subr.bf16.mxu1 %v5371_v31  ;;  %v5284_v31 = vunpack.c.h.s8.bf16 %v5208_v47 }
 0xae6   : > { %5456 = vmatpush2.bf16.msra.mxu1 %v5370_v51  ;;  %v5205_v51 = vld [vmem:[%s7174_s20 + $0xe38] sm:$0xff] }
 0xae7   : > { %5457 = vmatprep.subr.bf16.mxu1 %v5367_v42  ;;  %v5204_v42 = vld [vmem:[%s7174_s20 + $0xe30] sm:$0xff] }
 0xaea   : > { %5458 = vmatpush2.bf16.msra.mxu1 %v5366_v12  ;;  %v5276_v12 = vunpack.c.h.s8.bf16 %v5204_v42 }
 0xaeb   : > { %5459 = vmatprep.subr.bf16.mxu1 %v5363_v50  ;;  %v5269_v50 = vunpack.c.h.s8.bf16 %v5201_v59 }
 0xaee   : > { %5460 = vmatpush2.bf16.msra.mxu1 %v5362_v27  ;;  %v5268_v27 = vunpack.c.h.s8.bf16 %v5200_v62 }
 0xaef   : > { %5461 = vmatprep.subr.bf16.mxu1 %v5359_v49  ;;  %v5229_v49 = vld [vmem:[%s7174_s20 + $0xef8] sm:$0xff] }
 0xaf2   : > { %5462 = vmatpush2.bf16.msra.mxu1 %v5358_v54  ;;  %v5264_v54 = vunpack.c.l.s8.bf16 %v5200_v62 }
 0xaf3   : > { %v5023_v38 = vpop.f32.mrf.mxu0  ;;  %5513 = vmatprep.subr.bf16.mxu1 %v5357_v3  ;;  %v5325_v3 = vunpack.c.h.s8.bf16 %v5229_v49 }
 0xaf5   : > { %v5025_v11 = vpop.f32.mrf.mxu0 }
 0xaf7   : > { %v5027_v46 = vpop.f32.mrf.mxu0 }
 0xaf8   : > { %v5272_v46 = vunpack.c.l.s8.bf16 %v5204_v42 }
 0xaf9   : > { %v5028_v2 = vpop.f32.mrf.mxu0 }
 0xafa   : > { %v5265_v2 = vunpack.c.l.s8.bf16 %v5201_v59  ;;  %v5353_v59 = vunpack.c.l.s8.bf16 %v8225_v1  ;;  %v5237_v1 = vld [vmem:[%s7174_s20 + $0xf38] sm:$0xff] }
 0xb33   : > { %v5064_v13 = vpop.f32.mrf.mxu1  ;;  %v8238_v10 = vpop.f32.mrf.mxu0 }
 0xb34   : > { %v5065_v15 = vadd.f32 %v5064_v13, %v5023_v38  ;;  %v5277_v38 = vunpack.c.h.s8.bf16 %v5205_v51  ;;  %v5321_v13 = vunpack.c.l.s8.bf16 %v5229_v49 }
 0xb35   : > { %v5066_v23 = vpop.f32.mrf.mxu1  ;;  %v8244_v19 = vpop.f32.mrf.mxu0 }
 0xb36   : > { %v5174_v44 = vmul.f32 %v5157_v28, %v5065_v15  ;;  %v5067_v32 = vadd.f32 %v5066_v23, %v5025_v11  ;;  %v5273_v11 = vunpack.c.l.s8.bf16 %v5205_v51  ;;  %v5324_v28 = vunpack.c.h.s8.bf16 %v5228_v14  ;;  %v5224_v23 = vld [vmem:[%s7174_s20 + $0xed0] sm:$0xff] }
 0xb37   : > { %v5068_v40 = vpop.f32.mrf.mxu1  ;;  %v5109_v9 = vpop.f32.mrf.mxu0  ;;  %v5320_v15 = vunpack.c.l.s8.bf16 %v5228_v14 }
 0xb38   : > { %v5178_v17 = vadd.f32 %v5174_v44, %v3895_v37  ;;  %v5175_v5 = vmul.f32 %v5161_v16, %v5067_v32  ;;  %v5317_v16 = vunpack.c.h.s8.bf16 %v5225_v22  ;;  %v5316_v37 = vunpack.c.h.s8.bf16 %v5224_v23  ;;  %v5221_v32 = vld [vmem:[%s7174_s20 + $0xeb8] sm:$0xff] }
 0xb39   : > { %v5069_v24 = vpop.f32.mrf.mxu1  ;;  %v5110_v25 = vpop.f32.mrf.mxu0  ;;  %v5313_v44 = vunpack.c.l.s8.bf16 %v5225_v22  ;;  %v5312_v40 = vunpack.c.l.s8.bf16 %v5224_v23  ;;  %v5309_v9 = vunpack.c.h.s8.bf16 %v5221_v32 }
 0xb3a   : > { %vm5182_vm7 = vcmp.gt.f32.partialorder %v5178_v17, 0.0  ;;  %v5186_v29 = vmul.f32 0.01, %v5178_v17  ;;  %v5179_v36 = vadd.f32 %v5175_v5, %v3897_v52  ;;  %v5220_v52 = vld [vmem:[%s7174_s20 + $0xeb0] sm:$0xff]  ;;  %v5305_v5 = vunpack.c.l.s8.bf16 %v5221_v32  ;;  %v5217_v24 = vld [vmem:[%s7174_s20 + $0xe98] sm:$0xff] }
 0xb3b   : > { %v5165_v25 = vrot.slane %v8229_v60, %v7488_v26 }
 0xb3c   : > { %vm5183_vm8 = vcmp.gt.f32.partialorder %v5179_v36, 0.0  ;;  %v5187_v4 = vmul.f32 0.01, %v5179_v36  ;;  %v5190_v39 = vsel %vm5182_vm7, %v5178_v17, %v5186_v29  ;;  %v5308_v17 = vunpack.c.h.s8.bf16 %v5220_v52 }
 0xb3d   : > { %v8249_v58 = vpack.c.bf16 %v5190_v39, %v5190_v39  ;;  %v5169_v39 = vrot.slane %v8229_v60, %v7496_v18 }
 0xb3e   : > { %v5191_v45 = vsel %vm5183_vm8, %v5179_v36, %v5187_v4  ;;  %v5304_v36 = vunpack.c.l.s8.bf16 %v5220_v52  ;;  %v3811_v4 = vrot.slane %v8232_v6, %v7496_v18 }
 0xb3f   : > { %v5195_v53 = vpack.c.bf16 %v5191_v45, %v5191_v45  ;;  %v5301_v45 = vunpack.c.h.s8.bf16 %v5217_v24 }
 0xb40   : > { %v3968_v47 = vadd.f32 %v8018_v35, %v3811_v4 }
 0xb41   : > { %5422 = vmatprep.mubr.bf16.mxu0 %v5195_v53 }
 0xb42   : > { %5423 = vmatmul.mubr.bf16.vlgmr.msra.gmra.mxu0 %v8249_v58 }
 0xb43   : > { %5473 = vmatpush1.bf16.msra.mxu0 %v5292_v43  ;;  %5504 = vmatprep.mubr.bf16.mxu0 %v5195_v53  ;;  %v5216_v53 = vld [vmem:[%s7174_s20 + $0xe90] sm:$0xff] }
 0xb44   : > { %5474 = vmatprep.subr.bf16.mxu0 %v5289_v7 }
 0xb47   : > { %5475 = vmatpush1.bf16.msra.mxu0 %v5288_v8 }
 0xb48   : > { %5476 = vmatprep.subr.bf16.mxu0 %v5285_v30  ;;  %v5300_v30 = vunpack.c.h.s8.bf16 %v5216_v53 }
 0xb4b   : > { %5477 = vmatpush1.bf16.msra.mxu0 %v5284_v31 }
 0xb4c   : > { %5478 = vmatprep.subr.bf16.mxu0 %v5281_v34 }
 0xb4f   : > { %5479 = vmatpush1.bf16.msra.mxu0 %v5280_v21  ;;  %v5296_v21 = vunpack.c.l.s8.bf16 %v5216_v53  ;;  %v5252_v53 = vld [vmem:[%s7174_s20 + $0xfb0] sm:$0xff] }
 0xb50   : > { %5480 = vmatprep.subr.bf16.mxu0 %v5277_v38  ;;  %v5244_v38 = vld [vmem:[%s7174_s20 + $0xf70] sm:$0xff] }
 0xb53   : > { %5481 = vmatpush1.bf16.msra.mxu0 %v5276_v12 }
 0xb54   : > { %5482 = vmatprep.subr.bf16.mxu0 %v5273_v11 }
 0xb57   : > { %5483 = vmatpush1.bf16.msra.mxu0 %v5272_v46  ;;  %v5241_v46 = vld [vmem:[%s7174_s20 + $0xf58] sm:$0xff] }
 0xb58   : > { %5484 = vmatprep.subr.bf16.mxu0 %v5269_v50  ;;  %v5352_v50 = vunpack.c.l.s8.bf16 %v5244_v38  ;;  %v5349_v62 = vunpack.c.h.s8.bf16 %v5241_v46  ;;  %v5345_v49 = vunpack.c.l.s8.bf16 %v5241_v46 }
 0xb5b   : > { %5485 = vmatpush1.bf16.msra.mxu0 %v5268_v27  ;;  %v5240_v27 = vld [vmem:[%s7174_s20 + $0xf50] sm:$0xff] }
 0xb5c   : > { %5486 = vmatprep.subr.bf16.mxu0 %v5265_v2  ;;  %v5348_v2 = vunpack.c.h.s8.bf16 %v5240_v27 }
 0xb5f   : > { %5487 = vmatpush1.bf16.msra.mxu0 %v5264_v54  ;;  %v5344_v54 = vunpack.c.l.s8.bf16 %v5240_v27 }
 0xb60   : > { %5488 = vmatprep.subr.bf16.mxu0 %v5325_v3  ;;  %v5341_v3 = vunpack.c.h.s8.bf16 %v5237_v1 }
 0xb63   : > { %5489 = vmatpush2.bf16.msra.mxu0 %v5324_v28  ;;  %v5337_v28 = vunpack.c.l.s8.bf16 %v5237_v1 }
 0xb64   : > { %5490 = vmatprep.subr.bf16.mxu0 %v5321_v13  ;;  %v5233_v13 = vld [vmem:[%s7174_s20 + $0xf18] sm:$0xff] }
 0xb67   : > { %5491 = vmatpush2.bf16.msra.mxu0 %v5320_v15  ;;  %v5333_v15 = vunpack.c.h.s8.bf16 %v5233_v13 }
 0xb68   : > { %5492 = vmatprep.subr.bf16.mxu0 %v5317_v16  ;;  %v5232_v16 = vld [vmem:[%s7174_s20 + $0xf10] sm:$0xff] }
 0xb69   : > { %v5332_v23 = vunpack.c.h.s8.bf16 %v5232_v16  ;;  %v5328_v32 = vunpack.c.l.s8.bf16 %v5232_v16 }
 0xb6b   : > { %5493 = vmatpush2.bf16.msra.mxu0 %v5316_v37  ;;  %v5329_v37 = vunpack.c.l.s8.bf16 %v5233_v13 }
 0xb6c   : > { %5494 = vmatprep.subr.bf16.mxu0 %v5313_v44  ;;  %v5261_v44 = vld [vmem:[%s7174_s20 + $0xff8] sm:$0xff] }
 0xb6f   : > { %5495 = vmatpush2.bf16.msra.mxu0 %v5312_v40  ;;  %v5389_v40 = vunpack.c.h.s8.bf16 %v5261_v44 }
 0xb70   : > { %5496 = vmatprep.subr.bf16.mxu0 %v5309_v9  ;;  %v5260_v9 = vld [vmem:[%s7174_s20 + $0xff0] sm:$0xff] }
 0xb71   : > { %v5388_v52 = vunpack.c.h.s8.bf16 %v5260_v9 }
 0xb73   : > { %v5146_v29 = vpop.f32.mrf.mxu1  ;;  %5497 = vmatpush2.bf16.msra.mxu0 %v5308_v17  ;;  %v5385_v17 = vunpack.c.l.s8.bf16 %v5261_v44 }
 0xb74   : > { %v5147_v41 = vadd.f32 %v5146_v29, %v8238_v10  ;;  %5498 = vmatprep.subr.bf16.mxu0 %v5305_v5  ;;  %v5297_v10 = vunpack.c.l.s8.bf16 %v5217_v24  ;;  %v5257_v5 = vld [vmem:[%s7174_s20 + $0xfd8] sm:$0xff]  ;;  %v5384_v24 = vunpack.c.l.s8.bf16 %v5260_v9  ;;  %v5256_v29 = vld [vmem:[%s7174_s20 + $0xfd0] sm:$0xff] }
 0xb75   : > { %v5148_v43 = vpop.f32.mrf.mxu1  ;;  %v5377_v4 = vunpack.c.l.s8.bf16 %v5257_v5 }
 0xb76   : > { %v5176_v7 = vmul.f32 %v5165_v25, %v5147_v41  ;;  %v5149_v48 = vadd.f32 %v5148_v43, %v8244_v19  ;;  %v5381_v25 = vunpack.c.h.s8.bf16 %v5257_v5  ;;  %v5253_v41 = vld [vmem:[%s7174_s20 + $0xfb8] sm:$0xff]  ;;  %v5372_v43 = vunpack.c.h.s8.bf16 %v5252_v53 }
 0xb77   : > { %v5150_v8 = vpop.f32.mrf.mxu1  ;;  %5499 = vmatpush2.bf16.msra.mxu0 %v5304_v36  ;;  %v5380_v36 = vunpack.c.h.s8.bf16 %v5256_v29 }
 0xb78   : > { %v5180_v6 = vadd.f32 %v5176_v7, %v7953_v33  ;;  %v5177_v31 = vmul.f32 %v5169_v39, %v5149_v48  ;;  %5500 = vmatprep.subr.bf16.mxu0 %v5301_v45  ;;  %v5356_v33 = vunpack.c.h.s8.bf16 %v5244_v38  ;;  %v5376_v39 = vunpack.c.l.s8.bf16 %v5256_v29  ;;  %v5249_v48 = vld [vmem:[%s7174_s20 + $0xf98] sm:$0xff] }
 0xb79   : > { %v5151_v34 = vpop.f32.mrf.mxu1  ;;  %v5373_v45 = vunpack.c.h.s8.bf16 %v5253_v41  ;;  %v5369_v7 = vunpack.c.l.s8.bf16 %v5253_v41  ;;  %v5368_v8 = vunpack.c.l.s8.bf16 %v5252_v53  ;;  %v6290_v38 = vld [vmem:[%s7188_s21 + $0x65] ss:$8 sm:$0xf] }
 0xb7a   : > { %vm5184_vm9 = vcmp.gt.f32.partialorder %v5180_v6, 0.0  ;;  %v5188_v60 = vmul.f32 0.01, %v5180_v6  ;;  %v5181_v51 = vadd.f32 %v5177_v31, %v3968_v47  ;;  %v5248_v47 = vld [vmem:[%s7174_s20 + $0xf90] sm:$0xff]  ;;  %v5361_v31 = vunpack.c.l.s8.bf16 %v5249_v48 }
 0xb7b   : > { %5501 = vmatpush2.bf16.msra.mxu0 %v5300_v30  ;;  %v5365_v30 = vunpack.c.h.s8.bf16 %v5249_v48  ;;  %v5595_v9 = vrot.slane %v6290_v38, %v7496_v18 }
 0xb7c   : > { %5502 = vmatprep.subr.bf16.mxu0 %v5297_v10  ;;  %vm5185_vm11 = vcmp.gt.f32.partialorder %v5181_v51, 0.0  ;;  %v5189_v19 = vmul.f32 0.01, %v5181_v51  ;;  %v5192_v42 = vsel %vm5184_vm9, %v5180_v6, %v5188_v60  ;;  %v5364_v6 = vunpack.c.h.s8.bf16 %v5248_v47 }
 0xb7d   : > { %v8278_v11 = vpack.c.bf16 %v5192_v42, %v5192_v42  ;;  %v5360_v10 = vunpack.c.l.s8.bf16 %v5248_v47 }
 0xb7e   : > { %v5193_v12 = vsel %vm5185_vm11, %v5181_v51, %v5189_v19  ;;  %v6294_v19 = vld [vmem:[%s7188_s21 + $0x67] ss:$8 sm:$0xf] }
 0xb7f   : > { %5503 = vmatpush2.bf16.msra.mxu0 %v5296_v21  ;;  %v5197_v35 = vpack.c.bf16 %v5193_v12, %v5193_v12  ;;  %v5558_v42 = vrot.slane %v6294_v19, %v7528_v55  ;;  %v5562_v46 = vrot.slane %v6294_v19, %v7534_v57 }
 0xb81   : > { %5463 = vmatprep.mubr.bf16.mxu1 %v5197_v35 }
 0xb82   : > { %5464 = vmatmul.mubr.bf16.vlgmr.msra.gmra.mxu1 %v8278_v11  ;;  %5505 = vmatmul.mubr.bf16.vlgmr.msra.gmra.mxu0 %v8249_v58  ;;  %v5236_v58 = vld [vmem:[%s7174_s20 + $0xf30] sm:$0xff] }
 0xb83   : > { %5514 = vmatpush1.bf16.msra.mxu1 %v5356_v33  ;;  %5545 = vmatprep.mubr.bf16.mxu1 %v5197_v35  ;;  %v5340_v14 = vunpack.c.h.s8.bf16 %v5236_v58  ;;  %v5336_v22 = vunpack.c.l.s8.bf16 %v5236_v58 }
 0xb84   : > { %5515 = vmatprep.subr.bf16.mxu1 %v5353_v59  ;;  %v5583_v59 = vrot.slane %v6290_v38, %v7528_v55 }
 0xb87   : > { %5516 = vmatpush1.bf16.msra.mxu1 %v5352_v50 }
 0xb88   : > { %5517 = vmatprep.subr.bf16.mxu1 %v5349_v62 }
 0xb8b   : > { %5518 = vmatpush1.bf16.msra.mxu1 %v5348_v2 }
 0xb8c   : > { %5519 = vmatprep.subr.bf16.mxu1 %v5345_v49 }
 0xb8f   : > { %5520 = vmatpush1.bf16.msra.mxu1 %v5344_v54 }
 0xb90   : > { %5521 = vmatprep.subr.bf16.mxu1 %v5341_v3 }
 0xb93   : > { %5522 = vmatpush1.bf16.msra.mxu1 %v5340_v14 }
 0xb94   : > { %5523 = vmatprep.subr.bf16.mxu1 %v5337_v28 }
 0xb97   : > { %5524 = vmatpush1.bf16.msra.mxu1 %v5336_v22 }
 0xb98   : > { %5525 = vmatprep.subr.bf16.mxu1 %v5333_v15  ;;  %v5566_v15 = vrot.slane %v6294_v19, %v7488_v26 }
 0xb9b   : > { %5526 = vmatpush1.bf16.msra.mxu1 %v5332_v23 }
 0xb9c   : > { %5527 = vmatprep.subr.bf16.mxu1 %v5329_v37  ;;  %v5591_v37 = vrot.slane %v6290_v38, %v7488_v26 }
 0xb9f   : > { %5528 = vmatpush1.bf16.msra.mxu1 %v5328_v32 }
 0xba0   : > { %5529 = vmatprep.subr.bf16.mxu1 %v5389_v40 }
 0xba3   : > { %5530 = vmatpush2.bf16.msra.mxu1 %v5388_v52 }
 0xba4   : > { %5531 = vmatprep.subr.bf16.mxu1 %v5385_v17 }
 0xba7   : > { %5532 = vmatpush2.bf16.msra.mxu1 %v5384_v24 }
 0xba8   : > { %5533 = vmatprep.subr.bf16.mxu1 %v5381_v25 }
 0xbab   : > { %5534 = vmatpush2.bf16.msra.mxu1 %v5380_v36 }
 0xbac   : > { %5535 = vmatprep.subr.bf16.mxu1 %v5377_v4 }
 0xbaf   : > { %5536 = vmatpush2.bf16.msra.mxu1 %v5376_v39 }
 0xbb0   : > { %5537 = vmatprep.subr.bf16.mxu1 %v5373_v45 }
 0xbb3   : > { %5538 = vmatpush2.bf16.msra.mxu1 %v5372_v43 }
 0xbb4   : > { %5539 = vmatprep.subr.bf16.mxu1 %v5369_v7 }
 0xbb7   : > { %5540 = vmatpush2.bf16.msra.mxu1 %v5368_v8 }
 0xbb8   : > { %5541 = vmatprep.subr.bf16.mxu1 %v5365_v30 }
 0xbbb   : > { %5542 = vmatpush2.bf16.msra.mxu1 %v5364_v6 }
 0xbbc   : > { %5543 = vmatprep.subr.bf16.mxu1 %v5361_v31 }
 0xbbf   : > { %5544 = vmatpush2.bf16.msra.mxu1 %v5360_v10 }
 0xbc2   : > { %5546 = vmatmul.mubr.bf16.vlgmr.msra.gmra.mxu1 %v8278_v11  ;;  %v5587_v11 = vrot.slane %v6290_v38, %v7534_v57  ;;  %v5570_v57 = vrot.slane %v6294_v19, %v7496_v18 }
 0xc02   : > { %v5424_v34 = vpop.f32.mrf.mxu0 }
 0xc04   : > { %v5426_v60 = vpop.f32.mrf.mxu0 }
 0xc06   : > { %v5428_v51 = vpop.f32.mrf.mxu0 }
 0xc08   : > { %v5429_v21 = vpop.f32.mrf.mxu0 }
 0xc42   : > { %v5465_v12 = vpop.f32.mrf.mxu1  ;;  %v5506_v35 = vpop.f32.mrf.mxu0 }
 0xc43   : > { %v5466_v33 = vadd.f32 %v5465_v12, %v5424_v34 }
 0xc44   : > { %v5467_v50 = vpop.f32.mrf.mxu1  ;;  %v5508_v62 = vpop.f32.mrf.mxu0 }
 0xc45   : > { %v5575_v27 = vmul.f32 %v5558_v42, %v5466_v33  ;;  %v5468_v2 = vadd.f32 %v5467_v50, %v5426_v60 }
 0xc46   : > { %v5469_v49 = vpop.f32.mrf.mxu1  ;;  %v5510_v1 = vpop.f32.mrf.mxu0 }
 0xc47   : > { %v5600_v54 = vadd.f32 %v5583_v59, %v5575_v27  ;;  %v5576_v3 = vmul.f32 %v5562_v46, %v5468_v2 }
 0xc48   : > { %v5470_v58 = vpop.f32.mrf.mxu1  ;;  %v5511_v14 = vpop.f32.mrf.mxu0 }
 0xc49   : > { %v5604_v28 = vadd.f32 %v5600_v54, %v7890_v61  ;;  %v5601_v13 = vadd.f32 %v5587_v11, %v5576_v3 }
 0xc4b   : > { %5608 = vst [vmem:[#allocation4 + $0x10] sm:$0xff] %v5604_v28  ;;  %v5605_v22 = vadd.f32 %v5601_v13, %v7893_v63 }
 0xc4d   : > { %5609 = vst [vmem:[#allocation4] sm:$0xff] %v5605_v22 }
 0xc82   : > { %v5547_v16 = vpop.f32.mrf.mxu1 }
 0xc83   : > { %v5548_v23 = vadd.f32 %v5547_v16, %v5506_v35 }
 0xc84   : > { %v5549_v44 = vpop.f32.mrf.mxu1 }
 0xc85   : > { %v5577_v32 = vmul.f32 %v5566_v15, %v5548_v23  ;;  %v5550_v40 = vadd.f32 %v5549_v44, %v5508_v62 }
 0xc86   : > { %v5551_v52 = vpop.f32.mrf.mxu1 }
 0xc87   : > { %v5602_v61 = vadd.f32 %v5591_v37, %v5577_v32  ;;  %v5578_v17 = vmul.f32 %v5570_v57, %v5550_v40 }
 0xc88   : > { %v5552_v5 = vpop.f32.mrf.mxu1 }
 0xc89   : > { %v5606_v63 = vadd.f32 %v5602_v61, %v7935_v56  ;;  %v5603_v24 = vadd.f32 %v5595_v9, %v5578_v17  ;;  %5615 = sbr.rel (%p6295_p1) target bundleno = 3453 (0xd7d), region = 80 }
 0xc8b   : > { %5610 = vst [vmem:[#allocation4 + $0x18] sm:$0xff] %v5606_v63  ;;  %v5607_v25 = vadd.f32 %v5603_v24, %v7938_v20 }
 0xc8d   : > { %5611 = vst [vmem:[#allocation4 + $0x8] sm:$0xff] %v5607_v25 }
 0xc8e   : > { %v5680_v26 = vld [vmem:[%s8464_s4 + $0x120] sm:$0x3]  ;;  %vm5694_vm12 = vcmask 1041408   ;;  %v6932_v18 = vmov 0.0   ;;  %v6653_v56 = vld [vmem:[%s8464_s4 + $0x98] sm:$0xff]   ;;  %vm6933_vm13 = vmmov 0  }
 0xc8f   : > { %6467 = vmatprep.subr.bf16.mxu0 %v6932_v18  ;;  %v5696_v29 = vsel %vm5694_vm12, %v5680_v26, 0  ;;  %v6654_v20 = vld [vmem:[%s8464_s4 + $0x58] sm:$0xff]   ;;  %6469 = vmatprep.mubr.msk.bf16.mxu0 %vm6933_vm13, %v6932_v18  ;;  %v6657_v41 = vld [vmem:[%s8464_s4 + $0x90] sm:$0xff]   ;;  %v6661_v53 = vld [vmem:[%s8464_s4 + $0x88] sm:$0xff]   ;;  %vm6015_vm14 = vcmask 261120  }
 0xc90   : > { %6468 = vmatpush3.bf16.msra.mxu0 %v5696_v29  ;;  %6395 = vmatprep.subr.bf16.mxu1 %v6653_v56  ;;  %v6655_v36 = vld [vmem:[%s8464_s4 + $0x118] sm:$0xff]   ;;  %v6658_v39 = vld [vmem:[%s8464_s4 + $0x50] sm:$0xff]   ;;  %v6662_v43 = vld [vmem:[%s8464_s4 + $0x48] sm:$0xff]  }
 0xc91   : > { %6396 = vmatpush3.bf16.msra.mxu1 %v6654_v20  ;;  %v6656_v4 = vld [vmem:[%s8464_s4 + $0xd8] sm:$0xff]   ;;  %6417 = vmatprep.subr.bf16.mxu0 %v6655_v36  ;;  %v6659_v45 = vld [vmem:[%s8464_s4 + $0x110] sm:$0xff]   ;;  %v6663_v7 = vld [vmem:[%s8464_s4 + $0x108] sm:$0xff]  }
 0xc92   : > { %6397 = vmatprep.subr.bf16.mxu1 %v6657_v41  ;;  %v6664_v48 = vld [vmem:[%s8464_s4 + $0xc8] sm:$0xff]   ;;  %v6665_v8 = vld [vmem:[%s8464_s4 + $0x80] sm:$0xff]   ;;  %v6669_v31 = vld [vmem:[%s8464_s4 + $0x78] sm:$0xff]  }
 0xc93   : > { %6470 = vmatmul.mubr.msk.bf16.vlgmr.msra.gmra.mxu0 %vm1630_vm10, %v7183_v0  ;;  %v6660_v0 = vld [vmem:[%s8464_s4 + $0xd0] sm:$0xff]   ;;  %v6666_v30 = vld [vmem:[%s8464_s4 + $0x40] sm:$0xff]   ;;  %v6670_v10 = vld [vmem:[%s8464_s4 + $0x38] sm:$0xff]  }
 0xc94   : > { %6418 = vmatpush3.bf16.msra.mxu0 %v6656_v4  ;;  %v6667_v47 = vld [vmem:[%s8464_s4 + $0x100] sm:$0xff]   ;;  %v6671_v34 = vld [vmem:[%s8464_s4 + $0xf8] sm:$0xff]   ;;  %v6673_v51 = vld [vmem:[%s8464_s4 + $0x70] sm:$0xff]  }
 0xc95   : > { %6398 = vmatpush3.bf16.msra.mxu1 %v6658_v39  ;;  %6419 = vmatprep.subr.bf16.mxu0 %v6659_v45  ;;  %v6668_v6 = vld [vmem:[%s8464_s4 + $0xc0] sm:$0xff]   ;;  %v6672_v60 = vld [vmem:[%s8464_s4 + $0xb8] sm:$0xff]   ;;  %v6674_v21 = vld [vmem:[%s8464_s4 + $0x30] sm:$0xff]  }
 0xc96   : > { %6399 = vmatprep.subr.bf16.mxu1 %v6661_v53  ;;  %v6675_v19 = vld [vmem:[%s8464_s4 + $0xf0] sm:$0xff]   ;;  %v6677_v42 = vld [vmem:[%s8464_s4 + $0x68] sm:$0xff]   ;;  %v6681_v59 = vld [vmem:[%s8464_s4 + $0x60] sm:$0xff]  }
 0xc97   : > { %v6676_v38 = vld [vmem:[%s8464_s4 + $0xb0] sm:$0xff]   ;;  %v6678_v12 = vld [vmem:[%s8464_s4 + $0x28] sm:$0xff]   ;;  %v6682_v46 = vld [vmem:[%s8464_s4 + $0x20] sm:$0xff]  }
 0xc98   : > { %6420 = vmatpush3.bf16.msra.mxu0 %v6660_v0  ;;  %v6679_v35 = vld [vmem:[%s8464_s4 + $0xe8] sm:$0xff]   ;;  %v6683_v50 = vld [vmem:[%s8464_s4 + $0xe0] sm:$0xff]   ;;  %v5684_v62 = vld [vmem:[#allocation4] sm:$0xff] }
 0xc99   : > { %6400 = vmatpush3.bf16.msra.mxu1 %v6662_v43  ;;  %6421 = vmatprep.subr.bf16.mxu0 %v6663_v7  ;;  %v6680_v33 = vld [vmem:[%s8464_s4 + $0xa8] sm:$0xff]   ;;  %v5688_v27 = vpack.c.bf16 %v5684_v62, %v5684_v62  ;;  %v6684_v2 = vld [vmem:[%s8464_s4 + $0xa0] sm:$0xff]   ;;  %v5686_v49 = vld [vmem:[#allocation4 + $0x8] sm:$0xff] }
 0xc9a   : > { %6401 = vmatprep.subr.bf16.mxu1 %v6665_v8  ;;  %v5683_v11 = vld [vmem:[#allocation4 + $0x10] sm:$0xff]  ;;  %v5685_v1 = vld [vmem:[#allocation4 + $0x18] sm:$0xff]  ;;  %v5690_v3 = vpack.c.bf16 %v5686_v49, %v5686_v49 }
 0xc9b   : > { %5962 = vmatprep.mubr.bf16.mxu1 %v5688_v27  ;;  %v5687_v54 = vpack.c.bf16 %v5683_v11, %v5683_v11  ;;  %v5689_v58 = vpack.c.bf16 %v5685_v1, %v5685_v1  ;;  %v6017_v14 = vld [vmem:[#allocation2] sm:$0xff]  ;;  %v6019_v28 = vld [vmem:[#allocation3] sm:$0xff] }
 0xc9c   : > { %6422 = vmatpush3.bf16.msra.mxu0 %v6664_v48  ;;  %6002 = vmatprep.mubr.bf16.mxu0 %v5690_v3  ;;  %6018 = vst.msk [vmem:[#allocation14] sm:$0xff] %vm6015_vm14, %v6017_v14  ;;  %v5681_v23 = vld [vmem:[%s8464_s4 + $0x124] sm:$0x1] }
 0xc9d   : > { %6402 = vmatpush3.bf16.msra.mxu1 %v6666_v30  ;;  %6423 = vmatprep.subr.bf16.mxu0 %v6667_v47  ;;  %6020 = vst.msk [vmem:[%s8470_s10] sm:$0xff] %vm1630_vm10, %v6019_v28  ;;  %v5682_v44 = vunpack.c.l.bf16 %v5681_v23 }
 0xc9e   : > { %6403 = vmatprep.subr.bf16.mxu1 %v6669_v31 }
 0xc9f   : > { %v6013_v5 = vrot.slane %v5682_v44, %v7528_v55 }
 0xca0   : > { %6424 = vmatpush3.bf16.msra.mxu0 %v6668_v6 }
 0xca1   : > { %6404 = vmatpush3.bf16.msra.mxu1 %v6670_v10  ;;  %6425 = vmatprep.subr.bf16.mxu0 %v6671_v34 }
 0xca2   : > { %6405 = vmatprep.subr.bf16.mxu1 %v6673_v51 }
 0xca4   : > { %6426 = vmatpush3.bf16.msra.mxu0 %v6672_v60 }
 0xca5   : > { %6406 = vmatpush3.bf16.msra.mxu1 %v6674_v21  ;;  %6427 = vmatprep.subr.bf16.mxu0 %v6675_v19 }
 0xca6   : > { %6407 = vmatprep.subr.bf16.mxu1 %v6677_v42 }
 0xca8   : > { %6428 = vmatpush3.bf16.msra.mxu0 %v6676_v38 }
 0xca9   : > { %6408 = vmatpush3.bf16.msra.mxu1 %v6678_v12  ;;  %6429 = vmatprep.subr.bf16.mxu0 %v6679_v35 }
 0xcaa   : > { %6409 = vmatprep.subr.bf16.mxu1 %v6681_v59 }
 0xcac   : > { %6430 = vmatpush3.bf16.msra.mxu0 %v6680_v33 }
 0xcad   : > { %6410 = vmatpush3.bf16.msra.mxu1 %v6682_v46  ;;  %6431 = vmatprep.subr.bf16.mxu0 %v6683_v50 }
 0xcb0   : > { %6432 = vmatpush3.bf16.msra.mxu0 %v6684_v2  ;;  %5963 = vmatmul.mubr.bf16.vlgmr.msra.gmra.mxu1 %v5687_v54 }
 0xcb3   : > { %6003 = vmatmul.mubr.bf16.vlgmr.msra.gmra.mxu0 %v5689_v58 }
 0xd53   : > { %v5732_v13 = vpop.f32.mrf.mxu0 }
 0xd55   : > { %v6471_v22 = vpop.f32.mrf.mxu0 }
 0xd57   : > { %v5735_v15 = vpop.f32.mrf.mxu0 }
 0xd59   : > { %v6472_v16 = vpop.f32.mrf.mxu0 }
 0xd70   : > { %v6411_v37 = vpop.f32.mrf.mxu1 }
 0xd72   : > { %v6412_v32 = vpop.f32.mrf.mxu1 }
 0xd73   : > { %v6433_v57 = vpop.f32.mrf.mxu0  ;;  %v6413_v40 = vadd.f32 %v6412_v32, %v6411_v37 }
 0xd74   : > { %v6414_v52 = vpop.f32.mrf.mxu1 }
 0xd75   : > { %v6434_v9 = vpop.f32.mrf.mxu0  ;;  %v5965_v17 = vadd.f32 %v6413_v40, %v5732_v13 }
 0xd76   : > { %v6435_v61 = vadd.f32 %v6434_v9, %v6433_v57  ;;  %v6415_v24 = vpop.f32.mrf.mxu1 }
 0xd77   : > { %v6436_v63 = vpop.f32.mrf.mxu0 }
 0xd78   : > { %v6005_v25 = vadd.f32 %v6435_v61, %v5965_v17 }
 0xd79   : > { %v6437_v26 = vpop.f32.mrf.mxu0 }
 0xd7a   : > { %v6014_v18 = vadd.f32 %v6013_v5, %v6005_v25 }
 0xd7c   : > { %6016 = vst.msk [vmem:[#allocation15] sm:$0xff] %vm6015_vm14, %v6014_v18 }
 0xd7d PF: > { %p6521_p5 = scmp.eq.s32.totalorder %s7010_s17, 1  ;;  %s6934_s13 = smov [#allocation14]  }
 0xd7e   : > { %s6028_s18 = sshll.u32 %s6934_s13, 4  ;;  %s6935_s1 = smov [#allocation15]   ;;  %s6029_s18 = int_to_ptr.vmem [resolvable:$true] %s6028_s18 }
 0xd7f   : > { %s6039_s25 = sshll.u32 %s6935_s1, 4  ;;  %s6819_s24 = scalar_lea.vmem %s6029_s18, 128  ;;  %s6040_s25 = int_to_ptr.vmem [resolvable:$true] %s6039_s25 }
 0xd80   : > { %p6820_p6 = scmp.ne.s32.totalorder %s6029_s18, %s6819_s24  ;;  %p6826_p4 = scmp.lt.s32.totalorder %s6029_s18, %s6029_s18 }
 0xd81   : > { %p6827_p12 = scmp.lt.s32.totalorder %s6819_s24, %s6819_s24 }
 0xd82   : > { %p6821_p11 = pnand %p6820_p6, %p6521_p5 }
 0xd83   : > { %p6828_p0 = por %p6827_p12, %p6826_p4 }
 0xd84   : > { %p6822_p3 = pneg %p6821_p11 }
 0xd86   : > { %p6829_p13 = pnand %p6828_p0, %p6822_p3 }
 0xd88   : > { %6832 = shalt.err (!%p6829_p13)
}
 0xd89   : > { %6490 = dma.vmem_to_hbm [thread:$0]  (%p6521_p5), %s6029_s18, 128, %s8468_s8, [#allocation7]  }
 0xd8a   : > { %s6843_s26 = scalar_lea.vmem %s6040_s25, 128  ;;  %p6850_p9 = scmp.lt.s32.totalorder %s6040_s25, %s6040_s25 }
 0xd8b   : > { %p6844_p8 = scmp.ne.s32.totalorder %s6040_s25, %s6843_s26  ;;  %p6851_p7 = scmp.lt.s32.totalorder %s6843_s26, %s6843_s26 }
 0xd8d   : > { %p6845_p10 = pnand %p6844_p8, %p6521_p5  ;;  %p6852_p1 = por %p6851_p7, %p6850_p9 }
 0xd8f   : > { %p6846_p2 = pneg %p6845_p10 }
 0xd91   : > { %p6853_p6 = pnand %p6852_p1, %p6846_p2 }
 0xd93   : > { %6856 = shalt.err (!%p6853_p6)
}
 0xd94   : > { %6492 = dma.vmem_to_hbm [thread:$0]  (%p6521_p5), %s6040_s25, 128, %s8469_s9, [#allocation16]  }
 0xd95   : > { %6896 = dma.done.wait (%p6521_p5), [#allocation7], 128  }
 0xd96   : > { %6898 = vsyncadd (%p6521_p5), [#allocation7], 4294967168 }
 0xd97   : > { %6900 = dma.done.wait (%p6521_p5), [#allocation16], 128  }
 0xd98   : > { %6902 = vsyncadd (%p6521_p5), [#allocation16], 4294967168 }
 0xd99 PF: > { %p25_p11 = scmp.ge.s32.totalorder %s7030_s22, 4   ;;  %s8499_s13 = smov %s6909_s14 }
 0xd9a   : > { %s8500_s14 = smov %s6913_s15  ;;  %s8501_s15 = smov %s7060_s30 }
 0xd9b   : > { %s8502_s16 = smov %s7030_s22  ;;  %27 = sbr.rel (!%p25_p11) target bundleno = 10 (0xa), region = 153 }
 0xda0   :  { %6062 = vsyncpa [#allocation6], 1 }
 0xda1   :  { %6064 = vsyncpa [#allocation6 + $0x1], 1 }
 0xda2   :  { %6065 = vsyncpa [#allocation9], 1 }
 0xda3   :  { %6066 = vsyncpa [#allocation12], 1 }
 0xda4   :  { %6068 = vsyncpa [#allocation12 + $0x1], 1 }
 0xda5   :  { %6069 = vsyncpa [#allocation7], 1 }
 0xda6   :  { %6071 = vsyncpa [#allocation7 + $0x1], 1 }
 0xda7   :  { %6072 = vsyncpa [#allocation16], 1 }

</bundles_post_ra>
